<compile_context>
chip_gen: v7x
topology: tpu7x:2x2x1
jax: 0.10.0
libtpu: 0.0.40
codegen_flags: <defaults>
</compile_context>

<pallas_src>
import math
import jax
import jax.numpy as jnp
from jax.experimental import pallas as pl
from jax.experimental.pallas import tpu as pltpu

B = 2
L = 120          # sequence length implied by AvgPool1d(118): L - 2 == 118
C_IN = 1024


def make_txt_kernel(bb):
    """Build the fused forward kernel for `bb` batch elements per grid step."""

    def kernel(x_ref, w1_ref, b1_ref, w2_ref, b2_ref, w3w_ref, b3_ref,
               w4w_ref, b4_ref, wfc_ref, bfc_ref, r2_ref, cb_ref,
               out_ref, h2p):
        f32 = jnp.float32
        bf16 = jnp.bfloat16

        # ---- conv1 / conv2 (k=1): pointwise matmuls on the batch-folded slab.
        # k=1 padding only creates the analytic boundary rows r2 = relu(b2) and
        # cb = relu(relu(b1) @ w2 + b2), which arrive precomputed (r2_ref/cb_ref).
        xb = x_ref[...].astype(bf16)                                  # (bb*L,1024)
        a1 = jnp.maximum(
            jnp.dot(xb, w1_ref[...], preferred_element_type=f32) + b1_ref[...],
            0.0)                                                      # (bb*L,256)
        h2all = jnp.maximum(
            jnp.dot(a1.astype(bf16), w2_ref[...], preferred_element_type=f32)
            + b2_ref[...], 0.0)                                       # (bb*L,256)

        # ---- Constant boundary rows of the conv3 input slab (aligned tile
        # stores, once per grid step).  Slab layout in h2p:
        #   13: 0 | 14: r2 | 15: cb | 16..135: h2 (per batch) | 136: cb
        #   137: r2 | 138: 0.   Rows 0..12 and 139..143 are zero filler.
        lead = jnp.concatenate(
            [jnp.zeros((14, 256), bf16), r2_ref[...], cb_ref[...]], axis=0)
        h2p[pl.ds(0, 16), :] = lead                                   # rows 0..15
        tail = jnp.concatenate(
            [cb_ref[...], r2_ref[...], jnp.zeros((6, 256), bf16)], axis=0)
        h2p[pl.ds(136, 8), :] = tail                                  # rows 136..143

        pooled_rows = []
        for i in range(bb):                                           # static unroll
            h2 = h2all[i * L:(i + 1) * L]                             # (120,256) f32
            h2p[pl.ds(16, L), :] = h2.astype(bf16)                    # aligned bulk store

            # ---- conv3 (k=8, pad=1) fused: one full-width MXU matmul; tap j
            # lives in lanes [128j, 128j+128) of the wide result, so the tap
            # shifts become 8 f32 slice-adds.
            P = h2p[pl.ds(13, 126), :]                                # (126,256) bf16
            R = jnp.dot(P, w3w_ref[...], preferred_element_type=f32)  # (126,1024) f32
            acc3 = b3_ref[...]
            for j in range(8):
                acc3 = acc3 + R[j:j + (L - 1), 128 * j:128 * (j + 1)]
            h3 = jnp.maximum(acc3, 0.0)                               # (119,128)

            # ---- conv4 (k=4, pad=1) fused & scratch-free: zero padding is
            # handled purely by the slice ranges of the wide result.
            r4 = jnp.dot(h3.astype(bf16), w4w_ref[...],
                         preferred_element_type=f32)                  # (119,256) f32
            z1 = jnp.zeros((1, 64), f32)
            t0 = jnp.concatenate([z1, r4[0:117, 0:64]], axis=0)       # tap 0
            t1 = r4[0:118, 64:128]                                    # tap 1
            t2 = r4[1:119, 128:192]                                   # tap 2
            t3 = jnp.concatenate([r4[2:119, 192:256], z1], axis=0)    # tap 3
            h4 = jnp.maximum(t0 + t1 + t2 + t3 + b4_ref[...], 0.0)    # (118,64)

            # AvgPool1d(118)
            pooled_rows.append(jnp.mean(h4, axis=0, keepdims=True))   # (1,64)

        pooled = (pooled_rows[0] if bb == 1
                  else jnp.concatenate(pooled_rows, axis=0))          # (bb,64)

        # ---- fc + sigmoid
        logits = jnp.dot(pooled.astype(bf16), wfc_ref[...],
                         preferred_element_type=f32) + bfc_ref[...]   # (bb,4)
        sig = 1.0 / (1.0 + jnp.exp(-logits))
        for i in range(bb):
            out_ref[i] = sig[i:i + 1, :]

    return kernel


def _batches_per_step(b):
    """v7x (2 TCs/chip): keep grid=(B,) so batches shard across the cores.
    Single-TC v5e/v6e: fold the whole batch into M (one grid step, M=B*120)."""
    try:
        kind = jax.devices()[0].device_kind.lower()
    except Exception:
        kind = ""
    if "v7" in kind or "7x" in kind:
        return 1
    return b


def txt_model_forward(x, kp, bb=None):
    """x: (B, L, 1024) float32 (channels-last). kp: prepare_kernel_params(...)."""
    b, l, c = x.shape
    assert l == L and c == C_IN, (
        "TxtModel requires (B, 120, 1024) input: AvgPool1d(118) fixes L=120")
    if bb is None:
        bb = _batches_per_step(b)
    if b % bb != 0:
        bb = 1
    bf16 = jnp.bfloat16

    x2 = x.reshape(b * L, C_IN)       # free metadata reshape; x stays f32 in HBM

    out = pl.pallas_call(
        make_txt_kernel(bb),
        out_shape=jax.ShapeDtypeStruct((b, 1, 4), jnp.float32),
        grid_spec=pltpu.PrefetchScalarGridSpec(
            num_scalar_prefetch=0,
            grid=(b // bb,),
            in_specs=[
                pl.BlockSpec((bb * L, C_IN), lambda i: (i, 0)),    # x slab (f32)
                pl.BlockSpec((C_IN, 256), lambda i: (0, 0)),       # w1  bf16
                pl.BlockSpec((1, 256), lambda i: (0, 0)),          # b1  f32
                pl.BlockSpec((256, 256), lambda i: (0, 0)),        # w2  bf16
                pl.BlockSpec((1, 256), lambda i: (0, 0)),          # b2  f32
                pl.BlockSpec((256, 1024), lambda i: (0, 0)),       # w3 wide bf16
                pl.BlockSpec((1, 128), lambda i: (0, 0)),          # b3  f32
                pl.BlockSpec((128, 256), lambda i: (0, 0)),        # w4 wide bf16
                pl.BlockSpec((1, 64), lambda i: (0, 0)),           # b4  f32
                pl.BlockSpec((64, 4), lambda i: (0, 0)),           # wfc bf16
                pl.BlockSpec((1, 4), lambda i: (0, 0)),            # bfc f32
                pl.BlockSpec((1, 256), lambda i: (0, 0)),          # r2c bf16
                pl.BlockSpec((1, 256), lambda i: (0, 0)),          # cbc bf16
            ],
            out_specs=pl.BlockSpec((bb, 1, 4), lambda i: (i, 0, 0)),
            scratch_shapes=[pltpu.VMEM((144, 256), bf16)],         # padded conv2 out
        ),
        compiler_params=pltpu.CompilerParams(
            dimension_semantics=("parallel",)),
        cost_estimate=pl.CostEstimate(
            flops=310_000_000, transcendentals=8, bytes_accessed=2_200_000),
    )(x2, kp["w1"], kp["b1"], kp["w2"], kp["b2"], kp["w3w"], kp["b3"],
      kp["w4w"], kp["b4"], kp["wfc"], kp["bfc"], kp["r2c"], kp["cbc"])
    return out.reshape(b, 4)


def init_params(key):
    """Deterministic PyTorch-style init; f32, kernel-friendly layouts.
    Conv weights are stored channels-last; wide convs are tap-stacked along the
    output axis: w3w[:, 128j:128(j+1)] == w3[:, :, j].T, same for w4w."""
    ks = jax.random.split(key, 10)

    def u(k, shape, bound):
        return jax.random.uniform(k, shape, jnp.float32, -bound, bound)

    b1d = 1.0 / math.sqrt(1024 * 1)
    b2d = 1.0 / math.sqrt(256 * 1)
    b3d = 1.0 / math.sqrt(256 * 8)
    b4d = 1.0 / math.sqrt(128 * 4)
    bfd = 1.0 / math.sqrt(64)

    w3 = u(ks[2], (128, 256, 8), b3d)      # torch layout (out, in, k)
    w4 = u(ks[3], (64, 128, 4), b4d)
    w3w = jnp.concatenate([jnp.transpose(w3[:, :, j]) for j in range(8)], axis=1)
    w4w = jnp.concatenate([jnp.transpose(w4[:, :, j]) for j in range(4)], axis=1)

    return {
        "w1": jnp.transpose(u(ks[0], (256, 1024, 1), b1d)[:, :, 0]),   # (1024,256)
        "b1": u(ks[5], (1, 256), b1d),
        "w2": jnp.transpose(u(ks[1], (256, 256, 1), b2d)[:, :, 0]),    # (256,256)
        "b2": u(ks[6], (1, 256), b2d),
        "w3w": w3w,                                                    # (256,1024)
        "b3": u(ks[7], (1, 128), b3d),
        "w4w": w4w,                                                    # (128,256)
        "b4": u(ks[8], (1, 64), b4d),
        "wfc": jnp.transpose(u(ks[4], (4, 64), bfd)),                  # (64,4)
        "bfc": u(ks[9], (1, 4), bfd),
    }


def prepare_kernel_params(p):
    """One-time: cast weights to bf16 and precompute the weight-only conv2
    boundary rows (relu(b2) and relu(relu(b1) @ w2 + b2))."""
    bf16 = jnp.bfloat16
    r1 = jax.nn.relu(p["b1"])                        # conv1 output on a zero pad row
    r2 = jax.nn.relu(p["b2"])                        # conv2 output on a zero row
    cb = jax.nn.relu(r1 @ p["w2"] + p["b2"])         # conv2 output on conv1's pad row
    return {
        "w1": p["w1"].astype(bf16), "b1": p["b1"],
        "w2": p["w2"].astype(bf16), "b2": p["b2"],
        "w3w": p["w3w"].astype(bf16), "b3": p["b3"],
        "w4w": p["w4w"].astype(bf16), "b4": p["b4"],
        "wfc": p["wfc"].astype(bf16), "bfc": p["bfc"],
        "r2c": r2.astype(bf16), "cbc": cb.astype(bf16),
    }


def ref_forward(x, p):
    """Pure-JAX f32 reference with identical (channels-last) semantics."""
    xp = jnp.pad(x, ((0, 0), (1, 1), (0, 0)))
    h1 = jax.nn.relu(xp @ p["w1"] + p["b1"])
    h1p = jnp.pad(h1, ((0, 0), (1, 1), (0, 0)))
    h2 = jax.nn.relu(h1p @ p["w2"] + p["b2"])
    h2p = jnp.pad(h2, ((0, 0), (1, 1), (0, 0)))                     # (B,126,256)
    h3 = sum(h2p[:, j:j + L - 1, :] @ p["w3w"][:, 128 * j:128 * (j + 1)]
             for j in range(8)) + p["b3"]
    h3 = jax.nn.relu(h3)                                            # (B,119,128)
    h3p = jnp.pad(h3, ((0, 0), (1, 1), (0, 0)))                     # (B,121,128)
    h4 = sum(h3p[:, j:j + L - 2, :] @ p["w4w"][:, 64 * j:64 * (j + 1)]
             for j in range(4)) + p["b4"]
    h4 = jax.nn.relu(h4)                                            # (B,118,64)
    pooled = jnp.mean(h4, axis=1)
    return jax.nn.sigmoid(pooled @ p["wfc"] + p["bfc"])


if __name__ == "__main__":
    key = jax.random.PRNGKey(0)
    kx, kparam = jax.random.split(key)
    # module input is (B, seq, 1024); seq must be 120 for AvgPool1d(118) -> len 1
    x = jax.random.normal(kx, (B, L, C_IN), jnp.float32)
    params = init_params(kparam)
    kernel_params = prepare_kernel_params(params)     # one-time bf16 weights

    out = jax.block_until_ready(txt_model_forward(x, kernel_params))
    assert out.shape == (B, 4), out.shape

    ref = jax.block_until_ready(ref_forward(x, params))
    assert jnp.allclose(out, ref, atol=2e-2, rtol=2e-2), (
        "max abs diff %f" % float(jnp.max(jnp.abs(out - ref))))

    print("KERNEL_OK")
</pallas_src>

<mosaic_0001>
module attributes {stable_mosaic.version = 11 : i64} {
  func.func @kernel(%arg0: i32, %arg1: memref<240x1024xf32, #tpu.memory_space<vmem>>, %arg2: memref<1024x256xbf16, #tpu.memory_space<vmem>>, %arg3: memref<1x256xf32, #tpu.memory_space<vmem>>, %arg4: memref<256x256xbf16, #tpu.memory_space<vmem>>, %arg5: memref<1x256xf32, #tpu.memory_space<vmem>>, %arg6: memref<256x1024xbf16, #tpu.memory_space<vmem>>, %arg7: memref<1x128xf32, #tpu.memory_space<vmem>>, %arg8: memref<128x256xbf16, #tpu.memory_space<vmem>>, %arg9: memref<1x64xf32, #tpu.memory_space<vmem>>, %arg10: memref<64x4xbf16, #tpu.memory_space<vmem>>, %arg11: memref<1x4xf32, #tpu.memory_space<vmem>>, %arg12: memref<1x256xbf16, #tpu.memory_space<vmem>>, %arg13: memref<1x256xbf16, #tpu.memory_space<vmem>>, %arg14: memref<2x1x4xf32, #tpu.memory_space<vmem>>, %arg15: memref<144x256xbf16, #tpu.memory_space<vmem>>) attributes {dimension_semantics = [#tpu.dimension_semantics<parallel>], iteration_bounds = array<i64: 1>, scalar_prefetch = 0 : i64, scratch_operands = 1 : i64, tpu.core_type = #tpu.core_type<tc>, window_params = [{transform_indices = @transform_0, window_bounds = array<i64: 240, 1024>}, {pipeline_mode = #tpu.pipeline_mode<synchronous>, transform_indices = @transform_1, window_bounds = array<i64: 1024, 256>}, {pipeline_mode = #tpu.pipeline_mode<synchronous>, transform_indices = @transform_2, window_bounds = array<i64: 1, 256>}, {pipeline_mode = #tpu.pipeline_mode<synchronous>, transform_indices = @transform_3, window_bounds = array<i64: 256, 256>}, {pipeline_mode = #tpu.pipeline_mode<synchronous>, transform_indices = @transform_4, window_bounds = array<i64: 1, 256>}, {pipeline_mode = #tpu.pipeline_mode<synchronous>, transform_indices = @transform_5, window_bounds = array<i64: 256, 1024>}, {pipeline_mode = #tpu.pipeline_mode<synchronous>, transform_indices = @transform_6, window_bounds = array<i64: 1, 128>}, {pipeline_mode = #tpu.pipeline_mode<synchronous>, transform_indices = @transform_7, window_bounds = array<i64: 128, 256>}, {pipeline_mode = #tpu.pipeline_mode<synchronous>, transform_indices = @transform_8, window_bounds = array<i64: 1, 64>}, {pipeline_mode = #tpu.pipeline_mode<synchronous>, transform_indices = @transform_9, window_bounds = array<i64: 64, 4>}, {pipeline_mode = #tpu.pipeline_mode<synchronous>, transform_indices = @transform_10, window_bounds = array<i64: 1, 4>}, {pipeline_mode = #tpu.pipeline_mode<synchronous>, transform_indices = @transform_11, window_bounds = array<i64: 1, 256>}, {pipeline_mode = #tpu.pipeline_mode<synchronous>, transform_indices = @transform_12, window_bounds = array<i64: 1, 256>}, {transform_indices = @transform_13, window_bounds = array<i64: 2, 1, 4>}]} {
    %c0 = arith.constant 0 : index
    %c0_0 = arith.constant 0 : index
    %0 = vector.load %arg1[%c0, %c0_0] : memref<240x1024xf32, #tpu.memory_space<vmem>>, vector<240x1024xf32>
    %1 = arith.truncf %0 : vector<240x1024xf32> to vector<240x1024xbf16>
    %c0_1 = arith.constant 0 : index
    %c0_2 = arith.constant 0 : index
    %2 = vector.load %arg2[%c0_1, %c0_2] : memref<1024x256xbf16, #tpu.memory_space<vmem>>, vector<1024x256xbf16>
    %cst = arith.constant dense<0.000000e+00> : vector<240x256xf32>
    %3 = tpu.matmul %1, %2, %cst {dimension_numbers = #tpu.dot_dimension_numbers<[1], [0], [0], [1], [0, 0, 1, 1], [], []>} : vector<240x1024xbf16>, vector<1024x256xbf16>, vector<240x256xf32> -> vector<240x256xf32>
    %c0_3 = arith.constant 0 : index
    %c0_4 = arith.constant 0 : index
    %4 = vector.load %arg3[%c0_3, %c0_4] : memref<1x256xf32, #tpu.memory_space<vmem>>, vector<1x256xf32>
    %5 = vector.broadcast %4 : vector<1x256xf32> to vector<240x256xf32>
    %6 = arith.addf %3, %5 : vector<240x256xf32>
    %cst_5 = arith.constant 0.000000e+00 : f32
    %7 = vector.broadcast %cst_5 : f32 to vector<240x256xf32>
    %8 = arith.maximumf %6, %7 : vector<240x256xf32>
    %9 = arith.truncf %8 : vector<240x256xf32> to vector<240x256xbf16>
    %c0_6 = arith.constant 0 : index
    %c0_7 = arith.constant 0 : index
    %10 = vector.load %arg4[%c0_6, %c0_7] : memref<256x256xbf16, #tpu.memory_space<vmem>>, vector<256x256xbf16>
    %cst_8 = arith.constant dense<0.000000e+00> : vector<240x256xf32>
    %11 = tpu.matmul %9, %10, %cst_8 {dimension_numbers = #tpu.dot_dimension_numbers<[1], [0], [0], [1], [0, 0, 1, 1], [], []>} : vector<240x256xbf16>, vector<256x256xbf16>, vector<240x256xf32> -> vector<240x256xf32>
    %c0_9 = arith.constant 0 : index
    %c0_10 = arith.constant 0 : index
    %12 = vector.load %arg5[%c0_9, %c0_10] : memref<1x256xf32, #tpu.memory_space<vmem>>, vector<1x256xf32>
    %13 = vector.broadcast %12 : vector<1x256xf32> to vector<240x256xf32>
    %14 = arith.addf %11, %13 : vector<240x256xf32>
    %cst_11 = arith.constant 0.000000e+00 : f32
    %15 = vector.broadcast %cst_11 : f32 to vector<240x256xf32>
    %16 = arith.maximumf %14, %15 : vector<240x256xf32>
    %cst_12 = arith.constant 0.000000e+00 : bf16
    %17 = vector.broadcast %cst_12 : bf16 to vector<14x256xbf16>
    %c0_13 = arith.constant 0 : index
    %c0_14 = arith.constant 0 : index
    %18 = vector.load %arg12[%c0_13, %c0_14] : memref<1x256xbf16, #tpu.memory_space<vmem>>, vector<1x256xbf16>
    %c0_15 = arith.constant 0 : index
    %c0_16 = arith.constant 0 : index
    %19 = vector.load %arg13[%c0_15, %c0_16] : memref<1x256xbf16, #tpu.memory_space<vmem>>, vector<1x256xbf16>
    %20 = tpu.concatenate %17, %18, %19 in 0 : vector<14x256xbf16>, vector<1x256xbf16>, vector<1x256xbf16> -> vector<16x256xbf16>
    %c0_17 = arith.constant 0 : index
    %c0_18 = arith.constant 0 : index
    %21 = vector.load %arg15[%c0_17, %c0_18] : memref<144x256xbf16, #tpu.memory_space<vmem>>, vector<16x256xbf16>
    tpu.vector_store %arg15[%c0_17, %c0_18], %20 {strides = array<i32>} : memref<144x256xbf16, #tpu.memory_space<vmem>>, vector<16x256xbf16>,
    %c0_19 = arith.constant 0 : index
    %c0_20 = arith.constant 0 : index
    %22 = vector.load %arg13[%c0_19, %c0_20] : memref<1x256xbf16, #tpu.memory_space<vmem>>, vector<1x256xbf16>
    %c0_21 = arith.constant 0 : index
    %c0_22 = arith.constant 0 : index
    %23 = vector.load %arg12[%c0_21, %c0_22] : memref<1x256xbf16, #tpu.memory_space<vmem>>, vector<1x256xbf16>
    %cst_23 = arith.constant 0.000000e+00 : bf16
    %24 = vector.broadcast %cst_23 : bf16 to vector<6x256xbf16>
    %25 = tpu.concatenate %22, %23, %24 in 0 : vector<1x256xbf16>, vector<1x256xbf16>, vector<6x256xbf16> -> vector<8x256xbf16>
    %c136 = arith.constant 136 : index
    %c0_24 = arith.constant 0 : index
    %26 = vector.load %arg15[%c136, %c0_24] : memref<144x256xbf16, #tpu.memory_space<vmem>>, vector<8x256xbf16>
    tpu.vector_store %arg15[%c136, %c0_24], %25 {strides = array<i32>} : memref<144x256xbf16, #tpu.memory_space<vmem>>, vector<8x256xbf16>,
    %27 = vector.extract_strided_slice %16 {offsets = [0, 0], sizes = [120, 256], strides = [1, 1]} : vector<240x256xf32> to vector<120x256xf32>
    %28 = arith.truncf %27 : vector<120x256xf32> to vector<120x256xbf16>
    %c16 = arith.constant 16 : index
    %c0_25 = arith.constant 0 : index
    %29 = vector.load %arg15[%c16, %c0_25] : memref<144x256xbf16, #tpu.memory_space<vmem>>, vector<120x256xbf16>
    tpu.vector_store %arg15[%c16, %c0_25], %28 {strides = array<i32>} : memref<144x256xbf16, #tpu.memory_space<vmem>>, vector<120x256xbf16>,
    %c13 = arith.constant 13 : index
    %c0_26 = arith.constant 0 : index
    %30 = vector.load %arg15[%c13, %c0_26] : memref<144x256xbf16, #tpu.memory_space<vmem>>, vector<126x256xbf16>
    %c0_27 = arith.constant 0 : index
    %c0_28 = arith.constant 0 : index
    %31 = vector.load %arg6[%c0_27, %c0_28] : memref<256x1024xbf16, #tpu.memory_space<vmem>>, vector<256x1024xbf16>
    %cst_29 = arith.constant dense<0.000000e+00> : vector<126x1024xf32>
    %32 = tpu.matmul %30, %31, %cst_29 {dimension_numbers = #tpu.dot_dimension_numbers<[1], [0], [0], [1], [0, 0, 1, 1], [], []>} : vector<126x256xbf16>, vector<256x1024xbf16>, vector<126x1024xf32> -> vector<126x1024xf32>
    %c0_30 = arith.constant 0 : index
    %c0_31 = arith.constant 0 : index
    %33 = vector.load %arg7[%c0_30, %c0_31] : memref<1x128xf32, #tpu.memory_space<vmem>>, vector<1x128xf32>
    %34 = vector.extract_strided_slice %32 {offsets = [0, 0], sizes = [119, 128], strides = [1, 1]} : vector<126x1024xf32> to vector<119x128xf32>
    %35 = vector.broadcast %33 : vector<1x128xf32> to vector<119x128xf32>
    %36 = arith.addf %35, %34 : vector<119x128xf32>
    %37 = vector.extract_strided_slice %32 {offsets = [1, 128], sizes = [119, 128], strides = [1, 1]} : vector<126x1024xf32> to vector<119x128xf32>
    %38 = arith.addf %36, %37 : vector<119x128xf32>
    %39 = vector.extract_strided_slice %32 {offsets = [2, 256], sizes = [119, 128], strides = [1, 1]} : vector<126x1024xf32> to vector<119x128xf32>
    %40 = arith.addf %38, %39 : vector<119x128xf32>
    %41 = vector.extract_strided_slice %32 {offsets = [3, 384], sizes = [119, 128], strides = [1, 1]} : vector<126x1024xf32> to vector<119x128xf32>
    %42 = arith.addf %40, %41 : vector<119x128xf32>
    %43 = vector.extract_strided_slice %32 {offsets = [4, 512], sizes = [119, 128], strides = [1, 1]} : vector<126x1024xf32> to vector<119x128xf32>
    %44 = arith.addf %42, %43 : vector<119x128xf32>
    %45 = vector.extract_strided_slice %32 {offsets = [5, 640], sizes = [119, 128], strides = [1, 1]} : vector<126x1024xf32> to vector<119x128xf32>
    %46 = arith.addf %44, %45 : vector<119x128xf32>
    %47 = vector.extract_strided_slice %32 {offsets = [6, 768], sizes = [119, 128], strides = [1, 1]} : vector<126x1024xf32> to vector<119x128xf32>
    %48 = arith.addf %46, %47 : vector<119x128xf32>
    %49 = vector.extract_strided_slice %32 {offsets = [7, 896], sizes = [119, 128], strides = [1, 1]} : vector<126x1024xf32> to vector<119x128xf32>
    %50 = arith.addf %48, %49 : vector<119x128xf32>
    %cst_32 = arith.constant 0.000000e+00 : f32
    %51 = vector.broadcast %cst_32 : f32 to vector<119x128xf32>
    %52 = arith.maximumf %50, %51 : vector<119x128xf32>
    %53 = arith.truncf %52 : vector<119x128xf32> to vector<119x128xbf16>
    %c0_33 = arith.constant 0 : index
    %c0_34 = arith.constant 0 : index
    %54 = vector.load %arg8[%c0_33, %c0_34] : memref<128x256xbf16, #tpu.memory_space<vmem>>, vector<128x256xbf16>
    %cst_35 = arith.constant dense<0.000000e+00> : vector<119x256xf32>
    %55 = tpu.matmul %53, %54, %cst_35 {dimension_numbers = #tpu.dot_dimension_numbers<[1], [0], [0], [1], [0, 0, 1, 1], [], []>} : vector<119x128xbf16>, vector<128x256xbf16>, vector<119x256xf32> -> vector<119x256xf32>
    %cst_36 = arith.constant 0.000000e+00 : f32
    %56 = vector.broadcast %cst_36 : f32 to vector<1x64xf32>
    %57 = vector.extract_strided_slice %55 {offsets = [0, 0], sizes = [117, 64], strides = [1, 1]} : vector<119x256xf32> to vector<117x64xf32>
    %58 = tpu.concatenate %56, %57 in 0 : vector<1x64xf32>, vector<117x64xf32> -> vector<118x64xf32>
    %59 = vector.extract_strided_slice %55 {offsets = [0, 64], sizes = [118, 64], strides = [1, 1]} : vector<119x256xf32> to vector<118x64xf32>
    %60 = vector.extract_strided_slice %55 {offsets = [1, 128], sizes = [118, 64], strides = [1, 1]} : vector<119x256xf32> to vector<118x64xf32>
    %61 = vector.extract_strided_slice %55 {offsets = [2, 192], sizes = [117, 64], strides = [1, 1]} : vector<119x256xf32> to vector<117x64xf32>
    %62 = tpu.concatenate %61, %56 in 0 : vector<117x64xf32>, vector<1x64xf32> -> vector<118x64xf32>
    %63 = arith.addf %58, %59 : vector<118x64xf32>
    %64 = arith.addf %63, %60 : vector<118x64xf32>
    %65 = arith.addf %64, %62 : vector<118x64xf32>
    %c0_37 = arith.constant 0 : index
    %c0_38 = arith.constant 0 : index
    %66 = vector.load %arg9[%c0_37, %c0_38] : memref<1x64xf32, #tpu.memory_space<vmem>>, vector<1x64xf32>
    %67 = vector.broadcast %66 : vector<1x64xf32> to vector<118x64xf32>
    %68 = arith.addf %65, %67 : vector<118x64xf32>
    %cst_39 = arith.constant 0.000000e+00 : f32
    %69 = vector.broadcast %cst_39 : f32 to vector<118x64xf32>
    %70 = arith.maximumf %68, %69 : vector<118x64xf32>
    %cst_40 = arith.constant dense<0.000000e+00> : vector<64xf32>
    %71 = vector.multi_reduction <add>, %70, %cst_40 [0] : vector<118x64xf32> to vector<64xf32>
    %72 = vector.shape_cast %71 : vector<64xf32> to vector<1x64xf32>
    %cst_41 = arith.constant 1.180000e+02 : f32
    %73 = vector.broadcast %cst_41 : f32 to vector<1x64xf32>
    %74 = arith.divf %72, %73 : vector<1x64xf32>
    %75 = vector.extract_strided_slice %16 {offsets = [120, 0], sizes = [120, 256], strides = [1, 1]} : vector<240x256xf32> to vector<120x256xf32>
    %76 = arith.truncf %75 : vector<120x256xf32> to vector<120x256xbf16>
    %c16_42 = arith.constant 16 : index
    %c0_43 = arith.constant 0 : index
    %77 = vector.load %arg15[%c16_42, %c0_43] : memref<144x256xbf16, #tpu.memory_space<vmem>>, vector<120x256xbf16>
    tpu.vector_store %arg15[%c16_42, %c0_43], %76 {strides = array<i32>} : memref<144x256xbf16, #tpu.memory_space<vmem>>, vector<120x256xbf16>,
    %c13_44 = arith.constant 13 : index
    %c0_45 = arith.constant 0 : index
    %78 = vector.load %arg15[%c13_44, %c0_45] : memref<144x256xbf16, #tpu.memory_space<vmem>>, vector<126x256xbf16>
    %c0_46 = arith.constant 0 : index
    %c0_47 = arith.constant 0 : index
    %79 = vector.load %arg6[%c0_46, %c0_47] : memref<256x1024xbf16, #tpu.memory_space<vmem>>, vector<256x1024xbf16>
    %cst_48 = arith.constant dense<0.000000e+00> : vector<126x1024xf32>
    %80 = tpu.matmul %78, %79, %cst_48 {dimension_numbers = #tpu.dot_dimension_numbers<[1], [0], [0], [1], [0, 0, 1, 1], [], []>} : vector<126x256xbf16>, vector<256x1024xbf16>, vector<126x1024xf32> -> vector<126x1024xf32>
    %c0_49 = arith.constant 0 : index
    %c0_50 = arith.constant 0 : index
    %81 = vector.load %arg7[%c0_49, %c0_50] : memref<1x128xf32, #tpu.memory_space<vmem>>, vector<1x128xf32>
    %82 = vector.extract_strided_slice %80 {offsets = [0, 0], sizes = [119, 128], strides = [1, 1]} : vector<126x1024xf32> to vector<119x128xf32>
    %83 = vector.broadcast %81 : vector<1x128xf32> to vector<119x128xf32>
    %84 = arith.addf %83, %82 : vector<119x128xf32>
    %85 = vector.extract_strided_slice %80 {offsets = [1, 128], sizes = [119, 128], strides = [1, 1]} : vector<126x1024xf32> to vector<119x128xf32>
    %86 = arith.addf %84, %85 : vector<119x128xf32>
    %87 = vector.extract_strided_slice %80 {offsets = [2, 256], sizes = [119, 128], strides = [1, 1]} : vector<126x1024xf32> to vector<119x128xf32>
    %88 = arith.addf %86, %87 : vector<119x128xf32>
    %89 = vector.extract_strided_slice %80 {offsets = [3, 384], sizes = [119, 128], strides = [1, 1]} : vector<126x1024xf32> to vector<119x128xf32>
    %90 = arith.addf %88, %89 : vector<119x128xf32>
    %91 = vector.extract_strided_slice %80 {offsets = [4, 512], sizes = [119, 128], strides = [1, 1]} : vector<126x1024xf32> to vector<119x128xf32>
    %92 = arith.addf %90, %91 : vector<119x128xf32>
    %93 = vector.extract_strided_slice %80 {offsets = [5, 640], sizes = [119, 128], strides = [1, 1]} : vector<126x1024xf32> to vector<119x128xf32>
    %94 = arith.addf %92, %93 : vector<119x128xf32>
    %95 = vector.extract_strided_slice %80 {offsets = [6, 768], sizes = [119, 128], strides = [1, 1]} : vector<126x1024xf32> to vector<119x128xf32>
    %96 = arith.addf %94, %95 : vector<119x128xf32>
    %97 = vector.extract_strided_slice %80 {offsets = [7, 896], sizes = [119, 128], strides = [1, 1]} : vector<126x1024xf32> to vector<119x128xf32>
    %98 = arith.addf %96, %97 : vector<119x128xf32>
    %cst_51 = arith.constant 0.000000e+00 : f32
    %99 = vector.broadcast %cst_51 : f32 to vector<119x128xf32>
    %100 = arith.maximumf %98, %99 : vector<119x128xf32>
    %101 = arith.truncf %100 : vector<119x128xf32> to vector<119x128xbf16>
    %c0_52 = arith.constant 0 : index
    %c0_53 = arith.constant 0 : index
    %102 = vector.load %arg8[%c0_52, %c0_53] : memref<128x256xbf16, #tpu.memory_space<vmem>>, vector<128x256xbf16>
    %cst_54 = arith.constant dense<0.000000e+00> : vector<119x256xf32>
    %103 = tpu.matmul %101, %102, %cst_54 {dimension_numbers = #tpu.dot_dimension_numbers<[1], [0], [0], [1], [0, 0, 1, 1], [], []>} : vector<119x128xbf16>, vector<128x256xbf16>, vector<119x256xf32> -> vector<119x256xf32>
    %cst_55 = arith.constant 0.000000e+00 : f32
    %104 = vector.broadcast %cst_55 : f32 to vector<1x64xf32>
    %105 = vector.extract_strided_slice %103 {offsets = [0, 0], sizes = [117, 64], strides = [1, 1]} : vector<119x256xf32> to vector<117x64xf32>
    %106 = tpu.concatenate %104, %105 in 0 : vector<1x64xf32>, vector<117x64xf32> -> vector<118x64xf32>
    %107 = vector.extract_strided_slice %103 {offsets = [0, 64], sizes = [118, 64], strides = [1, 1]} : vector<119x256xf32> to vector<118x64xf32>
    %108 = vector.extract_strided_slice %103 {offsets = [1, 128], sizes = [118, 64], strides = [1, 1]} : vector<119x256xf32> to vector<118x64xf32>
    %109 = vector.extract_strided_slice %103 {offsets = [2, 192], sizes = [117, 64], strides = [1, 1]} : vector<119x256xf32> to vector<117x64xf32>
    %110 = tpu.concatenate %109, %104 in 0 : vector<117x64xf32>, vector<1x64xf32> -> vector<118x64xf32>
    %111 = arith.addf %106, %107 : vector<118x64xf32>
    %112 = arith.addf %111, %108 : vector<118x64xf32>
    %113 = arith.addf %112, %110 : vector<118x64xf32>
    %c0_56 = arith.constant 0 : index
    %c0_57 = arith.constant 0 : index
    %114 = vector.load %arg9[%c0_56, %c0_57] : memref<1x64xf32, #tpu.memory_space<vmem>>, vector<1x64xf32>
    %115 = vector.broadcast %114 : vector<1x64xf32> to vector<118x64xf32>
    %116 = arith.addf %113, %115 : vector<118x64xf32>
    %cst_58 = arith.constant 0.000000e+00 : f32
    %117 = vector.broadcast %cst_58 : f32 to vector<118x64xf32>
    %118 = arith.maximumf %116, %117 : vector<118x64xf32>
    %cst_59 = arith.constant dense<0.000000e+00> : vector<64xf32>
    %119 = vector.multi_reduction <add>, %118, %cst_59 [0] : vector<118x64xf32> to vector<64xf32>
    %120 = vector.shape_cast %119 : vector<64xf32> to vector<1x64xf32>
    %cst_60 = arith.constant 1.180000e+02 : f32
    %121 = vector.broadcast %cst_60 : f32 to vector<1x64xf32>
    %122 = arith.divf %120, %121 : vector<1x64xf32>
    %123 = tpu.concatenate %74, %122 in 0 : vector<1x64xf32>, vector<1x64xf32> -> vector<2x64xf32>
    %124 = arith.truncf %123 : vector<2x64xf32> to vector<2x64xbf16>
    %c0_61 = arith.constant 0 : index
    %c0_62 = arith.constant 0 : index
    %125 = vector.load %arg10[%c0_61, %c0_62] : memref<64x4xbf16, #tpu.memory_space<vmem>>, vector<64x4xbf16>
    %cst_63 = arith.constant dense<0.000000e+00> : vector<2x4xf32>
    %126 = tpu.matmul %124, %125, %cst_63 {dimension_numbers = #tpu.dot_dimension_numbers<[1], [0], [0], [1], [0, 0, 1, 1], [], []>} : vector<2x64xbf16>, vector<64x4xbf16>, vector<2x4xf32> -> vector<2x4xf32>
    %c0_64 = arith.constant 0 : index
    %c0_65 = arith.constant 0 : index
    %127 = vector.load %arg11[%c0_64, %c0_65] : memref<1x4xf32, #tpu.memory_space<vmem>>, vector<1x4xf32>
    %128 = vector.broadcast %127 : vector<1x4xf32> to vector<2x4xf32>
    %129 = arith.addf %126, %128 : vector<2x4xf32>
    %cst_66 = arith.constant 0.000000e+00 : f32
    %130 = vector.broadcast %cst_66 : f32 to vector<2x4xf32>
    %131 = arith.subf %130, %129 : vector<2x4xf32>
    %132 = math.exp %131 : vector<2x4xf32>
    %cst_67 = arith.constant 1.000000e+00 : f32
    %133 = vector.broadcast %cst_67 : f32 to vector<2x4xf32>
    %134 = arith.addf %133, %132 : vector<2x4xf32>
    %cst_68 = arith.constant 1.000000e+00 : f32
    %135 = vector.broadcast %cst_68 : f32 to vector<2x4xf32>
    %136 = arith.divf %135, %134 : vector<2x4xf32>
    %137 = vector.extract_strided_slice %136 {offsets = [0, 0], sizes = [1, 4], strides = [1, 1]} : vector<2x4xf32> to vector<1x4xf32>
    %c0_69 = arith.constant 0 : index
    %c0_70 = arith.constant 0 : index
    %c0_71 = arith.constant 0 : index
    %138 = vector.load %arg14[%c0_69, %c0_70, %c0_71] : memref<2x1x4xf32, #tpu.memory_space<vmem>>, vector<1x1x4xf32>
    %139 = vector.shape_cast %138 : vector<1x1x4xf32> to vector<1x4xf32>
    %140 = vector.shape_cast %137 : vector<1x4xf32> to vector<1x1x4xf32>
    tpu.vector_store %arg14[%c0_69, %c0_70, %c0_71], %140 {strides = array<i32>} : memref<2x1x4xf32, #tpu.memory_space<vmem>>, vector<1x1x4xf32>,
    %141 = vector.extract_strided_slice %136 {offsets = [1, 0], sizes = [1, 4], strides = [1, 1]} : vector<2x4xf32> to vector<1x4xf32>
    %c1 = arith.constant 1 : index
    %c0_72 = arith.constant 0 : index
    %c0_73 = arith.constant 0 : index
    %142 = vector.load %arg14[%c1, %c0_72, %c0_73] : memref<2x1x4xf32, #tpu.memory_space<vmem>>, vector<1x1x4xf32>
    %143 = vector.shape_cast %142 : vector<1x1x4xf32> to vector<1x4xf32>
    %144 = vector.shape_cast %141 : vector<1x4xf32> to vector<1x1x4xf32>
    tpu.vector_store %arg14[%c1, %c0_72, %c0_73], %144 {strides = array<i32>} : memref<2x1x4xf32, #tpu.memory_space<vmem>>, vector<1x1x4xf32>,
    return
  }
  func.func @transform_0(%arg0: i32) -> (i32, i32) {
    %c0_i32 = arith.constant 0 : i32
    %c0_i32_0 = arith.constant 0 : i32
    return %arg0, %c0_i32 : i32, i32
  }
  func.func @transform_1(%arg0: i32) -> (i32, i32) {
    %c0_i32 = arith.constant 0 : i32
    %c0_i32_0 = arith.constant 0 : i32
    %c0_i32_1 = arith.constant 0 : i32
    return %c0_i32, %c0_i32_0 : i32, i32
  }
  func.func @transform_2(%arg0: i32) -> (i32, i32) {
    %c0_i32 = arith.constant 0 : i32
    %c0_i32_0 = arith.constant 0 : i32
    %c0_i32_1 = arith.constant 0 : i32
    return %c0_i32, %c0_i32_0 : i32, i32
  }
  func.func @transform_3(%arg0: i32) -> (i32, i32) {
    %c0_i32 = arith.constant 0 : i32
    %c0_i32_0 = arith.constant 0 : i32
    %c0_i32_1 = arith.constant 0 : i32
    return %c0_i32, %c0_i32_0 : i32, i32
  }
  func.func @transform_4(%arg0: i32) -> (i32, i32) {
    %c0_i32 = arith.constant 0 : i32
    %c0_i32_0 = arith.constant 0 : i32
    %c0_i32_1 = arith.constant 0 : i32
    return %c0_i32, %c0_i32_0 : i32, i32
  }
  func.func @transform_5(%arg0: i32) -> (i32, i32) {
    %c0_i32 = arith.constant 0 : i32
    %c0_i32_0 = arith.constant 0 : i32
    %c0_i32_1 = arith.constant 0 : i32
    return %c0_i32, %c0_i32_0 : i32, i32
  }
  func.func @transform_6(%arg0: i32) -> (i32, i32) {
    %c0_i32 = arith.constant 0 : i32
    %c0_i32_0 = arith.constant 0 : i32
    %c0_i32_1 = arith.constant 0 : i32
    return %c0_i32, %c0_i32_0 : i32, i32
  }
  func.func @transform_7(%arg0: i32) -> (i32, i32) {
    %c0_i32 = arith.constant 0 : i32
    %c0_i32_0 = arith.constant 0 : i32
    %c0_i32_1 = arith.constant 0 : i32
    return %c0_i32, %c0_i32_0 : i32, i32
  }
  func.func @transform_8(%arg0: i32) -> (i32, i32) {
    %c0_i32 = arith.constant 0 : i32
    %c0_i32_0 = arith.constant 0 : i32
    %c0_i32_1 = arith.constant 0 : i32
    return %c0_i32, %c0_i32_0 : i32, i32
  }
  func.func @transform_9(%arg0: i32) -> (i32, i32) {
    %c0_i32 = arith.constant 0 : i32
    %c0_i32_0 = arith.constant 0 : i32
    %c0_i32_1 = arith.constant 0 : i32
    return %c0_i32, %c0_i32_0 : i32, i32
  }
  func.func @transform_10(%arg0: i32) -> (i32, i32) {
    %c0_i32 = arith.constant 0 : i32
    %c0_i32_0 = arith.constant 0 : i32
    %c0_i32_1 = arith.constant 0 : i32
    return %c0_i32, %c0_i32_0 : i32, i32
  }
  func.func @transform_11(%arg0: i32) -> (i32, i32) {
    %c0_i32 = arith.constant 0 : i32
    %c0_i32_0 = arith.constant 0 : i32
    %c0_i32_1 = arith.constant 0 : i32
    return %c0_i32, %c0_i32_0 : i32, i32
  }
  func.func @transform_12(%arg0: i32) -> (i32, i32) {
    %c0_i32 = arith.constant 0 : i32
    %c0_i32_0 = arith.constant 0 : i32
    %c0_i32_1 = arith.constant 0 : i32
    return %c0_i32, %c0_i32_0 : i32, i32
  }
  func.func @transform_13(%arg0: i32) -> (i32, i32, i32) {
    %c0_i32 = arith.constant 0 : i32
    %c0_i32_0 = arith.constant 0 : i32
    %c0_i32_1 = arith.constant 0 : i32
    return %arg0, %c0_i32, %c0_i32_0 : i32, i32, i32
  }
}

</mosaic_0001>

<bundles_post_ra>
// kernel: tpu_custom_call.1
= control target key start
LH: loop header
LB: loop body
LE: loop exit
PB: predicated region body
PF: predicated region fallthrough
CT: control target
= control target key end

     0   :  { %18 = vsyncpa [#allocation4], 0  ;;  %s11177_s0 = inlined_call_operand.hbm [shape: f32[240,1024], index: 0, kind: input, shape index: {}]   ;;  %s11178_s1 = inlined_call_operand.hbm [shape: bf16[1024,256], index: 1, kind: input, shape index: {}]   ;;  %s11179_s2 = inlined_call_operand.vmem [shape: f32[1,256], index: 2, kind: input, shape index: {}]   ;;  %s11180_s3 = inlined_call_operand.hbm [shape: bf16[256,256], index: 3, kind: input, shape index: {}]   ;;  %s11181_s4 = inlined_call_operand.vmem [shape: f32[1,256], index: 4, kind: input, shape index: {}]   ;;  %s11182_s5 = inlined_call_operand.hbm [shape: bf16[256,1024], index: 5, kind: input, shape index: {}]   ;;  %s11183_s6 = inlined_call_operand.vmem [shape: f32[1,128], index: 6, kind: input, shape index: {}]   ;;  %s11184_s7 = inlined_call_operand.hbm [shape: bf16[128,256], index: 7, kind: input, shape index: {}]   ;;  %s11185_s8 = inlined_call_operand.vmem [shape: f32[1,64], index: 8, kind: input, shape index: {}]   ;;  %s11186_s9 = inlined_call_operand.vmem [shape: bf16[64,4], index: 9, kind: input, shape index: {}]   ;;  %s11187_s10 = inlined_call_operand.vmem [shape: f32[1,4], index: 10, kind: input, shape index: {}]   ;;  %s11188_s11 = inlined_call_operand.vmem [shape: bf16[1,256], index: 11, kind: input, shape index: {}]   ;;  %s11189_s12 = inlined_call_operand.vmem [shape: bf16[1,256], index: 12, kind: input, shape index: {}]   ;;  %s11190_s13 = inlined_call_operand.hbm [shape: f32[2,1,4], index: 13, kind: output, shape index: {}]  }
   0x1   :  { %19 = vsyncpa [#allocation7], 0 }
   0x2   :  { %20 = vsyncpa [#allocation10], 0 }
   0x3   :  { %21 = vsyncpa [#allocation5], 0  ;;  %s9154_s25 = smov [#allocation6]   ;;  %s9014_s29 = scalar_lea.hbm %s11178_s1, 16384 }
   0x4   :  { %s39_s26 = sshll.u32 %s9154_s25, 4  ;;  %p9015_p0 = scmp.ne.s32.totalorder %s11178_s1, %s9014_s29  ;;  %s40_s26 = int_to_ptr.vmem [resolvable:$true] %s39_s26 }
   0x5   :  { %p9018_p1 = scmp.lt.u32.totalorder %s9014_s29, %s11178_s1 }
   0x7   :  { %p9020_p2 = pnand %p9018_p1, %p9015_p0 }
   0x9   :  { %9023 = shalt.err (!%p9020_p2)
}
   0xa   :  { %s9024_s17 = scalar_lea.vmem %s40_s26, 16384  ;;  %p9029_p4 = scmp.lt.s32.totalorder %s40_s26, %s40_s26 }
   0xb   :  { %p9025_p3 = scmp.ne.s32.totalorder %s40_s26, %s9024_s17  ;;  %p9030_p5 = scmp.lt.s32.totalorder %s9024_s17, %s9024_s17 }
   0xd   :  { %p9031_p6 = por %p9030_p5, %p9029_p4 }
   0xf   :  { %p9032_p7 = pnand %p9031_p6, %p9025_p3 }
  0x11   :  { %9035 = shalt.err (!%p9032_p7)
}
  0x12   :  { %s9155_s18 = smov 128   ;;  %s9156_s19 = smov 8  }
  0x13   :  { %45 = dma.hbm_to_vmem [thread:$0]  %s11178_s1, 16384, %s40_s26, [#allocation7], %s9155_s18, %s9155_s18, %s9156_s19  }
  0x14   :  { %s9157_s22 = smov [#allocation9]   ;;  %s9036_s27 = scalar_lea.hbm %s11182_s5, 16384 }
  0x15   :  { %s67_s23 = sshll.u32 %s9157_s22, 4  ;;  %p9037_p8 = scmp.ne.s32.totalorder %s11182_s5, %s9036_s27  ;;  %s68_s23 = int_to_ptr.vmem [resolvable:$true] %s67_s23 }
  0x16   :  { %p9040_p9 = scmp.lt.u32.totalorder %s9036_s27, %s11182_s5 }
  0x18   :  { %p9042_p10 = pnand %p9040_p9, %p9037_p8 }
  0x1a   :  { %9045 = shalt.err (!%p9042_p10)
}
  0x1b   :  { %s9046_s15 = scalar_lea.vmem %s68_s23, 16384  ;;  %p9051_p12 = scmp.lt.s32.totalorder %s68_s23, %s68_s23 }
  0x1c   :  { %p9047_p11 = scmp.ne.s32.totalorder %s68_s23, %s9046_s15  ;;  %p9052_p13 = scmp.lt.s32.totalorder %s9046_s15, %s9046_s15 }
  0x1e   :  { %p9053_p0 = por %p9052_p13, %p9051_p12 }
  0x20   :  { %p9054_p1 = pnand %p9053_p0, %p9047_p11 }
  0x22   :  { %9057 = shalt.err (!%p9054_p1)
}
  0x23   :  { %s9158_s1 = smov 512   ;;  %s9159_s26 = smov 32  }
  0x24   :  { %73 = dma.hbm_to_vmem [thread:$0]  %s11182_s5, 16384, %s68_s23, [#allocation10], %s9158_s1, %s9158_s1, %s9159_s26  }
  0x25   :  { %s9160_s20 = smov [#allocation3]   ;;  %s9058_s25 = scalar_lea.hbm %s11177_s0, 30720 }
  0x26   :  { %s27_s21 = sshll.u32 %s9160_s20, 4  ;;  %p9059_p2 = scmp.ne.s32.totalorder %s11177_s0, %s9058_s25  ;;  %s28_s21 = int_to_ptr.vmem [resolvable:$true] %s27_s21 }
  0x27   :  { %p9062_p3 = scmp.lt.u32.totalorder %s9058_s25, %s11177_s0 }
  0x29   :  { %p9064_p4 = pnand %p9062_p3, %p9059_p2 }
  0x2b   :  { %9067 = shalt.err (!%p9064_p4)
}
  0x2c   :  { %s9068_s14 = scalar_lea.vmem %s28_s21, 30720  ;;  %p9073_p6 = scmp.lt.s32.totalorder %s28_s21, %s28_s21 }
  0x2d   :  { %p9069_p5 = scmp.ne.s32.totalorder %s28_s21, %s9068_s14  ;;  %p9074_p7 = scmp.lt.s32.totalorder %s9068_s14, %s9068_s14 }
  0x2f   :  { %p9075_p8 = por %p9074_p7, %p9073_p6 }
  0x31   :  { %p9076_p9 = pnand %p9075_p8, %p9069_p5 }
  0x33   :  { %9079 = shalt.err (!%p9076_p9)
}
  0x34   :  { %s9161_s5 = smov 1024   ;;  %s9162_s23 = smov 64  }
  0x35   :  { %33 = dma.hbm_to_vmem [thread:$0]  %s11177_s0, 30720, %s28_s21, [#allocation4], %s9161_s5, %s9161_s5, %s9162_s23  }
  0x36   :  { %s9163_s26 = smov [#allocation8]   ;;  %s9164_s17 = smov [#allocation11]  }
  0x37   :  { %s53_s16 = sshll.u32 %s9163_s26, 4  ;;  %s81_s20 = sshll.u32 %s9164_s17, 4  ;;  %s54_s16 = int_to_ptr.vmem [resolvable:$true] %s53_s16  ;;  %s82_s20 = int_to_ptr.vmem [resolvable:$true] %s81_s20 }
  0x38   :  { %s9080_s25 = scalar_lea.hbm %s11180_s3, 4096 }
  0x39   :  { %p9081_p10 = scmp.ne.s32.totalorder %s11180_s3, %s9080_s25  ;;  %p9084_p11 = scmp.lt.u32.totalorder %s9080_s25, %s11180_s3 }
  0x3b   :  { %p9086_p12 = pnand %p9084_p11, %p9081_p10 }
  0x3d   :  { %9089 = shalt.err (!%p9086_p12)
}
  0x3e   :  { %s9090_s0 = scalar_lea.vmem %s54_s16, 4096  ;;  %p9095_p0 = scmp.lt.s32.totalorder %s54_s16, %s54_s16 }
  0x3f   :  { %p9091_p13 = scmp.ne.s32.totalorder %s54_s16, %s9090_s0  ;;  %p9096_p1 = scmp.lt.s32.totalorder %s9090_s0, %s9090_s0 }
  0x41   :  { %p9097_p2 = por %p9096_p1, %p9095_p0 }
  0x43   :  { %p9098_p3 = pnand %p9097_p2, %p9091_p13 }
  0x45   :  { %9101 = shalt.err (!%p9098_p3)
}
  0x46   :  { %59 = dma.hbm_to_vmem [thread:$0]  %s11180_s3, 4096, %s54_s16, [#allocation7], %s9155_s18, %s9155_s18, %s9156_s19  }
  0x47   :  { %s9102_s1 = scalar_lea.hbm %s11184_s7, 2048 }
  0x48   :  { %p9103_p4 = scmp.ne.s32.totalorder %s11184_s7, %s9102_s1  ;;  %p9106_p5 = scmp.lt.u32.totalorder %s9102_s1, %s11184_s7 }
  0x4a   :  { %p9108_p6 = pnand %p9106_p5, %p9103_p4 }
  0x4c   :  { %9111 = shalt.err (!%p9108_p6)
}
  0x4d   :  { %s9112_s25 = scalar_lea.vmem %s82_s20, 2048  ;;  %p9117_p8 = scmp.lt.s32.totalorder %s82_s20, %s82_s20 }
  0x4e   :  { %p9113_p7 = scmp.ne.s32.totalorder %s82_s20, %s9112_s25  ;;  %p9118_p9 = scmp.lt.s32.totalorder %s9112_s25, %s9112_s25 }
  0x50   :  { %p9119_p10 = por %p9118_p9, %p9117_p8 }
  0x52   :  { %p9120_p11 = pnand %p9119_p10, %p9113_p7 }
  0x54   :  { %9123 = shalt.err (!%p9120_p11)
}
  0x55   :  { %87 = dma.hbm_to_vmem [thread:$0]  %s11184_s7, 2048, %s82_s20, [#allocation10], %s9155_s18, %s9155_s18, %s9156_s19  }
  0x56   :  { %9146 = dma.done.wait [#allocation4], 30720  }
  0x57   :  { %9147 = vsyncadd [#allocation4], 4294936576 }
  0x58   :  { %9148 = dma.done.wait [#allocation7], 20480  }
  0x59   :  { %9149 = vsyncadd [#allocation7], 4294946816 }
  0x5a   :  { %9150 = dma.done.wait [#allocation10], 18432  }
  0x5b   :  { %9151 = vsyncadd [#allocation10], 4294948864  ;;  %v8716_v0 = vld [vmem:[#allocation6 + $0x4] ss:$8 sps:$4 sm:$0xff]   ;;  %v8718_v1 = vld [vmem:[#allocation6] ss:$8 sps:$4 sm:$0xff]  }
  0x5c   :  { %1254 = vmatprep.subr.bf16.mxu0 %v8716_v0  ;;  %v8719_v2 = vld [vmem:[#allocation6 + $0x14] ss:$8 sps:$4 sm:$0xff]   ;;  %v8721_v3 = vld [vmem:[#allocation6 + $0x10] ss:$8 sps:$4 sm:$0xff]   ;;  %v8722_v4 = vld [vmem:[#allocation6 + $0x24] ss:$8 sps:$4 sm:$0xff]  }
  0x5d   :  { %1255 = vmatpush1.bf16.msra.mxu0 %v8718_v1  ;;  %v8724_v5 = vld [vmem:[#allocation6 + $0x20] ss:$8 sps:$4 sm:$0xff]   ;;  %v8725_v6 = vld [vmem:[#allocation6 + $0x34] ss:$8 sps:$4 sm:$0xff]   ;;  %v8727_v7 = vld [vmem:[#allocation6 + $0x30] ss:$8 sps:$4 sm:$0xff]  }
  0x5e   :  { %1256 = vmatprep.subr.bf16.mxu0 %v8719_v2  ;;  %v8728_v8 = vld [vmem:[#allocation6 + $0x44] ss:$8 sps:$4 sm:$0xff]   ;;  %v8730_v9 = vld [vmem:[#allocation6 + $0x40] ss:$8 sps:$4 sm:$0xff]   ;;  %v8731_v10 = vld [vmem:[#allocation6 + $0x54] ss:$8 sps:$4 sm:$0xff]  }
  0x5f   :  { %v8733_v11 = vld [vmem:[#allocation6 + $0x50] ss:$8 sps:$4 sm:$0xff]   ;;  %v8734_v12 = vld [vmem:[#allocation6 + $0x64] ss:$8 sps:$4 sm:$0xff]   ;;  %v8736_v16 = vld [vmem:[#allocation6 + $0x60] ss:$8 sps:$4 sm:$0xff]  }
  0x60   :  { %v115_v13 = vld [vmem:[#allocation3 + $0x8] sm:$0xff]  ;;  %v8737_v17 = vld [vmem:[#allocation6 + $0x74] ss:$8 sps:$4 sm:$0xff]   ;;  %v8739_v18 = vld [vmem:[#allocation6 + $0x70] ss:$8 sps:$4 sm:$0xff]   ;;  %vm2584_vm0 = vcmask 1046528  }
  0x61   :  { %1257 = vmatpush1.bf16.msra.mxu0 %v8721_v3  ;;  %v123_v14 = vld [vmem:[#allocation3 + $0x48] sm:$0xff]  ;;  %v8743_v21 = vld [vmem:[#allocation6 + $0x94] ss:$8 sps:$4 sm:$0xff]   ;;  %v8745_v22 = vld [vmem:[#allocation6 + $0x90] ss:$8 sps:$4 sm:$0xff]   ;;  %vm2592_vm1 = vcmask 1047552  }
  0x62   :  { %1258 = vmatprep.subr.bf16.mxu0 %v8722_v4  ;;  %v355_v15 = vpack.c.bf16 %v123_v14, %v115_v13  ;;  %v8740_v19 = vld [vmem:[#allocation6 + $0x84] ss:$8 sps:$4 sm:$0xff]   ;;  %v8742_v20 = vld [vmem:[#allocation6 + $0x80] ss:$8 sps:$4 sm:$0xff]   ;;  %v8749_v25 = vld [vmem:[#allocation6 + $0xb4] ss:$8 sps:$4 sm:$0xff]  }
  0x63   :  { %v8746_v23 = vld [vmem:[#allocation6 + $0xa4] ss:$8 sps:$4 sm:$0xff]   ;;  %v8748_v24 = vld [vmem:[#allocation6 + $0xa0] ss:$8 sps:$4 sm:$0xff]   ;;  %v8751_v26 = vld [vmem:[#allocation6 + $0xb0] ss:$8 sps:$4 sm:$0xff]  }
  0x64   :  { %1286 = vmatprep.mubr.bf16.mxu0 %v355_v15  ;;  %v8752_v27 = vld [vmem:[#allocation6 + $0xc4] ss:$8 sps:$4 sm:$0xff]   ;;  %v8754_v28 = vld [vmem:[#allocation6 + $0xc0] ss:$8 sps:$4 sm:$0xff]   ;;  %v8755_v29 = vld [vmem:[#allocation6 + $0xd4] ss:$8 sps:$4 sm:$0xff]  }
  0x65   :  { %1259 = vmatpush1.bf16.msra.mxu0 %v8724_v5  ;;  %v8757_v30 = vld [vmem:[#allocation6 + $0xd0] ss:$8 sps:$4 sm:$0xff]   ;;  %v8758_v31 = vld [vmem:[#allocation6 + $0xe4] ss:$8 sps:$4 sm:$0xff]   ;;  %v8760_v32 = vld [vmem:[#allocation6 + $0xe0] ss:$8 sps:$4 sm:$0xff]  }
  0x66   :  { %1260 = vmatprep.subr.bf16.mxu0 %v8725_v6  ;;  %v8761_v33 = vld [vmem:[#allocation6 + $0xf4] ss:$8 sps:$4 sm:$0xff]   ;;  %v8763_v34 = vld [vmem:[#allocation6 + $0xf0] ss:$8 sps:$4 sm:$0xff]   ;;  %v114_v35 = vld [vmem:[#allocation3] sm:$0xff]  ;;  %vm2657_vm4 = vcmask 1040384  }
  0x67   :  { %v122_v36 = vld [vmem:[#allocation3 + $0x40] sm:$0xff]  ;;  %v131_v38 = vld [vmem:[#allocation3 + $0x88] sm:$0xff]  ;;  %v8769_v43 = vld [vmem:[#allocation6 + $0x114] ss:$8 sps:$4 sm:$0xff]   ;;  %vm2593_vm2 = vsmask.f32 7424 }
  0x68   :  { %v8766_v37 = vld [vmem:[#allocation6 + $0x104] ss:$8 sps:$4 sm:$0xff]   ;;  %v354_v40 = vpack.c.bf16 %v122_v36, %v114_v35  ;;  %v8764_v41 = vld [vmem:[#allocation6 + $0x100] ss:$8 sps:$4 sm:$0xff]   ;;  %v8767_v46 = vld [vmem:[#allocation6 + $0x110] ss:$8 sps:$4 sm:$0xff]  }
  0x69   :  { %1261 = vmatpush1.bf16.msra.mxu0 %v8727_v7  ;;  %v139_v39 = vld [vmem:[#allocation3 + $0xc8] sm:$0xff]  ;;  %v130_v44 = vld [vmem:[#allocation3 + $0x80] sm:$0xff]  ;;  %v8775_v52 = vld [vmem:[#allocation6 + $0x134] ss:$8 sps:$4 sm:$0xff]   ;;  %vm2658_vm5 = vsmask.f32 256 }
  0x6a   :  { %1262 = vmatprep.subr.bf16.mxu0 %v8728_v8  ;;  %v363_v42 = vpack.c.bf16 %v139_v39, %v131_v38  ;;  %v138_v45 = vld [vmem:[#allocation3 + $0xc0] sm:$0xff]  ;;  %v147_v47 = vld [vmem:[#allocation3 + $0x108] sm:$0xff]  ;;  %v8773_v58 = vld [vmem:[#allocation6 + $0x130] ss:$8 sps:$4 sm:$0xff]   ;;  %vm2853_vm7 = vsmask.f32 1280 }
  0x6b   :  { %v155_v48 = vld [vmem:[#allocation3 + $0x148] sm:$0xff]  ;;  %v362_v50 = vpack.c.bf16 %v138_v45, %v130_v44  ;;  %v146_v54 = vld [vmem:[#allocation3 + $0x100] sm:$0xff]  ;;  %v8781_v62 = vld [vmem:[#allocation6 + $0x154] ss:$8 sps:$4 sm:$0xff]   ;;  %vm4232_vm8 = vcmask 1045504   ;;  %vm4310_vm9 = vcmask 1044480  }
  0x6c   :  { %v8772_v49 = vld [vmem:[#allocation6 + $0x124] ss:$8 sps:$4 sm:$0xff]   ;;  %v8770_v51 = vld [vmem:[#allocation6 + $0x120] ss:$8 sps:$4 sm:$0xff]   ;;  %v371_v53 = vpack.c.bf16 %v155_v48, %v147_v47  ;;  %v8779_v4 = vld [vmem:[#allocation6 + $0x150] ss:$8 sps:$4 sm:$0xff]  }
  0x6d   :  { %1263 = vmatpush1.bf16.msra.mxu0 %v8730_v9  ;;  %v154_v55 = vld [vmem:[#allocation3 + $0x140] sm:$0xff]  ;;  %v163_v56 = vld [vmem:[#allocation3 + $0x188] sm:$0xff]  ;;  %v8787_v8 = vld [vmem:[#allocation6 + $0x174] ss:$8 sps:$4 sm:$0xff]   ;;  %vm4544_vm10 = vcmask 1041408   ;;  %vm4388_vm11 = vcmask 1043456  }
  0x6e   :  { %1264 = vmatprep.subr.bf16.mxu0 %v8731_v10  ;;  %v171_v57 = vld [vmem:[#allocation3 + $0x1c8] sm:$0xff]  ;;  %v370_v61 = vpack.c.bf16 %v154_v55, %v146_v54  ;;  %v162_v0 = vld [vmem:[#allocation3 + $0x180] sm:$0xff]  ;;  %v8785_v14 = vld [vmem:[#allocation6 + $0x170] ss:$8 sps:$4 sm:$0xff]   ;;  %vm4466_vm12 = vcmask 1042432   ;;  %vm5236_vm13 = vcmask 523264  }
  0x6f   :  { %v8778_v59 = vld [vmem:[#allocation6 + $0x144] ss:$8 sps:$4 sm:$0xff]   ;;  %v8776_v60 = vld [vmem:[#allocation6 + $0x140] ss:$8 sps:$4 sm:$0xff]   ;;  %v379_v63 = vpack.c.bf16 %v171_v57, %v163_v56  ;;  %v8805_v38 = vld [vmem:[#allocation6 + $0x1d4] ss:$8 sps:$4 sm:$0xff]  }
  0x70   :  { %v170_v1 = vld [vmem:[#allocation3 + $0x1c0] sm:$0xff]  ;;  %v179_v2 = vld [vmem:[#allocation3 + $0x208] sm:$0xff]  ;;  %v8803_v44 = vld [vmem:[#allocation6 + $0x1d0] ss:$8 sps:$4 sm:$0xff]   ;;  %vm9168_vm14 = vmmov 0   ;;  %vm5264_vm15 = vcmask 521216  }
  0x71   :  { %1265 = vmatpush1.bf16.msra.mxu0 %v8733_v11  ;;  %v187_v3 = vld [vmem:[#allocation3 + $0x248] sm:$0xff]  ;;  %v378_v7 = vpack.c.bf16 %v170_v1, %v162_v0  ;;  %v178_v10 = vld [vmem:[#allocation3 + $0x200] sm:$0xff]  ;;  %v8811_v48 = vld [vmem:[#allocation6 + $0x1f4] ss:$8 sps:$4 sm:$0xff]   ;;  %s9169_s18 = smov [#allocation12]  }
  0x72   :  { %1266 = vmatprep.subr.bf16.mxu0 %v8734_v12  ;;  %v8784_v5 = vld [vmem:[#allocation6 + $0x164] ss:$8 sps:$4 sm:$0xff]   ;;  %v8782_v6 = vld [vmem:[#allocation6 + $0x160] ss:$8 sps:$4 sm:$0xff]   ;;  %v387_v9 = vpack.c.bf16 %v187_v3, %v179_v2  ;;  %v8809_v54 = vld [vmem:[#allocation6 + $0x1f0] ss:$8 sps:$4 sm:$0xff]  }
  0x73   :  { %v186_v11 = vld [vmem:[#allocation3 + $0x240] sm:$0xff]  ;;  %v195_v12 = vld [vmem:[#allocation3 + $0x288] sm:$0xff]  ;;  %vm2594_vm3 = vmand %vm2592_vm1, %vm2593_vm2  ;;  %vm7959_vm1 = vcmask 25601  }
  0x74   :  { %v203_v13 = vld [vmem:[#allocation3 + $0x2c8] sm:$0xff]  ;;  %v274_v0 = vld [vmem:[#allocation3 + $0x500] sm:$0xff]  ;;  %vm2659_vm6 = vmand %vm2657_vm4, %vm2658_vm5 }
  0x75   :  { %1267 = vmatpush1.bf16.msra.mxu0 %v8736_v16  ;;  %v8790_v15 = vld [vmem:[#allocation6 + $0x184] ss:$8 sps:$4 sm:$0xff]   ;;  %v8788_v16 = vld [vmem:[#allocation6 + $0x180] ss:$8 sps:$4 sm:$0xff]  }
  0x76   :  { %1268 = vmatprep.subr.bf16.mxu0 %v8737_v17  ;;  %v386_v17 = vpack.c.bf16 %v186_v11, %v178_v10  ;;  %v8802_v35 = vld [vmem:[#allocation6 + $0x1c4] ss:$8 sps:$4 sm:$0xff]   ;;  %v8800_v36 = vld [vmem:[#allocation6 + $0x1c0] ss:$8 sps:$4 sm:$0xff]  }
  0x77   :  { %v8808_v45 = vld [vmem:[#allocation6 + $0x1e4] ss:$8 sps:$4 sm:$0xff]  }
  0x78   :  { %v8814_v55 = vld [vmem:[#allocation6 + $0x204] ss:$8 sps:$4 sm:$0xff]  }
  0x79   :  { %1269 = vmatpush1.bf16.msra.mxu0 %v8739_v18  ;;  %v8793_v18 = vld [vmem:[#allocation6 + $0x194] ss:$8 sps:$4 sm:$0xff]   ;;  %v282_v1 = vld [vmem:[#allocation3 + $0x540] sm:$0xff]  ;;  %v291_v2 = vld [vmem:[#allocation3 + $0x588] sm:$0xff] }
  0x7a   :  { %1270 = vmatprep.subr.bf16.mxu0 %v8740_v19  ;;  %v395_v19 = vpack.c.bf16 %v203_v13, %v195_v12  ;;  %v299_v3 = vld [vmem:[#allocation3 + $0x5c8] sm:$0xff]  ;;  %v306_v12 = vld [vmem:[#allocation3 + $0x600] sm:$0xff] }
  0x7b   :  { %v314_v13 = vld [vmem:[#allocation3 + $0x640] sm:$0xff] }
  0x7d   :  { %1271 = vmatpush1.bf16.msra.mxu0 %v8742_v20  ;;  %v194_v20 = vld [vmem:[#allocation3 + $0x280] sm:$0xff] }
  0x7e   :  { %1272 = vmatprep.subr.bf16.mxu0 %v8743_v21  ;;  %v202_v21 = vld [vmem:[#allocation3 + $0x2c0] sm:$0xff] }
  0x81   :  { %1273 = vmatpush1.bf16.msra.mxu0 %v8745_v22  ;;  %v211_v22 = vld [vmem:[#allocation3 + $0x308] sm:$0xff] }
  0x82   :  { %1274 = vmatprep.subr.bf16.mxu0 %v8746_v23  ;;  %v219_v23 = vld [vmem:[#allocation3 + $0x348] sm:$0xff] }
  0x85   :  { %1275 = vmatpush1.bf16.msra.mxu0 %v8748_v24  ;;  %v8791_v24 = vld [vmem:[#allocation6 + $0x190] ss:$8 sps:$4 sm:$0xff]  }
  0x86   :  { %1276 = vmatprep.subr.bf16.mxu0 %v8749_v25  ;;  %v8796_v25 = vld [vmem:[#allocation6 + $0x1a4] ss:$8 sps:$4 sm:$0xff]  }
  0x89   :  { %1277 = vmatpush1.bf16.msra.mxu0 %v8751_v26  ;;  %v8794_v26 = vld [vmem:[#allocation6 + $0x1a0] ss:$8 sps:$4 sm:$0xff]  }
  0x8a   :  { %1278 = vmatprep.subr.bf16.mxu0 %v8752_v27  ;;  %v394_v27 = vpack.c.bf16 %v202_v21, %v194_v20  ;;  %v339_v20 = vld [vmem:[#allocation3 + $0x708] sm:$0xff] }
  0x8b   :  { %v347_v21 = vld [vmem:[#allocation3 + $0x748] sm:$0xff] }
  0x8d   :  { %1279 = vmatpush1.bf16.msra.mxu0 %v8754_v28  ;;  %v8799_v28 = vld [vmem:[#allocation6 + $0x1b4] ss:$8 sps:$4 sm:$0xff]  }
  0x8e   :  { %1280 = vmatprep.subr.bf16.mxu0 %v8755_v29  ;;  %v403_v29 = vpack.c.bf16 %v219_v23, %v211_v22  ;;  %v467_v23 = vpack.c.bf16 %v347_v21, %v339_v20 }
  0x91   :  { %1281 = vmatpush1.bf16.msra.mxu0 %v8757_v30  ;;  %v210_v30 = vld [vmem:[#allocation3 + $0x300] sm:$0xff] }
  0x92   :  { %1282 = vmatprep.subr.bf16.mxu0 %v8758_v31  ;;  %v218_v31 = vld [vmem:[#allocation3 + $0x340] sm:$0xff] }
  0x95   :  { %1283 = vmatpush1.bf16.msra.mxu0 %v8760_v32  ;;  %v227_v32 = vld [vmem:[#allocation3 + $0x388] sm:$0xff] }
  0x96   :  { %1284 = vmatprep.subr.bf16.mxu0 %v8761_v33  ;;  %v235_v33 = vld [vmem:[#allocation3 + $0x3c8] sm:$0xff] }
  0x97   :  { %v411_v39 = vpack.c.bf16 %v235_v33, %v227_v32  ;;  %v133_v32 = vld [vmem:[#allocation3 + $0x98] sm:$0xff] }
  0x98   :  { %v141_v33 = vld [vmem:[#allocation3 + $0xd8] sm:$0xff] }
  0x99   :  { %1285 = vmatpush1.bf16.msra.mxu0 %v8763_v34  ;;  %v8797_v34 = vld [vmem:[#allocation6 + $0x1b0] ss:$8 sps:$4 sm:$0xff]  }
  0x9a   :  { %1437 = vmatprep.subr.bf16.mxu0 %v8766_v37  ;;  %v402_v37 = vpack.c.bf16 %v218_v31, %v210_v30  ;;  %v116_v30 = vld [vmem:[#allocation3 + $0x10] sm:$0xff] }
  0x9b   :  { %v124_v31 = vld [vmem:[#allocation3 + $0x50] sm:$0xff] }
  0x9c   :  { %1287 = vmatmul.mubr.bf16.vlgmr.msra.gmra.mrb[0].mxu0 %v354_v40  ;;  %v226_v40 = vld [vmem:[#allocation3 + $0x380] sm:$0xff] }
  0x9d   :  { %1438 = vmatpush1.bf16.msra.mxu0 %v8764_v41  ;;  %1296 = vmatprep.mubr.bf16.mxu0 %v363_v42  ;;  %v234_v41 = vld [vmem:[#allocation3 + $0x3c0] sm:$0xff]  ;;  %v243_v42 = vld [vmem:[#allocation3 + $0x408] sm:$0xff] }
  0x9e   :  { %1439 = vmatprep.subr.bf16.mxu0 %v8769_v43  ;;  %v251_v43 = vld [vmem:[#allocation3 + $0x448] sm:$0xff]  ;;  %v410_v47 = vpack.c.bf16 %v234_v41, %v226_v40  ;;  %v8815_v40 = vld [vmem:[#allocation6 + $0x210] ss:$8 sps:$4 sm:$0xff]  }
  0x9f   :  { %v149_v41 = vld [vmem:[#allocation3 + $0x118] sm:$0xff] }
  0xa1   :  { %1440 = vmatpush1.bf16.msra.mxu0 %v8767_v46  ;;  %v8806_v46 = vld [vmem:[#allocation6 + $0x1e0] ss:$8 sps:$4 sm:$0xff]  }
  0xa2   :  { %1441 = vmatprep.subr.bf16.mxu0 %v8772_v49  ;;  %v419_v49 = vpack.c.bf16 %v251_v43, %v243_v42  ;;  %v157_v42 = vld [vmem:[#allocation3 + $0x158] sm:$0xff]  ;;  %v8820_v43 = vld [vmem:[#allocation6 + $0x224] ss:$8 sps:$4 sm:$0xff]  }
  0xa4   :  { %1297 = vmatmul.mubr.bf16.gmra.mrb[4].mxu0 %v362_v50  ;;  %v242_v50 = vld [vmem:[#allocation3 + $0x400] sm:$0xff] }
  0xa5   :  { %1306 = vmatprep.mubr.bf16.mxu0 %v371_v53  ;;  %1442 = vmatpush1.bf16.msra.mxu0 %v8770_v51  ;;  %v250_v51 = vld [vmem:[#allocation3 + $0x440] sm:$0xff]  ;;  %v267_v53 = vld [vmem:[#allocation3 + $0x4c8] sm:$0xff] }
  0xa6   :  { %1443 = vmatprep.subr.bf16.mxu0 %v8775_v52  ;;  %v259_v52 = vld [vmem:[#allocation3 + $0x488] sm:$0xff]  ;;  %v418_v56 = vpack.c.bf16 %v250_v51, %v242_v50  ;;  %v8821_v50 = vld [vmem:[#allocation6 + $0x230] ss:$8 sps:$4 sm:$0xff]  }
  0xa7   :  { %v427_v57 = vpack.c.bf16 %v267_v53, %v259_v52  ;;  %v165_v51 = vld [vmem:[#allocation3 + $0x198] sm:$0xff]  ;;  %v8826_v53 = vld [vmem:[#allocation6 + $0x244] ss:$8 sps:$4 sm:$0xff]  }
  0xa8   :  { %v173_v52 = vld [vmem:[#allocation3 + $0x1d8] sm:$0xff] }
  0xa9   :  { %1444 = vmatpush1.bf16.msra.mxu0 %v8773_v58  ;;  %v258_v58 = vld [vmem:[#allocation3 + $0x480] sm:$0xff] }
  0xaa   :  { %1445 = vmatprep.subr.bf16.mxu0 %v8778_v59  ;;  %v266_v59 = vld [vmem:[#allocation3 + $0x4c0] sm:$0xff] }
  0xac   :  { %1307 = vmatmul.mubr.bf16.gmra.mrb[8].mxu0 %v370_v61  ;;  %v283_v61 = vld [vmem:[#allocation3 + $0x548] sm:$0xff] }
  0xad   :  { %1316 = vmatprep.mubr.bf16.mxu0 %v379_v63  ;;  %1446 = vmatpush1.bf16.msra.mxu0 %v8776_v60  ;;  %v275_v60 = vld [vmem:[#allocation3 + $0x508] sm:$0xff] }
  0xae   :  { %1447 = vmatprep.subr.bf16.mxu0 %v8781_v62  ;;  %v426_v62 = vpack.c.bf16 %v266_v59, %v258_v58  ;;  %v435_v63 = vpack.c.bf16 %v283_v61, %v275_v60  ;;  %v164_v58 = vld [vmem:[#allocation3 + $0x190] sm:$0xff]  ;;  %v181_v61 = vld [vmem:[#allocation3 + $0x218] sm:$0xff] }
  0xaf   :  { %v172_v59 = vld [vmem:[#allocation3 + $0x1d0] sm:$0xff] }
  0xb0   :  { %v8827_v60 = vld [vmem:[#allocation6 + $0x250] ss:$8 sps:$4 sm:$0xff]  }
  0xb1   :  { %1448 = vmatpush1.bf16.msra.mxu0 %v8779_v4  ;;  %v434_v4 = vpack.c.bf16 %v282_v1, %v274_v0  ;;  %v380_v0 = vpack.c.bf16 %v172_v59, %v164_v58  ;;  %v276_v58 = vld [vmem:[#allocation3 + $0x510] sm:$0xff] }
  0xb2   :  { %1449 = vmatprep.subr.bf16.mxu0 %v8784_v5  ;;  %v443_v5 = vpack.c.bf16 %v299_v3, %v291_v2  ;;  %v8830_v2 = vld [vmem:[#allocation6 + $0x260] ss:$8 sps:$4 sm:$0xff]   ;;  %v8835_v3 = vld [vmem:[#allocation6 + $0x274] ss:$8 sps:$4 sm:$0xff]  }
  0xb3   :  { %v284_v59 = vld [vmem:[#allocation3 + $0x550] sm:$0xff] }
  0xb4   :  { %1317 = vmatmul.mubr.bf16.gmra.mrb[12].mxu0 %v378_v7  ;;  %v298_v7 = vld [vmem:[#allocation3 + $0x5c0] sm:$0xff] }
  0xb5   :  { %1326 = vmatprep.mubr.bf16.mxu0 %v387_v9  ;;  %1450 = vmatpush1.bf16.msra.mxu0 %v8782_v6  ;;  %v290_v6 = vld [vmem:[#allocation3 + $0x580] sm:$0xff]  ;;  %v315_v9 = vld [vmem:[#allocation3 + $0x648] sm:$0xff] }
  0xb6   :  { %1451 = vmatprep.subr.bf16.mxu0 %v8787_v8  ;;  %v307_v8 = vld [vmem:[#allocation3 + $0x608] sm:$0xff]  ;;  %v442_v10 = vpack.c.bf16 %v298_v7, %v290_v6  ;;  %v8833_v6 = vld [vmem:[#allocation6 + $0x270] ss:$8 sps:$4 sm:$0xff]  }
  0xb7   :  { %v451_v11 = vpack.c.bf16 %v315_v9, %v307_v8  ;;  %v197_v7 = vld [vmem:[#allocation3 + $0x298] sm:$0xff]  ;;  %v8838_v9 = vld [vmem:[#allocation6 + $0x284] ss:$8 sps:$4 sm:$0xff]  }
  0xb8   :  { %v205_v8 = vld [vmem:[#allocation3 + $0x2d8] sm:$0xff] }
  0xb9   :  { %1452 = vmatpush1.bf16.msra.mxu0 %v8785_v14  ;;  %v323_v14 = vld [vmem:[#allocation3 + $0x688] sm:$0xff] }
  0xba   :  { %1453 = vmatprep.subr.bf16.mxu0 %v8790_v15  ;;  %v331_v15 = vld [vmem:[#allocation3 + $0x6c8] sm:$0xff] }
  0xbc   :  { %1327 = vmatmul.mubr.bf16.gmra.mrb[16].mxu0 %v386_v17  ;;  %v459_v17 = vpack.c.bf16 %v331_v15, %v323_v14  ;;  %v196_v14 = vld [vmem:[#allocation3 + $0x290] sm:$0xff] }
  0xbd   :  { %1336 = vmatprep.mubr.bf16.mxu0 %v395_v19  ;;  %1454 = vmatpush1.bf16.msra.mxu0 %v8788_v16  ;;  %v450_v16 = vpack.c.bf16 %v314_v13, %v306_v12  ;;  %v330_v19 = vld [vmem:[#allocation3 + $0x6c0] sm:$0xff]  ;;  %v8841_v13 = vld [vmem:[#allocation6 + $0x294] ss:$8 sps:$4 sm:$0xff]  }
  0xbe   :  { %1455 = vmatprep.subr.bf16.mxu0 %v8793_v18  ;;  %v322_v18 = vld [vmem:[#allocation3 + $0x680] sm:$0xff]  ;;  %v204_v15 = vld [vmem:[#allocation3 + $0x2d0] sm:$0xff] }
  0xbf   :  { %v458_v22 = vpack.c.bf16 %v330_v19, %v322_v18  ;;  %v8836_v12 = vld [vmem:[#allocation6 + $0x280] ss:$8 sps:$4 sm:$0xff]   ;;  %v221_v18 = vld [vmem:[#allocation3 + $0x358] sm:$0xff]  ;;  %v8844_v19 = vld [vmem:[#allocation6 + $0x2a4] ss:$8 sps:$4 sm:$0xff]   ;;  %v396_v20 = vpack.c.bf16 %v204_v15, %v196_v14 }
  0xc0   :  { %v341_v14 = vld [vmem:[#allocation3 + $0x718] sm:$0xff] }
  0xc1   :  { %1456 = vmatpush1.bf16.msra.mxu0 %v8791_v24  ;;  %v338_v24 = vld [vmem:[#allocation3 + $0x700] sm:$0xff]  ;;  %v349_v15 = vld [vmem:[#allocation3 + $0x758] sm:$0xff] }
  0xc2   :  { %1457 = vmatprep.subr.bf16.mxu0 %v8796_v25  ;;  %v346_v25 = vld [vmem:[#allocation3 + $0x740] sm:$0xff] }
  0xc4   :  { %1337 = vmatmul.mubr.bf16.gmra.mrb[20].mxu0 %v394_v27  ;;  %v125_v27 = vld [vmem:[#allocation3 + $0x58] sm:$0xff] }
  0xc5   :  { %1346 = vmatprep.mubr.bf16.mxu0 %v403_v29  ;;  %1458 = vmatpush1.bf16.msra.mxu0 %v8794_v26  ;;  %v117_v26 = vld [vmem:[#allocation3 + $0x18] sm:$0xff] }
  0xc6   :  { %1459 = vmatprep.subr.bf16.mxu0 %v8799_v28  ;;  %v466_v28 = vpack.c.bf16 %v346_v25, %v338_v24  ;;  %v357_v29 = vpack.c.bf16 %v125_v27, %v117_v26  ;;  %v212_v24 = vld [vmem:[#allocation3 + $0x310] sm:$0xff]  ;;  %v229_v27 = vld [vmem:[#allocation3 + $0x398] sm:$0xff] }
  0xc7   :  { %v220_v25 = vld [vmem:[#allocation3 + $0x350] sm:$0xff] }
  0xc8   :  { %v8845_v26 = vld [vmem:[#allocation6 + $0x2b0] ss:$8 sps:$4 sm:$0xff]  }
  0xc9   :  { %1460 = vmatpush1.bf16.msra.mxu0 %v8797_v34  ;;  %v356_v34 = vpack.c.bf16 %v124_v31, %v116_v30  ;;  %v404_v30 = vpack.c.bf16 %v220_v25, %v212_v24  ;;  %v118_v24 = vld [vmem:[#allocation3 + $0x20] sm:$0xff] }
  0xca   :  { %1461 = vmatprep.subr.bf16.mxu0 %v8802_v35  ;;  %v8812_v35 = vld [vmem:[#allocation6 + $0x200] ss:$8 sps:$4 sm:$0xff]  }
  0xcb   :  { %v126_v25 = vld [vmem:[#allocation3 + $0x60] sm:$0xff] }
  0xcc   :  { %1347 = vmatmul.mubr.bf16.gmra.mrb[24].mxu0 %v402_v37  ;;  %v8817_v37 = vld [vmem:[#allocation6 + $0x214] ss:$8 sps:$4 sm:$0xff]  }
  0xcd   :  { %1356 = vmatprep.mubr.bf16.mxu0 %v411_v39  ;;  %1462 = vmatpush1.bf16.msra.mxu0 %v8800_v36  ;;  %v365_v36 = vpack.c.bf16 %v141_v33, %v133_v32  ;;  %v140_v39 = vld [vmem:[#allocation3 + $0xd0] sm:$0xff]  ;;  %v8848_v32 = vld [vmem:[#allocation6 + $0x2c0] ss:$8 sps:$4 sm:$0xff]  }
  0xce   :  { %1463 = vmatprep.subr.bf16.mxu0 %v8805_v38  ;;  %v132_v38 = vld [vmem:[#allocation3 + $0x90] sm:$0xff] }
  0xcf   :  { %v8853_v33 = vld [vmem:[#allocation6 + $0x2d4] ss:$8 sps:$4 sm:$0xff]  }
  0xd1   :  { %1464 = vmatpush1.bf16.msra.mxu0 %v8803_v44  ;;  %v364_v44 = vpack.c.bf16 %v140_v39, %v132_v38  ;;  %v253_v38 = vld [vmem:[#allocation3 + $0x458] sm:$0xff]  ;;  %v8856_v39 = vld [vmem:[#allocation6 + $0x2e4] ss:$8 sps:$4 sm:$0xff]  }
  0xd2   :  { %1465 = vmatprep.subr.bf16.mxu0 %v8808_v45  ;;  %v373_v45 = vpack.c.bf16 %v157_v42, %v149_v41  ;;  %v8854_v42 = vld [vmem:[#allocation6 + $0x2e0] ss:$8 sps:$4 sm:$0xff]  }
  0xd4   :  { %1357 = vmatmul.mubr.bf16.gmra.mrb[28].mxu0 %v410_v47  ;;  %v8823_v47 = vld [vmem:[#allocation6 + $0x234] ss:$8 sps:$4 sm:$0xff]  }
  0xd5   :  { %1366 = vmatprep.mubr.bf16.mxu0 %v419_v49  ;;  %1466 = vmatpush1.bf16.msra.mxu0 %v8806_v46  ;;  %v8818_v46 = vld [vmem:[#allocation6 + $0x220] ss:$8 sps:$4 sm:$0xff]   ;;  %v156_v49 = vld [vmem:[#allocation3 + $0x150] sm:$0xff] }
  0xd6   :  { %1467 = vmatprep.subr.bf16.mxu0 %v8811_v48  ;;  %v148_v48 = vld [vmem:[#allocation3 + $0x110] sm:$0xff] }
  0xd9   :  { %1468 = vmatpush1.bf16.msra.mxu0 %v8809_v54  ;;  %v372_v54 = vpack.c.bf16 %v156_v49, %v148_v48  ;;  %v269_v48 = vld [vmem:[#allocation3 + $0x4d8] sm:$0xff]  ;;  %v8862_v49 = vld [vmem:[#allocation6 + $0x304] ss:$8 sps:$4 sm:$0xff]  }
  0xda   :  { %1620 = vmatprep.subr.bf16.mxu0 %v8814_v55  ;;  %v381_v55 = vpack.c.bf16 %v173_v52, %v165_v51  ;;  %v260_v52 = vld [vmem:[#allocation3 + $0x490] sm:$0xff] }
  0xdc   :  { %1367 = vmatmul.mubr.bf16.gmra.mrb[32].mxu0 %v418_v56  ;;  %v8824_v56 = vld [vmem:[#allocation6 + $0x240] ss:$8 sps:$4 sm:$0xff]  }
  0xdd   :  { %1376 = vmatprep.mubr.bf16.mxu0 %v427_v57  ;;  %v8829_v57 = vld [vmem:[#allocation6 + $0x254] ss:$8 sps:$4 sm:$0xff]  }
  0xe4   :  { %1377 = vmatmul.mubr.bf16.gmra.mrb[36].mxu0 %v426_v62  ;;  %v189_v62 = vld [vmem:[#allocation3 + $0x258] sm:$0xff] }
  0xe5   :  { %1386 = vmatprep.mubr.bf16.mxu0 %v435_v63  ;;  %v8832_v63 = vld [vmem:[#allocation6 + $0x264] ss:$8 sps:$4 sm:$0xff]   ;;  %v389_v1 = vpack.c.bf16 %v189_v62, %v181_v61  ;;  %v301_v61 = vld [vmem:[#allocation3 + $0x5d8] sm:$0xff]  ;;  %v436_v62 = vpack.c.bf16 %v284_v59, %v276_v58 }
  0xec   :  { %1387 = vmatmul.mubr.bf16.gmra.mrb[40].mxu0 %v434_v4  ;;  %v180_v4 = vld [vmem:[#allocation3 + $0x210] sm:$0xff] }
  0xed   :  { %1396 = vmatprep.mubr.bf16.mxu0 %v443_v5  ;;  %v188_v5 = vld [vmem:[#allocation3 + $0x250] sm:$0xff] }
  0xf4   :  { %1397 = vmatmul.mubr.bf16.gmra.mrb[44].mxu0 %v442_v10  ;;  %v388_v10 = vpack.c.bf16 %v188_v5, %v180_v4 }
  0xf5   :  { %1406 = vmatprep.mubr.bf16.mxu0 %v451_v11  ;;  %v397_v11 = vpack.c.bf16 %v205_v8, %v197_v7  ;;  %v316_v7 = vld [vmem:[#allocation3 + $0x650] sm:$0xff]  ;;  %v325_v8 = vld [vmem:[#allocation3 + $0x698] sm:$0xff] }
  0xfc   :  { %1407 = vmatmul.mubr.bf16.gmra.mrb[48].mxu0 %v450_v16  ;;  %v8839_v16 = vld [vmem:[#allocation6 + $0x290] ss:$8 sps:$4 sm:$0xff]  }
  0xfd   :  { %1416 = vmatprep.mubr.bf16.mxu0 %v459_v17  ;;  %v213_v17 = vld [vmem:[#allocation3 + $0x318] sm:$0xff] }
  0xfe   :  { %v405_v21 = vpack.c.bf16 %v221_v18, %v213_v17  ;;  %v469_v17 = vpack.c.bf16 %v349_v15, %v341_v14  ;;  %v340_v18 = vld [vmem:[#allocation3 + $0x710] sm:$0xff] }
 0x104   :  { %1417 = vmatmul.mubr.bf16.gmra.mrb[52].mxu0 %v458_v22  ;;  %v8842_v22 = vld [vmem:[#allocation6 + $0x2a0] ss:$8 sps:$4 sm:$0xff]  }
 0x105   :  { %1426 = vmatprep.mubr.bf16.mxu0 %v467_v23  ;;  %v8847_v23 = vld [vmem:[#allocation6 + $0x2b4] ss:$8 sps:$4 sm:$0xff]  }
 0x10c   :  { %1427 = vmatmul.mubr.bf16.gmra.mrb[56].mxu0 %v466_v28  ;;  %v237_v28 = vld [vmem:[#allocation3 + $0x3d8] sm:$0xff] }
 0x10d   :  { %1469 = vmatprep.mubr.bf16.mxu0 %v357_v29  ;;  %v8850_v29 = vld [vmem:[#allocation6 + $0x2c4] ss:$8 sps:$4 sm:$0xff]   ;;  %v413_v31 = vpack.c.bf16 %v237_v28, %v229_v27  ;;  %v358_v28 = vpack.c.bf16 %v126_v25, %v118_v24 }
 0x10e   :  { %v143_v27 = vld [vmem:[#allocation3 + $0xe8] sm:$0xff] }
 0x114   :  { %1470 = vmatmul.mubr.bf16.vlgmr.msra.gmra.mrb[0].mxu0 %v356_v34  ;;  %v228_v34 = vld [vmem:[#allocation3 + $0x390] sm:$0xff] }
 0x115   :  { %1621 = vmatpush1.bf16.msra.mxu0 %v8812_v35  ;;  %1479 = vmatprep.mubr.bf16.mxu0 %v365_v36  ;;  %v236_v35 = vld [vmem:[#allocation3 + $0x3d0] sm:$0xff] }
 0x116   :  { %1622 = vmatprep.subr.bf16.mxu0 %v8817_v37  ;;  %v8851_v36 = vld [vmem:[#allocation6 + $0x2d0] ss:$8 sps:$4 sm:$0xff]  }
 0x117   :  { %v245_v37 = vld [vmem:[#allocation3 + $0x418] sm:$0xff] }
 0x118   :  { %v421_v41 = vpack.c.bf16 %v253_v38, %v245_v37  ;;  %v8868_v37 = vld [vmem:[#allocation6 + $0x324] ss:$8 sps:$4 sm:$0xff]  }
 0x119   :  { %1623 = vmatpush1.bf16.msra.mxu0 %v8815_v40  ;;  %v412_v40 = vpack.c.bf16 %v236_v35, %v228_v34  ;;  %v8863_v34 = vld [vmem:[#allocation6 + $0x310] ss:$8 sps:$4 sm:$0xff]   ;;  %v151_v35 = vld [vmem:[#allocation3 + $0x128] sm:$0xff] }
 0x11a   :  { %1624 = vmatprep.subr.bf16.mxu0 %v8820_v43  ;;  %v8859_v43 = vld [vmem:[#allocation6 + $0x2f4] ss:$8 sps:$4 sm:$0xff]  }
 0x11c   :  { %1480 = vmatmul.mubr.bf16.gmra.mrb[4].mxu0 %v364_v44  ;;  %v244_v44 = vld [vmem:[#allocation3 + $0x410] sm:$0xff] }
 0x11d   :  { %1489 = vmatprep.mubr.bf16.mxu0 %v373_v45  ;;  %1625 = vmatpush1.bf16.msra.mxu0 %v8818_v46  ;;  %v252_v45 = vld [vmem:[#allocation3 + $0x450] sm:$0xff] }
 0x11e   :  { %1626 = vmatprep.subr.bf16.mxu0 %v8823_v47  ;;  %v8857_v46 = vld [vmem:[#allocation6 + $0x2f0] ss:$8 sps:$4 sm:$0xff]  }
 0x11f   :  { %v261_v47 = vld [vmem:[#allocation3 + $0x498] sm:$0xff] }
 0x120   :  { %v429_v51 = vpack.c.bf16 %v269_v48, %v261_v47  ;;  %v8874_v47 = vld [vmem:[#allocation6 + $0x344] ss:$8 sps:$4 sm:$0xff]  }
 0x121   :  { %1627 = vmatpush1.bf16.msra.mxu0 %v8821_v50  ;;  %v420_v50 = vpack.c.bf16 %v252_v45, %v244_v44  ;;  %v8869_v44 = vld [vmem:[#allocation6 + $0x330] ss:$8 sps:$4 sm:$0xff]   ;;  %v167_v45 = vld [vmem:[#allocation3 + $0x1a8] sm:$0xff] }
 0x122   :  { %1628 = vmatprep.subr.bf16.mxu0 %v8826_v53  ;;  %v268_v53 = vld [vmem:[#allocation3 + $0x4d0] sm:$0xff] }
 0x124   :  { %1490 = vmatmul.mubr.bf16.gmra.mrb[8].mxu0 %v372_v54  ;;  %v277_v54 = vld [vmem:[#allocation3 + $0x518] sm:$0xff] }
 0x125   :  { %1499 = vmatprep.mubr.bf16.mxu0 %v381_v55  ;;  %1629 = vmatpush1.bf16.msra.mxu0 %v8824_v56  ;;  %v285_v55 = vld [vmem:[#allocation3 + $0x558] sm:$0xff]  ;;  %v428_v56 = vpack.c.bf16 %v268_v53, %v260_v52  ;;  %v166_v52 = vld [vmem:[#allocation3 + $0x1a0] sm:$0xff] }
 0x126   :  { %1630 = vmatprep.subr.bf16.mxu0 %v8829_v57  ;;  %v437_v57 = vpack.c.bf16 %v285_v55, %v277_v54  ;;  %v174_v53 = vld [vmem:[#allocation3 + $0x1e0] sm:$0xff]  ;;  %v8875_v54 = vld [vmem:[#allocation6 + $0x350] ss:$8 sps:$4 sm:$0xff]   ;;  %v183_v55 = vld [vmem:[#allocation3 + $0x228] sm:$0xff] }
 0x127   :  { %v382_v58 = vpack.c.bf16 %v174_v53, %v166_v52  ;;  %v286_v52 = vld [vmem:[#allocation3 + $0x560] sm:$0xff]  ;;  %v295_v53 = vld [vmem:[#allocation3 + $0x5a8] sm:$0xff] }
 0x129   :  { %1631 = vmatpush1.bf16.msra.mxu0 %v8827_v60  ;;  %v293_v60 = vld [vmem:[#allocation3 + $0x598] sm:$0xff] }
 0x12a   :  { %1632 = vmatprep.subr.bf16.mxu0 %v8832_v63  ;;  %v445_v63 = vpack.c.bf16 %v301_v61, %v293_v60  ;;  %v8878_v60 = vld [vmem:[#allocation6 + $0x360] ss:$8 sps:$4 sm:$0xff]   ;;  %v8883_v61 = vld [vmem:[#allocation6 + $0x374] ss:$8 sps:$4 sm:$0xff]  }
 0x12c   :  { %1500 = vmatmul.mubr.bf16.gmra.mrb[12].mxu0 %v380_v0  ;;  %v292_v0 = vld [vmem:[#allocation3 + $0x590] sm:$0xff] }
 0x12d   :  { %1509 = vmatprep.mubr.bf16.mxu0 %v389_v1  ;;  %1633 = vmatpush1.bf16.msra.mxu0 %v8830_v2  ;;  %v300_v1 = vld [vmem:[#allocation3 + $0x5d0] sm:$0xff]  ;;  %v309_v2 = vld [vmem:[#allocation3 + $0x618] sm:$0xff] }
 0x12e   :  { %1634 = vmatprep.subr.bf16.mxu0 %v8835_v3  ;;  %v317_v3 = vld [vmem:[#allocation3 + $0x658] sm:$0xff]  ;;  %v444_v4 = vpack.c.bf16 %v300_v1, %v292_v0  ;;  %v199_v1 = vld [vmem:[#allocation3 + $0x2a8] sm:$0xff] }
 0x12f   :  { %v453_v5 = vpack.c.bf16 %v317_v3, %v309_v2  ;;  %v8881_v0 = vld [vmem:[#allocation6 + $0x370] ss:$8 sps:$4 sm:$0xff]   ;;  %v207_v2 = vld [vmem:[#allocation3 + $0x2e8] sm:$0xff] }
 0x130   :  { %v8886_v3 = vld [vmem:[#allocation6 + $0x384] ss:$8 sps:$4 sm:$0xff]  }
 0x131   :  { %1635 = vmatpush1.bf16.msra.mxu0 %v8833_v6  ;;  %v308_v6 = vld [vmem:[#allocation3 + $0x610] sm:$0xff] }
 0x132   :  { %1636 = vmatprep.subr.bf16.mxu0 %v8838_v9  ;;  %v333_v9 = vld [vmem:[#allocation3 + $0x6d8] sm:$0xff] }
 0x134   :  { %1510 = vmatmul.mubr.bf16.gmra.mrb[16].mxu0 %v388_v10  ;;  %v452_v10 = vpack.c.bf16 %v316_v7, %v308_v6  ;;  %v8884_v6 = vld [vmem:[#allocation6 + $0x380] ss:$8 sps:$4 sm:$0xff]   ;;  %v8889_v7 = vld [vmem:[#allocation6 + $0x394] ss:$8 sps:$4 sm:$0xff]  }
 0x135   :  { %1519 = vmatprep.mubr.bf16.mxu0 %v397_v11  ;;  %1637 = vmatpush1.bf16.msra.mxu0 %v8836_v12  ;;  %v461_v11 = vpack.c.bf16 %v333_v9, %v325_v8  ;;  %v324_v12 = vld [vmem:[#allocation3 + $0x690] sm:$0xff]  ;;  %v198_v8 = vld [vmem:[#allocation3 + $0x2a0] sm:$0xff] }
 0x136   :  { %1638 = vmatprep.subr.bf16.mxu0 %v8841_v13  ;;  %v332_v13 = vld [vmem:[#allocation3 + $0x6d0] sm:$0xff]  ;;  %v206_v9 = vld [vmem:[#allocation3 + $0x2e0] sm:$0xff] }
 0x137   :  { %v398_v14 = vpack.c.bf16 %v206_v9, %v198_v8  ;;  %v351_v8 = vld [vmem:[#allocation3 + $0x768] sm:$0xff] }
 0x139   :  { %1639 = vmatpush1.bf16.msra.mxu0 %v8839_v16  ;;  %v460_v16 = vpack.c.bf16 %v332_v13, %v324_v12  ;;  %v223_v12 = vld [vmem:[#allocation3 + $0x368] sm:$0xff] }
 0x13a   :  { %1640 = vmatprep.subr.bf16.mxu0 %v8844_v19  ;;  %v348_v19 = vld [vmem:[#allocation3 + $0x750] sm:$0xff]  ;;  %v8892_v13 = vld [vmem:[#allocation6 + $0x3a4] ss:$8 sps:$4 sm:$0xff]  }
 0x13c   :  { %1520 = vmatmul.mubr.bf16.gmra.mrb[20].mxu0 %v396_v20  ;;  %v119_v20 = vld [vmem:[#allocation3 + $0x28] sm:$0xff] }
 0x13d   :  { %1529 = vmatprep.mubr.bf16.mxu0 %v405_v21  ;;  %1641 = vmatpush1.bf16.msra.mxu0 %v8842_v22  ;;  %v127_v21 = vld [vmem:[#allocation3 + $0x68] sm:$0xff]  ;;  %v468_v22 = vpack.c.bf16 %v348_v19, %v340_v18  ;;  %v214_v18 = vld [vmem:[#allocation3 + $0x320] sm:$0xff] }
 0x13e   :  { %1642 = vmatprep.subr.bf16.mxu0 %v8847_v23  ;;  %v359_v23 = vpack.c.bf16 %v127_v21, %v119_v20  ;;  %v222_v19 = vld [vmem:[#allocation3 + $0x360] sm:$0xff]  ;;  %v8893_v20 = vld [vmem:[#allocation6 + $0x3b0] ss:$8 sps:$4 sm:$0xff]   ;;  %v231_v21 = vld [vmem:[#allocation3 + $0x3a8] sm:$0xff] }
 0x13f   :  { %v406_v24 = vpack.c.bf16 %v222_v19, %v214_v18  ;;  %v8913_v18 = vld [vmem:[#allocation8 + $0x10] ss:$8 sps:$4 sm:$0xff]  }
 0x141   :  { %1643 = vmatpush1.bf16.msra.mxu0 %v8845_v26  ;;  %v135_v26 = vld [vmem:[#allocation3 + $0xa8] sm:$0xff] }
 0x142   :  { %1644 = vmatprep.subr.bf16.mxu0 %v8850_v29  ;;  %v8860_v29 = vld [vmem:[#allocation6 + $0x300] ss:$8 sps:$4 sm:$0xff]  }
 0x144   :  { %1530 = vmatmul.mubr.bf16.gmra.mrb[24].mxu0 %v404_v30  ;;  %v367_v30 = vpack.c.bf16 %v143_v27, %v135_v26  ;;  %v8896_v26 = vld [vmem:[#allocation6 + $0x3c0] ss:$8 sps:$4 sm:$0xff]   ;;  %v8901_v27 = vld [vmem:[#allocation6 + $0x3d4] ss:$8 sps:$4 sm:$0xff]  }
 0x145   :  { %1539 = vmatprep.mubr.bf16.mxu0 %v413_v31  ;;  %1645 = vmatpush1.bf16.msra.mxu0 %v8848_v32  ;;  %v8865_v31 = vld [vmem:[#allocation6 + $0x314] ss:$8 sps:$4 sm:$0xff]   ;;  %v134_v32 = vld [vmem:[#allocation3 + $0xa0] sm:$0xff] }
 0x146   :  { %1646 = vmatprep.subr.bf16.mxu0 %v8853_v33  ;;  %v142_v33 = vld [vmem:[#allocation3 + $0xe0] sm:$0xff] }
 0x147   :  { %v366_v38 = vpack.c.bf16 %v142_v33, %v134_v32  ;;  %v255_v32 = vld [vmem:[#allocation3 + $0x468] sm:$0xff] }
 0x148   :  { %v8904_v33 = vld [vmem:[#allocation6 + $0x3e4] ss:$8 sps:$4 sm:$0xff]  }
 0x149   :  { %1647 = vmatpush1.bf16.msra.mxu0 %v8851_v36  ;;  %v159_v36 = vld [vmem:[#allocation3 + $0x168] sm:$0xff] }
 0x14a   :  { %1648 = vmatprep.subr.bf16.mxu0 %v8856_v39  ;;  %v375_v39 = vpack.c.bf16 %v159_v36, %v151_v35  ;;  %v8902_v36 = vld [vmem:[#allocation6 + $0x3e0] ss:$8 sps:$4 sm:$0xff]  }
 0x14c   :  { %1540 = vmatmul.mubr.bf16.gmra.mrb[28].mxu0 %v412_v40  ;;  %v8866_v40 = vld [vmem:[#allocation6 + $0x320] ss:$8 sps:$4 sm:$0xff]  }
 0x14d   :  { %1549 = vmatprep.mubr.bf16.mxu0 %v421_v41  ;;  %1649 = vmatpush1.bf16.msra.mxu0 %v8854_v42  ;;  %v8871_v41 = vld [vmem:[#allocation6 + $0x334] ss:$8 sps:$4 sm:$0xff]   ;;  %v150_v42 = vld [vmem:[#allocation3 + $0x120] sm:$0xff] }
 0x14e   :  { %1650 = vmatprep.subr.bf16.mxu0 %v8859_v43  ;;  %v158_v43 = vld [vmem:[#allocation3 + $0x160] sm:$0xff] }
 0x14f   :  { %v374_v48 = vpack.c.bf16 %v158_v43, %v150_v42  ;;  %v271_v42 = vld [vmem:[#allocation3 + $0x4e8] sm:$0xff] }
 0x151   :  { %1651 = vmatpush1.bf16.msra.mxu0 %v8857_v46  ;;  %v175_v46 = vld [vmem:[#allocation3 + $0x1e8] sm:$0xff] }
 0x152   :  { %1803 = vmatprep.subr.bf16.mxu0 %v8862_v49  ;;  %v383_v49 = vpack.c.bf16 %v175_v46, %v167_v45  ;;  %v262_v45 = vld [vmem:[#allocation3 + $0x4a0] sm:$0xff] }
 0x153   :  { %v270_v46 = vld [vmem:[#allocation3 + $0x4e0] sm:$0xff] }
 0x154   :  { %1550 = vmatmul.mubr.bf16.gmra.mrb[32].mxu0 %v420_v50  ;;  %v8872_v50 = vld [vmem:[#allocation6 + $0x340] ss:$8 sps:$4 sm:$0xff]  }
 0x155   :  { %1559 = vmatprep.mubr.bf16.mxu0 %v429_v51  ;;  %v8877_v51 = vld [vmem:[#allocation6 + $0x354] ss:$8 sps:$4 sm:$0xff]  }
 0x15c   :  { %1560 = vmatmul.mubr.bf16.gmra.mrb[36].mxu0 %v428_v56  ;;  %v191_v56 = vld [vmem:[#allocation3 + $0x268] sm:$0xff] }
 0x15d   :  { %1569 = vmatprep.mubr.bf16.mxu0 %v437_v57  ;;  %v8880_v57 = vld [vmem:[#allocation6 + $0x364] ss:$8 sps:$4 sm:$0xff]   ;;  %v391_v59 = vpack.c.bf16 %v191_v56, %v183_v55 }
 0x164   :  { %1570 = vmatmul.mubr.bf16.gmra.mrb[40].mxu0 %v436_v62  ;;  %v182_v62 = vld [vmem:[#allocation3 + $0x220] sm:$0xff] }
 0x165   :  { %1579 = vmatprep.mubr.bf16.mxu0 %v445_v63  ;;  %v190_v63 = vld [vmem:[#allocation3 + $0x260] sm:$0xff] }
 0x16c   :  { %1580 = vmatmul.mubr.bf16.gmra.mrb[44].mxu0 %v444_v4  ;;  %v390_v4 = vpack.c.bf16 %v190_v63, %v182_v62  ;;  %v310_v63 = vld [vmem:[#allocation3 + $0x620] sm:$0xff] }
 0x16d   :  { %1589 = vmatprep.mubr.bf16.mxu0 %v453_v5  ;;  %v399_v5 = vpack.c.bf16 %v207_v2, %v199_v1  ;;  %v327_v1 = vld [vmem:[#allocation3 + $0x6a8] sm:$0xff] }
 0x16e   :  { %v335_v2 = vld [vmem:[#allocation3 + $0x6e8] sm:$0xff] }
 0x174   :  { %1590 = vmatmul.mubr.bf16.gmra.mrb[48].mxu0 %v452_v10  ;;  %v8887_v10 = vld [vmem:[#allocation6 + $0x390] ss:$8 sps:$4 sm:$0xff]  }
 0x175   :  { %1599 = vmatprep.mubr.bf16.mxu0 %v461_v11  ;;  %v215_v11 = vld [vmem:[#allocation3 + $0x328] sm:$0xff] }
 0x176   :  { %v407_v15 = vpack.c.bf16 %v223_v12, %v215_v11  ;;  %v8908_v11 = vld [vmem:[#allocation8 + $0x4] ss:$8 sps:$4 sm:$0xff]   ;;  %v8910_v12 = vld [vmem:[#allocation8] ss:$8 sps:$4 sm:$0xff]  }
 0x177   :  { %2280 = vmatprep.subr.bf16.mxu1 %v8908_v11  ;;  %v208_v11 = vld [vmem:[#allocation3 + $0x2f0] sm:$0xff] }
 0x178   :  { %2281 = vmatpush1.bf16.msra.mxu1 %v8910_v12  ;;  %v217_v12 = vld [vmem:[#allocation3 + $0x338] sm:$0xff] }
 0x17c   :  { %1600 = vmatmul.mubr.bf16.gmra.mrb[52].mxu0 %v460_v16  ;;  %v8890_v16 = vld [vmem:[#allocation6 + $0x3a0] ss:$8 sps:$4 sm:$0xff]  }
 0x17d   :  { %1609 = vmatprep.mubr.bf16.mxu0 %v469_v17  ;;  %v8895_v17 = vld [vmem:[#allocation6 + $0x3b4] ss:$8 sps:$4 sm:$0xff]  }
 0x184   :  { %1610 = vmatmul.mubr.bf16.gmra.mrb[56].mxu0 %v468_v22  ;;  %v239_v22 = vld [vmem:[#allocation3 + $0x3e8] sm:$0xff] }
 0x185   :  { %1652 = vmatprep.mubr.bf16.mxu0 %v359_v23  ;;  %v8898_v23 = vld [vmem:[#allocation6 + $0x3c4] ss:$8 sps:$4 sm:$0xff]   ;;  %v415_v25 = vpack.c.bf16 %v239_v22, %v231_v21  ;;  %v8916_v22 = vld [vmem:[#allocation8 + $0x20] ss:$8 sps:$4 sm:$0xff]  }
 0x18c   :  { %1653 = vmatmul.mubr.bf16.vlgmr.msra.gmra.mrb[0].mxu0 %v358_v28  ;;  %v230_v28 = vld [vmem:[#allocation3 + $0x3a0] sm:$0xff] }
 0x18d   :  { %1804 = vmatpush1.bf16.msra.mxu0 %v8860_v29  ;;  %1662 = vmatprep.mubr.bf16.mxu0 %v367_v30  ;;  %v238_v29 = vld [vmem:[#allocation3 + $0x3e0] sm:$0xff]  ;;  %v8899_v30 = vld [vmem:[#allocation6 + $0x3d0] ss:$8 sps:$4 sm:$0xff]  }
 0x18e   :  { %1805 = vmatprep.subr.bf16.mxu0 %v8865_v31  ;;  %v247_v31 = vld [vmem:[#allocation3 + $0x428] sm:$0xff] }
 0x18f   :  { %v423_v35 = vpack.c.bf16 %v255_v32, %v247_v31  ;;  %v8922_v32 = vld [vmem:[#allocation8 + $0x40] ss:$8 sps:$4 sm:$0xff]  }
 0x191   :  { %1806 = vmatpush1.bf16.msra.mxu0 %v8863_v34  ;;  %v414_v34 = vpack.c.bf16 %v238_v29, %v230_v28  ;;  %v8919_v28 = vld [vmem:[#allocation8 + $0x30] ss:$8 sps:$4 sm:$0xff]  }
 0x192   :  { %1807 = vmatprep.subr.bf16.mxu0 %v8868_v37  ;;  %v8907_v37 = vld [vmem:[#allocation6 + $0x3f4] ss:$8 sps:$4 sm:$0xff]  }
 0x194   :  { %1663 = vmatmul.mubr.bf16.gmra.mrb[4].mxu0 %v366_v38  ;;  %v246_v38 = vld [vmem:[#allocation3 + $0x420] sm:$0xff] }
 0x195   :  { %1672 = vmatprep.mubr.bf16.mxu0 %v375_v39  ;;  %1808 = vmatpush1.bf16.msra.mxu0 %v8866_v40  ;;  %v254_v39 = vld [vmem:[#allocation3 + $0x460] sm:$0xff]  ;;  %v8905_v40 = vld [vmem:[#allocation6 + $0x3f0] ss:$8 sps:$4 sm:$0xff]  }
 0x196   :  { %1809 = vmatprep.subr.bf16.mxu0 %v8871_v41  ;;  %v263_v41 = vld [vmem:[#allocation3 + $0x4a8] sm:$0xff]  ;;  %v422_v43 = vpack.c.bf16 %v254_v39, %v246_v38  ;;  %v8925_v38 = vld [vmem:[#allocation8 + $0x50] ss:$8 sps:$4 sm:$0xff]  }
 0x199   :  { %1810 = vmatpush1.bf16.msra.mxu0 %v8869_v44  ;;  %v431_v44 = vpack.c.bf16 %v271_v42, %v263_v41  ;;  %v8928_v42 = vld [vmem:[#allocation8 + $0x60] ss:$8 sps:$4 sm:$0xff]  }
 0x19a   :  { %1811 = vmatprep.subr.bf16.mxu0 %v8874_v47  ;;  %v279_v47 = vld [vmem:[#allocation3 + $0x528] sm:$0xff] }
 0x19c   :  { %1673 = vmatmul.mubr.bf16.gmra.mrb[8].mxu0 %v374_v48  ;;  %v287_v48 = vld [vmem:[#allocation3 + $0x568] sm:$0xff] }
 0x19d   :  { %1682 = vmatprep.mubr.bf16.mxu0 %v383_v49  ;;  %1812 = vmatpush1.bf16.msra.mxu0 %v8872_v50  ;;  %v430_v49 = vpack.c.bf16 %v270_v46, %v262_v45  ;;  %v439_v50 = vpack.c.bf16 %v287_v48, %v279_v47  ;;  %v160_v45 = vld [vmem:[#allocation3 + $0x170] sm:$0xff]  ;;  %v169_v46 = vld [vmem:[#allocation3 + $0x1b8] sm:$0xff] }
 0x19e   :  { %1813 = vmatprep.subr.bf16.mxu0 %v8877_v51  ;;  %v278_v51 = vld [vmem:[#allocation3 + $0x520] sm:$0xff]  ;;  %v177_v47 = vld [vmem:[#allocation3 + $0x1f8] sm:$0xff] }
 0x19f   :  { %v438_v55 = vpack.c.bf16 %v286_v52, %v278_v51  ;;  %v8931_v48 = vld [vmem:[#allocation8 + $0x70] ss:$8 sps:$4 sm:$0xff]   ;;  %v385_v51 = vpack.c.bf16 %v177_v47, %v169_v46  ;;  %v8934_v52 = vld [vmem:[#allocation8 + $0x80] ss:$8 sps:$4 sm:$0xff]  }
 0x1a0   :  { %v296_v46 = vld [vmem:[#allocation3 + $0x5b0] sm:$0xff] }
 0x1a1   :  { %1814 = vmatpush1.bf16.msra.mxu0 %v8875_v54  ;;  %v303_v54 = vld [vmem:[#allocation3 + $0x5e8] sm:$0xff]  ;;  %v304_v47 = vld [vmem:[#allocation3 + $0x5f0] sm:$0xff] }
 0x1a2   :  { %1815 = vmatprep.subr.bf16.mxu0 %v8880_v57  ;;  %v447_v56 = vpack.c.bf16 %v303_v54, %v295_v53  ;;  %v294_v57 = vld [vmem:[#allocation3 + $0x5a0] sm:$0xff]  ;;  %v8935_v53 = vld [vmem:[#allocation8 + $0x94] ss:$8 sps:$4 sm:$0xff]  }
 0x1a3   :  { %v168_v54 = vld [vmem:[#allocation3 + $0x1b0] sm:$0xff] }
 0x1a4   :  { %1683 = vmatmul.mubr.bf16.gmra.mrb[12].mxu0 %v382_v58  ;;  %v302_v58 = vld [vmem:[#allocation3 + $0x5e0] sm:$0xff] }
 0x1a5   :  { %1692 = vmatprep.mubr.bf16.mxu0 %v391_v59  ;;  %1816 = vmatpush1.bf16.msra.mxu0 %v8878_v60  ;;  %v311_v59 = vld [vmem:[#allocation3 + $0x628] sm:$0xff] }
 0x1a6   :  { %1817 = vmatprep.subr.bf16.mxu0 %v8883_v61  ;;  %v319_v60 = vld [vmem:[#allocation3 + $0x668] sm:$0xff]  ;;  %v446_v61 = vpack.c.bf16 %v302_v58, %v294_v57  ;;  %v193_v57 = vld [vmem:[#allocation3 + $0x278] sm:$0xff] }
 0x1a7   :  { %v455_v62 = vpack.c.bf16 %v319_v60, %v311_v59  ;;  %v8937_v58 = vld [vmem:[#allocation8 + $0x90] ss:$8 sps:$4 sm:$0xff]   ;;  %v8938_v60 = vld [vmem:[#allocation8 + $0xa4] ss:$8 sps:$4 sm:$0xff]  }
 0x1a9   :  { %1818 = vmatpush1.bf16.msra.mxu0 %v8881_v0  ;;  %v318_v0 = vld [vmem:[#allocation3 + $0x660] sm:$0xff] }
 0x1aa   :  { %1819 = vmatprep.subr.bf16.mxu0 %v8886_v3  ;;  %v454_v3 = vpack.c.bf16 %v318_v0, %v310_v63  ;;  %v8941_v63 = vld [vmem:[#allocation8 + $0xb4] ss:$8 sps:$4 sm:$0xff]  }
 0x1ab   :  { %v184_v0 = vld [vmem:[#allocation3 + $0x230] sm:$0xff] }
 0x1ac   :  { %1693 = vmatmul.mubr.bf16.gmra.mrb[16].mxu0 %v390_v4  ;;  %v463_v4 = vpack.c.bf16 %v335_v2, %v327_v1  ;;  %v192_v1 = vld [vmem:[#allocation3 + $0x270] sm:$0xff]  ;;  %v201_v2 = vld [vmem:[#allocation3 + $0x2b8] sm:$0xff] }
 0x1ad   :  { %1702 = vmatprep.mubr.bf16.mxu0 %v399_v5  ;;  %1820 = vmatpush1.bf16.msra.mxu0 %v8884_v6  ;;  %v326_v5 = vld [vmem:[#allocation3 + $0x6a0] sm:$0xff] }
 0x1ae   :  { %1821 = vmatprep.subr.bf16.mxu0 %v8889_v7  ;;  %v334_v6 = vld [vmem:[#allocation3 + $0x6e0] sm:$0xff]  ;;  %v343_v7 = vld [vmem:[#allocation3 + $0x728] sm:$0xff] }
 0x1af   :  { %v462_v9 = vpack.c.bf16 %v334_v6, %v326_v5  ;;  %v392_v5 = vpack.c.bf16 %v192_v1, %v184_v0  ;;  %v8944_v6 = vld [vmem:[#allocation8 + $0xc4] ss:$8 sps:$4 sm:$0xff]   ;;  %v336_v0 = vld [vmem:[#allocation3 + $0x6f0] sm:$0xff]  ;;  %v345_v1 = vld [vmem:[#allocation3 + $0x738] sm:$0xff] }
 0x1b1   :  { %1822 = vmatpush1.bf16.msra.mxu0 %v8887_v10  ;;  %v471_v10 = vpack.c.bf16 %v351_v8, %v343_v7  ;;  %v8946_v8 = vld [vmem:[#allocation8 + $0xc0] ss:$8 sps:$4 sm:$0xff]  }
 0x1b2   :  { %1823 = vmatprep.subr.bf16.mxu0 %v8892_v13  ;;  %v8911_v13 = vld [vmem:[#allocation8 + $0x14] ss:$8 sps:$4 sm:$0xff]  }
 0x1b3   :  { %2282 = vmatprep.subr.bf16.mxu1 %v8911_v13  ;;  %v225_v13 = vld [vmem:[#allocation3 + $0x378] sm:$0xff] }
 0x1b4   :  { %1703 = vmatmul.mubr.bf16.gmra.mrb[20].mxu0 %v398_v14  ;;  %v342_v14 = vld [vmem:[#allocation3 + $0x720] sm:$0xff]  ;;  %2283 = vmatpush1.bf16.msra.mxu1 %v8913_v18  ;;  %v233_v18 = vld [vmem:[#allocation3 + $0x3b8] sm:$0xff] }
 0x1b5   :  { %1712 = vmatprep.mubr.bf16.mxu0 %v407_v15  ;;  %1824 = vmatpush1.bf16.msra.mxu0 %v8890_v16  ;;  %v350_v15 = vld [vmem:[#allocation3 + $0x760] sm:$0xff]  ;;  %v121_v16 = vld [vmem:[#allocation3 + $0x38] sm:$0xff] }
 0x1b6   :  { %1825 = vmatprep.subr.bf16.mxu0 %v8895_v17  ;;  %v129_v17 = vld [vmem:[#allocation3 + $0x78] sm:$0xff]  ;;  %v470_v19 = vpack.c.bf16 %v350_v15, %v342_v14  ;;  %v409_v15 = vpack.c.bf16 %v225_v13, %v217_v12  ;;  %v2725_v13 = vld [vmem:[#allocation9] sm:$0xff] }
 0x1b7   :  { %v361_v21 = vpack.c.bf16 %v129_v17, %v121_v16  ;;  %v216_v16 = vld [vmem:[#allocation3 + $0x330] sm:$0xff] }
 0x1b8   :  { %v224_v17 = vld [vmem:[#allocation3 + $0x370] sm:$0xff] }
 0x1b9   :  { %1826 = vmatpush1.bf16.msra.mxu0 %v8893_v20  ;;  %v8914_v20 = vld [vmem:[#allocation8 + $0x24] ss:$8 sps:$4 sm:$0xff]  }
 0x1ba   :  { %1827 = vmatprep.subr.bf16.mxu0 %v8898_v23  ;;  %2284 = vmatprep.subr.bf16.mxu1 %v8914_v20  ;;  %v8917_v23 = vld [vmem:[#allocation8 + $0x34] ss:$8 sps:$4 sm:$0xff]   ;;  %v408_v20 = vpack.c.bf16 %v224_v17, %v216_v16 }
 0x1bb   :  { %2285 = vmatpush1.bf16.msra.mxu1 %v8916_v22  ;;  %v232_v22 = vld [vmem:[#allocation3 + $0x3b0] sm:$0xff] }
 0x1bc   :  { %1713 = vmatmul.mubr.bf16.gmra.mrb[24].mxu0 %v406_v24  ;;  %v120_v24 = vld [vmem:[#allocation3 + $0x30] sm:$0xff]  ;;  %2286 = vmatprep.subr.bf16.mxu1 %v8917_v23 }
 0x1bd   :  { %1722 = vmatprep.mubr.bf16.mxu0 %v415_v25  ;;  %1828 = vmatpush1.bf16.msra.mxu0 %v8896_v26  ;;  %v128_v25 = vld [vmem:[#allocation3 + $0x70] sm:$0xff]  ;;  %v137_v26 = vld [vmem:[#allocation3 + $0xb8] sm:$0xff] }
 0x1be   :  { %1829 = vmatprep.subr.bf16.mxu0 %v8901_v27  ;;  %v145_v27 = vld [vmem:[#allocation3 + $0xf8] sm:$0xff]  ;;  %v360_v29 = vpack.c.bf16 %v128_v25, %v120_v24  ;;  %v240_v23 = vld [vmem:[#allocation3 + $0x3f0] sm:$0xff] }
 0x1bf   :  { %v369_v31 = vpack.c.bf16 %v145_v27, %v137_v26  ;;  %2287 = vmatpush1.bf16.msra.mxu1 %v8919_v28  ;;  %v249_v24 = vld [vmem:[#allocation3 + $0x438] sm:$0xff]  ;;  %v416_v26 = vpack.c.bf16 %v240_v23, %v232_v22  ;;  %v248_v28 = vld [vmem:[#allocation3 + $0x430] sm:$0xff] }
 0x1c0   :  { %v257_v25 = vld [vmem:[#allocation3 + $0x478] sm:$0xff] }
 0x1c1   :  { %1830 = vmatpush1.bf16.msra.mxu0 %v8899_v30  ;;  %v8920_v30 = vld [vmem:[#allocation8 + $0x44] ss:$8 sps:$4 sm:$0xff]   ;;  %v425_v27 = vpack.c.bf16 %v257_v25, %v249_v24 }
 0x1c2   :  { %1831 = vmatprep.subr.bf16.mxu0 %v8904_v33  ;;  %2288 = vmatprep.subr.bf16.mxu1 %v8920_v30  ;;  %v8923_v33 = vld [vmem:[#allocation8 + $0x54] ss:$8 sps:$4 sm:$0xff]  }
 0x1c3   :  { %2289 = vmatpush1.bf16.msra.mxu1 %v8922_v32  ;;  %v265_v30 = vld [vmem:[#allocation3 + $0x4b8] sm:$0xff] }
 0x1c4   :  { %1723 = vmatmul.mubr.bf16.gmra.mrb[28].mxu0 %v414_v34  ;;  %v136_v34 = vld [vmem:[#allocation3 + $0xb0] sm:$0xff]  ;;  %2290 = vmatprep.subr.bf16.mxu1 %v8923_v33 }
 0x1c5   :  { %1732 = vmatprep.mubr.bf16.mxu0 %v423_v35  ;;  %1832 = vmatpush1.bf16.msra.mxu0 %v8902_v36  ;;  %v144_v35 = vld [vmem:[#allocation3 + $0xf0] sm:$0xff]  ;;  %v153_v36 = vld [vmem:[#allocation3 + $0x138] sm:$0xff] }
 0x1c6   :  { %1833 = vmatprep.subr.bf16.mxu0 %v8907_v37  ;;  %v161_v37 = vld [vmem:[#allocation3 + $0x178] sm:$0xff]  ;;  %v368_v39 = vpack.c.bf16 %v144_v35, %v136_v34  ;;  %v264_v34 = vld [vmem:[#allocation3 + $0x4b0] sm:$0xff] }
 0x1c7   :  { %v377_v41 = vpack.c.bf16 %v161_v37, %v153_v36  ;;  %2291 = vmatpush1.bf16.msra.mxu1 %v8925_v38  ;;  %v272_v35 = vld [vmem:[#allocation3 + $0x4f0] sm:$0xff]  ;;  %v281_v36 = vld [vmem:[#allocation3 + $0x538] sm:$0xff] }
 0x1c8   :  { %v289_v37 = vld [vmem:[#allocation3 + $0x578] sm:$0xff]  ;;  %v432_v38 = vpack.c.bf16 %v272_v35, %v264_v34 }
 0x1c9   :  { %1834 = vmatpush1.bf16.msra.mxu0 %v8905_v40  ;;  %v8926_v40 = vld [vmem:[#allocation8 + $0x64] ss:$8 sps:$4 sm:$0xff]  }
 0x1ca   :  { %2292 = vmatprep.subr.bf16.mxu1 %v8926_v40  ;;  %v280_v40 = vld [vmem:[#allocation3 + $0x530] sm:$0xff] }
 0x1cb   :  { %2293 = vmatpush1.bf16.msra.mxu1 %v8928_v42  ;;  %v297_v42 = vld [vmem:[#allocation3 + $0x5b8] sm:$0xff] }
 0x1cc   :  { %1733 = vmatmul.mubr.bf16.gmra.mrb[32].mxu0 %v422_v43  ;;  %v8929_v43 = vld [vmem:[#allocation8 + $0x74] ss:$8 sps:$4 sm:$0xff]  }
 0x1cd   :  { %1742 = vmatprep.mubr.bf16.mxu0 %v431_v44  ;;  %v152_v44 = vld [vmem:[#allocation3 + $0x130] sm:$0xff]  ;;  %2294 = vmatprep.subr.bf16.mxu1 %v8929_v43  ;;  %v305_v43 = vld [vmem:[#allocation3 + $0x5f8] sm:$0xff] }
 0x1cf   :  { %2295 = vmatpush1.bf16.msra.mxu1 %v8931_v48  ;;  %v8949_v48 = vld [vmem:[#allocation8 + $0xd0] ss:$8 sps:$4 sm:$0xff]  }
 0x1d4   :  { %1743 = vmatmul.mubr.bf16.gmra.mrb[36].mxu0 %v430_v49  ;;  %v376_v49 = vpack.c.bf16 %v160_v45, %v152_v44  ;;  %v449_v45 = vpack.c.bf16 %v305_v43, %v297_v42  ;;  %v2745_v42 = vld [vmem:[#allocation9 + $0xa0] sm:$0xff] }
 0x1d5   :  { %1752 = vmatprep.mubr.bf16.mxu0 %v439_v50  ;;  %v8932_v50 = vld [vmem:[#allocation8 + $0x84] ss:$8 sps:$4 sm:$0xff]  }
 0x1d6   :  { %2296 = vmatprep.subr.bf16.mxu1 %v8932_v50  ;;  %v321_v50 = vld [vmem:[#allocation3 + $0x678] sm:$0xff] }
 0x1d7   :  { %2297 = vmatpush1.bf16.msra.mxu1 %v8934_v52  ;;  %v8950_v52 = vld [vmem:[#allocation8 + $0xe4] ss:$8 sps:$4 sm:$0xff]  }
 0x1d8   :  { %2298 = vmatprep.subr.bf16.mxu1 %v8935_v53 }
 0x1db   :  { %2299 = vmatpush1.bf16.msra.mxu1 %v8937_v58  ;;  %v8955_v58 = vld [vmem:[#allocation8 + $0xf0] ss:$8 sps:$4 sm:$0xff]  }
 0x1dc   :  { %1753 = vmatmul.mubr.bf16.gmra.mrb[40].mxu0 %v438_v55  ;;  %v176_v55 = vld [vmem:[#allocation3 + $0x1f0] sm:$0xff]  ;;  %2300 = vmatprep.subr.bf16.mxu1 %v8938_v60  ;;  %v337_v60 = vld [vmem:[#allocation3 + $0x6f8] sm:$0xff] }
 0x1dd   :  { %1762 = vmatprep.mubr.bf16.mxu0 %v447_v56  ;;  %v185_v56 = vld [vmem:[#allocation3 + $0x238] sm:$0xff]  ;;  %v384_v59 = vpack.c.bf16 %v176_v55, %v168_v54  ;;  %v8952_v54 = vld [vmem:[#allocation8 + $0xe0] ss:$8 sps:$4 sm:$0xff]  }
 0x1de   :  { %v8953_v55 = vld [vmem:[#allocation8 + $0xf4] ss:$8 sps:$4 sm:$0xff]  }
 0x1e4   :  { %1763 = vmatmul.mubr.bf16.gmra.mrb[44].mxu0 %v446_v61  ;;  %v393_v61 = vpack.c.bf16 %v193_v57, %v185_v56  ;;  %v312_v56 = vld [vmem:[#allocation3 + $0x630] sm:$0xff] }
 0x1e5   :  { %1772 = vmatprep.mubr.bf16.mxu0 %v455_v62  ;;  %v8940_v62 = vld [vmem:[#allocation8 + $0xa0] ss:$8 sps:$4 sm:$0xff]   ;;  %v320_v57 = vld [vmem:[#allocation3 + $0x670] sm:$0xff] }
 0x1e6   :  { %2301 = vmatpush1.bf16.msra.mxu1 %v8940_v62 }
 0x1e7   :  { %2302 = vmatprep.subr.bf16.mxu1 %v8941_v63  ;;  %v328_v63 = vld [vmem:[#allocation3 + $0x6b0] sm:$0xff] }
 0x1ec   :  { %1773 = vmatmul.mubr.bf16.gmra.mrb[48].mxu0 %v454_v3  ;;  %v209_v3 = vld [vmem:[#allocation3 + $0x2f8] sm:$0xff] }
 0x1ed   :  { %1782 = vmatprep.mubr.bf16.mxu0 %v463_v4  ;;  %v8943_v4 = vld [vmem:[#allocation8 + $0xb0] ss:$8 sps:$4 sm:$0xff]   ;;  %v401_v7 = vpack.c.bf16 %v209_v3, %v201_v2  ;;  %v464_v3 = vpack.c.bf16 %v336_v0, %v328_v63  ;;  %v2757_v63 = vld [vmem:[#allocation9 + $0x100] sm:$0xff] }
 0x1ee   :  { %2303 = vmatpush1.bf16.msra.mxu1 %v8943_v4  ;;  %v353_v2 = vld [vmem:[#allocation3 + $0x778] sm:$0xff]  ;;  %v2761_v0 = vld [vmem:[#allocation9 + $0x120] sm:$0xff] }
 0x1ef   :  { %2304 = vmatprep.subr.bf16.mxu1 %v8944_v6  ;;  %v473_v4 = vpack.c.bf16 %v353_v2, %v345_v1  ;;  %v352_v6 = vld [vmem:[#allocation3 + $0x770] sm:$0xff] }
 0x1f2   :  { %2305 = vmatpush1.bf16.msra.mxu1 %v8946_v8  ;;  %v604_v8 = vlaneseq }
 0x1f4   :  { %1783 = vmatmul.mubr.bf16.gmra.mrb[52].mxu0 %v462_v9  ;;  %v8947_v9 = vld [vmem:[#allocation8 + $0xd4] ss:$8 sps:$4 sm:$0xff]  }
 0x1f5   :  { %1792 = vmatprep.mubr.bf16.mxu0 %v471_v10  ;;  %v200_v10 = vld [vmem:[#allocation3 + $0x2b0] sm:$0xff]  ;;  %2306 = vmatprep.subr.bf16.mxu1 %v8947_v9  ;;  %v9312_v9 = vshrl.u32 %v604_v8, 7 }
 0x1f6   :  { %v400_v14 = vpack.c.bf16 %v208_v11, %v200_v10  ;;  %2307 = vmatpush1.bf16.msra.mxu1 %v8949_v48  ;;  %v602_v11 = vld [vmem:[%s11179_s2] sm:$0x3]  ;;  %s7966_s2 = sshll.u32 %s9169_s18, 4  ;;  %s7967_s2 = int_to_ptr.vmem [resolvable:$true] %s7966_s2 }
 0x1f7   :  { %2308 = vmatprep.subr.bf16.mxu1 %v8950_v52  ;;  %v606_v10 = vsub.s32 0, %v9312_v9  ;;  %v610_v12 = vsub.s32 1, %v9312_v9  ;;  %v2749_v52 = vld [vmem:[#allocation9 + $0xc0] sm:$0xff]  ;;  %p9129_p13 = scmp.lt.s32.totalorder %s7967_s2, %s7967_s2 }
 0x1f9   :  { %v9321_v16 = vrot.slane %v602_v11, %v606_v10  ;;  %v9325_v17 = vrot.slane %v602_v11, %v610_v12 }
 0x1fa   :  { %2309 = vmatpush1.bf16.msra.mxu1 %v8952_v54 }
 0x1fb   :  { %2310 = vmatprep.subr.bf16.mxu1 %v8953_v55 }
 0x1fc   :  { %1793 = vmatmul.mubr.bf16.gmra.mrb[56].mxu0 %v470_v19  ;;  %v241_v19 = vld [vmem:[#allocation3 + $0x3f8] sm:$0xff] }
 0x1fd   :  { %1835 = vmatprep.mubr.bf16.mxu0 %v361_v21  ;;  %v417_v21 = vpack.c.bf16 %v241_v19, %v233_v18 }
 0x1fe   :  { %2311 = vmatpush1.bf16.msra.mxu1 %v8955_v58 }
 0x204   :  { %1836 = vmatmul.mubr.bf16.vlgmr.msra.gmra.mrb[0].mxu0 %v360_v29  ;;  %v256_v29 = vld [vmem:[#allocation3 + $0x470] sm:$0xff] }
 0x205   :  { %1845 = vmatprep.mubr.bf16.mxu0 %v369_v31  ;;  %v273_v31 = vld [vmem:[#allocation3 + $0x4f8] sm:$0xff]  ;;  %v424_v32 = vpack.c.bf16 %v256_v29, %v248_v28 }
 0x206   :  { %v433_v33 = vpack.c.bf16 %v273_v31, %v265_v30  ;;  %v2733_v30 = vld [vmem:[#allocation9 + $0x40] sm:$0xff] }
 0x207   :  { %v2737_v31 = vld [vmem:[#allocation9 + $0x60] sm:$0xff] }
 0x20c   :  { %1846 = vmatmul.mubr.bf16.gmra.mrb[4].mxu0 %v368_v39  ;;  %v441_v39 = vpack.c.bf16 %v289_v37, %v281_v36 }
 0x20d   :  { %1855 = vmatprep.mubr.bf16.mxu0 %v377_v41  ;;  %v288_v41 = vld [vmem:[#allocation3 + $0x570] sm:$0xff] }
 0x20e   :  { %v440_v44 = vpack.c.bf16 %v288_v41, %v280_v40  ;;  %v2741_v41 = vld [vmem:[#allocation9 + $0x80] sm:$0xff] }
 0x214   :  { %1856 = vmatmul.mubr.bf16.gmra.mrb[8].mxu0 %v376_v49  ;;  %v313_v49 = vld [vmem:[#allocation3 + $0x638] sm:$0xff] }
 0x215   :  { %1865 = vmatprep.mubr.bf16.mxu0 %v385_v51  ;;  %v448_v51 = vpack.c.bf16 %v304_v47, %v296_v46  ;;  %v457_v53 = vpack.c.bf16 %v321_v50, %v313_v49  ;;  %v8151_v46 = vcombine.low %v2733_v30, %v2737_v31  ;;  %v8160_v49 = vcombine.high %v2741_v41, %v2745_v42 }
 0x21c   :  { %1866 = vmatmul.mubr.bf16.gmra.mrb[12].mxu0 %v384_v59  ;;  %v329_v59 = vld [vmem:[#allocation3 + $0x6b8] sm:$0xff] }
 0x21d   :  { %1875 = vmatprep.mubr.bf16.mxu0 %v393_v61  ;;  %v456_v61 = vpack.c.bf16 %v320_v57, %v312_v56  ;;  %v465_v62 = vpack.c.bf16 %v337_v60, %v329_v59  ;;  %v8159_v57 = vcombine.low %v2741_v41, %v2745_v42 }
 0x224   :  { %1876 = vmatmul.mubr.bf16.gmra.mrb[16].mxu0 %v392_v5  ;;  %v344_v5 = vld [vmem:[#allocation3 + $0x730] sm:$0xff] }
 0x225   :  { %1885 = vmatprep.mubr.bf16.mxu0 %v401_v7  ;;  %v472_v7 = vpack.c.bf16 %v352_v6, %v344_v5 }
 0x22c   :  { %1886 = vmatmul.mubr.bf16.gmra.mrb[20].mxu0 %v400_v14  ;;  %v2729_v14 = vld [vmem:[#allocation9 + $0x20] sm:$0xff] }
 0x22d   :  { %1895 = vmatprep.mubr.bf16.mxu0 %v409_v15  ;;  %v8144_v15 = vcombine.high %v2725_v13, %v2729_v14  ;;  %v8143_v35 = vcombine.low %v2725_v13, %v2729_v14  ;;  %v2765_v13 = vld [vmem:[#allocation9 + $0x140] sm:$0xff] }
 0x22e   :  { %v2769_v14 = vld [vmem:[#allocation9 + $0x160] sm:$0xff] }
 0x22f   :  { %3670 = vmatprep.subr.bf16.mxu1 %v8144_v15 }
 0x234   :  { %1896 = vmatmul.mubr.bf16.gmra.mrb[24].mxu0 %v408_v20 }
 0x235   :  { %1905 = vmatprep.mubr.bf16.mxu0 %v417_v21 }
 0x23c   :  { %1906 = vmatmul.mubr.bf16.gmra.mrb[28].mxu0 %v416_v26 }
 0x23d   :  { %1915 = vmatprep.mubr.bf16.mxu0 %v425_v27 }
 0x244   :  { %1916 = vmatmul.mubr.bf16.gmra.mrb[32].mxu0 %v424_v32 }
 0x245   :  { %1925 = vmatprep.mubr.bf16.mxu0 %v433_v33 }
 0x24c   :  { %1926 = vmatmul.mubr.bf16.gmra.mrb[36].mxu0 %v432_v38  ;;  %v8152_v38 = vcombine.high %v2733_v30, %v2737_v31  ;;  %v8183_v31 = vcombine.low %v2765_v13, %v2769_v14 }
 0x24d   :  { %1935 = vmatprep.mubr.bf16.mxu0 %v441_v39 }
 0x254   :  { %1936 = vmatmul.mubr.bf16.gmra.mrb[40].mxu0 %v440_v44 }
 0x255   :  { %1945 = vmatprep.mubr.bf16.mxu0 %v449_v45 }
 0x25c   :  { %1946 = vmatmul.mubr.bf16.gmra.mrb[44].mxu0 %v448_v51 }
 0x25d   :  { %1955 = vmatprep.mubr.bf16.mxu0 %v457_v53  ;;  %v2753_v53 = vld [vmem:[#allocation9 + $0xe0] sm:$0xff] }
 0x25e   :  { %v8168_v60 = vcombine.high %v2749_v52, %v2753_v53 }
 0x264   :  { %1956 = vmatmul.mubr.bf16.gmra.mrb[48].mxu0 %v456_v61 }
 0x265   :  { %1965 = vmatprep.mubr.bf16.mxu0 %v465_v62 }
 0x26c   :  { %1966 = vmatmul.mubr.bf16.gmra.mrb[52].mxu0 %v464_v3 }
 0x26d   :  { %1975 = vmatprep.mubr.bf16.mxu0 %v473_v4  ;;  %v8167_v4 = vcombine.low %v2749_v52, %v2753_v53 }
 0x274   :  { %1976 = vmatmul.mubr.bf16.gmra.mrb[56].mxu0 %v472_v7  ;;  %v8176_v7 = vcombine.high %v2757_v63, %v2761_v0 }
 0x2d7   :  { %v1837_v18 = vpop.f32.mrb[0].mxu0 }
 0x2d8   :  { %v8458_v19 = vadd.f32 %v1837_v18, %v9321_v16  ;;  %v1839_v20 = vpop.f32.mrb[1].mxu0 }
 0x2d9   :  { %v8459_v21 = vadd.f32 %v1839_v20, %v9325_v17  ;;  %v1841_v22 = vpop.f32.mrb[2].mxu0  ;;  %v8175_v20 = vcombine.low %v2757_v63, %v2761_v0 }
 0x2da   :  { %v8460_v23 = vadd.f32 %v1841_v22, %v9321_v16  ;;  %v1843_v24 = vpop.f32.mrb[3].mxu0  ;;  %v1986_v26 = vmax.f32 %v8458_v19, 0.0 }
 0x2db   :  { %v8461_v25 = vadd.f32 %v1843_v24, %v9325_v17  ;;  %v1987_v28 = vmax.f32 %v8459_v21, 0.0 }
 0x2dc   :  { %v1988_v27 = vmax.f32 %v8460_v23, 0.0  ;;  %v8184_v23 = vcombine.high %v2765_v13, %v2769_v14 }
 0x2dd   :  { %v1989_v29 = vmax.f32 %v8461_v25, 0.0 }
 0x2de   :  { %v2046_v32 = vpack.c.bf16 %v1988_v27, %v1986_v26  ;;  %v2773_v26 = vld [vmem:[#allocation9 + $0x180] sm:$0xff] }
 0x2df   :  { %v1847_v33 = vpop.f32.mrb[4].mxu0  ;;  %v2047_v34 = vpack.c.bf16 %v1989_v29, %v1987_v28  ;;  %v2777_v27 = vld [vmem:[#allocation9 + $0x1a0] sm:$0xff] }
 0x2e0   :  { %v8462_v36 = vadd.f32 %v1847_v33, %v9321_v16  ;;  %v1849_v37 = vpop.f32.mrb[5].mxu0  ;;  %v8191_v42 = vcombine.low %v2773_v26, %v2777_v27 }
 0x2e1   :  { %v8463_v39 = vadd.f32 %v1849_v37, %v9325_v17  ;;  %v1851_v40 = vpop.f32.mrb[6].mxu0  ;;  %2312 = vmatprep.mubr.bf16.mxu1 %v2047_v34  ;;  %v8192_v34 = vcombine.high %v2773_v26, %v2777_v27  ;;  %v2781_v37 = vld [vmem:[#allocation9 + $0x1c0] sm:$0xff] }
 0x2e2   :  { %v8464_v43 = vadd.f32 %v1851_v40, %v9321_v16  ;;  %v1853_v44 = vpop.f32.mrb[7].mxu0  ;;  %2313 = vmatmul.mubr.bf16.vlgmr.msra.gmra.mrb[0].mxu1 %v2046_v32  ;;  %v1990_v47 = vmax.f32 %v8462_v36, 0.0 }
 0x2e3   :  { %v8465_v45 = vadd.f32 %v1853_v44, %v9325_v17  ;;  %3671 = vmatpush1.bf16.msra.mxu1 %v8143_v35  ;;  %v1991_v50 = vmax.f32 %v8463_v39, 0.0 }
 0x2e4   :  { %v1992_v48 = vmax.f32 %v8464_v43, 0.0  ;;  %3672 = vmatprep.subr.bf16.mxu1 %v8152_v38  ;;  %v2785_v38 = vld [vmem:[#allocation9 + $0x1e0] sm:$0xff] }
 0x2e5   :  { %v1993_v51 = vmax.f32 %v8465_v45, 0.0  ;;  %v8200_v45 = vcombine.high %v2781_v37, %v2785_v38  ;;  %v8199_v53 = vcombine.low %v2781_v37, %v2785_v38 }
 0x2e6   :  { %v2048_v54 = vpack.c.bf16 %v1992_v48, %v1990_v47  ;;  %v2789_v48 = vld [vmem:[#allocation9 + $0x200] sm:$0xff] }
 0x2e7   :  { %v2049_v55 = vpack.c.bf16 %v1993_v51, %v1991_v50  ;;  %v1857_v56 = vpop.f32.mrb[8].mxu0  ;;  %3673 = vmatpush1.bf16.msra.mxu1 %v8151_v46 }
 0x2e8   :  { %v8466_v58 = vadd.f32 %v1857_v56, %v9321_v16  ;;  %v1859_v59 = vpop.f32.mrb[9].mxu0  ;;  %3674 = vmatprep.subr.bf16.mxu1 %v8160_v49  ;;  %v2793_v49 = vld [vmem:[#allocation9 + $0x220] sm:$0xff] }
 0x2e9   :  { %v8467_v61 = vadd.f32 %v1859_v59, %v9325_v17  ;;  %v1861_v62 = vpop.f32.mrb[10].mxu0  ;;  %2322 = vmatprep.mubr.bf16.mxu1 %v2049_v55  ;;  %v8208_v56 = vcombine.high %v2789_v48, %v2793_v49  ;;  %v2797_v59 = vld [vmem:[#allocation9 + $0x240] sm:$0xff]  ;;  %v8207_v0 = vcombine.low %v2789_v48, %v2793_v49 }
 0x2ea   :  { %v8468_v1 = vadd.f32 %v1861_v62, %v9321_v16  ;;  %v1863_v2 = vpop.f32.mrb[11].mxu0  ;;  %2323 = vmatmul.mubr.bf16.gmra.mrb[4].mxu1 %v2048_v54  ;;  %v1994_v5 = vmax.f32 %v8466_v58, 0.0 }
 0x2eb   :  { %v8469_v3 = vadd.f32 %v1863_v2, %v9325_v17  ;;  %3675 = vmatpush1.bf16.msra.mxu1 %v8159_v57  ;;  %v1995_v8 = vmax.f32 %v8467_v61, 0.0 }
 0x2ec   :  { %v1996_v6 = vmax.f32 %v8468_v1, 0.0  ;;  %3676 = vmatprep.subr.bf16.mxu1 %v8168_v60  ;;  %v2801_v60 = vld [vmem:[#allocation9 + $0x260] sm:$0xff] }
 0x2ed   :  { %v1997_v11 = vmax.f32 %v8469_v3, 0.0  ;;  %v8216_v3 = vcombine.high %v2797_v59, %v2801_v60  ;;  %v8215_v14 = vcombine.low %v2797_v59, %v2801_v60 }
 0x2ee   :  { %v2050_v15 = vpack.c.bf16 %v1996_v6, %v1994_v5  ;;  %v2805_v6 = vld [vmem:[#allocation9 + $0x280] sm:$0xff] }
 0x2ef   :  { %v2051_v18 = vpack.c.bf16 %v1997_v11, %v1995_v8  ;;  %v1867_v19 = vpop.f32.mrb[12].mxu0  ;;  %3677 = vmatpush1.bf16.msra.mxu1 %v8167_v4 }
 0x2f0   :  { %v8470_v21 = vadd.f32 %v1867_v19, %v9321_v16  ;;  %v1869_v22 = vpop.f32.mrb[13].mxu0  ;;  %3678 = vmatprep.subr.bf16.mxu1 %v8176_v7  ;;  %v2809_v7 = vld [vmem:[#allocation9 + $0x2a0] sm:$0xff] }
 0x2f1   :  { %v8471_v24 = vadd.f32 %v1869_v22, %v9325_v17  ;;  %v1871_v25 = vpop.f32.mrb[14].mxu0  ;;  %2332 = vmatprep.mubr.bf16.mxu1 %v2051_v18  ;;  %v8224_v19 = vcombine.high %v2805_v6, %v2809_v7  ;;  %v2813_v22 = vld [vmem:[#allocation9 + $0x2c0] sm:$0xff]  ;;  %v8223_v27 = vcombine.low %v2805_v6, %v2809_v7 }
 0x2f2   :  { %v8472_v28 = vadd.f32 %v1871_v25, %v9321_v16  ;;  %v1873_v29 = vpop.f32.mrb[15].mxu0  ;;  %2333 = vmatmul.mubr.bf16.gmra.mrb[8].mxu1 %v2050_v15  ;;  %v1998_v32 = vmax.f32 %v8470_v21, 0.0 }
 0x2f3   :  { %v8473_v30 = vadd.f32 %v1873_v29, %v9325_v17  ;;  %3679 = vmatpush1.bf16.msra.mxu1 %v8175_v20  ;;  %v1999_v35 = vmax.f32 %v8471_v24, 0.0 }
 0x2f4   :  { %v2000_v33 = vmax.f32 %v8472_v28, 0.0  ;;  %3680 = vmatprep.subr.bf16.mxu1 %v8184_v23  ;;  %v2817_v23 = vld [vmem:[#allocation9 + $0x2e0] sm:$0xff] }
 0x2f5   :  { %v2001_v36 = vmax.f32 %v8473_v30, 0.0  ;;  %v8232_v30 = vcombine.high %v2813_v22, %v2817_v23  ;;  %v8231_v38 = vcombine.low %v2813_v22, %v2817_v23 }
 0x2f6   :  { %v2052_v39 = vpack.c.bf16 %v2000_v33, %v1998_v32  ;;  %v2821_v33 = vld [vmem:[#allocation9 + $0x300] sm:$0xff] }
 0x2f7   :  { %v2053_v40 = vpack.c.bf16 %v2001_v36, %v1999_v35  ;;  %v1877_v41 = vpop.f32.mrb[16].mxu0  ;;  %3681 = vmatpush1.bf16.msra.mxu1 %v8183_v31 }
 0x2f8   :  { %v8474_v43 = vadd.f32 %v1877_v41, %v9321_v16  ;;  %v1879_v44 = vpop.f32.mrb[17].mxu0  ;;  %3682 = vmatprep.subr.bf16.mxu1 %v8192_v34  ;;  %v2825_v34 = vld [vmem:[#allocation9 + $0x320] sm:$0xff] }
 0x2f9   :  { %v8475_v46 = vadd.f32 %v1879_v44, %v9325_v17  ;;  %v1881_v47 = vpop.f32.mrb[18].mxu0  ;;  %2342 = vmatprep.mubr.bf16.mxu1 %v2053_v40  ;;  %v8240_v41 = vcombine.high %v2821_v33, %v2825_v34 }
 0x2fa   :  { %v8476_v50 = vadd.f32 %v1881_v47, %v9321_v16  ;;  %v1883_v51 = vpop.f32.mrb[19].mxu0  ;;  %2343 = vmatmul.mubr.bf16.gmra.mrb[12].mxu1 %v2052_v39  ;;  %v2002_v54 = vmax.f32 %v8474_v43, 0.0  ;;  %v8239_v47 = vcombine.low %v2821_v33, %v2825_v34 }
 0x2fb   :  { %v8477_v52 = vadd.f32 %v1883_v51, %v9325_v17  ;;  %3683 = vmatpush1.bf16.msra.mxu1 %v8191_v42  ;;  %v2003_v57 = vmax.f32 %v8475_v46, 0.0 }
 0x2fc   :  { %v2004_v55 = vmax.f32 %v8476_v50, 0.0  ;;  %3684 = vmatprep.subr.bf16.mxu1 %v8200_v45 }
 0x2fd   :  { %v2005_v58 = vmax.f32 %v8477_v52, 0.0 }
 0x2fe   :  { %v2054_v61 = vpack.c.bf16 %v2004_v55, %v2002_v54 }
 0x2ff   :  { %v2055_v62 = vpack.c.bf16 %v2005_v58, %v2003_v57  ;;  %v1887_v63 = vpop.f32.mrb[20].mxu0  ;;  %3685 = vmatpush1.bf16.msra.mxu1 %v8199_v53 }
 0x300   :  { %v8478_v1 = vadd.f32 %v1887_v63, %v9321_v16  ;;  %v1889_v2 = vpop.f32.mrb[21].mxu0  ;;  %3686 = vmatprep.subr.bf16.mxu1 %v8208_v56 }
 0x301   :  { %v8479_v4 = vadd.f32 %v1889_v2, %v9325_v17  ;;  %v1891_v5 = vpop.f32.mrb[22].mxu0  ;;  %2352 = vmatprep.mubr.bf16.mxu1 %v2055_v62 }
 0x302   :  { %v8480_v8 = vadd.f32 %v1891_v5, %v9321_v16  ;;  %v1893_v11 = vpop.f32.mrb[23].mxu0  ;;  %2353 = vmatmul.mubr.bf16.gmra.mrb[16].mxu1 %v2054_v61  ;;  %v2006_v15 = vmax.f32 %v8478_v1, 0.0 }
 0x303   :  { %v8481_v13 = vadd.f32 %v1893_v11, %v9325_v17  ;;  %3687 = vmatpush1.bf16.msra.mxu1 %v8207_v0  ;;  %v2007_v20 = vmax.f32 %v8479_v4, 0.0 }
 0x304   :  { %v2008_v18 = vmax.f32 %v8480_v8, 0.0  ;;  %3688 = vmatprep.subr.bf16.mxu1 %v8216_v3 }
 0x305   :  { %v2009_v21 = vmax.f32 %v8481_v13, 0.0 }
 0x306   :  { %v2056_v24 = vpack.c.bf16 %v2008_v18, %v2006_v15 }
 0x307   :  { %v2057_v25 = vpack.c.bf16 %v2009_v21, %v2007_v20  ;;  %v1897_v26 = vpop.f32.mrb[24].mxu0  ;;  %3689 = vmatpush1.bf16.msra.mxu1 %v8215_v14 }
 0x308   :  { %v8482_v28 = vadd.f32 %v1897_v26, %v9321_v16  ;;  %v1899_v29 = vpop.f32.mrb[25].mxu0  ;;  %3690 = vmatprep.subr.bf16.mxu1 %v8224_v19 }
 0x309   :  { %v8483_v31 = vadd.f32 %v1899_v29, %v9325_v17  ;;  %v1901_v32 = vpop.f32.mrb[26].mxu0  ;;  %2362 = vmatprep.mubr.bf16.mxu1 %v2057_v25  ;;  %v9165_v29 = vmov 1966171168  }
 0x30a   :  { %v8484_v35 = vadd.f32 %v1901_v32, %v9321_v16  ;;  %v1903_v36 = vpop.f32.mrb[27].mxu0  ;;  %2363 = vmatmul.mubr.bf16.gmra.mrb[20].mxu1 %v2056_v24  ;;  %v2010_v39 = vmax.f32 %v8482_v28, 0.0 }
 0x30b   :  { %v8485_v37 = vadd.f32 %v1903_v36, %v9325_v17  ;;  %3691 = vmatpush1.bf16.msra.mxu1 %v8223_v27  ;;  %v2011_v42 = vmax.f32 %v8483_v31, 0.0 }
 0x30c   :  { %v2012_v40 = vmax.f32 %v8484_v35, 0.0  ;;  %3692 = vmatprep.subr.bf16.mxu1 %v8232_v30  ;;  %v2528_v30 = vunpack.c.l.s4 %v9165_v29 }
 0x30d   :  { %v2013_v43 = vmax.f32 %v8485_v37, 0.0 }
 0x30e   :  { %v2058_v44 = vpack.c.bf16 %v2012_v40, %v2010_v39  ;;  %v2529_v35 = vunpack.c.0.s8 %v2528_v30  ;;  %v8956_v40 = vld [vmem:[%s11188_s11] ss:$0 sps:$4 sm:$0x33]  }
 0x30f   :  { %v2059_v45 = vpack.c.bf16 %v2013_v43, %v2011_v42  ;;  %v1907_v46 = vpop.f32.mrb[28].mxu0  ;;  %3693 = vmatpush1.bf16.msra.mxu1 %v8231_v38 }
 0x310   :  { %v8486_v48 = vadd.f32 %v1907_v46, %v9321_v16  ;;  %v1909_v49 = vpop.f32.mrb[29].mxu0  ;;  %3694 = vmatprep.subr.bf16.mxu1 %v8240_v41  ;;  %v9374_v41 = vsub.s32 %v2529_v35, %v9312_v9 }
 0x311   :  { %v8487_v50 = vadd.f32 %v1909_v49, %v9325_v17  ;;  %v1911_v51 = vpop.f32.mrb[30].mxu0  ;;  %2372 = vmatprep.mubr.bf16.mxu1 %v2059_v45 }
 0x312   :  { %v8488_v52 = vadd.f32 %v1911_v51, %v9321_v16  ;;  %v1913_v53 = vpop.f32.mrb[31].mxu0  ;;  %2373 = vmatmul.mubr.bf16.gmra.mrb[24].mxu1 %v2058_v44  ;;  %v2014_v55 = vmax.f32 %v8486_v48, 0.0  ;;  %v2533_v45 = vrot.slane %v8956_v40, %v9374_v41  ;;  %v8140_v48 = vld.sshfl [vmem:[%s11189_s12] sm:$0x11 pattern:$0x75316420] }
 0x313   :  { %v8489_v54 = vadd.f32 %v1913_v53, %v9325_v17  ;;  %3695 = vmatpush1.bf16.msra.mxu1 %v8239_v47  ;;  %v2015_v57 = vmax.f32 %v8487_v50, 0.0  ;;  %v2559_v51 = vcombine.high %v8140_v48, %v8140_v48 }
 0x314   :  { %v2016_v56 = vmax.f32 %v8488_v52, 0.0  ;;  %v2534_v50 = vcombine.low %v2533_v45, %v2533_v45 }
 0x315   :  { %v2017_v58 = vmax.f32 %v8489_v54, 0.0  ;;  %v9382_v54 = vrot.slane %v8140_v48, %v9374_v41  ;;  %v2845_v48 = vld [vmem:[#allocation9 + $0x3c0] sm:$0xff] }
 0x316   :  { %v2060_v59 = vpack.c.bf16 %v2016_v56, %v2014_v55 }
 0x317   :  { %v2061_v60 = vpack.c.bf16 %v2017_v58, %v2015_v57  ;;  %v1917_v61 = vpop.f32.mrb[32].mxu0  ;;  %v9386_v57 = vrot.slane %v2559_v51, %v9374_v41  ;;  %v2541_v58 = vrot.slane %v2534_v50, %v9374_v41 }
 0x318   :  { %v8490_v62 = vadd.f32 %v1917_v61, %v9321_v16  ;;  %v1919_v63 = vpop.f32.mrb[33].mxu0  ;;  %v2548_v61 = vrot.slane %v2533_v45, %v9374_v41 }
 0x319   :  { %v8491_v0 = vadd.f32 %v1919_v63, %v9325_v17  ;;  %v1921_v1 = vpop.f32.mrb[34].mxu0  ;;  %2382 = vmatprep.mubr.bf16.mxu1 %v2061_v60 }
 0x31a   :  { %v8492_v2 = vadd.f32 %v1921_v1, %v9321_v16  ;;  %v1923_v3 = vpop.f32.mrb[35].mxu0  ;;  %2383 = vmatmul.mubr.bf16.gmra.mrb[28].mxu1 %v2060_v59  ;;  %v2018_v5 = vmax.f32 %v8490_v62, 0.0  ;;  %v2575_v62 = vshll.u32 %v9382_v54, 16  ;;  %v2579_v1 = vshll.u32 %v9386_v57, 16 }
 0x31b   :  { %v8493_v4 = vadd.f32 %v1923_v3, %v9325_v17  ;;  %v2019_v7 = vmax.f32 %v8491_v0, 0.0 }
 0x31c   :  { %v2020_v6 = vmax.f32 %v8492_v2, 0.0  ;;  %v2549_v2 = vcombine.low %v2541_v58, %v2541_v58  ;;  %v5326_v58 = vld [vmem:[#allocation9 + $0x8] sm:$0xff] }
 0x31d   :  { %v2021_v8 = vmax.f32 %v8493_v4, 0.0 }
 0x31e   :  { %v2062_v11 = vpack.c.bf16 %v2020_v6, %v2018_v5  ;;  %v2550_v5 = vcombine.low %v2548_v61, %v2548_v61 }
 0x31f   :  { %v2063_v13 = vpack.c.bf16 %v2021_v8, %v2019_v7  ;;  %v1927_v14 = vpop.f32.mrb[36].mxu0  ;;  %v2581_v7 = vrot.slane %v2579_v1, 1 }
 0x320   :  { %v8494_v15 = vadd.f32 %v1927_v14, %v9321_v16  ;;  %v1929_v18 = vpop.f32.mrb[37].mxu0  ;;  %v2577_v14 = vrot.slane %v2575_v62, 1 }
 0x321   :  { %v8495_v19 = vadd.f32 %v1929_v18, %v9325_v17  ;;  %v1931_v20 = vpop.f32.mrb[38].mxu0  ;;  %2392 = vmatprep.mubr.bf16.mxu1 %v2063_v13  ;;  %v2590_v13 = vsel %vm2584_vm0, 0, %v2550_v5  ;;  %v5338_v5 = vld [vmem:[#allocation9 + $0x68] sm:$0xff] }
 0x322   :  { %v8496_v21 = vadd.f32 %v1931_v20, %v9321_v16  ;;  %v1933_v22 = vpop.f32.mrb[39].mxu0  ;;  %2393 = vmatmul.mubr.bf16.gmra.mrb[32].mxu1 %v2062_v11  ;;  %v2022_v24 = vmax.f32 %v8494_v15, 0.0  ;;  %v2596_v18 = vsel %vm2594_vm3, %v2590_v13, %v2581_v7 }
 0x323   :  { %v8497_v23 = vadd.f32 %v1933_v22, %v9325_v17  ;;  %v2023_v26 = vmax.f32 %v8495_v19, 0.0  ;;  %v2587_v19 = vsel %vm2584_vm0, 0, %v2549_v2  ;;  %2598 = vst [vmem:[#allocation2 + $0x8] sm:$0xff] %v2596_v18 }
 0x324   :  { %v2024_v25 = vmax.f32 %v8496_v21, 0.0  ;;  %v2595_v22 = vsel %vm2594_vm3, %v2587_v19, %v2577_v14 }
 0x325   :  { %v2025_v27 = vmax.f32 %v8497_v23, 0.0  ;;  %2597 = vst [vmem:[#allocation2] sm:$0xff] %v2595_v22  ;;  %v5346_v22 = vld [vmem:[#allocation9 + $0xa8] sm:$0xff] }
 0x326   :  { %v2064_v28 = vpack.c.bf16 %v2024_v25, %v2022_v24  ;;  %v2829_v25 = vld [vmem:[#allocation9 + $0x340] sm:$0xff] }
 0x327   :  { %v2065_v31 = vpack.c.bf16 %v2025_v27, %v2023_v26  ;;  %v1937_v32 = vpop.f32.mrb[40].mxu0  ;;  %v2833_v26 = vld [vmem:[#allocation9 + $0x360] sm:$0xff] }
 0x328   :  { %v8498_v33 = vadd.f32 %v1937_v32, %v9321_v16  ;;  %v1939_v34 = vpop.f32.mrb[41].mxu0  ;;  %v8248_v29 = vcombine.high %v2829_v25, %v2833_v26  ;;  %v8247_v32 = vcombine.low %v2829_v25, %v2833_v26 }
 0x329   :  { %v8499_v36 = vadd.f32 %v1939_v34, %v9325_v17  ;;  %v1941_v37 = vpop.f32.mrb[42].mxu0  ;;  %2402 = vmatprep.mubr.bf16.mxu1 %v2065_v31 }
 0x32a   :  { %v8500_v38 = vadd.f32 %v1941_v37, %v9321_v16  ;;  %v1943_v39 = vpop.f32.mrb[43].mxu0  ;;  %2403 = vmatmul.mubr.bf16.gmra.mrb[36].mxu1 %v2064_v28  ;;  %v2026_v43 = vmax.f32 %v8498_v33, 0.0  ;;  %3696 = vmatprep.subr.bf16.mxu1 %v8248_v29  ;;  %v2841_v37 = vld [vmem:[#allocation9 + $0x3a0] sm:$0xff] }
 0x32b   :  { %v8501_v42 = vadd.f32 %v1943_v39, %v9325_v17  ;;  %v2027_v46 = vmax.f32 %v8499_v36, 0.0  ;;  %3697 = vmatpush1.bf16.msra.mxu1 %v8247_v32  ;;  %v2837_v36 = vld [vmem:[#allocation9 + $0x380] sm:$0xff] }
 0x32c   :  { %v2028_v44 = vmax.f32 %v8500_v38, 0.0  ;;  %v8256_v40 = vcombine.high %v2837_v36, %v2841_v37 }
 0x32d   :  { %v2029_v47 = vmax.f32 %v8501_v42, 0.0 }
 0x32e   :  { %v2066_v49 = vpack.c.bf16 %v2028_v44, %v2026_v43  ;;  %v8255_v43 = vcombine.low %v2837_v36, %v2841_v37  ;;  %3698 = vmatprep.subr.bf16.mxu1 %v8256_v40 }
 0x32f   :  { %v2067_v52 = vpack.c.bf16 %v2029_v47, %v2027_v46  ;;  %v1947_v53 = vpop.f32.mrb[44].mxu0 }
 0x330   :  { %v8502_v55 = vadd.f32 %v1947_v53, %v9321_v16  ;;  %v1949_v56 = vpop.f32.mrb[45].mxu0  ;;  %3699 = vmatpush1.bf16.msra.mxu1 %v8255_v43  ;;  %v5374_v43 = vld [vmem:[#allocation9 + $0x188] sm:$0xff] }
 0x331   :  { %v8503_v59 = vadd.f32 %v1949_v56, %v9325_v17  ;;  %v1951_v60 = vpop.f32.mrb[46].mxu0  ;;  %2412 = vmatprep.mubr.bf16.mxu1 %v2067_v52 }
 0x332   :  { %v8504_v63 = vadd.f32 %v1951_v60, %v9321_v16  ;;  %v1953_v0 = vpop.f32.mrb[47].mxu0  ;;  %2413 = vmatmul.mubr.bf16.gmra.mrb[40].mxu1 %v2066_v49  ;;  %v2030_v3 = vmax.f32 %v8502_v55, 0.0  ;;  %v2849_v49 = vld [vmem:[#allocation9 + $0x3e0] sm:$0xff] }
 0x333   :  { %v8505_v4 = vadd.f32 %v1953_v0, %v9325_v17  ;;  %v2031_v8 = vmax.f32 %v8503_v59, 0.0  ;;  %v8264_v52 = vcombine.high %v2845_v48, %v2849_v49  ;;  %v8263_v56 = vcombine.low %v2845_v48, %v2849_v49  ;;  %v5330_v59 = vld [vmem:[#allocation9 + $0x28] sm:$0xff] }
 0x334   :  { %v2032_v6 = vmax.f32 %v8504_v63, 0.0  ;;  %v8292_v61 = vcombine.high %v5326_v58, %v5330_v59  ;;  %v9405_v0 = vcombine.low %v5326_v58, %v5330_v59  ;;  %v5386_v48 = vld [vmem:[#allocation9 + $0x1e8] sm:$0xff] }
 0x335   :  { %v2033_v11 = vmax.f32 %v8505_v4, 0.0  ;;  %3700 = vmatprep.subr.bf16.mxu1 %v8264_v52  ;;  %v5334_v4 = vld [vmem:[#allocation9 + $0x48] sm:$0xff] }
 0x336   :  { %v2068_v15 = vpack.c.bf16 %v2032_v6, %v2030_v3  ;;  %3701 = vmatpush1.bf16.msra.mxu1 %v8263_v56  ;;  %6380 = vmatprep.subr.bf16.mxu0 %v8292_v61  ;;  %v9411_v14 = vcombine.low %v5334_v4, %v5338_v5  ;;  %v5394_v52 = vld [vmem:[#allocation9 + $0x228] sm:$0xff] }
 0x337   :  { %v2069_v20 = vpack.c.bf16 %v2033_v11, %v2031_v8  ;;  %v1957_v21 = vpop.f32.mrb[48].mxu0  ;;  %3781 = vmatprep.subr.bf16.mxu1 %v8292_v61  ;;  %6381 = vmatpush1.bf16.msra.mxu0 %v9405_v0  ;;  %v9408_v8 = vcombine.high %v5334_v4, %v5338_v5  ;;  %v5398_v56 = vld [vmem:[#allocation9 + $0x248] sm:$0xff] }
 0x338   :  { %v8506_v23 = vadd.f32 %v1957_v21, %v9321_v16  ;;  %v1959_v24 = vpop.f32.mrb[49].mxu0  ;;  %v5342_v21 = vld [vmem:[#allocation9 + $0x88] sm:$0xff] }
 0x339   :  { %v8507_v27 = vadd.f32 %v1959_v24, %v9325_v17  ;;  %v1961_v28 = vpop.f32.mrb[50].mxu0  ;;  %2422 = vmatprep.mubr.bf16.mxu1 %v2069_v20  ;;  %6382 = vmatprep.subr.bf16.mxu0 %v9408_v8  ;;  %v9418_v24 = vcombine.high %v5342_v21, %v5346_v22  ;;  %v5402_v58 = vld [vmem:[#allocation9 + $0x268] sm:$0xff] }
 0x33a   :  { %v8508_v30 = vadd.f32 %v1961_v28, %v9321_v16  ;;  %v1963_v31 = vpop.f32.mrb[51].mxu0  ;;  %2423 = vmatmul.mubr.bf16.gmra.mrb[44].mxu1 %v2068_v15  ;;  %v2034_v34 = vmax.f32 %v8506_v23, 0.0  ;;  %v9460_v59 = vcombine.high %v5398_v56, %v5402_v58  ;;  %v5406_v61 = vld [vmem:[#allocation9 + $0x288] sm:$0xff] }
 0x33b   :  { %v8509_v33 = vadd.f32 %v1963_v31, %v9325_v17  ;;  %v2035_v38 = vmax.f32 %v8507_v27, 0.0  ;;  %6383 = vmatpush1.bf16.msra.mxu0 %v9411_v14  ;;  %v9420_v27 = vcombine.low %v5342_v21, %v5346_v22  ;;  %v5354_v31 = vld [vmem:[#allocation9 + $0xe8] sm:$0xff] }
 0x33c   :  { %v2036_v35 = vmax.f32 %v8508_v30, 0.0  ;;  %6384 = vmatprep.subr.bf16.mxu0 %v9418_v24  ;;  %v5422_v21 = vld [vmem:[#allocation9 + $0x308] sm:$0xff] }
 0x33d   :  { %v2037_v39 = vmax.f32 %v8509_v33, 0.0  ;;  %v5426_v22 = vld [vmem:[#allocation9 + $0x328] sm:$0xff] }
 0x33e   :  { %v2070_v42 = vpack.c.bf16 %v2036_v35, %v2034_v34  ;;  %v5362_v35 = vld [vmem:[#allocation9 + $0x128] sm:$0xff] }
 0x33f   :  { %v2071_v44 = vpack.c.bf16 %v2037_v39, %v2035_v38  ;;  %v1967_v45 = vpop.f32.mrb[52].mxu0  ;;  %6385 = vmatpush1.bf16.msra.mxu0 %v9420_v27  ;;  %v5366_v38 = vld [vmem:[#allocation9 + $0x148] sm:$0xff] }
 0x340   :  { %v8510_v46 = vadd.f32 %v1967_v45, %v9321_v16  ;;  %v1969_v47 = vpop.f32.mrb[53].mxu0  ;;  %v5370_v39 = vld [vmem:[#allocation9 + $0x168] sm:$0xff] }
 0x341   :  { %v8511_v50 = vadd.f32 %v1969_v47, %v9325_v17  ;;  %v1971_v51 = vpop.f32.mrb[54].mxu0  ;;  %2432 = vmatprep.mubr.bf16.mxu1 %v2071_v44  ;;  %v9436_v40 = vcombine.high %v5366_v38, %v5370_v39  ;;  %v5378_v44 = vld [vmem:[#allocation9 + $0x1a8] sm:$0xff] }
 0x342   :  { %v8512_v53 = vadd.f32 %v1971_v51, %v9321_v16  ;;  %v1973_v55 = vpop.f32.mrb[55].mxu0  ;;  %2433 = vmatmul.mubr.bf16.gmra.mrb[48].mxu1 %v2070_v42  ;;  %v2038_v62 = vmax.f32 %v8510_v46, 0.0  ;;  %v9438_v42 = vcombine.low %v5366_v38, %v5370_v39  ;;  %v9442_v45 = vcombine.high %v5374_v43, %v5378_v44  ;;  %v5382_v47 = vld [vmem:[#allocation9 + $0x1c8] sm:$0xff] }
 0x343   :  { %v8513_v60 = vadd.f32 %v1973_v55, %v9325_v17  ;;  %v2039_v1 = vmax.f32 %v8511_v50, 0.0  ;;  %v9444_v46 = vcombine.low %v5374_v43, %v5378_v44  ;;  %v9448_v49 = vcombine.high %v5382_v47, %v5386_v48  ;;  %v5390_v51 = vld [vmem:[#allocation9 + $0x208] sm:$0xff] }
 0x344   :  { %v2040_v63 = vmax.f32 %v8512_v53, 0.0  ;;  %v9450_v50 = vcombine.low %v5382_v47, %v5386_v48  ;;  %v9454_v53 = vcombine.high %v5390_v51, %v5394_v52  ;;  %v9456_v55 = vcombine.low %v5390_v51, %v5394_v52  ;;  %v5446_v38 = vld [vmem:[#allocation9 + $0x3c8] sm:$0xff]  ;;  %v5328_v47 = vld [vmem:[#allocation9 + $0x18] sm:$0xff] }
 0x345   :  { %v2041_v2 = vmax.f32 %v8513_v60, 0.0  ;;  %v9462_v60 = vcombine.low %v5398_v56, %v5402_v58  ;;  %v5450_v39 = vld [vmem:[#allocation9 + $0x3e8] sm:$0xff]  ;;  %v5332_v48 = vld [vmem:[#allocation9 + $0x38] sm:$0xff]  ;;  %v2108_v56 = vld [vmem:[%s11181_s4] sm:$0x3] }
 0x346   :  { %v2072_v3 = vpack.c.bf16 %v2040_v63, %v2038_v62  ;;  %v5410_v62 = vld [vmem:[#allocation9 + $0x2a8] sm:$0xff]  ;;  %v8142_v63 = vld.sshfl [vmem:[%s11188_s11] sm:$0x11 pattern:$0x75316420]  ;;  %v9506_v43 = vcombine.high %v5446_v38, %v5450_v39  ;;  %v9508_v44 = vcombine.low %v5446_v38, %v5450_v39  ;;  %v9512_v51 = vcombine.high %v5328_v47, %v5332_v48 }
 0x347   :  { %v2073_v6 = vpack.c.bf16 %v2041_v2, %v2039_v1  ;;  %v1977_v7 = vpop.f32.mrb[56].mxu0  ;;  %v9469_v1 = vcombine.high %v5406_v61, %v5410_v62  ;;  %v2634_v2 = vcombine.high %v8142_v63, %v8142_v63  ;;  %v2641_v4 = vrot.slane %v8142_v63, %v9374_v41 }
 0x348   :  { %v8514_v11 = vadd.f32 %v1977_v7, %v9321_v16  ;;  %v1979_v13 = vpop.f32.mrb[57].mxu0  ;;  %v5418_v7 = vld [vmem:[#allocation9 + $0x2e8] sm:$0xff]  ;;  %v9514_v52 = vcombine.low %v5328_v47, %v5332_v48  ;;  %v9522_v58 = vrot.slane %v2108_v56, %v606_v10 }
 0x349   :  { %v8515_v15 = vadd.f32 %v1979_v13, %v9325_v17  ;;  %v1981_v18 = vpop.f32.mrb[58].mxu0  ;;  %2442 = vmatprep.mubr.bf16.mxu1 %v2073_v6  ;;  %v2648_v5 = vrot.slane %v2634_v2, %v9374_v41  ;;  %v5414_v6 = vld [vmem:[#allocation9 + $0x2c8] sm:$0xff] }
 0x34a   :  { %v8516_v19 = vadd.f32 %v1981_v18, %v9321_v16  ;;  %v1983_v20 = vpop.f32.mrb[59].mxu0  ;;  %2443 = vmatmul.mubr.bf16.gmra.mrb[52].mxu1 %v2072_v3  ;;  %v2042_v25 = vmax.f32 %v8514_v11, 0.0  ;;  %v5350_v16 = vld [vmem:[#allocation9 + $0xc8] sm:$0xff]  ;;  %v9471_v3 = vcombine.low %v5406_v61, %v5410_v62  ;;  %v2650_v11 = vshll.u32 %v2641_v4, 16  ;;  %v2708_v4 = vld [vmem:[#allocation2 + $0x8] sm:$0xc0] }
 0x34b   :  { %v8517_v23 = vadd.f32 %v1983_v20, %v9325_v17  ;;  %v2043_v28 = vmax.f32 %v8515_v15, 0.0  ;;  %v9424_v33 = vcombine.high %v5350_v16, %v5354_v31  ;;  %v9426_v34 = vcombine.low %v5350_v16, %v5354_v31  ;;  %v5358_v17 = vld [vmem:[#allocation9 + $0x108] sm:$0xff] }
 0x34c   :  { %v2044_v26 = vmax.f32 %v8516_v19, 0.0  ;;  %v9430_v36 = vcombine.high %v5358_v17, %v5362_v35  ;;  %v9432_v37 = vcombine.low %v5358_v17, %v5362_v35  ;;  %v9477_v13 = vcombine.high %v5414_v6, %v5418_v7  ;;  %v5438_v31 = vld [vmem:[#allocation9 + $0x388] sm:$0xff] }
 0x34d   :  { %v2045_v29 = vmax.f32 %v8517_v23, 0.0  ;;  %6386 = vmatprep.subr.bf16.mxu0 %v9424_v33  ;;  %v2653_v15 = vshll.u32 %v2648_v5, 16  ;;  %v9480_v18 = vcombine.low %v5414_v6, %v5418_v7  ;;  %v2660_v19 = vsel %vm2659_vm6, %v9382_v54, %v2650_v11  ;;  %v5430_v54 = vld [vmem:[#allocation9 + $0x348] sm:$0xff]  ;;  %v2707_v5 = vld [vmem:[#allocation2] sm:$0xc0] }
 0x34e   :  { %v2074_v30 = vpack.c.bf16 %v2044_v26, %v2042_v25  ;;  %6387 = vmatpush1.bf16.msra.mxu0 %v9426_v34  ;;  %v2664_v20 = vsel %vm2657_vm4, %v2660_v19, 0  ;;  %v9488_v26 = vcombine.high %v5422_v21, %v5426_v22  ;;  %v9526_v61 = vrot.slane %v2108_v56, %v610_v12 }
 0x34f   :  { %v2075_v32 = vpack.c.bf16 %v2045_v29, %v2043_v28  ;;  %6388 = vmatprep.subr.bf16.mxu0 %v9430_v36  ;;  %v2661_v41 = vsel %vm2659_vm6, %v9386_v57, %v2653_v15  ;;  %v2669_v25 = vrot.slane %v2664_v20, 4  ;;  %v9490_v29 = vcombine.low %v5422_v21, %v5426_v22  ;;  %v5434_v57 = vld [vmem:[#allocation9 + $0x368] sm:$0xff] }
 0x350   :  { %v2666_v23 = vsel %vm2657_vm4, %v2661_v41, 0  ;;  %v9496_v16 = vcombine.low %v5430_v54, %v5434_v57  ;;  %v2872_v10 = vshrl.u32 %v2708_v4, 16  ;;  %v2875_v41 = vshll.u32 %v2708_v4, 16 }
 0x351   :  { %2452 = vmatprep.mubr.bf16.mxu1 %v2075_v32  ;;  %v2670_v28 = vrot.slane %v2666_v23, 4  ;;  %2673 = vst [vmem:[#allocation2 + $0x80] sm:$0xf0] %v2669_v25  ;;  %v5442_v32 = vld [vmem:[#allocation9 + $0x3a8] sm:$0xff]  ;;  %v2855_v20 = vshrl.u32 %v2707_v5, 16  ;;  %v2858_v21 = vshll.u32 %v2707_v5, 16 }
 0x352   :  { %2453 = vmatmul.mubr.bf16.gmra.mrb[56].mxu1 %v2074_v30  ;;  %6389 = vmatpush1.bf16.msra.mxu0 %v9432_v37  ;;  %v9494_v30 = vcombine.high %v5430_v54, %v5434_v57  ;;  %v9500_v17 = vcombine.high %v5438_v31, %v5442_v32  ;;  %v9502_v35 = vcombine.low %v5438_v31, %v5442_v32  ;;  %v2874_v57 = vrot.slane %v2872_v10, 6 }
 0x353   :  { %6390 = vmatprep.subr.bf16.mxu0 %v9436_v40  ;;  %2674 = vst [vmem:[#allocation2 + $0x88] sm:$0xf0] %v2670_v28  ;;  %v2877_v31 = vrot.slane %v2875_v41, 7  ;;  %v2857_v32 = vrot.slane %v2855_v20, 6  ;;  %v2860_v47 = vrot.slane %v2858_v21, 7 }
 0x356   :  { %6391 = vmatpush1.bf16.msra.mxu0 %v9438_v42 }
 0x357   :  { %6392 = vmatprep.subr.bf16.mxu0 %v9442_v45 }
 0x35a   :  { %6393 = vmatpush1.bf16.msra.mxu0 %v9444_v46 }
 0x35b   :  { %6394 = vmatprep.subr.bf16.mxu0 %v9448_v49 }
 0x35e   :  { %6395 = vmatpush1.bf16.msra.mxu0 %v9450_v50 }
 0x35f   :  { %6396 = vmatprep.subr.bf16.mxu0 %v9454_v53 }
 0x362   :  { %6397 = vmatpush1.bf16.msra.mxu0 %v9456_v55 }
 0x363   :  { %6398 = vmatprep.subr.bf16.mxu0 %v9460_v59 }
 0x366   :  { %6399 = vmatpush1.bf16.msra.mxu0 %v9462_v60 }
 0x367   :  { %6400 = vmatprep.subr.bf16.mxu0 %v9469_v1 }
 0x36a   :  { %6401 = vmatpush1.bf16.msra.mxu0 %v9471_v3 }
 0x36b   :  { %6402 = vmatprep.subr.bf16.mxu0 %v9477_v13 }
 0x36e   :  { %6403 = vmatpush1.bf16.msra.mxu0 %v9480_v18 }
 0x36f   :  { %6404 = vmatprep.subr.bf16.mxu0 %v9488_v26 }
 0x372   :  { %6405 = vmatpush1.bf16.msra.mxu0 %v9490_v29 }
 0x373   :  { %6406 = vmatprep.subr.bf16.mxu0 %v9494_v30 }
 0x376   :  { %6407 = vmatpush1.bf16.msra.mxu0 %v9496_v16 }
 0x377   :  { %6408 = vmatprep.subr.bf16.mxu0 %v9500_v17 }
 0x37a   :  { %6409 = vmatpush1.bf16.msra.mxu0 %v9502_v35 }
 0x37b   :  { %6410 = vmatprep.subr.bf16.mxu0 %v9506_v43 }
 0x37e   :  { %6411 = vmatpush1.bf16.msra.mxu0 %v9508_v44 }
 0x37f   :  { %6606 = vmatprep.subr.bf16.mxu0 %v9512_v51 }
 0x3b5   :  { %v2314_v62 = vpop.f32.mrb[0].mxu1 }
 0x3b6   :  { %v2315_v63 = vadd.f32 %v2314_v62, %v9522_v58  ;;  %v2316_v2 = vpop.f32.mrb[1].mxu1 }
 0x3b7   :  { %v2317_v6 = vadd.f32 %v2316_v2, %v9526_v61  ;;  %v2318_v7 = vpop.f32.mrb[2].mxu1 }
 0x3b8   :  { %v2319_v11 = vadd.f32 %v2318_v7, %v9522_v58  ;;  %v2320_v15 = vpop.f32.mrb[3].mxu1  ;;  %v2463_v9 = vmax.f32 %v2315_v63, 0.0 }
 0x3b9   :  { %v2321_v19 = vadd.f32 %v2320_v15, %v9526_v61  ;;  %v2464_v22 = vmax.f32 %v2317_v6, 0.0 }
 0x3ba   :  { %v2465_v12 = vmax.f32 %v2319_v11, 0.0 }
 0x3bb   :  { %v2466_v23 = vmax.f32 %v2321_v19, 0.0  ;;  %v2878_v19 = vor.u32 %v2877_v31, %v2874_v57 }
 0x3bc   :  { %v2675_v25 = vpack.c.bf16 %v2465_v12, %v2463_v9  ;;  %v2861_v12 = vor.u32 %v2860_v47, %v2857_v32 }
 0x3bd   :  { %v2676_v28 = vpack.c.bf16 %v2466_v23, %v2464_v22  ;;  %v2324_v54 = vpop.f32.mrb[4].mxu1 }
 0x3be   :  { %v2325_v38 = vadd.f32 %v2324_v54, %v9522_v58  ;;  %v2326_v39 = vpop.f32.mrb[5].mxu1  ;;  %v2863_v48 = vshrl.u32 %v2675_v25, 16  ;;  %v2866_v56 = vshll.u32 %v2675_v25, 16 }
 0x3bf   :  { %v2327_v62 = vadd.f32 %v2326_v39, %v9526_v61  ;;  %v2328_v2 = vpop.f32.mrb[6].mxu1  ;;  %v2880_v63 = vshrl.u32 %v2676_v28, 16  ;;  %v2883_v4 = vshll.u32 %v2676_v28, 16 }
 0x3c0   :  { %v2329_v5 = vadd.f32 %v2328_v2, %v9522_v58  ;;  %v2330_v6 = vpop.f32.mrb[7].mxu1  ;;  %v2865_v7 = vrot.slane %v2863_v48, 6  ;;  %v2868_v11 = vrot.slane %v2866_v56, 7  ;;  %v2467_v20 = vmax.f32 %v2325_v38, 0.0 }
 0x3c1   :  { %v2331_v15 = vadd.f32 %v2330_v6, %v9526_v61  ;;  %v2882_v10 = vrot.slane %v2880_v63, 6  ;;  %v2885_v41 = vrot.slane %v2883_v4, 7  ;;  %v2468_v22 = vmax.f32 %v2327_v62, 0.0 }
 0x3c2   :  { %v2469_v9 = vmax.f32 %v2329_v5, 0.0  ;;  %v2869_v21 = vor.u32 %v2868_v11, %v2865_v7 }
 0x3c3   :  { %v2470_v23 = vmax.f32 %v2331_v15, 0.0  ;;  %v2886_v25 = vor.u32 %v2885_v41, %v2882_v10 }
 0x3c4   :  { %v2677_v54 = vpack.c.bf16 %v2469_v9, %v2467_v20  ;;  %v9542_v57 = vsel %vm2853_vm7, %v2861_v12, %v2869_v21 }
 0x3c5   :  { %v2678_v28 = vpack.c.bf16 %v2470_v23, %v2468_v22  ;;  %v2334_v39 = vpop.f32.mrb[8].mxu1  ;;  %v9537_v2 = vsel %vm2853_vm7, %v2878_v19, %v2886_v25 }
 0x3c6   :  { %v2335_v48 = vadd.f32 %v2334_v39, %v9522_v58  ;;  %v2336_v56 = vpop.f32.mrb[9].mxu1  ;;  %3702 = vmatprep.mubr.bf16.mxu1 %v9537_v2  ;;  %v2889_v31 = vshrl.u32 %v2677_v54, 16  ;;  %v2892_v32 = vshll.u32 %v2677_v54, 16 }
 0x3c7   :  { %v2337_v38 = vadd.f32 %v2336_v56, %v9526_v61  ;;  %v2338_v47 = vpop.f32.mrb[10].mxu1  ;;  %3703 = vmatmul.mubr.bf16.vlgmr.msra.gmra.mrb[60].mxu1 %v9542_v57  ;;  %v2898_v62 = vshrl.u32 %v2678_v28, 16  ;;  %v2901_v63 = vshll.u32 %v2678_v28, 16 }
 0x3c8   :  { %v2339_v4 = vadd.f32 %v2338_v47, %v9522_v58  ;;  %v2340_v5 = vpop.f32.mrb[11].mxu1  ;;  %3782 = vmatpush1.bf16.msra.mxu1 %v9405_v0  ;;  %v2891_v6 = vrot.slane %v2889_v31, 6  ;;  %v2894_v7 = vrot.slane %v2892_v32, 7  ;;  %v2471_v10 = vmax.f32 %v2335_v48, 0.0 }
 0x3c9   :  { %v2341_v11 = vadd.f32 %v2340_v5, %v9526_v61  ;;  %3783 = vmatprep.subr.bf16.mxu1 %v9408_v8  ;;  %v2900_v15 = vrot.slane %v2898_v62, 6  ;;  %v2903_v19 = vrot.slane %v2901_v63, 7  ;;  %v2472_v9 = vmax.f32 %v2337_v38, 0.0 }
 0x3ca   :  { %v2473_v41 = vmax.f32 %v2339_v4, 0.0  ;;  %v2895_v20 = vor.u32 %v2894_v7, %v2891_v6 }
 0x3cb   :  { %v2474_v12 = vmax.f32 %v2341_v11, 0.0  ;;  %v2904_v22 = vor.u32 %v2903_v19, %v2900_v15 }
 0x3cc   :  { %v2679_v23 = vpack.c.bf16 %v2473_v41, %v2471_v10  ;;  %3784 = vmatpush1.bf16.msra.mxu1 %v9411_v14  ;;  %v9552_v54 = vsel %vm2853_vm7, %v2869_v21, %v2895_v20 }
 0x3cd   :  { %v2680_v0 = vpack.c.bf16 %v2474_v12, %v2472_v9  ;;  %v2344_v28 = vpop.f32.mrb[12].mxu1  ;;  %v9555_v39 = vsel %vm2853_vm7, %v2886_v25, %v2904_v22  ;;  %3785 = vmatprep.subr.bf16.mxu1 %v9418_v24 }
 0x3ce   :  { %v2345_v8 = vadd.f32 %v2344_v28, %v9522_v58  ;;  %v2346_v48 = vpop.f32.mrb[13].mxu1  ;;  %3712 = vmatprep.mubr.bf16.mxu1 %v9555_v39  ;;  %v2907_v56 = vshrl.u32 %v2679_v23, 16  ;;  %v2910_v31 = vshll.u32 %v2679_v23, 16 }
 0x3cf   :  { %v2347_v32 = vadd.f32 %v2346_v48, %v9526_v61  ;;  %v2348_v14 = vpop.f32.mrb[14].mxu1  ;;  %3713 = vmatmul.mubr.bf16.gmra.mrb[64].mxu1 %v9552_v54  ;;  %v2916_v21 = vshrl.u32 %v2680_v0, 16  ;;  %v2919_v38 = vshll.u32 %v2680_v0, 16 }
 0x3d0   :  { %v2349_v47 = vadd.f32 %v2348_v14, %v9522_v58  ;;  %v2350_v25 = vpop.f32.mrb[15].mxu1  ;;  %3786 = vmatpush1.bf16.msra.mxu1 %v9420_v27  ;;  %v2909_v24 = vrot.slane %v2907_v56, 6  ;;  %v2912_v62 = vrot.slane %v2910_v31, 7  ;;  %v2475_v6 = vmax.f32 %v2345_v8, 0.0 }
 0x3d1   :  { %v2351_v63 = vadd.f32 %v2350_v25, %v9526_v61  ;;  %3787 = vmatprep.subr.bf16.mxu1 %v9424_v33  ;;  %v2918_v4 = vrot.slane %v2916_v21, 6  ;;  %v2921_v5 = vrot.slane %v2919_v38, 7  ;;  %v2476_v15 = vmax.f32 %v2347_v32, 0.0 }
 0x3d2   :  { %v2477_v7 = vmax.f32 %v2349_v47, 0.0  ;;  %v2913_v11 = vor.u32 %v2912_v62, %v2909_v24 }
 0x3d3   :  { %v2478_v19 = vmax.f32 %v2351_v63, 0.0  ;;  %v2922_v10 = vor.u32 %v2921_v5, %v2918_v4 }
 0x3d4   :  { %v2681_v41 = vpack.c.bf16 %v2477_v7, %v2475_v6  ;;  %3788 = vmatpush1.bf16.msra.mxu1 %v9426_v34  ;;  %v9568_v9 = vsel %vm2853_vm7, %v2895_v20, %v2913_v11 }
 0x3d5   :  { %v2682_v27 = vpack.c.bf16 %v2478_v19, %v2476_v15  ;;  %v2354_v12 = vpop.f32.mrb[16].mxu1  ;;  %v9571_v23 = vsel %vm2853_vm7, %v2904_v22, %v2922_v10  ;;  %3789 = vmatprep.subr.bf16.mxu1 %v9430_v36 }
 0x3d6   :  { %v2355_v33 = vadd.f32 %v2354_v12, %v9522_v58  ;;  %v2356_v0 = vpop.f32.mrb[17].mxu1  ;;  %3722 = vmatprep.mubr.bf16.mxu1 %v9571_v23  ;;  %v2925_v28 = vshrl.u32 %v2681_v41, 16  ;;  %v2928_v8 = vshll.u32 %v2681_v41, 16 }
 0x3d7   :  { %v2357_v48 = vadd.f32 %v2356_v0, %v9526_v61  ;;  %v2358_v34 = vpop.f32.mrb[18].mxu1  ;;  %3723 = vmatmul.mubr.bf16.gmra.mrb[68].mxu1 %v9568_v9  ;;  %v2934_v20 = vshrl.u32 %v2682_v27, 16  ;;  %v2937_v56 = vshll.u32 %v2682_v27, 16 }
 0x3d8   :  { %v2359_v31 = vadd.f32 %v2358_v34, %v9522_v58  ;;  %v2360_v22 = vpop.f32.mrb[19].mxu1  ;;  %3790 = vmatpush1.bf16.msra.mxu1 %v9432_v37  ;;  %v2927_v36 = vrot.slane %v2925_v28, 6  ;;  %v2930_v32 = vrot.slane %v2928_v8, 7  ;;  %v2479_v47 = vmax.f32 %v2355_v33, 0.0 }
 0x3d9   :  { %v2361_v14 = vadd.f32 %v2360_v22, %v9526_v61  ;;  %3791 = vmatprep.subr.bf16.mxu1 %v9436_v40  ;;  %v2936_v21 = vrot.slane %v2934_v20, 6  ;;  %v2939_v38 = vrot.slane %v2937_v56, 7  ;;  %v2480_v62 = vmax.f32 %v2357_v48, 0.0 }
 0x3da   :  { %v2481_v25 = vmax.f32 %v2359_v31, 0.0  ;;  %v2931_v24 = vor.u32 %v2930_v32, %v2927_v36 }
 0x3db   :  { %v2482_v63 = vmax.f32 %v2361_v14, 0.0  ;;  %v2940_v4 = vor.u32 %v2939_v38, %v2936_v21 }
 0x3dc   :  { %v2683_v5 = vpack.c.bf16 %v2481_v25, %v2479_v47  ;;  %3792 = vmatpush1.bf16.msra.mxu1 %v9438_v42  ;;  %v9584_v6 = vsel %vm2853_vm7, %v2913_v11, %v2931_v24 }
 0x3dd   :  { %11223 = vst [vmem:[#allocation17_spill] sm:$0xff] %v9584_v6  ;;  %v2684_v37 = vpack.c.bf16 %v2482_v63, %v2480_v62  ;;  %v2364_v7 = vpop.f32.mrb[20].mxu1  ;;  %v9587_v15 = vsel %vm2853_vm7, %v2922_v10, %v2940_v4  ;;  %3793 = vmatprep.subr.bf16.mxu1 %v9442_v45 }
 0x3de   :  { %11224 = vst [vmem:[#allocation18_spill] sm:$0xff] %v9587_v15  ;;  %v2365_v40 = vadd.f32 %v2364_v7, %v9522_v58  ;;  %v2366_v19 = vpop.f32.mrb[21].mxu1  ;;  %3732 = vmatprep.mubr.bf16.mxu1 %v9587_v15  ;;  %v2943_v41 = vshrl.u32 %v2683_v5, 16  ;;  %v2946_v27 = vshll.u32 %v2683_v5, 16 }
 0x3df   :  { %v2367_v12 = vadd.f32 %v2366_v19, %v9526_v61  ;;  %v2368_v42 = vpop.f32.mrb[22].mxu1  ;;  %3733 = vmatmul.mubr.bf16.gmra.mrb[72].mxu1 %v9584_v6  ;;  %v2952_v11 = vshrl.u32 %v2684_v37, 16  ;;  %v2955_v33 = vshll.u32 %v2684_v37, 16 }
 0x3e0   :  { %v2369_v0 = vadd.f32 %v2368_v42, %v9522_v58  ;;  %v2370_v10 = vpop.f32.mrb[23].mxu1  ;;  %3794 = vmatpush1.bf16.msra.mxu1 %v9444_v46  ;;  %v2945_v45 = vrot.slane %v2943_v41, 6  ;;  %v2948_v28 = vrot.slane %v2946_v27, 7  ;;  %v2483_v20 = vmax.f32 %v2365_v40, 0.0 }
 0x3e1   :  { %v2371_v8 = vadd.f32 %v2370_v10, %v9526_v61  ;;  %3795 = vmatprep.subr.bf16.mxu1 %v9448_v49  ;;  %v2954_v48 = vrot.slane %v2952_v11, 6  ;;  %v2957_v34 = vrot.slane %v2955_v33, 7  ;;  %v2484_v22 = vmax.f32 %v2367_v12, 0.0 }
 0x3e2   :  { %v2485_v56 = vmax.f32 %v2369_v0, 0.0  ;;  %v2949_v31 = vor.u32 %v2948_v28, %v2945_v45 }
 0x3e3   :  { %v2486_v36 = vmax.f32 %v2371_v8, 0.0  ;;  %v2958_v32 = vor.u32 %v2957_v34, %v2954_v48 }
 0x3e4   :  { %v2685_v14 = vpack.c.bf16 %v2485_v56, %v2483_v20  ;;  %3796 = vmatpush1.bf16.msra.mxu1 %v9450_v50  ;;  %v9600_v21 = vsel %vm2853_vm7, %v2931_v24, %v2949_v31 }
 0x3e5   :  { %v2686_v46 = vpack.c.bf16 %v2486_v36, %v2484_v22  ;;  %v2374_v38 = vpop.f32.mrb[24].mxu1  ;;  %v9603_v47 = vsel %vm2853_vm7, %v2940_v4, %v2958_v32  ;;  %3797 = vmatprep.subr.bf16.mxu1 %v9454_v53 }
 0x3e6   :  { %11225 = vst [vmem:[#allocation19_spill] sm:$0xff] %v9603_v47  ;;  %v2375_v49 = vadd.f32 %v2374_v38, %v9522_v58  ;;  %v2376_v25 = vpop.f32.mrb[25].mxu1  ;;  %3742 = vmatprep.mubr.bf16.mxu1 %v9603_v47  ;;  %v2961_v62 = vshrl.u32 %v2685_v14, 16  ;;  %v2964_v63 = vshll.u32 %v2685_v14, 16  ;;  %v5308_v14 = vld [vmem:[#allocation2 + $0x8] sm:$0xc0] }
 0x3e7   :  { %v2377_v5 = vadd.f32 %v2376_v25, %v9526_v61  ;;  %v2378_v50 = vpop.f32.mrb[26].mxu1  ;;  %3743 = vmatmul.mubr.bf16.gmra.mrb[76].mxu1 %v9600_v21  ;;  %v2970_v24 = vshrl.u32 %v2686_v46, 16  ;;  %v2973_v37 = vshll.u32 %v2686_v46, 16 }
 0x3e8   :  { %v2379_v7 = vadd.f32 %v2378_v50, %v9522_v58  ;;  %v2380_v4 = vpop.f32.mrb[27].mxu1  ;;  %3798 = vmatpush1.bf16.msra.mxu1 %v9456_v55  ;;  %v2963_v53 = vrot.slane %v2961_v62, 6  ;;  %v2966_v40 = vrot.slane %v2964_v63, 7  ;;  %v2487_v12 = vmax.f32 %v2375_v49, 0.0  ;;  %v5307_v49 = vld [vmem:[#allocation2] sm:$0xc0] }
 0x3e9   :  { %v2381_v19 = vadd.f32 %v2380_v4, %v9526_v61  ;;  %3799 = vmatprep.subr.bf16.mxu1 %v9460_v59  ;;  %v2972_v41 = vrot.slane %v2970_v24, 6  ;;  %v2975_v27 = vrot.slane %v2973_v37, 7  ;;  %v2488_v33 = vmax.f32 %v2377_v5, 0.0 }
 0x3ea   :  { %v2489_v42 = vmax.f32 %v2379_v7, 0.0  ;;  %v2967_v11 = vor.u32 %v2966_v40, %v2963_v53  ;;  %v5471_v24 = vshrl.u32 %v5308_v14, 16  ;;  %v5474_v37 = vshll.u32 %v5308_v14, 16 }
 0x3eb   :  { %v2490_v0 = vmax.f32 %v2381_v19, 0.0  ;;  %v2976_v10 = vor.u32 %v2975_v27, %v2972_v41  ;;  %v5454_v53 = vshrl.u32 %v5307_v49, 16  ;;  %v5457_v40 = vshll.u32 %v5307_v49, 16 }
 0x3ec   :  { %v2687_v45 = vpack.c.bf16 %v2489_v42, %v2487_v12  ;;  %3800 = vmatpush1.bf16.msra.mxu1 %v9462_v60  ;;  %v9616_v28 = vsel %vm2853_vm7, %v2949_v31, %v2967_v11 }
 0x3ed   :  { %v2688_v55 = vpack.c.bf16 %v2490_v0, %v2488_v33  ;;  %v2384_v8 = vpop.f32.mrb[28].mxu1  ;;  %v9619_v48 = vsel %vm2853_vm7, %v2958_v32, %v2976_v10  ;;  %3801 = vmatprep.subr.bf16.mxu1 %v9469_v1  ;;  %v9648_v33 = vrot.slane %v5474_v37, 7 }
 0x3ee   :  { %v2385_v59 = vadd.f32 %v2384_v8, %v9522_v58  ;;  %v2386_v34 = vpop.f32.mrb[29].mxu1  ;;  %3752 = vmatprep.mubr.bf16.mxu1 %v9619_v48  ;;  %v2979_v20 = vshrl.u32 %v2687_v45, 16  ;;  %v2982_v56 = vshll.u32 %v2687_v45, 16  ;;  %v9652_v45 = vrot.slane %v5454_v53, 6 }
 0x3ef   :  { %v2387_v22 = vadd.f32 %v2386_v34, %v9526_v61  ;;  %v2388_v60 = vpop.f32.mrb[30].mxu1  ;;  %3753 = vmatmul.mubr.bf16.gmra.mrb[80].mxu1 %v9616_v28  ;;  %v2988_v31 = vshrl.u32 %v2688_v55, 16  ;;  %v2991_v36 = vshll.u32 %v2688_v55, 16 }
 0x3f0   :  { %v2491_v46 = vmax.f32 %v2385_v59, 0.0  ;;  %v2390_v32 = vpop.f32.mrb[31].mxu1  ;;  %3802 = vmatpush1.bf16.msra.mxu1 %v9471_v3  ;;  %v2981_v1 = vrot.slane %v2979_v20, 6  ;;  %v2984_v38 = vrot.slane %v2982_v56, 7  ;;  %v2389_v3 = vadd.f32 %v2388_v60, %v9522_v58 }
 0x3f1   :  { %v2492_v25 = vmax.f32 %v2387_v22, 0.0  ;;  %3803 = vmatprep.subr.bf16.mxu1 %v9477_v13  ;;  %v2990_v62 = vrot.slane %v2988_v31, 6  ;;  %v2993_v63 = vrot.slane %v2991_v36, 7  ;;  %v2391_v19 = vadd.f32 %v2390_v32, %v9526_v61 }
 0x3f2   :  { %v2689_v5 = vpack.c.bf16 %v2491_v46, %v2491_v46  ;;  %v9628_v50 = vor.u32 %v2984_v38, %v2981_v1  ;;  %v2493_v55 = vmax.f32 %v2389_v3, 0.0  ;;  %v5340_v3 = vld [vmem:[#allocation9 + $0x78] sm:$0xff] }
 0x3f3   :  { %v2690_v7 = vpack.c.bf16 %v2492_v25, %v2492_v25  ;;  %v9630_v4 = vor.u32 %v2993_v63, %v2990_v62  ;;  %v2494_v59 = vmax.f32 %v2391_v19, 0.0 }
 0x3f4   :  { %2705 = vst [vmem:[#allocation2 + $0x80] sm:$0xf] %v2689_v5  ;;  %3804 = vmatpush1.bf16.msra.mxu1 %v9480_v18  ;;  %v9636_v13 = vsel %vm2853_vm7, %v2967_v11, %v9628_v50  ;;  %v9646_v18 = vrot.slane %v5471_v24, 6 }
 0x3f5   :  { %2706 = vst [vmem:[#allocation2 + $0x88] sm:$0xf] %v2690_v7  ;;  %v2394_v41 = vpop.f32.mrb[32].mxu1  ;;  %v9641_v27 = vsel %vm2853_vm7, %v2976_v10, %v9630_v4  ;;  %3805 = vmatprep.subr.bf16.mxu1 %v9488_v26  ;;  %v9654_v10 = vrot.slane %v5457_v40, 7  ;;  %v5336_v40 = vld [vmem:[#allocation9 + $0x58] sm:$0xff] }
 0x3f6   :  { %v2395_v12 = vadd.f32 %v2394_v41, %v9522_v58  ;;  %v2396_v42 = vpop.f32.mrb[33].mxu1  ;;  %3762 = vmatprep.mubr.bf16.mxu1 %v9641_v27  ;;  %v5477_v56 = vor.u32 %v9648_v33, %v9646_v18  ;;  %v9668_v18 = vld [vmem:[#allocation9 + $0x10] sm:$0xff] }
 0x3f7   :  { %v2397_v11 = vadd.f32 %v2396_v42, %v9526_v61  ;;  %v2398_v0 = vpop.f32.mrb[34].mxu1  ;;  %3763 = vmatmul.mubr.bf16.gmra.mrb[84].mxu1 %v9636_v13  ;;  %v5460_v14 = vor.u32 %v9654_v10, %v9652_v45  ;;  %v9670_v33 = vld [vmem:[#allocation9 + $0x30] sm:$0xff] }
 0x3f8   :  { %v2495_v26 = vmax.f32 %v2395_v12, 0.0  ;;  %v2400_v8 = vpop.f32.mrb[35].mxu1  ;;  %3806 = vmatpush1.bf16.msra.mxu1 %v9490_v29  ;;  %v2399_v60 = vadd.f32 %v2398_v0, %v9522_v58 }
 0x3f9   :  { %v2496_v34 = vmax.f32 %v2397_v11, 0.0  ;;  %3807 = vmatprep.subr.bf16.mxu1 %v9494_v30  ;;  %v2401_v31 = vadd.f32 %v2400_v8, %v9526_v61 }
 0x3fa   :  { %v5275_v20 = vpack.c.bf16 %v2495_v26, %v2493_v55 }
 0x3fb   :  { %v5276_v22 = vpack.c.bf16 %v2496_v34, %v2494_v59  ;;  %v2723_v36 = vld [vmem:[#allocation2 + $0x80] sm:$0x3f]  ;;  %v2498_v55 = vmax.f32 %v2401_v31, 0.0 }
 0x3fc   :  { %v2724_v46 = vld [vmem:[#allocation2 + $0x88] sm:$0x3f]  ;;  %3808 = vmatpush1.bf16.msra.mxu1 %v9496_v16  ;;  %v2997_v29 = vshrl.u32 %v2723_v36, 16  ;;  %v3000_v32 = vshll.u32 %v2723_v36, 16  ;;  %v5462_v1 = vshrl.u32 %v5275_v20, 16  ;;  %v5465_v30 = vshll.u32 %v5275_v20, 16 }
 0x3fd   :  { %v2404_v38 = vpop.f32.mrb[36].mxu1  ;;  %v3006_v49 = vshrl.u32 %v2724_v46, 16  ;;  %v3009_v25 = vshll.u32 %v2724_v46, 16  ;;  %3809 = vmatprep.subr.bf16.mxu1 %v9500_v17  ;;  %v5479_v62 = vshrl.u32 %v5276_v22, 16  ;;  %v5482_v63 = vshll.u32 %v5276_v22, 16 }
 0x3fe   :  { %v2405_v5 = vadd.f32 %v2404_v38, %v9522_v58  ;;  %v2406_v24 = vpop.f32.mrb[37].mxu1  ;;  %v2999_v37 = vrot.slane %v2997_v29, 6  ;;  %v3002_v7 = vrot.slane %v3000_v32, 7  ;;  %v5464_v53 = vrot.slane %v5462_v1, 6 }
 0x3ff   :  { %v2407_v16 = vadd.f32 %v2406_v24, %v9526_v61  ;;  %v2408_v19 = vpop.f32.mrb[38].mxu1  ;;  %v3008_v41 = vrot.slane %v3006_v49, 6  ;;  %v3011_v12 = vrot.slane %v3009_v25, 7  ;;  %v5481_v42 = vrot.slane %v5479_v62, 6  ;;  %v5344_v25 = vld [vmem:[#allocation9 + $0x98] sm:$0xff] }
 0x400   :  { %v2497_v17 = vmax.f32 %v2399_v60, 0.0  ;;  %v2499_v11 = vmax.f32 %v2405_v5, 0.0  ;;  %v2410_v0 = vpop.f32.mrb[39].mxu1  ;;  %v3003_v45 = vor.u32 %v3002_v7, %v2999_v37  ;;  %3810 = vmatpush1.bf16.msra.mxu1 %v9502_v35  ;;  %v5484_v10 = vrot.slane %v5482_v63, 7  ;;  %v5348_v62 = vld [vmem:[#allocation9 + $0xb8] sm:$0xff] }
 0x401   :  { %v2500_v26 = vmax.f32 %v2407_v16, 0.0  ;;  %v3012_v8 = vor.u32 %v3011_v12, %v3008_v41  ;;  %3811 = vmatprep.subr.bf16.mxu1 %v9506_v43  ;;  %v5467_v59 = vrot.slane %v5465_v30, 7  ;;  %v8148_v22 = vcombine.high %v9668_v18, %v9670_v33  ;;  %v2735_v12 = vld [vmem:[#allocation9 + $0x50] sm:$0xff] }
 0x402   :  { %v5277_v34 = vpack.c.bf16 %v2499_v11, %v2497_v17  ;;  %v5485_v20 = vor.u32 %v5484_v10, %v5481_v42  ;;  %v9676_v36 = vcombine.high %v5336_v40, %v5340_v3  ;;  %v2409_v46 = vadd.f32 %v2408_v19, %v9522_v58  ;;  %v2739_v42 = vld [vmem:[#allocation9 + $0x70] sm:$0xff] }
 0x403   :  { %v5278_v60 = vpack.c.bf16 %v2500_v26, %v2498_v55  ;;  %v9681_v35 = vsel %vm2853_vm7, %v9630_v4, %v3012_v8  ;;  %v5468_v31 = vor.u32 %v5467_v59, %v5464_v53  ;;  %v9686_v43 = vsel %vm2853_vm7, %v9628_v50, %v3003_v45  ;;  %v5352_v26 = vld [vmem:[#allocation9 + $0xd8] sm:$0xff] }
 0x404   :  { %3772 = vmatprep.mubr.bf16.mxu1 %v9681_v35  ;;  %3812 = vmatpush1.bf16.msra.mxu1 %v9508_v44  ;;  %v9690_v29 = vsel %vm2853_vm7, %v5477_v56, %v5485_v20  ;;  %v5488_v32 = vshrl.u32 %v5277_v34, 16  ;;  %v5491_v1 = vshll.u32 %v5277_v34, 16  ;;  %v2411_v30 = vadd.f32 %v2410_v0, %v9526_v61  ;;  %v5356_v8 = vld [vmem:[#allocation9 + $0xf8] sm:$0xff] }
 0x405   :  { %v2414_v38 = vpop.f32.mrb[40].mxu1  ;;  %3773 = vmatmul.mubr.bf16.gmra.mrb[88].mxu1 %v9686_v43  ;;  %6412 = vmatprep.mubr.bf16.mxu0 %v9690_v29  ;;  %v9696_v4 = vsel %vm2853_vm7, %v5460_v14, %v5468_v31  ;;  %v5497_v49 = vshrl.u32 %v5278_v60, 16  ;;  %v5500_v50 = vshll.u32 %v5278_v60, 16  ;;  %v9703_v14 = vcombine.low %v5336_v40, %v5340_v3 }
 0x406   :  { %v2415_v44 = vadd.f32 %v2414_v38, %v9522_v58  ;;  %v2416_v56 = vpop.f32.mrb[41].mxu1  ;;  %3813 = vmatprep.mubr.bf16.mxu1 %v9537_v2  ;;  %6413 = vmatmul.mubr.bf16.vlgmr.msra.gmra.mrb[60].mxu0 %v9696_v4  ;;  %v5490_v63 = vrot.slane %v5488_v32, 6  ;;  %v5493_v5 = vrot.slane %v5491_v1, 7  ;;  %v2501_v16 = vmax.f32 %v2409_v46, 0.0 }
 0x407   :  { %v2417_v24 = vadd.f32 %v2416_v56, %v9526_v61  ;;  %v2418_v37 = vpop.f32.mrb[42].mxu1  ;;  %6607 = vmatpush1.bf16.msra.mxu0 %v9514_v52  ;;  %3894 = vmatprep.subr.bf16.mxu1 %v8148_v22  ;;  %v5499_v7 = vrot.slane %v5497_v49, 6  ;;  %v5502_v53 = vrot.slane %v5500_v50, 7  ;;  %v9706_v11 = vcombine.high %v5344_v25, %v5348_v62 }
 0x408   :  { %v2503_v19 = vmax.f32 %v2415_v44, 0.0  ;;  %v2420_v41 = vpop.f32.mrb[43].mxu1  ;;  %6608 = vmatprep.subr.bf16.mxu0 %v9676_v36  ;;  %v5494_v17 = vor.u32 %v5493_v5, %v5490_v63  ;;  %v2502_v0 = vmax.f32 %v2411_v30, 0.0  ;;  %v8147_v40 = vcombine.low %v9668_v18, %v9670_v33  ;;  %v9725_v18 = vld [vmem:[#allocation9 + $0x90] sm:$0xff]  ;;  %v5360_v63 = vld [vmem:[#allocation9 + $0x118] sm:$0xff] }
 0x409   :  { %v2504_v45 = vmax.f32 %v2417_v24, 0.0  ;;  %v9708_v10 = vor.u32 %v5502_v53, %v5499_v7  ;;  %v8156_v34 = vcombine.high %v2735_v12, %v2739_v42  ;;  %v2419_v60 = vadd.f32 %v2418_v37, %v9522_v58  ;;  %v9727_v33 = vld [vmem:[#allocation9 + $0xb0] sm:$0xff]  ;;  %v5364_v5 = vld [vmem:[#allocation9 + $0x138] sm:$0xff] }
 0x40a   :  { %v5279_v55 = vpack.c.bf16 %v2503_v19, %v2501_v16  ;;  %v9713_v3 = vsel %vm2853_vm7, %v5468_v31, %v5494_v17  ;;  %v9722_v46 = vcombine.low %v5344_v25, %v5348_v62  ;;  %v2421_v1 = vadd.f32 %v2420_v41, %v9526_v61 }
 0x40b   :  { %v5280_v59 = vpack.c.bf16 %v2504_v45, %v2502_v0  ;;  %6609 = vmatpush1.bf16.msra.mxu0 %v9703_v14  ;;  %v9718_v22 = vsel %vm2853_vm7, %v5485_v20, %v9708_v10  ;;  %v9731_v20 = vcombine.high %v5352_v26, %v5356_v8  ;;  %v8155_v62 = vcombine.low %v2735_v12, %v2739_v42  ;;  %v9742_v42 = vld [vmem:[#allocation9 + $0xd0] sm:$0xff] }
 0x40c   :  { %6422 = vmatprep.mubr.bf16.mxu0 %v9718_v22  ;;  %6610 = vmatprep.subr.bf16.mxu0 %v9706_v11  ;;  %v5506_v31 = vshrl.u32 %v5279_v55, 16  ;;  %v5509_v32 = vshll.u32 %v5279_v55, 16  ;;  %v8164_v7 = vcombine.high %v9725_v18, %v9727_v33  ;;  %v2505_v19 = vmax.f32 %v2419_v60, 0.0  ;;  %v2755_v45 = vld [vmem:[#allocation9 + $0xf0] sm:$0xff] }
 0x40d   :  { %v2424_v30 = vpop.f32.mrb[44].mxu1  ;;  %3814 = vmatmul.mubr.bf16.vlgmr.msra.gmra.mrb[92].mxu1 %v9542_v57  ;;  %v5515_v38 = vshrl.u32 %v5280_v59, 16  ;;  %v5518_v49 = vshll.u32 %v5280_v59, 16  ;;  %v9740_v12 = vcombine.low %v5352_v26, %v5356_v8  ;;  %v5368_v8 = vld [vmem:[#allocation9 + $0x158] sm:$0xff] }
 0x40e   :  { %v2425_v50 = vadd.f32 %v2424_v30, %v9522_v58  ;;  %v2426_v25 = vpop.f32.mrb[45].mxu1  ;;  %3823 = vmatprep.mubr.bf16.mxu1 %v9555_v39  ;;  %3895 = vmatpush1.bf16.msra.mxu1 %v8147_v40  ;;  %v5508_v44 = vrot.slane %v5506_v31, 6  ;;  %v5511_v56 = vrot.slane %v5509_v32, 7  ;;  %v2506_v40 = vmax.f32 %v2421_v1, 0.0  ;;  %v5372_v30 = vld [vmem:[#allocation9 + $0x178] sm:$0xff] }
 0x40f   :  { %v2427_v24 = vadd.f32 %v2426_v25, %v9526_v61  ;;  %v2428_v37 = vpop.f32.mrb[46].mxu1  ;;  %3896 = vmatprep.subr.bf16.mxu1 %v8156_v34  ;;  %6423 = vmatmul.mubr.bf16.gmra.mrb[64].mxu0 %v9713_v3  ;;  %v5517_v53 = vrot.slane %v5515_v38, 6  ;;  %v5520_v16 = vrot.slane %v5518_v49, 7  ;;  %11226 = vst [vmem:[#allocation20_spill] sm:$0xff] %v9740_v12  ;;  %v9749_v31 = vcombine.high %v5360_v63, %v5364_v5 }
 0x410   :  { %v2507_v41 = vmax.f32 %v2425_v50, 0.0  ;;  %v2430_v0 = vpop.f32.mrb[47].mxu1  ;;  %6611 = vmatpush1.bf16.msra.mxu0 %v9722_v46  ;;  %v9744_v55 = vor.u32 %v5511_v56, %v5508_v44  ;;  %v8163_v32 = vcombine.low %v9725_v18, %v9727_v33  ;;  %v8172_v1 = vcombine.high %v9742_v42, %v2755_v45  ;;  %v9770_v33 = vld [vmem:[#allocation9 + $0x130] sm:$0xff] }
 0x411   :  { %v2508_v59 = vmax.f32 %v2427_v24, 0.0  ;;  %6612 = vmatprep.subr.bf16.mxu0 %v9731_v20  ;;  %v9747_v34 = vor.u32 %v5520_v16, %v5517_v53  ;;  %11227 = vst [vmem:[#allocation21_spill] sm:$0xff] %v9749_v31  ;;  %v2429_v50 = vadd.f32 %v2428_v37, %v9522_v58  ;;  %v9766_v18 = vcombine.low %v5360_v63, %v5364_v5 }
 0x412   :  { %v5281_v60 = vpack.c.bf16 %v2507_v41, %v2505_v19  ;;  %3897 = vmatpush1.bf16.msra.mxu1 %v8155_v62  ;;  %v9755_v26 = vsel %vm2853_vm7, %v5494_v17, %v9744_v55  ;;  %v9768_v17 = vld [vmem:[#allocation9 + $0x110] sm:$0xff]  ;;  %v2431_v44 = vadd.f32 %v2430_v0, %v9526_v61  ;;  %v5376_v19 = vld [vmem:[#allocation9 + $0x198] sm:$0xff] }
 0x413   :  { %v5282_v38 = vpack.c.bf16 %v2508_v59, %v2506_v40  ;;  %3898 = vmatprep.subr.bf16.mxu1 %v8164_v7  ;;  %v9761_v49 = vsel %vm2853_vm7, %v9708_v10, %v9747_v34  ;;  %11228 = vst [vmem:[#allocation22_spill] sm:$0xff] %v9766_v18  ;;  %v9775_v10 = vcombine.high %v5368_v8, %v5372_v30  ;;  %v5380_v41 = vld [vmem:[#allocation9 + $0x1b8] sm:$0xff] }
 0x414   :  { %6613 = vmatpush1.bf16.msra.mxu0 %v9740_v12  ;;  %6432 = vmatprep.mubr.bf16.mxu0 %v9761_v49  ;;  %v5524_v25 = vshrl.u32 %v5281_v60, 16  ;;  %v5527_v62 = vshll.u32 %v5281_v60, 16  ;;  %v8171_v7 = vcombine.low %v9742_v42, %v2755_v45  ;;  %v8180_v59 = vcombine.high %v9768_v17, %v9770_v33  ;;  %v9787_v45 = vld [vmem:[#allocation9 + $0x150] sm:$0xff] }
 0x415   :  { %v2434_v56 = vpop.f32.mrb[48].mxu1  ;;  %3824 = vmatmul.mubr.bf16.gmra.mrb[96].mxu1 %v9552_v54  ;;  %6614 = vmatprep.subr.bf16.mxu0 %v9749_v31  ;;  %11229 = vst [vmem:[#allocation23_spill] sm:$0xff] %v9775_v10  ;;  %v5533_v24 = vshrl.u32 %v5282_v38, 16  ;;  %v5536_v37 = vshll.u32 %v5282_v38, 16  ;;  %v9785_v42 = vcombine.low %v5368_v8, %v5372_v30  ;;  %v8179_v8 = vcombine.low %v9768_v17, %v9770_v33  ;;  %v9817_v17 = vld [vmem:[#allocation9 + $0x190] sm:$0xff] }
 0x416   :  { %v2435_v63 = vadd.f32 %v2434_v56, %v9522_v58  ;;  %v2436_v5 = vpop.f32.mrb[49].mxu1  ;;  %3833 = vmatprep.mubr.bf16.mxu1 %v9571_v23  ;;  %3899 = vmatpush1.bf16.msra.mxu1 %v8163_v32  ;;  %v5526_v53 = vrot.slane %v5524_v25, 6  ;;  %v5529_v16 = vrot.slane %v5527_v62, 7  ;;  %v2509_v56 = vmax.f32 %v2429_v50, 0.0  ;;  %v9789_v25 = vld [vmem:[#allocation9 + $0x170] sm:$0xff] }
 0x417   :  { %v2437_v0 = vadd.f32 %v2436_v5, %v9526_v61  ;;  %v2438_v40 = vpop.f32.mrb[50].mxu1  ;;  %3900 = vmatprep.subr.bf16.mxu1 %v8172_v1  ;;  %6433 = vmatmul.mubr.bf16.gmra.mrb[68].mxu0 %v9755_v26  ;;  %v5535_v60 = vrot.slane %v5533_v24, 6  ;;  %v5538_v38 = vrot.slane %v5536_v37, 7  ;;  %11230 = vst [vmem:[#allocation24_spill] sm:$0xff] %v9785_v42  ;;  %v2510_v1 = vmax.f32 %v2431_v44, 0.0  ;;  %v5384_v37 = vld [vmem:[#allocation9 + $0x1d8] sm:$0xff] }
 0x418   :  { %v2511_v31 = vmax.f32 %v2435_v63, 0.0  ;;  %v2440_v32 = vpop.f32.mrb[51].mxu1  ;;  %6615 = vmatpush1.bf16.msra.mxu0 %v9766_v18  ;;  %v9791_v62 = vor.u32 %v5529_v16, %v5526_v53  ;;  %v9796_v24 = vcombine.high %v5376_v19, %v5380_v41  ;;  %v5388_v63 = vld [vmem:[#allocation9 + $0x1f8] sm:$0xff]  ;;  %v8188_v53 = vcombine.high %v9787_v45, %v9789_v25  ;;  %v9819_v33 = vld [vmem:[#allocation9 + $0x1b0] sm:$0xff] }
 0x419   :  { %v2512_v5 = vmax.f32 %v2437_v0, 0.0  ;;  %6616 = vmatprep.subr.bf16.mxu0 %v9775_v10  ;;  %v9794_v12 = vor.u32 %v5538_v38, %v5535_v60 }
 0x41a   :  { %11231 = vst [vmem:[#allocation25_spill] sm:$0xff] %v9796_v24  ;;  %v5283_v50 = vpack.c.bf16 %v2511_v31, %v2509_v56  ;;  %3901 = vmatpush1.bf16.msra.mxu1 %v8171_v7  ;;  %v9803_v30 = vsel %vm2853_vm7, %v9744_v55, %v9791_v62  ;;  %v2439_v7 = vadd.f32 %v2438_v40, %v9522_v58 }
 0x41b   :  { %11232 = vst [vmem:[#allocation26_spill] sm:$0xff] %v9803_v30  ;;  %v5284_v44 = vpack.c.bf16 %v2512_v5, %v2510_v1  ;;  %3902 = vmatprep.subr.bf16.mxu1 %v8180_v59  ;;  %v9810_v31 = vsel %vm2853_vm7, %v9747_v34, %v9794_v12  ;;  %v9815_v55 = vcombine.low %v5376_v19, %v5380_v41  ;;  %v5392_v5 = vld [vmem:[#allocation9 + $0x218] sm:$0xff] }
 0x41c   :  { %6617 = vmatpush1.bf16.msra.mxu0 %v9785_v42  ;;  %6442 = vmatprep.mubr.bf16.mxu0 %v9810_v31  ;;  %v5542_v16 = vshrl.u32 %v5283_v50, 16  ;;  %v5545_v0 = vshll.u32 %v5283_v50, 16  ;;  %v2441_v59 = vadd.f32 %v2440_v32, %v9526_v61  ;;  %v9824_v34 = vcombine.high %v5384_v37, %v5388_v63  ;;  %v5396_v50 = vld [vmem:[#allocation9 + $0x238] sm:$0xff] }
 0x41d   :  { %11233 = vst [vmem:[#allocation27_spill] sm:$0xff] %v9815_v55  ;;  %v2444_v60 = vpop.f32.mrb[52].mxu1  ;;  %3834 = vmatmul.mubr.bf16.gmra.mrb[100].mxu1 %v9568_v9  ;;  %6618 = vmatprep.subr.bf16.mxu0 %v9796_v24  ;;  %v5551_v40 = vshrl.u32 %v5284_v44, 16  ;;  %v5554_v38 = vshll.u32 %v5284_v44, 16  ;;  %v8187_v56 = vcombine.low %v9787_v45, %v9789_v25  ;;  %v8196_v44 = vcombine.high %v9817_v17, %v9819_v33  ;;  %v9837_v25 = vld [vmem:[#allocation9 + $0x1d0] sm:$0xff] }
 0x41e   :  { %11234 = vst [vmem:[#allocation28_spill] sm:$0xff] %v9824_v34  ;;  %v2445_v19 = vadd.f32 %v2444_v60, %v9522_v58  ;;  %v2446_v41 = vpop.f32.mrb[53].mxu1  ;;  %3843 = vmatprep.mubr.bf16.mxu1 %v9587_v15  ;;  %3903 = vmatpush1.bf16.msra.mxu1 %v8179_v8  ;;  %v5544_v1 = vrot.slane %v5542_v16, 6  ;;  %v5547_v32 = vrot.slane %v5545_v0, 7  ;;  %v2513_v18 = vmax.f32 %v2439_v7, 0.0  ;;  %v9839_v16 = vld [vmem:[#allocation9 + $0x1f0] sm:$0xff] }
 0x41f   :  { %v2447_v42 = vadd.f32 %v2446_v41, %v9526_v61  ;;  %v2448_v24 = vpop.f32.mrb[54].mxu1  ;;  %3904 = vmatprep.subr.bf16.mxu1 %v8188_v53  ;;  %6443 = vmatmul.mubr.bf16.gmra.mrb[72].mxu0 %v9803_v30  ;;  %v5553_v60 = vrot.slane %v5551_v40, 6  ;;  %v5556_v10 = vrot.slane %v5554_v38, 7  ;;  %v9835_v45 = vcombine.low %v5384_v37, %v5388_v63  ;;  %v5400_v7 = vld [vmem:[#allocation9 + $0x258] sm:$0xff] }
 0x420   :  { %v2515_v8 = vmax.f32 %v2445_v19, 0.0  ;;  %v2450_v15 = vpop.f32.mrb[55].mxu1  ;;  %6619 = vmatpush1.bf16.msra.mxu0 %v9815_v55  ;;  %v9841_v0 = vor.u32 %v5547_v32, %v5544_v1  ;;  %v2514_v53 = vmax.f32 %v2441_v59, 0.0  ;;  %v9846_v40 = vcombine.high %v5392_v5, %v5396_v50  ;;  %v5404_v38 = vld [vmem:[#allocation9 + $0x278] sm:$0xff] }
 0x421   :  { %11235 = vst [vmem:[#allocation29_spill] sm:$0xff] %v9835_v45  ;;  %v2516_v41 = vmax.f32 %v2447_v42, 0.0  ;;  %6620 = vmatprep.subr.bf16.mxu0 %v9824_v34  ;;  %v9844_v30 = vor.u32 %v5556_v10, %v5553_v60  ;;  %v8195_v37 = vcombine.low %v9817_v17, %v9819_v33  ;;  %v9855_v59 = vcombine.low %v5392_v5, %v5396_v50  ;;  %v9866_v17 = vld [vmem:[#allocation9 + $0x210] sm:$0xff]  ;;  %v5408_v50 = vld [vmem:[#allocation9 + $0x298] sm:$0xff] }
 0x422   :  { %11236 = vst [vmem:[#allocation30_spill] sm:$0xff] %v9846_v40  ;;  %v5285_v19 = vpack.c.bf16 %v2515_v8, %v2513_v18  ;;  %3905 = vmatpush1.bf16.msra.mxu1 %v8187_v56  ;;  %v9853_v63 = vsel %vm2853_vm7, %v9791_v62, %v9841_v0  ;;  %v8203_v10 = vcombine.low %v9837_v25, %v9839_v16  ;;  %v9868_v33 = vld [vmem:[#allocation9 + $0x230] sm:$0xff] }
 0x423   :  { %11237 = vst [vmem:[#allocation31_spill] sm:$0xff] %v9853_v63  ;;  %v5286_v42 = vpack.c.bf16 %v2516_v41, %v2514_v53  ;;  %3906 = vmatprep.subr.bf16.mxu1 %v8196_v44  ;;  %v8204_v1 = vcombine.high %v9837_v25, %v9839_v16  ;;  %v9864_v18 = vsel %vm2853_vm7, %v9794_v12, %v9844_v30  ;;  %v5412_v44 = vld [vmem:[#allocation9 + $0x2b8] sm:$0xff] }
 0x424   :  { %v2449_v62 = vadd.f32 %v2448_v24, %v9522_v58  ;;  %6621 = vmatpush1.bf16.msra.mxu0 %v9835_v45  ;;  %6452 = vmatprep.mubr.bf16.mxu0 %v9864_v18  ;;  %v9873_v56 = vcombine.high %v5400_v7, %v5404_v38  ;;  %v5560_v32 = vshrl.u32 %v5285_v19, 16  ;;  %v5563_v5 = vshll.u32 %v5285_v19, 16 }
 0x425   :  { %v2451_v60 = vadd.f32 %v2450_v15, %v9526_v61  ;;  %v2454_v12 = vpop.f32.mrb[56].mxu1  ;;  %3844 = vmatmul.mubr.bf16.gmra.mrb[104].mxu1 %v9584_v6  ;;  %6622 = vmatprep.subr.bf16.mxu0 %v9846_v40  ;;  %v9878_v8 = vcombine.low %v5400_v7, %v5404_v38  ;;  %v5569_v24 = vshrl.u32 %v5286_v42, 16  ;;  %v5572_v25 = vshll.u32 %v5286_v42, 16 }
 0x426   :  { %v2455_v16 = vadd.f32 %v2454_v12, %v9522_v58  ;;  %v2456_v53 = vpop.f32.mrb[57].mxu1  ;;  %3853 = vmatprep.mubr.bf16.mxu1 %v9603_v47  ;;  %3907 = vmatpush1.bf16.msra.mxu1 %v8195_v37  ;;  %v8212_v41 = vcombine.high %v9866_v17, %v9868_v33  ;;  %v5562_v19 = vrot.slane %v5560_v32, 6  ;;  %v5565_v15 = vrot.slane %v5563_v5, 7  ;;  %v2799_v47 = vld [vmem:[#allocation9 + $0x250] sm:$0xff] }
 0x427   :  { %v2457_v45 = vadd.f32 %v2456_v53, %v9526_v61  ;;  %v2458_v34 = vpop.f32.mrb[58].mxu1  ;;  %3908 = vmatprep.subr.bf16.mxu1 %v8204_v1  ;;  %6453 = vmatmul.mubr.bf16.gmra.mrb[76].mxu0 %v9853_v63  ;;  %v5571_v7 = vrot.slane %v5569_v24, 6  ;;  %v5574_v38 = vrot.slane %v5572_v25, 7  ;;  %v9886_v42 = vcombine.high %v5408_v50, %v5412_v44  ;;  %v2803_v32 = vld [vmem:[#allocation9 + $0x270] sm:$0xff] }
 0x428   :  { %v2517_v12 = vmax.f32 %v2449_v62, 0.0  ;;  %v2519_v40 = vmax.f32 %v2455_v16, 0.0  ;;  %v2459_v55 = vadd.f32 %v2458_v34, %v9522_v58  ;;  %v2460_v37 = vpop.f32.mrb[59].mxu1  ;;  %6623 = vmatpush1.bf16.msra.mxu0 %v9855_v59  ;;  %v5566_v5 = vor.u32 %v5565_v15, %v5562_v19  ;;  %v5416_v34 = vld [vmem:[#allocation9 + $0x2d8] sm:$0xff] }
 0x429   :  { %v2518_v6 = vmax.f32 %v2451_v60, 0.0  ;;  %v2520_v53 = vmax.f32 %v2457_v45, 0.0  ;;  %v2461_v1 = vadd.f32 %v2460_v37, %v9526_v61  ;;  %6624 = vmatprep.subr.bf16.mxu0 %v9873_v56  ;;  %v5575_v24 = vor.u32 %v5574_v38, %v5571_v7  ;;  %v5420_v16 = vld [vmem:[#allocation9 + $0x2f8] sm:$0xff] }
 0x42a   :  { %v5287_v25 = vpack.c.bf16 %v2519_v40, %v2517_v12  ;;  %v2521_v63 = vmax.f32 %v2459_v55, 0.0  ;;  %3909 = vmatpush1.bf16.msra.mxu1 %v8203_v10  ;;  %v8211_v62 = vcombine.low %v9866_v17, %v9868_v33  ;;  %v9896_v58 = vsel %vm2853_vm7, %v9841_v0, %v5566_v5  ;;  %v2807_v10 = vld [vmem:[#allocation9 + $0x290] sm:$0xff]  ;;  %v5424_v7 = vld [vmem:[#allocation9 + $0x318] sm:$0xff] }
 0x42b   :  { %v5288_v19 = vpack.c.bf16 %v2520_v53, %v2518_v6  ;;  %v2522_v60 = vmax.f32 %v2461_v1, 0.0  ;;  %3910 = vmatprep.subr.bf16.mxu1 %v8212_v41  ;;  %v8220_v45 = vcombine.high %v2799_v47, %v2803_v32  ;;  %v9900_v61 = vsel %vm2853_vm7, %v9844_v30, %v5575_v24  ;;  %v2811_v0 = vld [vmem:[#allocation9 + $0x2b0] sm:$0xff]  ;;  %v5428_v38 = vld [vmem:[#allocation9 + $0x338] sm:$0xff] }
 0x42c   :  { %v5289_v40 = vpack.c.bf16 %v2521_v63, %v2521_v63  ;;  %6625 = vmatpush1.bf16.msra.mxu0 %v9878_v8  ;;  %6462 = vmatprep.mubr.bf16.mxu0 %v9900_v61  ;;  %v9904_v55 = vcombine.low %v5408_v50, %v5412_v44  ;;  %v5578_v17 = vshrl.u32 %v5287_v25, 16  ;;  %v5581_v33 = vshll.u32 %v5287_v25, 16  ;;  %v2815_v25 = vld [vmem:[#allocation9 + $0x2d0] sm:$0xff] }
 0x42d   :  { %v5290_v15 = vpack.c.bf16 %v2522_v60, %v2522_v60  ;;  %3854 = vmatmul.mubr.bf16.gmra.mrb[108].mxu1 %v9600_v21  ;;  %6626 = vmatprep.subr.bf16.mxu0 %v9886_v42  ;;  %v9908_v6 = vcombine.high %v5416_v34, %v5420_v16  ;;  %v5587_v30 = vshrl.u32 %v5288_v19, 16  ;;  %v5590_v41 = vshll.u32 %v5288_v19, 16  ;;  %v2819_v19 = vld [vmem:[#allocation9 + $0x2f0] sm:$0xff] }
 0x42e   :  { %11238 = vst [vmem:[#allocation32_spill] sm:$0xff] %v9904_v55  ;;  %5305 = vst [vmem:[#allocation2 + $0x80] sm:$0xf] %v5289_v40  ;;  %3863 = vmatprep.mubr.bf16.mxu1 %v9619_v48  ;;  %3911 = vmatpush1.bf16.msra.mxu1 %v8211_v62  ;;  %v8219_v63 = vcombine.low %v2799_v47, %v2803_v32  ;;  %v5580_v50 = vrot.slane %v5578_v17, 6  ;;  %v5583_v44 = vrot.slane %v5581_v33, 7  ;;  %v5432_v40 = vld [vmem:[#allocation9 + $0x358] sm:$0xff] }
 0x42f   :  { %11239 = vst [vmem:[#allocation33_spill] sm:$0xff] %v9908_v6  ;;  %5306 = vst [vmem:[#allocation2 + $0x88] sm:$0xf] %v5290_v15  ;;  %3912 = vmatprep.subr.bf16.mxu1 %v8220_v45  ;;  %6463 = vmatmul.mubr.bf16.gmra.mrb[80].mxu0 %v9896_v58  ;;  %v8228_v12 = vcombine.high %v2807_v10, %v2811_v0  ;;  %v5589_v37 = vrot.slane %v5587_v30, 6  ;;  %v5592_v53 = vrot.slane %v5590_v41, 7  ;;  %v5436_v17 = vld [vmem:[#allocation9 + $0x378] sm:$0xff] }
 0x430   :  { %6627 = vmatpush1.bf16.msra.mxu0 %v9904_v55  ;;  %v9913_v1 = vcombine.low %v5416_v34, %v5420_v16  ;;  %v9915_v60 = vor.u32 %v5583_v44, %v5580_v50  ;;  %v9918_v32 = vcombine.high %v5424_v7, %v5428_v38  ;;  %v8227_v62 = vcombine.low %v2807_v10, %v2811_v0  ;;  %v2823_v15 = vld [vmem:[#allocation9 + $0x310] sm:$0xff]  ;;  %v5440_v50 = vld [vmem:[#allocation9 + $0x398] sm:$0xff] }
 0x431   :  { %6628 = vmatprep.subr.bf16.mxu0 %v9908_v6  ;;  %v5593_v47 = vor.u32 %v5592_v53, %v5589_v37  ;;  %v8236_v34 = vcombine.high %v2815_v25, %v2819_v19  ;;  %v9929_v33 = vcombine.low %v5424_v7, %v5428_v38  ;;  %v2827_v30 = vld [vmem:[#allocation9 + $0x330] sm:$0xff]  ;;  %v5444_v44 = vld [vmem:[#allocation9 + $0x3b8] sm:$0xff]  ;;  %v9938_v37 = vcombine.low %v5432_v40, %v5436_v17 }
 0x432   :  { %11240 = vst [vmem:[#allocation34_spill] sm:$0xff] %v9913_v1  ;;  %11241 = vst [vmem:[#allocation35_spill] sm:$0xff] %v9918_v32  ;;  %3913 = vmatpush1.bf16.msra.mxu1 %v8219_v63  ;;  %v9922_v45 = vsel %vm2853_vm7, %v5566_v5, %v9915_v60  ;;  %v9933_v5 = vcombine.high %v5432_v40, %v5436_v17  ;;  %v5452_v6 = vld [vmem:[#allocation9 + $0x3f8] sm:$0xff]  ;;  %v8243_v55 = vcombine.low %v2823_v15, %v2827_v30 }
 0x433   :  { %11242 = vst [vmem:[#allocation36_spill] sm:$0xff] %v9922_v45  ;;  %3914 = vmatprep.subr.bf16.mxu1 %v8228_v12  ;;  %v9925_v16 = vsel %vm2853_vm7, %v5575_v24, %v5593_v47  ;;  %v8235_v24 = vcombine.low %v2815_v25, %v2819_v19  ;;  %v8244_v12 = vcombine.high %v2823_v15, %v2827_v30  ;;  %v2831_v25 = vld [vmem:[#allocation9 + $0x350] sm:$0xff] }
 0x434   :  { %6629 = vmatpush1.bf16.msra.mxu0 %v9913_v1  ;;  %6472 = vmatprep.mubr.bf16.mxu0 %v9925_v16  ;;  %v2835_v19 = vld [vmem:[#allocation9 + $0x370] sm:$0xff]  ;;  %v9944_v17 = vcombine.low %v5440_v50, %v5444_v44 }
 0x435   :  { %3864 = vmatmul.mubr.bf16.gmra.mrb[112].mxu1 %v9616_v28  ;;  %6630 = vmatprep.subr.bf16.mxu0 %v9918_v32  ;;  %v5323_v10 = vld [vmem:[#allocation2 + $0x80] sm:$0x3f]  ;;  %v8252_v40 = vcombine.high %v2831_v25, %v2835_v19  ;;  %v8251_v15 = vcombine.low %v2831_v25, %v2835_v19  ;;  %v11256_v25 = vld [vmem:[#allocation29_spill] sm:$0xff] }
 0x436   :  { %3873 = vmatprep.mubr.bf16.mxu1 %v9641_v27  ;;  %3915 = vmatpush1.bf16.msra.mxu1 %v8227_v62  ;;  %v5324_v0 = vld [vmem:[#allocation2 + $0x88] sm:$0x3f]  ;;  %v5596_v41 = vshrl.u32 %v5323_v10, 16  ;;  %v5599_v63 = vshll.u32 %v5323_v10, 16  ;;  %v9941_v10 = vcombine.high %v5440_v50, %v5444_v44  ;;  %v2847_v50 = vld [vmem:[#allocation9 + $0x3d0] sm:$0xff] }
 0x437   :  { %3916 = vmatprep.subr.bf16.mxu1 %v8236_v34  ;;  %6473 = vmatmul.mubr.bf16.gmra.mrb[84].mxu0 %v9922_v45  ;;  %v5605_v7 = vshrl.u32 %v5324_v0, 16  ;;  %v5608_v38 = vshll.u32 %v5324_v0, 16  ;;  %v5448_v45 = vld [vmem:[#allocation9 + $0x3d8] sm:$0xff]  ;;  %v2851_v44 = vld [vmem:[#allocation9 + $0x3f0] sm:$0xff] }
 0x438   :  { %6631 = vmatpush1.bf16.msra.mxu0 %v9929_v33  ;;  %v5598_v53 = vrot.slane %v5596_v41, 6  ;;  %v5601_v32 = vrot.slane %v5599_v63, 7  ;;  %v2839_v63 = vld [vmem:[#allocation9 + $0x390] sm:$0xff]  ;;  %v9961_v30 = vcombine.low %v5448_v45, %v5452_v6 }
 0x439   :  { %v5607_v1 = vrot.slane %v5605_v7, 6  ;;  %v5610_v62 = vrot.slane %v5608_v38, 7  ;;  %6632 = vmatprep.subr.bf16.mxu0 %v9933_v5  ;;  %v11252_v38 = vld [vmem:[#allocation19_spill] sm:$0xff]  ;;  %v11257_v19 = vld [vmem:[#allocation30_spill] sm:$0xff] }
 0x43a   :  { %3917 = vmatpush1.bf16.msra.mxu1 %v8235_v24  ;;  %v5602_v34 = vor.u32 %v5601_v32, %v5598_v53  ;;  %v2843_v24 = vld [vmem:[#allocation9 + $0x3b0] sm:$0xff]  ;;  %v9951_v32 = vcombine.high %v5448_v45, %v5452_v6  ;;  %v11251_v45 = vld [vmem:[#allocation17_spill] sm:$0xff]  ;;  %v11254_v53 = vld [vmem:[#allocation28_spill] sm:$0xff] }
 0x43b   :  { %v5611_v0 = vor.u32 %v5610_v62, %v5607_v1  ;;  %3918 = vmatprep.subr.bf16.mxu1 %v8244_v12  ;;  %v8259_v7 = vcombine.low %v2839_v63, %v2843_v24  ;;  %v11248_v6 = vld [vmem:[#allocation26_spill] sm:$0xff]  ;;  %v11253_v12 = vld [vmem:[#allocation27_spill] sm:$0xff] }
 0x43c   :  { %6633 = vmatpush1.bf16.msra.mxu0 %v9938_v37  ;;  %v9957_v1 = vsel %vm2853_vm7, %v9915_v60, %v5602_v34  ;;  %v8267_v60 = vcombine.low %v2847_v50, %v2851_v44  ;;  %v11255_v62 = vld [vmem:[#allocation31_spill] sm:$0xff]  ;;  %v11258_v34 = vld [vmem:[#allocation32_spill] sm:$0xff] }
 0x43d   :  { %v9947_v41 = vsel %vm2853_vm7, %v5593_v47, %v5611_v0  ;;  %3874 = vmatmul.mubr.bf16.gmra.mrb[116].mxu1 %v9636_v13  ;;  %6634 = vmatprep.subr.bf16.mxu0 %v9941_v10  ;;  %v8260_v47 = vcombine.high %v2839_v63, %v2843_v24  ;;  %v11259_v0 = vld [vmem:[#allocation33_spill] sm:$0xff] }
 0x43e   :  { %6482 = vmatprep.mubr.bf16.mxu0 %v9947_v41  ;;  %3883 = vmatprep.mubr.bf16.mxu1 %v9681_v35 }
 0x43f   :  { %3919 = vmatpush1.bf16.msra.mxu1 %v8243_v55  ;;  %6483 = vmatmul.mubr.bf16.gmra.mrb[88].mxu0 %v9957_v1  ;;  %v8268_v55 = vcombine.high %v2847_v50, %v2851_v44 }
 0x440   :  { %3920 = vmatprep.subr.bf16.mxu1 %v8252_v40  ;;  %6635 = vmatpush1.bf16.msra.mxu0 %v9944_v17  ;;  %v11260_v40 = vld [vmem:[#allocation36_spill] sm:$0xff] }
 0x441   :  { %6638 = vmatprep.mubr.bf16.mxu0 %v9690_v29  ;;  %6636 = vmatprep.subr.bf16.mxu0 %v9951_v32 }
 0x443   :  { %3921 = vmatpush1.bf16.msra.mxu1 %v8251_v15 }
 0x444   :  { %3922 = vmatprep.subr.bf16.mxu1 %v8260_v47  ;;  %6637 = vmatpush1.bf16.msra.mxu0 %v9961_v30 }
 0x445   :  { %3884 = vmatmul.mubr.bf16.gmra.mrb[120].mxu1 %v9686_v43 }
 0x446   :  { %3926 = vmatprep.mubr.bf16.mxu1 %v9537_v2 }
 0x447   :  { %3923 = vmatpush1.bf16.msra.mxu1 %v8259_v7  ;;  %6639 = vmatmul.mubr.bf16.vlgmr.msra.gmra.mrb[92].mxu0 %v9696_v4 }
 0x448   :  { %3924 = vmatprep.subr.bf16.mxu1 %v8268_v55  ;;  %6648 = vmatprep.mubr.bf16.mxu0 %v9718_v22 }
 0x44b   :  { %3925 = vmatpush1.bf16.msra.mxu1 %v8267_v60 }
 0x44c   :  { %4007 = vmatprep.subr.bf16.mxu1 %v9512_v51  ;;  %v11243_v51 = vld [vmem:[#allocation20_spill] sm:$0xff] }
 0x44e   :  { %3927 = vmatmul.mubr.bf16.vlgmr.msra.gmra.mrb[124].mxu1 %v9542_v57 }
 0x44f   :  { %3936 = vmatprep.mubr.bf16.mxu1 %v9555_v39  ;;  %4008 = vmatpush1.bf16.msra.mxu1 %v9514_v52  ;;  %v11244_v52 = vld [vmem:[#allocation21_spill] sm:$0xff] }
 0x450   :  { %4009 = vmatprep.subr.bf16.mxu1 %v9676_v36  ;;  %6649 = vmatmul.mubr.bf16.gmra.mrb[96].mxu0 %v9713_v3  ;;  %v11245_v36 = vld [vmem:[#allocation18_spill] sm:$0xff] }
 0x451   :  { %6658 = vmatprep.mubr.bf16.mxu0 %v9761_v49 }
 0x453   :  { %4010 = vmatpush1.bf16.msra.mxu1 %v9703_v14  ;;  %v11246_v14 = vld [vmem:[#allocation22_spill] sm:$0xff] }
 0x454   :  { %4011 = vmatprep.subr.bf16.mxu1 %v9706_v11  ;;  %v11247_v11 = vld [vmem:[#allocation23_spill] sm:$0xff] }
 0x456   :  { %3937 = vmatmul.mubr.bf16.gmra.mrb[128].mxu1 %v9552_v54 }
 0x457   :  { %3946 = vmatprep.mubr.bf16.mxu1 %v9571_v23  ;;  %4012 = vmatpush1.bf16.msra.mxu1 %v9722_v46  ;;  %v11249_v46 = vld [vmem:[#allocation24_spill] sm:$0xff] }
 0x458   :  { %4013 = vmatprep.subr.bf16.mxu1 %v9731_v20  ;;  %6659 = vmatmul.mubr.bf16.gmra.mrb[100].mxu0 %v9755_v26  ;;  %v11250_v20 = vld [vmem:[#allocation25_spill] sm:$0xff] }
 0x459   :  { %6668 = vmatprep.mubr.bf16.mxu0 %v9810_v31 }
 0x45b   :  { %4014 = vmatpush1.bf16.msra.mxu1 %v11243_v51 }
 0x45c   :  { %4015 = vmatprep.subr.bf16.mxu1 %v11244_v52 }
 0x45e   :  { %3947 = vmatmul.mubr.bf16.gmra.mrb[132].mxu1 %v9568_v9 }
 0x45f   :  { %3956 = vmatprep.mubr.bf16.mxu1 %v11245_v36  ;;  %4016 = vmatpush1.bf16.msra.mxu1 %v11246_v14 }
 0x460   :  { %4017 = vmatprep.subr.bf16.mxu1 %v11247_v11  ;;  %6669 = vmatmul.mubr.bf16.gmra.mrb[104].mxu0 %v11248_v6 }
 0x461   :  { %6678 = vmatprep.mubr.bf16.mxu0 %v9864_v18 }
 0x463   :  { %4018 = vmatpush1.bf16.msra.mxu1 %v11249_v46 }
 0x464   :  { %4019 = vmatprep.subr.bf16.mxu1 %v11250_v20 }
 0x466   :  { %3957 = vmatmul.mubr.bf16.gmra.mrb[136].mxu1 %v11251_v45 }
 0x467   :  { %3966 = vmatprep.mubr.bf16.mxu1 %v11252_v38  ;;  %4020 = vmatpush1.bf16.msra.mxu1 %v11253_v12 }
 0x468   :  { %4021 = vmatprep.subr.bf16.mxu1 %v11254_v53  ;;  %6679 = vmatmul.mubr.bf16.gmra.mrb[108].mxu0 %v11255_v62 }
 0x469   :  { %6688 = vmatprep.mubr.bf16.mxu0 %v9900_v61 }
 0x46b   :  { %4022 = vmatpush1.bf16.msra.mxu1 %v11256_v25 }
 0x46c   :  { %4023 = vmatprep.subr.bf16.mxu1 %v11257_v19 }
 0x46e   :  { %3967 = vmatmul.mubr.bf16.gmra.mrb[140].mxu1 %v9600_v21 }
 0x46f   :  { %3976 = vmatprep.mubr.bf16.mxu1 %v9619_v48  ;;  %4024 = vmatpush1.bf16.msra.mxu1 %v9855_v59  ;;  %v11261_v59 = vld [vmem:[#allocation34_spill] sm:$0xff] }
 0x470   :  { %4025 = vmatprep.subr.bf16.mxu1 %v9873_v56  ;;  %6689 = vmatmul.mubr.bf16.gmra.mrb[112].mxu0 %v9896_v58  ;;  %v11262_v56 = vld [vmem:[#allocation35_spill] sm:$0xff] }
 0x471   :  { %6698 = vmatprep.mubr.bf16.mxu0 %v9925_v16 }
 0x473   :  { %4026 = vmatpush1.bf16.msra.mxu1 %v9878_v8 }
 0x474   :  { %4027 = vmatprep.subr.bf16.mxu1 %v9886_v42 }
 0x476   :  { %3977 = vmatmul.mubr.bf16.gmra.mrb[144].mxu1 %v9616_v28 }
 0x477   :  { %3986 = vmatprep.mubr.bf16.mxu1 %v9641_v27  ;;  %4028 = vmatpush1.bf16.msra.mxu1 %v11258_v34 }
 0x478   :  { %4029 = vmatprep.subr.bf16.mxu1 %v11259_v0  ;;  %6699 = vmatmul.mubr.bf16.gmra.mrb[116].mxu0 %v11260_v40 }
 0x479   :  { %6708 = vmatprep.mubr.bf16.mxu0 %v9947_v41 }
 0x47b   :  { %4030 = vmatpush1.bf16.msra.mxu1 %v11261_v59 }
 0x47c   :  { %4031 = vmatprep.subr.bf16.mxu1 %v11262_v56 }
 0x47e   :  { %3987 = vmatmul.mubr.bf16.gmra.mrb[148].mxu1 %v9636_v13 }
 0x47f   :  { %3996 = vmatprep.mubr.bf16.mxu1 %v9681_v35  ;;  %4032 = vmatpush1.bf16.msra.mxu1 %v9929_v33  ;;  %v10038_v33 = vld [vmem:[%s11183_s6] ss:$0 sm:$0xff] }
 0x480   :  { %4033 = vmatprep.subr.bf16.mxu1 %v9933_v5  ;;  %6709 = vmatmul.mubr.bf16.gmra.mrb[120].mxu0 %v9957_v1 }
 0x483   :  { %4034 = vmatpush1.bf16.msra.mxu1 %v9938_v37 }
 0x484   :  { %4035 = vmatprep.subr.bf16.mxu1 %v9941_v10 }
 0x486   :  { %3997 = vmatmul.mubr.bf16.gmra.mrb[152].mxu1 %v9686_v43 }
 0x487   :  { %4036 = vmatpush1.bf16.msra.mxu1 %v9944_v17  ;;  %4039 = vmatprep.mubr.bf16.mxu1 %v9537_v2 }
 0x488   :  { %4037 = vmatprep.subr.bf16.mxu1 %v9951_v32 }
 0x48b   :  { %4038 = vmatpush1.bf16.msra.mxu1 %v9961_v30 }
 0x48e   :  { %4040 = vmatmul.mubr.bf16.vlgmr.msra.gmra.mrb[156].mxu1 %v9542_v57 }
 0x48f   :  { %4049 = vmatprep.mubr.bf16.mxu1 %v9555_v39 }
 0x496   :  { %4050 = vmatmul.mubr.bf16.gmra.mrb[160].mxu1 %v9552_v54 }
 0x497   :  { %4059 = vmatprep.mubr.bf16.mxu1 %v9571_v23 }
 0x49a   :  { %v3704_v8 = vpop.f32.mrb[60].mxu1 }
 0x49b   :  { %v3706_v42 = vpop.f32.mrb[61].mxu1  ;;  %v4127_v57 = vadd.f32 %v10038_v33, %v3704_v8 }
 0x49c   :  { %v3708_v2 = vpop.f32.mrb[62].mxu1  ;;  %v4157_v37 = vrot.slane %v3706_v42, 1 }
 0x49d   :  { %v3710_v5 = vpop.f32.mrb[63].mxu1  ;;  %v4128_v32 = vadd.f32 %v10038_v33, %v3708_v2 }
 0x49e   :  { %4060 = vmatmul.mubr.bf16.gmra.mrb[164].mxu1 %v9568_v9  ;;  %v4158_v10 = vrot.slane %v3710_v5, 1  ;;  %v8957_v5 = vld [vmem:[#allocation11] ss:$8 sps:$4 sm:$0xff]  }
 0x49f   :  { %4069 = vmatprep.mubr.bf16.mxu1 %v11245_v36 }
 0x4a0   :  { %v4159_v54 = vsel %vm2584_vm0, %v4157_v37, %v4158_v10  ;;  %v8959_v37 = vld [vmem:[#allocation11 + $0x4] ss:$8 sps:$4 sm:$0xff]  }
 0x4a1   :  { %v10044_v39 = vadd.f32 %v4159_v54, %v4127_v57  ;;  %4802 = vmatprep.subr.bf16.mxu1 %v8959_v37 }
 0x4a2   :  { %v3714_v23 = vpop.f32.mrb[64].mxu1  ;;  %4803 = vmatpush1.bf16.msra.mxu1 %v8957_v5 }
 0x4a3   :  { %v3716_v17 = vpop.f32.mrb[65].mxu1  ;;  %v4129_v30 = vadd.f32 %v10038_v33, %v3714_v23 }
 0x4a4   :  { %v4160_v63 = vrot.slane %v3716_v17, 1  ;;  %v3718_v24 = vpop.f32.mrb[66].mxu1 }
 0x4a5   :  { %v3720_v15 = vpop.f32.mrb[67].mxu1  ;;  %v4130_v36 = vadd.f32 %v10038_v33, %v3718_v24 }
 0x4a6   :  { %4070 = vmatmul.mubr.bf16.gmra.mrb[168].mxu1 %v11251_v45  ;;  %v4161_v9 = vsel %vm2584_vm0, %v4158_v10, %v4160_v63  ;;  %v4162_v47 = vrot.slane %v3720_v15, 1 }
 0x4a7   :  { %4079 = vmatprep.mubr.bf16.mxu1 %v11252_v38  ;;  %v10051_v50 = vadd.f32 %v4161_v9, %v4128_v32 }
 0x4a8   :  { %v4163_v44 = vsel %vm2584_vm0, %v4160_v63, %v4162_v47 }
 0x4a9   :  { %v10054_v7 = vadd.f32 %v4163_v44, %v4129_v30  ;;  %v8962_v30 = vld [vmem:[#allocation11 + $0x14] ss:$8 sps:$4 sm:$0xff]  }
 0x4aa   :  { %v3724_v55 = vpop.f32.mrb[68].mxu1  ;;  %4804 = vmatprep.subr.bf16.mxu1 %v8962_v30 }
 0x4ab   :  { %v3726_v60 = vpop.f32.mrb[69].mxu1  ;;  %v4131_v20 = vadd.f32 %v10038_v33, %v3724_v55 }
 0x4ac   :  { %v4164_v51 = vrot.slane %v3726_v60, 1  ;;  %v3728_v52 = vpop.f32.mrb[70].mxu1 }
 0x4ad   :  { %v3730_v14 = vpop.f32.mrb[71].mxu1  ;;  %v4132_v0 = vadd.f32 %v10038_v33, %v3728_v52 }
 0x4ae   :  { %4080 = vmatmul.mubr.bf16.gmra.mrb[172].mxu1 %v9600_v21  ;;  %v4165_v11 = vsel %vm2584_vm0, %v4162_v47, %v4164_v51  ;;  %v4166_v46 = vrot.slane %v3730_v14, 1  ;;  %v8960_v47 = vld [vmem:[#allocation11 + $0x10] ss:$8 sps:$4 sm:$0xff]  }
 0x4af   :  { %4089 = vmatprep.mubr.bf16.mxu1 %v9619_v48  ;;  %v10061_v45 = vadd.f32 %v4165_v11, %v4130_v36  ;;  %4805 = vmatpush1.bf16.msra.mxu1 %v8960_v47 }
 0x4b0   :  { %v4167_v38 = vsel %vm2584_vm0, %v4164_v51, %v4166_v46 }
 0x4b1   :  { %v10064_v12 = vadd.f32 %v4167_v38, %v4131_v20  ;;  %v8963_v38 = vld [vmem:[#allocation11 + $0x20] ss:$8 sps:$4 sm:$0xff]  }
 0x4b2   :  { %v3734_v53 = vpop.f32.mrb[72].mxu1 }
 0x4b3   :  { %v3736_v25 = vpop.f32.mrb[73].mxu1  ;;  %v4133_v56 = vadd.f32 %v10038_v33, %v3734_v53  ;;  %v8965_v53 = vld [vmem:[#allocation11 + $0x24] ss:$8 sps:$4 sm:$0xff]  }
 0x4b4   :  { %v4168_v19 = vrot.slane %v3736_v25, 1  ;;  %v3738_v34 = vpop.f32.mrb[74].mxu1  ;;  %4806 = vmatprep.subr.bf16.mxu1 %v8965_v53 }
 0x4b5   :  { %v3740_v21 = vpop.f32.mrb[75].mxu1  ;;  %v4134_v23 = vadd.f32 %v10038_v33, %v3738_v34  ;;  %4807 = vmatpush1.bf16.msra.mxu1 %v8963_v38 }
 0x4b6   :  { %4090 = vmatmul.mubr.bf16.gmra.mrb[176].mxu1 %v9616_v28  ;;  %v4169_v59 = vsel %vm2584_vm0, %v4166_v46, %v4168_v19  ;;  %v4170_v48 = vrot.slane %v3740_v21, 1 }
 0x4b7   :  { %4099 = vmatprep.mubr.bf16.mxu1 %v9641_v27  ;;  %v10071_v8 = vadd.f32 %v4169_v59, %v4132_v0 }
 0x4b8   :  { %v4171_v42 = vsel %vm2584_vm0, %v4168_v19, %v4170_v48 }
 0x4b9   :  { %v10074_v2 = vadd.f32 %v4171_v42, %v4133_v56 }
 0x4ba   :  { %v3744_v10 = vpop.f32.mrb[76].mxu1 }
 0x4bb   :  { %v3746_v57 = vpop.f32.mrb[77].mxu1  ;;  %v4135_v24 = vadd.f32 %v10038_v33, %v3744_v10  ;;  %v8966_v10 = vld [vmem:[#allocation11 + $0x30] ss:$8 sps:$4 sm:$0xff]  }
 0x4bc   :  { %v4172_v54 = vrot.slane %v3746_v57, 1  ;;  %v3748_v28 = vpop.f32.mrb[78].mxu1  ;;  %v8968_v57 = vld [vmem:[#allocation11 + $0x34] ss:$8 sps:$4 sm:$0xff]  }
 0x4bd   :  { %v3750_v17 = vpop.f32.mrb[79].mxu1  ;;  %v4136_v51 = vadd.f32 %v10038_v33, %v3748_v28  ;;  %4808 = vmatprep.subr.bf16.mxu1 %v8968_v57 }
 0x4be   :  { %4100 = vmatmul.mubr.bf16.gmra.mrb[180].mxu1 %v9636_v13  ;;  %v4173_v27 = vsel %vm2584_vm0, %v4170_v48, %v4172_v54  ;;  %v4174_v63 = vrot.slane %v3750_v17, 1 }
 0x4bf   :  { %4109 = vmatprep.mubr.bf16.mxu1 %v9681_v35  ;;  %v10081_v32 = vadd.f32 %v4173_v27, %v4134_v23  ;;  %4809 = vmatpush1.bf16.msra.mxu1 %v8966_v10  ;;  %v8969_v27 = vld [vmem:[#allocation11 + $0x40] ss:$8 sps:$4 sm:$0xff]  }
 0x4c0   :  { %v4175_v15 = vsel %vm2584_vm0, %v4172_v54, %v4174_v63 }
 0x4c1   :  { %v10084_v9 = vadd.f32 %v4175_v15, %v4135_v24 }
 0x4c2   :  { %v3754_v44 = vpop.f32.mrb[80].mxu1 }
 0x4c3   :  { %v3756_v55 = vpop.f32.mrb[81].mxu1  ;;  %v4137_v14 = vadd.f32 %v10038_v33, %v3754_v44 }
 0x4c4   :  { %v4176_v60 = vrot.slane %v3756_v55, 1  ;;  %v3758_v13 = vpop.f32.mrb[82].mxu1 }
 0x4c5   :  { %v3760_v52 = vpop.f32.mrb[83].mxu1 }
 0x4c6   :  { %4110 = vmatmul.mubr.bf16.gmra.mrb[184].mxu1 %v9686_v43  ;;  %v4177_v35 = vsel %vm2584_vm0, %v4174_v63, %v4176_v60  ;;  %v4178_v36 = vrot.slane %v3760_v52, 1  ;;  %v4138_v43 = vadd.f32 %v10038_v33, %v3758_v13  ;;  %v8971_v63 = vld [vmem:[#allocation11 + $0x44] ss:$8 sps:$4 sm:$0xff]  }
 0x4c7   :  { %v10090_v11 = vadd.f32 %v4177_v35, %v4136_v51  ;;  %4810 = vmatprep.subr.bf16.mxu1 %v8971_v63 }
 0x4c8   :  { %v4179_v46 = vsel %vm2584_vm0, %v4176_v60, %v4178_v36  ;;  %4811 = vmatpush1.bf16.msra.mxu1 %v8969_v27 }
 0x4c9   :  { %v10093_v20 = vadd.f32 %v4179_v46, %v4137_v14 }
 0x4ca   :  { %v3764_v25 = vpop.f32.mrb[84].mxu1 }
 0x4cb   :  { %v3766_v19 = vpop.f32.mrb[85].mxu1  ;;  %v4139_v56 = vadd.f32 %v10038_v33, %v3764_v25 }
 0x4cc   :  { %v4180_v34 = vrot.slane %v3766_v19, 1  ;;  %v3768_v0 = vpop.f32.mrb[86].mxu1  ;;  %v8972_v19 = vld [vmem:[#allocation11 + $0x50] ss:$8 sps:$4 sm:$0xff]  }
 0x4cd   :  { %v3770_v21 = vpop.f32.mrb[87].mxu1  ;;  %v4140_v30 = vadd.f32 %v10038_v33, %v3768_v0 }
 0x4ce   :  { %v4181_v59 = vsel %vm2584_vm0, %v4178_v36, %v4180_v34  ;;  %v4182_v48 = vrot.slane %v3770_v21, 1 }
 0x4cf   :  { %v10098_v42 = vadd.f32 %v4181_v59, %v4138_v43 }
 0x4d0   :  { %v4183_v5 = vsel %vm2584_vm0, %v4180_v34, %v4182_v48  ;;  %v8974_v34 = vld [vmem:[#allocation11 + $0x54] ss:$8 sps:$4 sm:$0xff]  }
 0x4d1   :  { %v10101_v37 = vadd.f32 %v4183_v5, %v4139_v56  ;;  %4812 = vmatprep.subr.bf16.mxu1 %v8974_v34 }
 0x4d2   :  { %4813 = vmatpush1.bf16.msra.mxu1 %v8972_v19 }
 0x4d8   :  { %v3774_v54 = vpop.f32.mrb[88].mxu1 }
 0x4d9   :  { %v4141_v28 = vadd.f32 %v10038_v33, %v3774_v54  ;;  %v3776_v23 = vpop.f32.mrb[89].mxu1  ;;  %v6414_v17 = vpop.f32.mrb[60].mxu0 }
 0x4da   :  { %v4184_v24 = vrot.slane %v3776_v23, 1  ;;  %v3778_v15 = vpop.f32.mrb[90].mxu1  ;;  %v6416_v47 = vpop.f32.mrb[61].mxu0  ;;  %v6831_v51 = vrot.slane %v6414_v17, 2 }
 0x4db   :  { %v3779_v44 = vpop.f32.mrb[91].mxu1  ;;  %v6418_v55 = vpop.f32.mrb[62].mxu0  ;;  %v6908_v14 = vrot.slane %v6416_v47, 3 }
 0x4dc   :  { %v4185_v60 = vsel %vm2584_vm0, %v4182_v48, %v4184_v24  ;;  %v10106_v13 = vadd.f32 %v4184_v24, %v4141_v28  ;;  %v6832_v52 = vrot.slane %v6418_v55, 2  ;;  %v6420_v35 = vpop.f32.mrb[63].mxu0 }
 0x4dd   :  { %v10108_v36 = vadd.f32 %v4185_v60, %v4140_v30  ;;  %v6909_v46 = vrot.slane %v6420_v35, 3 }
 0x4de   :  { %v10111_v38 = vsel %vm4232_vm8, %v6831_v51, %v6832_v52 }
 0x4df   :  { %v10114_v33 = vsel %vm4310_vm9, %v6908_v14, %v6909_v46 }
 0x4e0   :  { %v3815_v53 = vpop.f32.mrb[92].mxu1 }
 0x4e1   :  { %v3817_v25 = vpop.f32.mrb[93].mxu1  ;;  %v4233_v21 = vrot.slane %v3815_v53, 2 }
 0x4e2   :  { %v3819_v0 = vpop.f32.mrb[94].mxu1  ;;  %v6424_v43 = vpop.f32.mrb[64].mxu0  ;;  %v4311_v10 = vrot.slane %v3817_v25, 3 }
 0x4e3   :  { %v4234_v59 = vrot.slane %v3819_v0, 2  ;;  %v3821_v48 = vpop.f32.mrb[95].mxu1  ;;  %v6834_v56 = vrot.slane %v6424_v43, 2  ;;  %v6426_v5 = vpop.f32.mrb[65].mxu0  ;;  %v8975_v43 = vld [vmem:[#allocation11 + $0x60] ss:$8 sps:$4 sm:$0xff]  }
 0x4e4   :  { %v4312_v57 = vrot.slane %v3821_v48, 3  ;;  %v6911_v54 = vrot.slane %v6426_v5, 3  ;;  %v6428_v28 = vpop.f32.mrb[66].mxu0 }
 0x4e5   :  { %v4235_v23 = vsel %vm4232_vm8, %v4233_v21, %v4234_v59  ;;  %v10118_v17 = vsel %vm4232_vm8, %v6832_v52, %v6834_v56  ;;  %v6836_v27 = vrot.slane %v6428_v28, 2  ;;  %v6430_v63 = vpop.f32.mrb[67].mxu0 }
 0x4e6   :  { %v4279_v24 = vadd.f32 %v4235_v23, %v10044_v39  ;;  %v4313_v15 = vsel %vm4310_vm9, %v4311_v10, %v4312_v57  ;;  %v10123_v47 = vsel %vm4310_vm9, %v6909_v46, %v6911_v54  ;;  %v6913_v30 = vrot.slane %v6430_v63, 3 }
 0x4e7   :  { %v10126_v44 = vsel %vm4232_vm8, %v6834_v56, %v6836_v27 }
 0x4e8   :  { %v10128_v55 = vadd.f32 %v4313_v15, %v4279_v24  ;;  %v3825_v60 = vpop.f32.mrb[96].mxu1  ;;  %v10131_v51 = vsel %vm4310_vm9, %v6911_v54, %v6913_v30  ;;  %v8977_v54 = vld [vmem:[#allocation11 + $0x64] ss:$8 sps:$4 sm:$0xff]  }
 0x4e9   :  { %v4236_v52 = vrot.slane %v3825_v60, 2  ;;  %v3827_v35 = vpop.f32.mrb[97].mxu1  ;;  %4814 = vmatprep.subr.bf16.mxu1 %v8977_v54 }
 0x4ea   :  { %v4314_v14 = vrot.slane %v3827_v35, 3  ;;  %v3829_v53 = vpop.f32.mrb[98].mxu1  ;;  %v6434_v39 = vpop.f32.mrb[68].mxu0  ;;  %4815 = vmatpush1.bf16.msra.mxu1 %v8975_v43 }
 0x4eb   :  { %v4237_v25 = vsel %vm4232_vm8, %v4234_v59, %v4236_v52  ;;  %v4238_v19 = vrot.slane %v3829_v53, 2  ;;  %v3831_v46 = vpop.f32.mrb[99].mxu1  ;;  %v6838_v34 = vrot.slane %v6434_v39, 2  ;;  %v6436_v0 = vpop.f32.mrb[69].mxu0 }
 0x4ec   :  { %v4280_v21 = vadd.f32 %v4237_v25, %v10051_v50  ;;  %v4315_v48 = vsel %vm4310_vm9, %v4312_v57, %v4314_v14  ;;  %v4316_v56 = vrot.slane %v3831_v46, 3  ;;  %v6915_v5 = vrot.slane %v6436_v0, 3  ;;  %v6438_v10 = vpop.f32.mrb[70].mxu0 }
 0x4ed   :  { %v4239_v28 = vsel %vm4232_vm8, %v4236_v52, %v4238_v19  ;;  %v10138_v23 = vsel %vm4232_vm8, %v6836_v27, %v6838_v34  ;;  %v6840_v63 = vrot.slane %v6438_v10, 2  ;;  %v6440_v59 = vpop.f32.mrb[71].mxu0 }
 0x4ee   :  { %v10140_v24 = vadd.f32 %v4315_v48, %v4280_v21  ;;  %v4281_v15 = vadd.f32 %v4239_v28, %v10054_v7  ;;  %v4317_v60 = vsel %vm4310_vm9, %v4314_v14, %v4316_v56  ;;  %v10145_v50 = vsel %vm4310_vm9, %v6913_v30, %v6915_v5  ;;  %v8980_v7 = vld [vmem:[#allocation11 + $0x74] ss:$8 sps:$4 sm:$0xff]   ;;  %v8978_v30 = vld [vmem:[#allocation11 + $0x70] ss:$8 sps:$4 sm:$0xff]  }
 0x4ef   :  { %11263 = vst [vmem:[#allocation20_spill] sm:$0xff] %v10145_v50  ;;  %v10148_v57 = vsel %vm4232_vm8, %v6838_v34, %v6840_v63  ;;  %v6917_v35 = vrot.slane %v6440_v59, 3  ;;  %4816 = vmatprep.subr.bf16.mxu1 %v8980_v7 }
 0x4f0   :  { %v10150_v52 = vadd.f32 %v4317_v60, %v4281_v15  ;;  %v3835_v27 = vpop.f32.mrb[100].mxu1  ;;  %4817 = vmatpush1.bf16.msra.mxu1 %v8978_v30  ;;  %v10158_v60 = vld [vmem:[#allocation9] sm:$0xff]  ;;  %v11217_v30 = vmov 0  }
 0x4f1   :  { %v4240_v53 = vrot.slane %v3835_v27, 2  ;;  %v3837_v39 = vpop.f32.mrb[101].mxu1  ;;  %v10153_v25 = vsel %vm4310_vm9, %v6915_v5, %v6917_v35  ;;  %v10160_v27 = vld [vmem:[#allocation9 + $0x20] sm:$0xff]  ;;  %4834 = vmatprep.mubr.bf16.mxu1 %v11217_v30 }
 0x4f2   :  { %11264 = vst [vmem:[#allocation21_spill] sm:$0xff] %v10153_v25  ;;  %v4318_v46 = vrot.slane %v3837_v39, 3  ;;  %v3839_v14 = vpop.f32.mrb[102].mxu1  ;;  %v6444_v0 = vpop.f32.mrb[72].mxu0 }
 0x4f3   :  { %v4241_v21 = vsel %vm4232_vm8, %v4238_v19, %v4240_v53  ;;  %v4242_v48 = vrot.slane %v3839_v14, 2  ;;  %v3841_v34 = vpop.f32.mrb[103].mxu1  ;;  %v6842_v10 = vrot.slane %v6444_v0, 2  ;;  %v6446_v54 = vpop.f32.mrb[73].mxu0 }
 0x4f4   :  { %v4282_v43 = vadd.f32 %v4241_v21, %v10061_v45  ;;  %v4319_v28 = vsel %vm4310_vm9, %v4316_v56, %v4318_v46  ;;  %v4320_v59 = vrot.slane %v3841_v34, 3  ;;  %v6919_v15 = vrot.slane %v6446_v54, 3  ;;  %v6448_v5 = vpop.f32.mrb[74].mxu0 }
 0x4f5   :  { %v4243_v39 = vsel %vm4232_vm8, %v4240_v53, %v4242_v48  ;;  %v10164_v19 = vsel %vm4232_vm8, %v6840_v63, %v6842_v10  ;;  %v6844_v14 = vrot.slane %v6448_v5, 2  ;;  %v6450_v0 = vpop.f32.mrb[75].mxu0  ;;  %v8290_v54 = vcombine.high %v10158_v60, %v10160_v27 }
 0x4f6   :  { %11265 = vst [vmem:[#allocation18_spill] sm:$0xff] %v10164_v19  ;;  %v10166_v7 = vadd.f32 %v4319_v28, %v4282_v43  ;;  %v4283_v45 = vadd.f32 %v4243_v39, %v10064_v12  ;;  %v4321_v56 = vsel %vm4310_vm9, %v4318_v46, %v4320_v59  ;;  %v10171_v21 = vsel %vm4310_vm9, %v6917_v35, %v6919_v15 }
 0x4f7   :  { %11266 = vst [vmem:[#allocation22_spill] sm:$0xff] %v10171_v21  ;;  %v10175_v34 = vsel %vm4232_vm8, %v6842_v10, %v6844_v14  ;;  %v6921_v53 = vrot.slane %v6450_v0, 3  ;;  %6269 = vmatprep.subr.bf16.mxu1 %v8290_v54 }
 0x4f8   :  { %11267 = vst [vmem:[#allocation23_spill] sm:$0xff] %v10175_v34  ;;  %v10181_v43 = vadd.f32 %v4321_v56, %v4283_v45  ;;  %v3845_v12 = vpop.f32.mrb[104].mxu1 }
 0x4f9   :  { %v4244_v46 = vrot.slane %v3845_v12, 2  ;;  %v3847_v28 = vpop.f32.mrb[105].mxu1  ;;  %v10184_v35 = vsel %vm4310_vm9, %v6919_v15, %v6921_v53 }
 0x4fa   :  { %11268 = vst [vmem:[#allocation26_spill] sm:$0xff] %v10184_v35  ;;  %v4322_v5 = vrot.slane %v3847_v28, 3  ;;  %v3849_v39 = vpop.f32.mrb[106].mxu1  ;;  %v6454_v10 = vpop.f32.mrb[76].mxu0 }
 0x4fb   :  { %v4245_v0 = vsel %vm4232_vm8, %v4242_v48, %v4244_v46  ;;  %v4246_v30 = vrot.slane %v3849_v39, 2  ;;  %v3851_v21 = vpop.f32.mrb[107].mxu1  ;;  %v6846_v63 = vrot.slane %v6454_v10, 2  ;;  %v6456_v34 = vpop.f32.mrb[77].mxu0 }
 0x4fc   :  { %v4284_v19 = vadd.f32 %v4245_v0, %v10071_v8  ;;  %v4323_v45 = vsel %vm4310_vm9, %v4320_v59, %v4322_v5  ;;  %v4324_v56 = vrot.slane %v3851_v21, 3  ;;  %v6923_v12 = vrot.slane %v6456_v34, 3  ;;  %v6458_v25 = vpop.f32.mrb[78].mxu0 }
 0x4fd   :  { %v4247_v15 = vsel %vm4232_vm8, %v4244_v46, %v4246_v30  ;;  %v10191_v54 = vsel %vm4232_vm8, %v6844_v14, %v6846_v63  ;;  %v6848_v28 = vrot.slane %v6458_v25, 2  ;;  %v6460_v35 = vpop.f32.mrb[79].mxu0 }
 0x4fe   :  { %11269 = vst [vmem:[#allocation24_spill] sm:$0xff] %v10191_v54  ;;  %v10193_v50 = vadd.f32 %v4323_v45, %v4284_v19  ;;  %v4285_v48 = vadd.f32 %v4247_v15, %v10074_v2  ;;  %v4325_v39 = vsel %vm4310_vm9, %v4322_v5, %v4324_v56  ;;  %v10198_v8 = vsel %vm4310_vm9, %v6921_v53, %v6923_v12 }
 0x4ff   :  { %11270 = vst [vmem:[#allocation25_spill] sm:$0xff] %v10198_v8  ;;  %v10201_v59 = vsel %vm4232_vm8, %v6846_v63, %v6848_v28  ;;  %v6925_v21 = vrot.slane %v6460_v35, 3 }
 0x500   :  { %11271 = vst [vmem:[#allocation17_spill] sm:$0xff] %v10201_v59  ;;  %v10203_v34 = vadd.f32 %v4325_v39, %v4285_v48  ;;  %v3855_v46 = vpop.f32.mrb[108].mxu1 }
 0x501   :  { %v4248_v14 = vrot.slane %v3855_v46, 2  ;;  %v3857_v10 = vpop.f32.mrb[109].mxu1  ;;  %v10206_v25 = vsel %vm4310_vm9, %v6923_v12, %v6925_v21 }
 0x502   :  { %11272 = vst [vmem:[#allocation19_spill] sm:$0xff] %v10206_v25  ;;  %v4326_v19 = vrot.slane %v3857_v10, 3  ;;  %v3859_v0 = vpop.f32.mrb[110].mxu1  ;;  %v6464_v2 = vpop.f32.mrb[80].mxu0 }
 0x503   :  { %v4249_v5 = vsel %vm4232_vm8, %v4246_v30, %v4248_v14  ;;  %v4250_v45 = vrot.slane %v3859_v0, 2  ;;  %v3861_v53 = vpop.f32.mrb[111].mxu1  ;;  %v6850_v15 = vrot.slane %v6464_v2, 2  ;;  %v6466_v8 = vpop.f32.mrb[81].mxu0 }
 0x504   :  { %v4286_v63 = vadd.f32 %v4249_v5, %v10081_v32  ;;  %v4327_v35 = vsel %vm4310_vm9, %v4324_v56, %v4326_v19  ;;  %v4328_v48 = vrot.slane %v3861_v53, 3  ;;  %v6927_v39 = vrot.slane %v6466_v8, 3  ;;  %v6468_v46 = vpop.f32.mrb[82].mxu0 }
 0x505   :  { %v4251_v59 = vsel %vm4232_vm8, %v4248_v14, %v4250_v45  ;;  %v10213_v12 = vsel %vm4232_vm8, %v6848_v28, %v6850_v15  ;;  %v6852_v10 = vrot.slane %v6468_v46, 2  ;;  %v6470_v25 = vpop.f32.mrb[83].mxu0 }
 0x506   :  { %11273 = vst [vmem:[#allocation27_spill] sm:$0xff] %v10213_v12  ;;  %v10215_v54 = vadd.f32 %v4327_v35, %v4286_v63  ;;  %v4287_v30 = vadd.f32 %v4251_v59, %v10084_v9  ;;  %v4329_v0 = vsel %vm4310_vm9, %v4326_v19, %v4328_v48  ;;  %v10220_v32 = vsel %vm4310_vm9, %v6925_v21, %v6927_v39 }
 0x507   :  { %11274 = vst [vmem:[#allocation28_spill] sm:$0xff] %v10220_v32  ;;  %v10223_v56 = vsel %vm4232_vm8, %v6850_v15, %v6852_v10  ;;  %v6929_v8 = vrot.slane %v6470_v25, 3 }
 0x508   :  { %11275 = vst [vmem:[#allocation31_spill] sm:$0xff] %v10223_v56  ;;  %v10225_v2 = vadd.f32 %v4329_v0, %v4287_v30  ;;  %v3865_v14 = vpop.f32.mrb[112].mxu1 }
 0x509   :  { %v4252_v28 = vrot.slane %v3865_v14, 2  ;;  %v3867_v5 = vpop.f32.mrb[113].mxu1  ;;  %v10228_v53 = vsel %vm4310_vm9, %v6927_v39, %v6929_v8 }
 0x50a   :  { %11276 = vst [vmem:[#allocation29_spill] sm:$0xff] %v10228_v53  ;;  %v4330_v63 = vrot.slane %v3867_v5, 3  ;;  %v3869_v35 = vpop.f32.mrb[114].mxu1  ;;  %v6474_v9 = vpop.f32.mrb[84].mxu0 }
 0x50b   :  { %v4253_v59 = vsel %vm4232_vm8, %v4250_v45, %v4252_v28  ;;  %v4254_v19 = vrot.slane %v3869_v35, 2  ;;  %v3871_v21 = vpop.f32.mrb[115].mxu1  ;;  %v6854_v46 = vrot.slane %v6474_v9, 2  ;;  %v6476_v32 = vpop.f32.mrb[85].mxu0 }
 0x50c   :  { %v4288_v15 = vadd.f32 %v4253_v59, %v10090_v11  ;;  %v4331_v25 = vsel %vm4310_vm9, %v4328_v48, %v4330_v63  ;;  %v4332_v30 = vrot.slane %v3871_v21, 3  ;;  %v6931_v0 = vrot.slane %v6476_v32, 3  ;;  %v6478_v14 = vpop.f32.mrb[86].mxu0 }
 0x50d   :  { %v4255_v56 = vsel %vm4232_vm8, %v4252_v28, %v4254_v19  ;;  %v10235_v39 = vsel %vm4232_vm8, %v6852_v10, %v6854_v46  ;;  %v6856_v5 = vrot.slane %v6478_v14, 2  ;;  %v6480_v53 = vpop.f32.mrb[87].mxu0 }
 0x50e   :  { %11277 = vst [vmem:[#allocation30_spill] sm:$0xff] %v10235_v39  ;;  %v10237_v12 = vadd.f32 %v4331_v25, %v4288_v15  ;;  %v4289_v45 = vadd.f32 %v4255_v56, %v10093_v20  ;;  %v4333_v35 = vsel %vm4310_vm9, %v4330_v63, %v4332_v30  ;;  %v10242_v11 = vsel %vm4310_vm9, %v6929_v8, %v6931_v0 }
 0x50f   :  { %11278 = vst [vmem:[#allocation32_spill] sm:$0xff] %v10242_v11  ;;  %v10245_v48 = vsel %vm4232_vm8, %v6854_v46, %v6856_v5  ;;  %v6933_v32 = vrot.slane %v6480_v53, 3 }
 0x510   :  { %11279 = vst [vmem:[#allocation33_spill] sm:$0xff] %v10245_v48  ;;  %v10247_v9 = vadd.f32 %v4333_v35, %v4289_v45  ;;  %v3875_v28 = vpop.f32.mrb[116].mxu1 }
 0x511   :  { %v4256_v10 = vrot.slane %v3875_v28, 2  ;;  %v3877_v59 = vpop.f32.mrb[117].mxu1  ;;  %v10250_v21 = vsel %vm4310_vm9, %v6931_v0, %v6933_v32 }
 0x512   :  { %11280 = vst [vmem:[#allocation36_spill] sm:$0xff] %v10250_v21  ;;  %v4334_v15 = vrot.slane %v3877_v59, 3  ;;  %v3879_v25 = vpop.f32.mrb[118].mxu1  ;;  %v6484_v20 = vpop.f32.mrb[88].mxu0 }
 0x513   :  { %v4257_v56 = vsel %vm4232_vm8, %v4254_v19, %v4256_v10  ;;  %v4258_v63 = vrot.slane %v3879_v25, 2  ;;  %v3881_v8 = vpop.f32.mrb[119].mxu1  ;;  %v6858_v14 = vrot.slane %v6484_v20, 2  ;;  %v6486_v11 = vpop.f32.mrb[89].mxu0 }
 0x514   :  { %v4290_v46 = vadd.f32 %v4257_v56, %v10098_v42  ;;  %v4335_v53 = vsel %vm4310_vm9, %v4332_v30, %v4334_v15  ;;  %v4336_v45 = vrot.slane %v3881_v8, 3  ;;  %v6935_v35 = vrot.slane %v6486_v11, 3  ;;  %v6488_v28 = vpop.f32.mrb[90].mxu0 }
 0x515   :  { %v4259_v48 = vsel %vm4232_vm8, %v4256_v10, %v4258_v63  ;;  %v10257_v0 = vsel %vm4232_vm8, %v6856_v5, %v6858_v14  ;;  %v6860_v59 = vrot.slane %v6488_v28, 2  ;;  %v6490_v21 = vpop.f32.mrb[91].mxu0 }
 0x516   :  { %11281 = vst [vmem:[#allocation34_spill] sm:$0xff] %v10257_v0  ;;  %v10259_v39 = vadd.f32 %v4335_v53, %v4290_v46  ;;  %v4291_v19 = vadd.f32 %v4259_v48, %v10101_v37  ;;  %v4337_v25 = vsel %vm4310_vm9, %v4334_v15, %v4336_v45  ;;  %v10264_v42 = vsel %vm4310_vm9, %v6933_v32, %v6935_v35 }
 0x517   :  { %11282 = vst [vmem:[#allocation35_spill] sm:$0xff] %v10264_v42  ;;  %v10267_v30 = vsel %vm4232_vm8, %v6858_v14, %v6860_v59  ;;  %v6937_v11 = vrot.slane %v6490_v21, 3 }
 0x518   :  { %11283 = vst [vmem:[#allocation37_spill] sm:$0xff] %v10267_v30  ;;  %v10269_v20 = vadd.f32 %v4337_v25, %v4291_v19  ;;  %v3885_v10 = vpop.f32.mrb[120].mxu1 }
 0x519   :  { %v4260_v5 = vrot.slane %v3885_v10, 2  ;;  %v3887_v56 = vpop.f32.mrb[121].mxu1  ;;  %v10272_v8 = vsel %vm4310_vm9, %v6935_v35, %v6937_v11 }
 0x51a   :  { %11284 = vst [vmem:[#allocation38_spill] sm:$0xff] %v10272_v8  ;;  %v4338_v46 = vrot.slane %v3887_v56, 3  ;;  %v3889_v53 = vpop.f32.mrb[122].mxu1  ;;  %v6640_v37 = vpop.f32.mrb[92].mxu0 }
 0x51b   :  { %v4261_v48 = vsel %vm4232_vm8, %v4258_v63, %v4260_v5  ;;  %v4262_v15 = vrot.slane %v3889_v53, 2  ;;  %v3891_v32 = vpop.f32.mrb[123].mxu1  ;;  %v6642_v28 = vpop.f32.mrb[93].mxu0  ;;  %v7139_v10 = vrot.slane %v6640_v37, 6 }
 0x51c   :  { %v4292_v14 = vadd.f32 %v4261_v48, %v10108_v36  ;;  %v4339_v21 = vsel %vm4310_vm9, %v4336_v45, %v4338_v46  ;;  %v4340_v59 = vrot.slane %v3891_v32, 3  ;;  %v6644_v19 = vpop.f32.mrb[94].mxu0  ;;  %v7216_v35 = vrot.slane %v6642_v28, 7 }
 0x51d   :  { %v4263_v25 = vsel %vm4232_vm8, %v4260_v5, %v4262_v15  ;;  %v7140_v11 = vrot.slane %v6644_v19, 6  ;;  %v6646_v56 = vpop.f32.mrb[95].mxu0 }
 0x51e   :  { %v10278_v42 = vadd.f32 %v4339_v21, %v4292_v14  ;;  %v4293_v63 = vadd.f32 %v4263_v25, %v10106_v13  ;;  %v4341_v53 = vsel %vm4310_vm9, %v4338_v46, %v4340_v59  ;;  %v7217_v8 = vrot.slane %v6646_v56, 7 }
 0x51f   :  { %v10283_v36 = vsel %vm4544_vm10, %v7139_v10, %v7140_v11 }
 0x520   :  { %11285 = vst [vmem:[#allocation39_spill] sm:$0xff] %v10283_v36  ;;  %v10285_v45 = vadd.f32 %v4341_v53, %v4293_v63  ;;  %v10288_v48 = vsel %vm2657_vm4, %v7216_v35, %v7217_v8 }
 0x521   :  { %11286 = vst [vmem:[#allocation40_spill] sm:$0xff] %v10288_v48  ;;  %v3928_v5 = vpop.f32.mrb[124].mxu1 }
 0x522   :  { %v3930_v37 = vpop.f32.mrb[125].mxu1  ;;  %v4389_v28 = vrot.slane %v3928_v5, 4 }
 0x523   :  { %v3932_v15 = vpop.f32.mrb[126].mxu1  ;;  %v6650_v32 = vpop.f32.mrb[96].mxu0  ;;  %v4467_v59 = vrot.slane %v3930_v37, 5 }
 0x524   :  { %v4390_v14 = vrot.slane %v3932_v15, 4  ;;  %v3934_v21 = vpop.f32.mrb[127].mxu1  ;;  %v7142_v13 = vrot.slane %v6650_v32, 6  ;;  %v6652_v46 = vpop.f32.mrb[97].mxu0 }
 0x525   :  { %v4468_v19 = vrot.slane %v3934_v21, 5  ;;  %v7219_v25 = vrot.slane %v6652_v46, 7  ;;  %v6654_v10 = vpop.f32.mrb[98].mxu0 }
 0x526   :  { %v4391_v56 = vsel %vm4388_vm11, %v4389_v28, %v4390_v14  ;;  %v10292_v35 = vsel %vm4544_vm10, %v7140_v11, %v7142_v13  ;;  %v7144_v63 = vrot.slane %v6654_v10, 6  ;;  %v6656_v53 = vpop.f32.mrb[99].mxu0 }
 0x527   :  { %11287 = vst [vmem:[#allocation41_spill] sm:$0xff] %v10292_v35  ;;  %v4435_v48 = vadd.f32 %v4391_v56, %v10128_v55  ;;  %v4469_v5 = vsel %vm4466_vm12, %v4467_v59, %v4468_v19  ;;  %v10297_v15 = vsel %vm2657_vm4, %v7217_v8, %v7219_v25  ;;  %v7221_v32 = vrot.slane %v6656_v53, 7 }
 0x528   :  { %11288 = vst [vmem:[#allocation42_spill] sm:$0xff] %v10297_v15  ;;  %v10300_v37 = vsel %vm4544_vm10, %v7142_v13, %v7144_v63 }
 0x529   :  { %11289 = vst [vmem:[#allocation43_spill] sm:$0xff] %v10300_v37  ;;  %v10302_v21 = vadd.f32 %v4469_v5, %v4435_v48  ;;  %v3938_v46 = vpop.f32.mrb[128].mxu1  ;;  %v10305_v28 = vsel %vm2657_vm4, %v7219_v25, %v7221_v32 }
 0x52a   :  { %11290 = vst [vmem:[#allocation44_spill] sm:$0xff] %v10305_v28  ;;  %v4392_v11 = vrot.slane %v3938_v46, 4  ;;  %v3940_v10 = vpop.f32.mrb[129].mxu1 }
 0x52b   :  { %v4470_v35 = vrot.slane %v3940_v10, 5  ;;  %v3942_v36 = vpop.f32.mrb[130].mxu1  ;;  %v6660_v55 = vpop.f32.mrb[100].mxu0 }
 0x52c   :  { %v4393_v59 = vsel %vm4388_vm11, %v4390_v14, %v4392_v11  ;;  %v4394_v56 = vrot.slane %v3942_v36, 4  ;;  %v3944_v8 = vpop.f32.mrb[131].mxu1  ;;  %v7146_v15 = vrot.slane %v6660_v55, 6  ;;  %v6662_v53 = vpop.f32.mrb[101].mxu0 }
 0x52d   :  { %v4436_v13 = vadd.f32 %v4393_v59, %v10140_v24  ;;  %v4471_v48 = vsel %vm4466_vm12, %v4468_v19, %v4470_v35  ;;  %v4472_v5 = vrot.slane %v3944_v8, 5  ;;  %v7223_v37 = vrot.slane %v6662_v53, 7  ;;  %v6664_v0 = vpop.f32.mrb[102].mxu0 }
 0x52e   :  { %v4395_v25 = vsel %vm4388_vm11, %v4392_v11, %v4394_v56  ;;  %v10312_v46 = vsel %vm4544_vm10, %v7144_v63, %v7146_v15  ;;  %v7148_v10 = vrot.slane %v6664_v0, 6  ;;  %v6666_v28 = vpop.f32.mrb[103].mxu0 }
 0x52f   :  { %11291 = vst [vmem:[#allocation45_spill] sm:$0xff] %v10312_v46  ;;  %v10314_v30 = vadd.f32 %v4471_v48, %v4436_v13  ;;  %v4437_v36 = vadd.f32 %v4395_v25, %v10150_v52  ;;  %v4473_v14 = vsel %vm4466_vm12, %v4470_v35, %v4472_v5  ;;  %v10319_v24 = vsel %vm2657_vm4, %v7221_v32, %v7223_v37 }
 0x530   :  { %11292 = vst [vmem:[#allocation46_spill] sm:$0xff] %v10319_v24  ;;  %v10322_v19 = vsel %vm4544_vm10, %v7146_v15, %v7148_v10  ;;  %v7225_v55 = vrot.slane %v6666_v28, 7 }
 0x531   :  { %11293 = vst [vmem:[#allocation47_spill] sm:$0xff] %v10322_v19  ;;  %v10324_v59 = vadd.f32 %v4473_v14, %v4437_v36  ;;  %v3948_v11 = vpop.f32.mrb[132].mxu1 }
 0x532   :  { %v4396_v63 = vrot.slane %v3948_v11, 4  ;;  %v3950_v8 = vpop.f32.mrb[133].mxu1  ;;  %v10327_v0 = vsel %vm2657_vm4, %v7223_v37, %v7225_v55 }
 0x533   :  { %11294 = vst [vmem:[#allocation48_spill] sm:$0xff] %v10327_v0  ;;  %v4474_v53 = vrot.slane %v3950_v8, 5  ;;  %v3952_v13 = vpop.f32.mrb[134].mxu1  ;;  %v6670_v52 = vpop.f32.mrb[104].mxu0 }
 0x534   :  { %v4397_v35 = vsel %vm4388_vm11, %v4394_v56, %v4396_v63  ;;  %v4398_v48 = vrot.slane %v3952_v13, 4  ;;  %v3954_v32 = vpop.f32.mrb[135].mxu1  ;;  %v7150_v25 = vrot.slane %v6670_v52, 6  ;;  %v6672_v24 = vpop.f32.mrb[105].mxu0 }
 0x535   :  { %v4438_v15 = vadd.f32 %v4397_v35, %v10166_v7  ;;  %v4475_v28 = vsel %vm4466_vm12, %v4472_v5, %v4474_v53  ;;  %v4476_v36 = vrot.slane %v3954_v32, 5  ;;  %v7227_v14 = vrot.slane %v6672_v24, 7  ;;  %v6674_v11 = vpop.f32.mrb[106].mxu0 }
 0x536   :  { %v4399_v19 = vsel %vm4388_vm11, %v4396_v63, %v4398_v48  ;;  %v10334_v37 = vsel %vm4544_vm10, %v7148_v10, %v7150_v25  ;;  %v7152_v8 = vrot.slane %v6674_v11, 6  ;;  %v6676_v0 = vpop.f32.mrb[107].mxu0 }
 0x537   :  { %11295 = vst [vmem:[#allocation49_spill] sm:$0xff] %v10334_v37  ;;  %v10336_v46 = vadd.f32 %v4475_v28, %v4438_v15  ;;  %v4439_v56 = vadd.f32 %v4399_v19, %v10181_v43  ;;  %v4477_v13 = vsel %vm4466_vm12, %v4474_v53, %v4476_v36  ;;  %v10341_v7 = vsel %vm2657_vm4, %v7225_v55, %v7227_v14 }
 0x538   :  { %11296 = vst [vmem:[#allocation50_spill] sm:$0xff] %v10341_v7  ;;  %v10344_v5 = vsel %vm4544_vm10, %v7150_v25, %v7152_v8  ;;  %v7229_v24 = vrot.slane %v6676_v0, 7 }
 0x539   :  { %11297 = vst [vmem:[#allocation51_spill] sm:$0xff] %v10344_v5  ;;  %v10346_v52 = vadd.f32 %v4477_v13, %v4439_v56  ;;  %v3958_v63 = vpop.f32.mrb[136].mxu1 }
 0x53a   :  { %v4400_v10 = vrot.slane %v3958_v63, 4  ;;  %v3960_v35 = vpop.f32.mrb[137].mxu1  ;;  %v10349_v32 = vsel %vm2657_vm4, %v7227_v14, %v7229_v24 }
 0x53b   :  { %11298 = vst [vmem:[#allocation52_spill] sm:$0xff] %v10349_v32  ;;  %v4478_v15 = vrot.slane %v3960_v35, 5  ;;  %v3962_v28 = vpop.f32.mrb[138].mxu1  ;;  %v6680_v43 = vpop.f32.mrb[108].mxu0 }
 0x53c   :  { %v4401_v19 = vsel %vm4388_vm11, %v4398_v48, %v4400_v10  ;;  %v4402_v53 = vrot.slane %v3962_v28, 4  ;;  %v3964_v55 = vpop.f32.mrb[139].mxu1  ;;  %v7154_v11 = vrot.slane %v6680_v43, 6  ;;  %v6682_v7 = vpop.f32.mrb[109].mxu0 }
 0x53d   :  { %v4440_v25 = vadd.f32 %v4401_v19, %v10193_v50  ;;  %v4479_v0 = vsel %vm4466_vm12, %v4476_v36, %v4478_v15  ;;  %v4480_v56 = vrot.slane %v3964_v55, 5  ;;  %v7231_v13 = vrot.slane %v6682_v7, 7  ;;  %v6684_v63 = vpop.f32.mrb[110].mxu0 }
 0x53e   :  { %v4403_v5 = vsel %vm4388_vm11, %v4400_v10, %v4402_v53  ;;  %v10356_v14 = vsel %vm4544_vm10, %v7152_v8, %v7154_v11  ;;  %v7156_v35 = vrot.slane %v6684_v63, 6  ;;  %v6686_v32 = vpop.f32.mrb[111].mxu0 }
 0x53f   :  { %11299 = vst [vmem:[#allocation53_spill] sm:$0xff] %v10356_v14  ;;  %v10358_v37 = vadd.f32 %v4479_v0, %v4440_v25  ;;  %v4441_v48 = vadd.f32 %v4403_v5, %v10203_v34  ;;  %v4481_v28 = vsel %vm4466_vm12, %v4478_v15, %v4480_v56  ;;  %v10363_v50 = vsel %vm2657_vm4, %v7229_v24, %v7231_v13 }
 0x540   :  { %11300 = vst [vmem:[#allocation54_spill] sm:$0xff] %v10363_v50  ;;  %v10366_v36 = vsel %vm4544_vm10, %v7154_v11, %v7156_v35  ;;  %v7233_v7 = vrot.slane %v6686_v32, 7 }
 0x541   :  { %11301 = vst [vmem:[#allocation55_spill] sm:$0xff] %v10366_v36  ;;  %v10368_v43 = vadd.f32 %v4481_v28, %v4441_v48  ;;  %v3968_v10 = vpop.f32.mrb[140].mxu1 }
 0x542   :  { %v4404_v8 = vrot.slane %v3968_v10, 4  ;;  %v3970_v19 = vpop.f32.mrb[141].mxu1  ;;  %v10371_v55 = vsel %vm2657_vm4, %v7231_v13, %v7233_v7 }
 0x543   :  { %11302 = vst [vmem:[#allocation56_spill] sm:$0xff] %v10371_v55  ;;  %v4482_v25 = vrot.slane %v3970_v19, 5  ;;  %v3972_v0 = vpop.f32.mrb[142].mxu1  ;;  %v6690_v34 = vpop.f32.mrb[112].mxu0 }
 0x544   :  { %v4405_v5 = vsel %vm4388_vm11, %v4402_v53, %v4404_v8  ;;  %v4406_v15 = vrot.slane %v3972_v0, 4  ;;  %v3974_v24 = vpop.f32.mrb[143].mxu1  ;;  %v7158_v63 = vrot.slane %v6690_v34, 6  ;;  %v6692_v50 = vpop.f32.mrb[113].mxu0 }
 0x545   :  { %v4442_v11 = vadd.f32 %v4405_v5, %v10215_v54  ;;  %v4483_v32 = vsel %vm4466_vm12, %v4480_v56, %v4482_v25  ;;  %v4484_v48 = vrot.slane %v3974_v24, 5  ;;  %v7235_v28 = vrot.slane %v6692_v50, 7  ;;  %v6694_v10 = vpop.f32.mrb[114].mxu0 }
 0x546   :  { %v4407_v36 = vsel %vm4388_vm11, %v4404_v8, %v4406_v15  ;;  %v10378_v13 = vsel %vm4544_vm10, %v7156_v35, %v7158_v63  ;;  %v7160_v19 = vrot.slane %v6694_v10, 6  ;;  %v6696_v55 = vpop.f32.mrb[115].mxu0 }
 0x547   :  { %11303 = vst [vmem:[#allocation57_spill] sm:$0xff] %v10378_v13  ;;  %v10380_v14 = vadd.f32 %v4483_v32, %v4442_v11  ;;  %v4443_v53 = vadd.f32 %v4407_v36, %v10225_v2  ;;  %v4485_v0 = vsel %vm4466_vm12, %v4482_v25, %v4484_v48  ;;  %v10385_v54 = vsel %vm2657_vm4, %v7233_v7, %v7235_v28 }
 0x548   :  { %11304 = vst [vmem:[#allocation58_spill] sm:$0xff] %v10385_v54  ;;  %v10388_v56 = vsel %vm4544_vm10, %v7158_v63, %v7160_v19  ;;  %v7237_v50 = vrot.slane %v6696_v55, 7 }
 0x549   :  { %11305 = vst [vmem:[#allocation59_spill] sm:$0xff] %v10388_v56  ;;  %v10390_v34 = vadd.f32 %v4485_v0, %v4443_v53  ;;  %v3978_v8 = vpop.f32.mrb[144].mxu1 }
 0x54a   :  { %v4408_v35 = vrot.slane %v3978_v8, 4  ;;  %v3980_v5 = vpop.f32.mrb[145].mxu1  ;;  %v10393_v24 = vsel %vm2657_vm4, %v7235_v28, %v7237_v50 }
 0x54b   :  { %11306 = vst [vmem:[#allocation60_spill] sm:$0xff] %v10393_v24  ;;  %v4486_v11 = vrot.slane %v3980_v5, 5  ;;  %v3982_v32 = vpop.f32.mrb[146].mxu1  ;;  %v6700_v2 = vpop.f32.mrb[116].mxu0 }
 0x54c   :  { %v4409_v36 = vsel %vm4388_vm11, %v4406_v15, %v4408_v35  ;;  %v4410_v25 = vrot.slane %v3982_v32, 4  ;;  %v3984_v7 = vpop.f32.mrb[147].mxu1  ;;  %v7162_v10 = vrot.slane %v6700_v2, 6  ;;  %v6702_v54 = vpop.f32.mrb[117].mxu0 }
 0x54d   :  { %v4444_v63 = vadd.f32 %v4409_v36, %v10237_v12  ;;  %v4487_v55 = vsel %vm4466_vm12, %v4484_v48, %v4486_v11  ;;  %v4488_v53 = vrot.slane %v3984_v7, 5  ;;  %v7239_v0 = vrot.slane %v6702_v54, 7  ;;  %v6704_v8 = vpop.f32.mrb[118].mxu0 }
 0x54e   :  { %v4411_v56 = vsel %vm4388_vm11, %v4408_v35, %v4410_v25  ;;  %v10400_v28 = vsel %vm4544_vm10, %v7160_v19, %v7162_v10  ;;  %v7164_v5 = vrot.slane %v6704_v8, 6  ;;  %v6706_v24 = vpop.f32.mrb[119].mxu0 }
 0x54f   :  { %11307 = vst [vmem:[#allocation61_spill] sm:$0xff] %v10400_v28  ;;  %v10402_v13 = vadd.f32 %v4487_v55, %v4444_v63  ;;  %v4445_v15 = vadd.f32 %v4411_v56, %v10247_v9  ;;  %v4489_v32 = vsel %vm4466_vm12, %v4486_v11, %v4488_v53  ;;  %v10407_v12 = vsel %vm2657_vm4, %v7237_v50, %v7239_v0 }
 0x550   :  { %11308 = vst [vmem:[#allocation62_spill] sm:$0xff] %v10407_v12  ;;  %v10410_v48 = vsel %vm4544_vm10, %v7162_v10, %v7164_v5  ;;  %v7241_v54 = vrot.slane %v6706_v24, 7 }
 0x551   :  { %11309 = vst [vmem:[#allocation63_spill] sm:$0xff] %v10410_v48  ;;  %v10412_v2 = vadd.f32 %v4489_v32, %v4445_v15  ;;  %v3988_v35 = vpop.f32.mrb[148].mxu1 }
 0x552   :  { %v4412_v19 = vrot.slane %v3988_v35, 4  ;;  %v3990_v36 = vpop.f32.mrb[149].mxu1  ;;  %v10415_v7 = vsel %vm2657_vm4, %v7239_v0, %v7241_v54 }
 0x553   :  { %11310 = vst [vmem:[#allocation64_spill] sm:$0xff] %v10415_v7  ;;  %v4490_v63 = vrot.slane %v3990_v36, 5  ;;  %v3992_v55 = vpop.f32.mrb[150].mxu1  ;;  %v6710_v9 = vpop.f32.mrb[120].mxu0 }
 0x554   :  { %v4413_v56 = vsel %vm4388_vm11, %v4410_v25, %v4412_v19  ;;  %v4414_v11 = vrot.slane %v3992_v55, 4  ;;  %v3994_v50 = vpop.f32.mrb[151].mxu1  ;;  %v7166_v8 = vrot.slane %v6710_v9, 6  ;;  %v6712_v12 = vpop.f32.mrb[121].mxu0 }
 0x555   :  { %v4446_v10 = vadd.f32 %v4413_v56, %v10259_v39  ;;  %v4491_v24 = vsel %vm4466_vm12, %v4488_v53, %v4490_v63  ;;  %v4492_v15 = vrot.slane %v3994_v50, 5  ;;  %v7243_v32 = vrot.slane %v6712_v12, 7  ;;  %v6714_v35 = vpop.f32.mrb[122].mxu0 }
 0x556   :  { %v4415_v48 = vsel %vm4388_vm11, %v4412_v19, %v4414_v11  ;;  %v10422_v0 = vsel %vm4544_vm10, %v7164_v5, %v7166_v8  ;;  %v7168_v36 = vrot.slane %v6714_v35, 6  ;;  %v6716_v7 = vpop.f32.mrb[123].mxu0 }
 0x557   :  { %11311 = vst [vmem:[#allocation65_spill] sm:$0xff] %v10422_v0  ;;  %v10424_v28 = vadd.f32 %v4491_v24, %v4446_v10  ;;  %v4447_v25 = vadd.f32 %v4415_v48, %v10269_v20  ;;  %v4493_v55 = vsel %vm4466_vm12, %v4490_v63, %v4492_v15  ;;  %v10429_v39 = vsel %vm2657_vm4, %v7241_v54, %v7243_v32 }
 0x558   :  { %11312 = vst [vmem:[#allocation66_spill] sm:$0xff] %v10429_v39  ;;  %v10432_v53 = vsel %vm4544_vm10, %v7166_v8, %v7168_v36  ;;  %v7245_v12 = vrot.slane %v6716_v7, 7 }
 0x559   :  { %11313 = vst [vmem:[#allocation67_spill] sm:$0xff] %v10432_v53  ;;  %v10434_v9 = vadd.f32 %v4493_v55, %v4447_v25  ;;  %v3998_v19 = vpop.f32.mrb[152].mxu1 }
 0x55a   :  { %v4416_v5 = vrot.slane %v3998_v19, 4  ;;  %v4000_v56 = vpop.f32.mrb[153].mxu1  ;;  %v10437_v50 = vsel %vm2657_vm4, %v7243_v32, %v7245_v12 }
 0x55b   :  { %11314 = vst [vmem:[#allocation68_spill] sm:$0xff] %v10437_v50  ;;  %v4494_v10 = vrot.slane %v4000_v56, 5  ;;  %v4002_v24 = vpop.f32.mrb[154].mxu1 }
 0x55c   :  { %v4417_v20 = vsel %vm4388_vm11, %v4414_v11, %v4416_v5  ;;  %v4418_v48 = vrot.slane %v4002_v24, 4  ;;  %v4004_v63 = vpop.f32.mrb[155].mxu1 }
 0x55d   :  { %v4448_v54 = vadd.f32 %v4417_v20, %v10278_v42  ;;  %v4495_v8 = vsel %vm4466_vm12, %v4492_v15, %v4494_v10  ;;  %v4496_v35 = vrot.slane %v4004_v63, 5 }
 0x55e   :  { %v4419_v7 = vsel %vm4388_vm11, %v4416_v5, %v4418_v48 }
 0x55f   :  { %v10443_v36 = vadd.f32 %v4495_v8, %v4448_v54  ;;  %v4449_v25 = vadd.f32 %v4419_v7, %v10285_v45  ;;  %v4497_v32 = vsel %vm4466_vm12, %v4494_v10, %v4496_v35 }
 0x561   :  { %v10447_v55 = vadd.f32 %v4497_v32, %v4449_v25  ;;  %v4041_v12 = vpop.f32.mrb[156].mxu1 }
 0x562   :  { %v4043_v19 = vpop.f32.mrb[157].mxu1  ;;  %v4545_v56 = vrot.slane %v4041_v12, 6 }
 0x563   :  { %v4045_v11 = vpop.f32.mrb[158].mxu1  ;;  %v4622_v42 = vrot.slane %v4043_v19, 7 }
 0x564   :  { %v4546_v24 = vrot.slane %v4045_v11, 6  ;;  %v4047_v50 = vpop.f32.mrb[159].mxu1 }
 0x565   :  { %v4623_v20 = vrot.slane %v4047_v50, 7 }
 0x566   :  { %v4547_v15 = vsel %vm4544_vm10, %v4545_v56, %v4546_v24 }
 0x567   :  { %v4591_v5 = vadd.f32 %v4547_v15, %v10302_v21  ;;  %v4624_v48 = vsel %vm2657_vm4, %v4622_v42, %v4623_v20  ;;  %v5333_v15 = vld [vmem:[#allocation9 + $0x40] sm:$0xff] }
 0x569   :  { %v4668_v63 = vadd.f32 %v4624_v48, %v4591_v5  ;;  %v4051_v45 = vpop.f32.mrb[160].mxu1  ;;  %v5337_v5 = vld [vmem:[#allocation9 + $0x60] sm:$0xff] }
 0x56a   :  { %v4548_v54 = vrot.slane %v4051_v45, 6  ;;  %v4053_v10 = vpop.f32.mrb[161].mxu1 }
 0x56b   :  { %v4625_v8 = vrot.slane %v4053_v10, 7  ;;  %v4055_v35 = vpop.f32.mrb[162].mxu1  ;;  %v4683_v48 = vmax.f32 %v4668_v63, 0.0 }
 0x56c   :  { %v4549_v7 = vsel %vm4544_vm10, %v4546_v24, %v4548_v54  ;;  %v4550_v25 = vrot.slane %v4055_v35, 6  ;;  %v4057_v32 = vpop.f32.mrb[163].mxu1 }
 0x56d   :  { %v4592_v12 = vadd.f32 %v4549_v7, %v10314_v30  ;;  %v4626_v50 = vsel %vm2657_vm4, %v4623_v20, %v4625_v8  ;;  %v4627_v19 = vrot.slane %v4057_v32, 7  ;;  %v8298_v20 = vcombine.high %v5333_v15, %v5337_v5 }
 0x56e   :  { %v4551_v11 = vsel %vm4544_vm10, %v4548_v54, %v4550_v25 }
 0x56f   :  { %v4669_v21 = vadd.f32 %v4626_v50, %v4592_v12  ;;  %v4593_v56 = vadd.f32 %v4551_v11, %v10324_v59  ;;  %v4628_v42 = vsel %vm2657_vm4, %v4625_v8, %v4627_v19  ;;  %v5341_v50 = vld [vmem:[#allocation9 + $0x80] sm:$0xff] }
 0x570   :  { %v5345_v59 = vld [vmem:[#allocation9 + $0xa0] sm:$0xff] }
 0x571   :  { %v4684_v45 = vmax.f32 %v4669_v21, 0.0  ;;  %v4670_v10 = vadd.f32 %v4628_v42, %v4593_v56  ;;  %v4061_v24 = vpop.f32.mrb[164].mxu1  ;;  %v11315_v56 = vcombine.low %v10158_v60, %v10160_v27  ;;  %v11316_v42 = vmov 0  }
 0x572   :  { %v4552_v35 = vrot.slane %v4061_v24, 6  ;;  %v4063_v53 = vpop.f32.mrb[165].mxu1  ;;  %v5349_v24 = vld [vmem:[#allocation9 + $0xc0] sm:$0xff]  ;;  %v8305_v60 = vcombine.low %v5341_v50, %v5345_v59 }
 0x573   :  { %v4698_v39 = vpack.c.bf16 %v4684_v45, %v4683_v48  ;;  %v4629_v30 = vrot.slane %v4063_v53, 7  ;;  %v4065_v7 = vpop.f32.mrb[166].mxu1  ;;  %v8297_v53 = vcombine.low %v5333_v15, %v5337_v5 }
 0x574   :  { %v4553_v32 = vsel %vm4544_vm10, %v4550_v25, %v4552_v35  ;;  %v4554_v54 = vrot.slane %v4065_v7, 6  ;;  %v4067_v12 = vpop.f32.mrb[167].mxu1 }
 0x575   :  { %v4594_v8 = vadd.f32 %v4553_v32, %v10336_v46  ;;  %v4630_v11 = vsel %vm2657_vm4, %v4627_v19, %v4629_v30  ;;  %v4631_v63 = vrot.slane %v4067_v12, 7  ;;  %4835 = vmatmul.mubr.bf16.vlgmr.msra.gmra.mrb[188].mxu1 %v4698_v39  ;;  %v8306_v46 = vcombine.high %v5341_v50, %v5345_v59  ;;  %v5353_v19 = vld [vmem:[#allocation9 + $0xe0] sm:$0xff] }
 0x576   :  { %v4555_v21 = vsel %vm4544_vm10, %v4552_v35, %v4554_v54  ;;  %6270 = vmatpush1.bf16.msra.mxu1 %v11315_v56  ;;  %4844 = vmatprep.mubr.bf16.mxu1 %v11316_v42  ;;  %v4685_v32 = vmax.f32 %v4670_v10, 0.0 }
 0x577   :  { %v4671_v25 = vadd.f32 %v4630_v11, %v4594_v8  ;;  %v4595_v48 = vadd.f32 %v4555_v21, %v10346_v52  ;;  %v4632_v45 = vsel %vm2657_vm4, %v4629_v30, %v4631_v63  ;;  %6271 = vmatprep.subr.bf16.mxu1 %v8298_v20  ;;  %v8314_v8 = vcombine.high %v5349_v24, %v5353_v19  ;;  %v5357_v11 = vld [vmem:[#allocation9 + $0x100] sm:$0xff] }
 0x578   :  { %v5361_v21 = vld [vmem:[#allocation9 + $0x120] sm:$0xff] }
 0x579   :  { %v4672_v7 = vadd.f32 %v4632_v45, %v4595_v48  ;;  %v4071_v39 = vpop.f32.mrb[168].mxu1  ;;  %v4686_v35 = vmax.f32 %v4671_v25, 0.0  ;;  %v8322_v48 = vcombine.high %v5357_v11, %v5361_v21  ;;  %v5365_v45 = vld [vmem:[#allocation9 + $0x140] sm:$0xff] }
 0x57a   :  { %v4556_v12 = vrot.slane %v4071_v39, 6  ;;  %v4073_v0 = vpop.f32.mrb[169].mxu1  ;;  %6272 = vmatpush1.bf16.msra.mxu1 %v8297_v53 }
 0x57b   :  { %v4633_v27 = vrot.slane %v4073_v0, 7  ;;  %v4075_v15 = vpop.f32.mrb[170].mxu1  ;;  %v4699_v5 = vpack.c.bf16 %v4686_v35, %v4685_v32  ;;  %6273 = vmatprep.subr.bf16.mxu1 %v8306_v46  ;;  %v8313_v0 = vcombine.low %v5349_v24, %v5353_v19  ;;  %v5369_v46 = vld [vmem:[#allocation9 + $0x160] sm:$0xff] }
 0x57c   :  { %v4557_v52 = vsel %vm4544_vm10, %v4554_v54, %v4556_v12  ;;  %v4558_v30 = vrot.slane %v4075_v15, 6  ;;  %v4077_v20 = vpop.f32.mrb[171].mxu1 }
 0x57d   :  { %v4596_v56 = vadd.f32 %v4557_v52, %v10358_v37  ;;  %v4634_v10 = vsel %vm2657_vm4, %v4631_v63, %v4633_v27  ;;  %v4635_v25 = vrot.slane %v4077_v20, 7  ;;  %4845 = vmatmul.mubr.bf16.gmra.mrb[192].mxu1 %v4699_v5  ;;  %v4687_v63 = vmax.f32 %v4672_v7, 0.0  ;;  %v5373_v52 = vld [vmem:[#allocation9 + $0x180] sm:$0xff] }
 0x57e   :  { %v4559_v53 = vsel %vm4544_vm10, %v4556_v12, %v4558_v30  ;;  %6274 = vmatpush1.bf16.msra.mxu1 %v8305_v60  ;;  %4854 = vmatprep.mubr.bf16.mxu1 %v11316_v42  ;;  %v8321_v12 = vcombine.low %v5357_v11, %v5361_v21  ;;  %v8330_v5 = vcombine.high %v5365_v45, %v5369_v46  ;;  %v5377_v20 = vld [vmem:[#allocation9 + $0x1a0] sm:$0xff] }
 0x57f   :  { %v4673_v50 = vadd.f32 %v4634_v10, %v4596_v56  ;;  %v4597_v59 = vadd.f32 %v4559_v53, %v10368_v43  ;;  %v4636_v54 = vsel %vm2657_vm4, %v4633_v27, %v4635_v25  ;;  %6275 = vmatprep.subr.bf16.mxu1 %v8314_v8  ;;  %v8329_v11 = vcombine.low %v5365_v45, %v5369_v46 }
 0x581   :  { %v4674_v37 = vadd.f32 %v4636_v54, %v4597_v59  ;;  %v4081_v39 = vpop.f32.mrb[172].mxu1  ;;  %v4688_v32 = vmax.f32 %v4673_v50, 0.0  ;;  %v8338_v50 = vcombine.high %v5373_v52, %v5377_v20  ;;  %v5381_v59 = vld [vmem:[#allocation9 + $0x1c0] sm:$0xff] }
 0x582   :  { %v4560_v35 = vrot.slane %v4081_v39, 6  ;;  %v4083_v15 = vpop.f32.mrb[173].mxu1  ;;  %6276 = vmatpush1.bf16.msra.mxu1 %v8313_v0  ;;  %v5385_v54 = vld [vmem:[#allocation9 + $0x1e0] sm:$0xff] }
 0x583   :  { %v4637_v24 = vrot.slane %v4083_v15, 7  ;;  %v4085_v19 = vpop.f32.mrb[174].mxu1  ;;  %v4700_v60 = vpack.c.bf16 %v4688_v32, %v4687_v63  ;;  %6277 = vmatprep.subr.bf16.mxu1 %v8322_v48 }
 0x584   :  { %v4561_v43 = vsel %vm4544_vm10, %v4558_v30, %v4560_v35  ;;  %v4562_v27 = vrot.slane %v4085_v19, 6  ;;  %v4087_v8 = vpop.f32.mrb[175].mxu1 }
 0x585   :  { %v4598_v56 = vadd.f32 %v4561_v43, %v10380_v14  ;;  %v4638_v7 = vsel %vm2657_vm4, %v4635_v25, %v4637_v24  ;;  %v4639_v10 = vrot.slane %v4087_v8, 7  ;;  %4855 = vmatmul.mubr.bf16.gmra.mrb[196].mxu1 %v4700_v60  ;;  %v4689_v25 = vmax.f32 %v4674_v37, 0.0  ;;  %v5389_v60 = vld [vmem:[#allocation9 + $0x200] sm:$0xff] }
 0x586   :  { %v4563_v53 = vsel %vm4544_vm10, %v4560_v35, %v4562_v27  ;;  %6278 = vmatpush1.bf16.msra.mxu1 %v8321_v12  ;;  %4864 = vmatprep.mubr.bf16.mxu1 %v11316_v42  ;;  %v8337_v35 = vcombine.low %v5373_v52, %v5377_v20  ;;  %v8346_v12 = vcombine.high %v5381_v59, %v5385_v54 }
 0x587   :  { %v4675_v21 = vadd.f32 %v4638_v7, %v4598_v56  ;;  %v4599_v0 = vadd.f32 %v4563_v53, %v10390_v34  ;;  %v4640_v30 = vsel %vm2657_vm4, %v4637_v24, %v4639_v10  ;;  %6279 = vmatprep.subr.bf16.mxu1 %v8330_v5  ;;  %v5393_v5 = vld [vmem:[#allocation9 + $0x220] sm:$0xff]  ;;  %v8345_v52 = vcombine.low %v5381_v59, %v5385_v54 }
 0x588   :  { %v8354_v53 = vcombine.high %v5389_v60, %v5393_v5 }
 0x589   :  { %v4676_v14 = vadd.f32 %v4640_v30, %v4599_v0  ;;  %v4091_v48 = vpop.f32.mrb[176].mxu1  ;;  %v4690_v39 = vmax.f32 %v4675_v21, 0.0  ;;  %v5401_v21 = vld [vmem:[#allocation9 + $0x260] sm:$0xff] }
 0x58a   :  { %v4564_v63 = vrot.slane %v4091_v48, 6  ;;  %v4093_v32 = vpop.f32.mrb[177].mxu1  ;;  %6280 = vmatpush1.bf16.msra.mxu1 %v8329_v11  ;;  %v5397_v11 = vld [vmem:[#allocation9 + $0x240] sm:$0xff] }
 0x58b   :  { %v4641_v45 = vrot.slane %v4093_v32, 7  ;;  %v4095_v46 = vpop.f32.mrb[178].mxu1  ;;  %v4701_v15 = vpack.c.bf16 %v4690_v39, %v4689_v25  ;;  %6281 = vmatprep.subr.bf16.mxu1 %v8338_v50  ;;  %v8353_v25 = vcombine.low %v5389_v60, %v5393_v5 }
 0x58c   :  { %v4565_v34 = vsel %vm4544_vm10, %v4562_v27, %v4564_v63  ;;  %v4566_v24 = vrot.slane %v4095_v46, 6  ;;  %v4097_v19 = vpop.f32.mrb[179].mxu1  ;;  %v5409_v46 = vld [vmem:[#allocation9 + $0x2a0] sm:$0xff] }
 0x58d   :  { %v4600_v43 = vadd.f32 %v4565_v34, %v10402_v13  ;;  %v4642_v37 = vsel %vm2657_vm4, %v4639_v10, %v4641_v45  ;;  %v4643_v8 = vrot.slane %v4097_v19, 7  ;;  %4865 = vmatmul.mubr.bf16.gmra.mrb[200].mxu1 %v4701_v15  ;;  %v4691_v10 = vmax.f32 %v4676_v14, 0.0 }
 0x58e   :  { %v4567_v56 = vsel %vm4544_vm10, %v4564_v63, %v4566_v24  ;;  %6282 = vmatpush1.bf16.msra.mxu1 %v8337_v35  ;;  %4874 = vmatprep.mubr.bf16.mxu1 %v11316_v42  ;;  %v8362_v63 = vcombine.high %v5397_v11, %v5401_v21  ;;  %v8361_v19 = vcombine.low %v5397_v11, %v5401_v21 }
 0x58f   :  { %v4677_v20 = vadd.f32 %v4642_v37, %v4600_v43  ;;  %v4601_v7 = vadd.f32 %v4567_v56, %v10412_v2  ;;  %v4644_v27 = vsel %vm2657_vm4, %v4641_v45, %v4643_v8  ;;  %6283 = vmatprep.subr.bf16.mxu1 %v8346_v12  ;;  %v5405_v45 = vld [vmem:[#allocation9 + $0x280] sm:$0xff] }
 0x590   :  { %v8370_v43 = vcombine.high %v5405_v45, %v5409_v46  ;;  %v5413_v37 = vld [vmem:[#allocation9 + $0x2c0] sm:$0xff] }
 0x591   :  { %v4678_v13 = vadd.f32 %v4644_v27, %v4601_v7  ;;  %v4101_v0 = vpop.f32.mrb[180].mxu1  ;;  %v4692_v30 = vmax.f32 %v4677_v20, 0.0  ;;  %v5417_v56 = vld [vmem:[#allocation9 + $0x2e0] sm:$0xff] }
 0x592   :  { %v4568_v50 = vrot.slane %v4101_v0, 6  ;;  %v4103_v48 = vpop.f32.mrb[181].mxu1  ;;  %6284 = vmatpush1.bf16.msra.mxu1 %v8345_v52 }
 0x593   :  { %v4645_v59 = vrot.slane %v4103_v48, 7  ;;  %v4105_v54 = vpop.f32.mrb[182].mxu1  ;;  %v4702_v39 = vpack.c.bf16 %v4692_v30, %v4691_v10  ;;  %6285 = vmatprep.subr.bf16.mxu1 %v8354_v53  ;;  %v8369_v53 = vcombine.low %v5405_v45, %v5409_v46  ;;  %v8378_v10 = vcombine.high %v5413_v37, %v5417_v56  ;;  %v5421_v48 = vld [vmem:[#allocation9 + $0x300] sm:$0xff] }
 0x594   :  { %v4569_v2 = vsel %vm4544_vm10, %v4566_v24, %v4568_v50  ;;  %v4570_v32 = vrot.slane %v4105_v54, 6  ;;  %v4107_v35 = vpop.f32.mrb[183].mxu1  ;;  %v5429_v46 = vld [vmem:[#allocation9 + $0x340] sm:$0xff] }
 0x595   :  { %v4602_v15 = vadd.f32 %v4569_v2, %v10424_v28  ;;  %v4646_v14 = vsel %vm2657_vm4, %v4643_v8, %v4645_v59  ;;  %v4647_v12 = vrot.slane %v4107_v35, 7  ;;  %4875 = vmatmul.mubr.bf16.gmra.mrb[204].mxu1 %v4702_v39  ;;  %v4693_v8 = vmax.f32 %v4678_v13, 0.0 }
 0x596   :  { %v4571_v34 = vsel %vm4544_vm10, %v4568_v50, %v4570_v32  ;;  %6286 = vmatpush1.bf16.msra.mxu1 %v8353_v25  ;;  %4884 = vmatprep.mubr.bf16.mxu1 %v11316_v42  ;;  %v5425_v25 = vld [vmem:[#allocation9 + $0x320] sm:$0xff] }
 0x597   :  { %v4679_v60 = vadd.f32 %v4646_v14, %v4602_v15  ;;  %v4603_v5 = vadd.f32 %v4571_v34, %v10434_v9  ;;  %v4648_v24 = vsel %vm2657_vm4, %v4645_v59, %v4647_v12  ;;  %6287 = vmatprep.subr.bf16.mxu1 %v8362_v63  ;;  %v8377_v63 = vcombine.low %v5413_v37, %v5417_v56  ;;  %v5433_v15 = vld [vmem:[#allocation9 + $0x360] sm:$0xff] }
 0x598   :  { %v8386_v45 = vcombine.high %v5421_v48, %v5425_v25  ;;  %v8385_v34 = vcombine.low %v5421_v48, %v5425_v25  ;;  %v5445_v56 = vld [vmem:[#allocation9 + $0x3c0] sm:$0xff] }
 0x599   :  { %v4680_v28 = vadd.f32 %v4648_v24, %v4603_v5  ;;  %v4111_v52 = vpop.f32.mrb[184].mxu1  ;;  %v4694_v20 = vmax.f32 %v4679_v60, 0.0  ;;  %v8394_v60 = vcombine.high %v5429_v46, %v5433_v15  ;;  %v5437_v5 = vld [vmem:[#allocation9 + $0x380] sm:$0xff] }
 0x59a   :  { %v4572_v7 = vrot.slane %v4111_v52, 6  ;;  %v4113_v27 = vpop.f32.mrb[185].mxu1  ;;  %6288 = vmatpush1.bf16.msra.mxu1 %v8361_v19  ;;  %v5441_v24 = vld [vmem:[#allocation9 + $0x3a0] sm:$0xff] }
 0x59b   :  { %v4649_v11 = vrot.slane %v4113_v27, 7  ;;  %v4115_v21 = vpop.f32.mrb[186].mxu1  ;;  %v4703_v0 = vpack.c.bf16 %v4694_v20, %v4693_v8  ;;  %6289 = vmatprep.subr.bf16.mxu1 %v8370_v43  ;;  %v8393_v43 = vcombine.low %v5429_v46, %v5433_v15  ;;  %v8402_v37 = vcombine.high %v5437_v5, %v5441_v24  ;;  %v5449_v52 = vld [vmem:[#allocation9 + $0x3e0] sm:$0xff]  ;;  %v5331_v27 = vld [vmem:[#allocation9 + $0x30] sm:$0xff] }
 0x59c   :  { %v4573_v9 = vsel %vm4544_vm10, %v4570_v32, %v4572_v7  ;;  %v4574_v30 = vrot.slane %v4115_v21, 6  ;;  %v4117_v50 = vpop.f32.mrb[187].mxu1  ;;  %v8410_v20 = vcombine.high %v5445_v56, %v5449_v52  ;;  %v5335_v21 = vld [vmem:[#allocation9 + $0x50] sm:$0xff] }
 0x59d   :  { %v4604_v59 = vadd.f32 %v4573_v9, %v10443_v36  ;;  %v4650_v13 = vsel %vm2657_vm4, %v4647_v12, %v4649_v11  ;;  %v4651_v54 = vrot.slane %v4117_v50, 7  ;;  %4885 = vmatmul.mubr.bf16.gmra.mrb[208].mxu1 %v4703_v0  ;;  %v4695_v36 = vmax.f32 %v4680_v28, 0.0  ;;  %v5339_v0 = vld [vmem:[#allocation9 + $0x70] sm:$0xff] }
 0x59e   :  { %v4575_v39 = vsel %vm4544_vm10, %v4572_v7, %v4574_v30  ;;  %6290 = vmatpush1.bf16.msra.mxu1 %v8369_v53  ;;  %4894 = vmatprep.mubr.bf16.mxu1 %v11316_v42  ;;  %v8401_v28 = vcombine.low %v5437_v5, %v5441_v24  ;;  %v5327_v7 = vld [vmem:[#allocation9 + $0x10] sm:$0xff]  ;;  %v8409_v53 = vcombine.low %v5445_v56, %v5449_v52 }
 0x59f   :  { %v4681_v2 = vadd.f32 %v4650_v13, %v4604_v59  ;;  %v4605_v35 = vadd.f32 %v4575_v39, %v10447_v55  ;;  %v4652_v32 = vsel %vm2657_vm4, %v4649_v11, %v4651_v54  ;;  %6291 = vmatprep.subr.bf16.mxu1 %v8378_v10  ;;  %v8294_v11 = vcombine.high %v5327_v7, %v5331_v27  ;;  %v5343_v30 = vld [vmem:[#allocation9 + $0x90] sm:$0xff] }
 0x5a0   :  { %v8293_v10 = vcombine.low %v5327_v7, %v5331_v27  ;;  %v8302_v9 = vcombine.high %v5335_v21, %v5339_v0  ;;  %v5347_v50 = vld [vmem:[#allocation9 + $0xb0] sm:$0xff]  ;;  %v8301_v48 = vcombine.low %v5335_v21, %v5339_v0 }
 0x5a1   :  { %v4696_v14 = vmax.f32 %v4681_v2, 0.0  ;;  %v4682_v12 = vadd.f32 %v4652_v32, %v4605_v35  ;;  %v8310_v25 = vcombine.high %v5343_v30, %v5347_v50  ;;  %v5351_v59 = vld [vmem:[#allocation9 + $0xd0] sm:$0xff]  ;;  %v8309_v54 = vcombine.low %v5343_v30, %v5347_v50 }
 0x5a2   :  { %6292 = vmatpush1.bf16.msra.mxu1 %v8377_v63  ;;  %v5355_v13 = vld [vmem:[#allocation9 + $0xf0] sm:$0xff] }
 0x5a3   :  { %v4704_v19 = vpack.c.bf16 %v4696_v14, %v4695_v36  ;;  %6293 = vmatprep.subr.bf16.mxu1 %v8386_v45  ;;  %v4697_v55 = vmax.f32 %v4682_v12, 0.0  ;;  %v8318_v39 = vcombine.high %v5351_v59, %v5355_v13  ;;  %v5359_v63 = vld [vmem:[#allocation9 + $0x110] sm:$0xff]  ;;  %v8317_v35 = vcombine.low %v5351_v59, %v5355_v13 }
 0x5a4   :  { %v5363_v2 = vld [vmem:[#allocation9 + $0x130] sm:$0xff] }
 0x5a5   :  { %4895 = vmatmul.mubr.bf16.gmra.mrb[212].mxu1 %v4704_v19  ;;  %v4705_v8 = vpack.c.bf16 %v4697_v55, %v4697_v55  ;;  %v8326_v32 = vcombine.high %v5359_v63, %v5363_v2  ;;  %v5367_v45 = vld [vmem:[#allocation9 + $0x150] sm:$0xff]  ;;  %v8325_v15 = vcombine.low %v5359_v63, %v5363_v2 }
 0x5a6   :  { %6294 = vmatpush1.bf16.msra.mxu1 %v8385_v34  ;;  %4904 = vmatprep.mubr.bf16.mxu1 %v11316_v42  ;;  %v5371_v46 = vld [vmem:[#allocation9 + $0x170] sm:$0xff] }
 0x5a7   :  { %6295 = vmatprep.subr.bf16.mxu1 %v8394_v60  ;;  %v8334_v36 = vcombine.high %v5367_v45, %v5371_v46  ;;  %v5375_v14 = vld [vmem:[#allocation9 + $0x190] sm:$0xff]  ;;  %v8333_v34 = vcombine.low %v5367_v45, %v5371_v46 }
 0x5a8   :  { %v5379_v12 = vld [vmem:[#allocation9 + $0x1b0] sm:$0xff] }
 0x5a9   :  { %v8342_v19 = vcombine.high %v5375_v14, %v5379_v12  ;;  %v5383_v60 = vld [vmem:[#allocation9 + $0x1d0] sm:$0xff]  ;;  %v8341_v24 = vcombine.low %v5375_v14, %v5379_v12 }
 0x5aa   :  { %6296 = vmatpush1.bf16.msra.mxu1 %v8393_v43  ;;  %v5387_v5 = vld [vmem:[#allocation9 + $0x1f0] sm:$0xff] }
 0x5ab   :  { %6297 = vmatprep.subr.bf16.mxu1 %v8402_v37  ;;  %v8350_v43 = vcombine.high %v5383_v60, %v5387_v5  ;;  %v5391_v55 = vld [vmem:[#allocation9 + $0x210] sm:$0xff]  ;;  %v8349_v56 = vcombine.low %v5383_v60, %v5387_v5 }
 0x5ac   :  { %v5395_v37 = vld [vmem:[#allocation9 + $0x230] sm:$0xff] }
 0x5ad   :  { %4905 = vmatmul.mubr.bf16.gmra.mrb[216].mxu1 %v4705_v8  ;;  %v8358_v52 = vcombine.high %v5391_v55, %v5395_v37  ;;  %v5403_v8 = vld [vmem:[#allocation9 + $0x270] sm:$0xff] }
 0x5ae   :  { %6298 = vmatpush1.bf16.msra.mxu1 %v8401_v28  ;;  %6301 = vmatprep.mubr.bf16.mxu1 %v9690_v29  ;;  %v5399_v28 = vld [vmem:[#allocation9 + $0x250] sm:$0xff] }
 0x5af   :  { %6299 = vmatprep.subr.bf16.mxu1 %v8410_v20  ;;  %v8357_v20 = vcombine.low %v5391_v55, %v5395_v37  ;;  %v8366_v7 = vcombine.high %v5399_v28, %v5403_v8  ;;  %v5407_v27 = vld [vmem:[#allocation9 + $0x290] sm:$0xff] }
 0x5b0   :  { %v5415_v0 = vld [vmem:[#allocation9 + $0x2d0] sm:$0xff] }
 0x5b1   :  { %v5423_v50 = vld [vmem:[#allocation9 + $0x310] sm:$0xff] }
 0x5b2   :  { %6300 = vmatpush1.bf16.msra.mxu1 %v8409_v53  ;;  %v5411_v53 = vld [vmem:[#allocation9 + $0x2b0] sm:$0xff] }
 0x5b3   :  { %6493 = vmatprep.subr.bf16.mxu1 %v8294_v11  ;;  %v8365_v11 = vcombine.low %v5399_v28, %v5403_v8  ;;  %v8374_v21 = vcombine.high %v5407_v27, %v5411_v53  ;;  %v5431_v13 = vld [vmem:[#allocation9 + $0x350] sm:$0xff] }
 0x5b4   :  { %v5439_v2 = vld [vmem:[#allocation9 + $0x390] sm:$0xff] }
 0x5b5   :  { %6302 = vmatmul.mubr.bf16.vlgmr.msra.gmra.mrb[220].mxu1 %v9696_v4  ;;  %v5447_v46 = vld [vmem:[#allocation9 + $0x3d0] sm:$0xff] }
 0x5b6   :  { %6311 = vmatprep.mubr.bf16.mxu1 %v9718_v22  ;;  %6494 = vmatpush1.bf16.msra.mxu1 %v8293_v10  ;;  %v5419_v10 = vld [vmem:[#allocation9 + $0x2f0] sm:$0xff] }
 0x5b7   :  { %6495 = vmatprep.subr.bf16.mxu1 %v8302_v9  ;;  %v8373_v9 = vcombine.low %v5407_v27, %v5411_v53  ;;  %v8382_v30 = vcombine.high %v5415_v0, %v5419_v10 }
 0x5ba   :  { %6496 = vmatpush1.bf16.msra.mxu1 %v8301_v48  ;;  %v5427_v48 = vld [vmem:[#allocation9 + $0x330] sm:$0xff] }
 0x5bb   :  { %6497 = vmatprep.subr.bf16.mxu1 %v8310_v25  ;;  %v8381_v25 = vcombine.low %v5415_v0, %v5419_v10  ;;  %v8390_v59 = vcombine.high %v5423_v50, %v5427_v48 }
 0x5bd   :  { %6312 = vmatmul.mubr.bf16.gmra.mrb[224].mxu1 %v9713_v3 }
 0x5be   :  { %6321 = vmatprep.mubr.bf16.mxu1 %v9761_v49  ;;  %6498 = vmatpush1.bf16.msra.mxu1 %v8309_v54  ;;  %v5435_v54 = vld [vmem:[#allocation9 + $0x370] sm:$0xff] }
 0x5bf   :  { %6499 = vmatprep.subr.bf16.mxu1 %v8318_v39  ;;  %v8389_v39 = vcombine.low %v5423_v50, %v5427_v48  ;;  %v8398_v63 = vcombine.high %v5431_v13, %v5435_v54 }
 0x5c2   :  { %6500 = vmatpush1.bf16.msra.mxu1 %v8317_v35  ;;  %v5443_v35 = vld [vmem:[#allocation9 + $0x3b0] sm:$0xff] }
 0x5c3   :  { %6501 = vmatprep.subr.bf16.mxu1 %v8326_v32  ;;  %v8397_v32 = vcombine.low %v5431_v13, %v5435_v54  ;;  %v8406_v45 = vcombine.high %v5439_v2, %v5443_v35  ;;  %v8999_v13 = vld [vmem:[#allocation11 + $0x60] ss:$8 sps:$4 sm:$0xff]   ;;  %v9001_v54 = vld [vmem:[#allocation11 + $0x64] ss:$8 sps:$4 sm:$0xff]  }
 0x5c5   :  { %6322 = vmatmul.mubr.bf16.gmra.mrb[228].mxu1 %v9755_v26 }
 0x5c6   :  { %6331 = vmatprep.mubr.bf16.mxu1 %v9810_v31  ;;  %6502 = vmatpush1.bf16.msra.mxu1 %v8325_v15  ;;  %v5451_v15 = vld [vmem:[#allocation9 + $0x3f0] sm:$0xff] }
 0x5c7   :  { %6503 = vmatprep.subr.bf16.mxu1 %v8334_v36  ;;  %v8405_v36 = vcombine.low %v5439_v2, %v5443_v35  ;;  %v8414_v14 = vcombine.high %v5447_v46, %v5451_v15  ;;  %v8413_v12 = vcombine.low %v5447_v46, %v5451_v15 }
 0x5ca   :  { %6504 = vmatpush1.bf16.msra.mxu1 %v8333_v34 }
 0x5cb   :  { %6505 = vmatprep.subr.bf16.mxu1 %v8342_v19 }
 0x5cd   :  { %6332 = vmatmul.mubr.bf16.gmra.mrb[232].mxu1 %v11248_v6 }
 0x5ce   :  { %6341 = vmatprep.mubr.bf16.mxu1 %v9864_v18  ;;  %6506 = vmatpush1.bf16.msra.mxu1 %v8341_v24 }
 0x5cf   :  { %6507 = vmatprep.subr.bf16.mxu1 %v8350_v43 }
 0x5d2   :  { %6508 = vmatpush1.bf16.msra.mxu1 %v8349_v56 }
 0x5d3   :  { %6509 = vmatprep.subr.bf16.mxu1 %v8358_v52 }
 0x5d5   :  { %6342 = vmatmul.mubr.bf16.gmra.mrb[236].mxu1 %v11255_v62 }
 0x5d6   :  { %6351 = vmatprep.mubr.bf16.mxu1 %v9900_v61  ;;  %6510 = vmatpush1.bf16.msra.mxu1 %v8357_v20 }
 0x5d7   :  { %6511 = vmatprep.subr.bf16.mxu1 %v8366_v7 }
 0x5da   :  { %6512 = vmatpush1.bf16.msra.mxu1 %v8365_v11 }
 0x5db   :  { %6513 = vmatprep.subr.bf16.mxu1 %v8374_v21 }
 0x5dd   :  { %6352 = vmatmul.mubr.bf16.gmra.mrb[240].mxu1 %v9896_v58 }
 0x5de   :  { %6361 = vmatprep.mubr.bf16.mxu1 %v9925_v16  ;;  %6514 = vmatpush1.bf16.msra.mxu1 %v8373_v9 }
 0x5df   :  { %6515 = vmatprep.subr.bf16.mxu1 %v8382_v30 }
 0x5e2   :  { %6516 = vmatpush1.bf16.msra.mxu1 %v8381_v25 }
 0x5e3   :  { %6517 = vmatprep.subr.bf16.mxu1 %v8390_v59 }
 0x5e5   :  { %6362 = vmatmul.mubr.bf16.gmra.mrb[244].mxu1 %v11260_v40 }
 0x5e6   :  { %6371 = vmatprep.mubr.bf16.mxu1 %v9947_v41  ;;  %6518 = vmatpush1.bf16.msra.mxu1 %v8389_v39 }
 0x5e7   :  { %6519 = vmatprep.subr.bf16.mxu1 %v8398_v63 }
 0x5ea   :  { %6520 = vmatpush1.bf16.msra.mxu1 %v8397_v32 }
 0x5eb   :  { %6521 = vmatprep.subr.bf16.mxu1 %v8406_v45 }
 0x5ed   :  { %6372 = vmatmul.mubr.bf16.gmra.mrb[248].mxu1 %v9957_v1 }
 0x5ee   :  { %6522 = vmatpush1.bf16.msra.mxu1 %v8405_v36  ;;  %6525 = vmatprep.mubr.bf16.mxu1 %v9690_v29  ;;  %v8981_v29 = vld [vmem:[#allocation11] ss:$8 sps:$4 sm:$0xff]  }
 0x5ef   :  { %6523 = vmatprep.subr.bf16.mxu1 %v8414_v14 }
 0x5f2   :  { %6524 = vmatpush1.bf16.msra.mxu1 %v8413_v12 }
 0x5f5   :  { %6526 = vmatmul.mubr.bf16.vlgmr.msra.gmra.mrb[252].mxu1 %v9696_v4  ;;  %v8983_v4 = vld [vmem:[#allocation11 + $0x4] ss:$8 sps:$4 sm:$0xff]  }
 0x5f6   :  { %6535 = vmatprep.mubr.bf16.mxu1 %v9718_v22  ;;  %7396 = vmatprep.subr.bf16.mxu1 %v8983_v4  ;;  %v8986_v22 = vld [vmem:[#allocation11 + $0x14] ss:$8 sps:$4 sm:$0xff]  }
 0x5f7   :  { %7397 = vmatpush1.bf16.msra.mxu1 %v8981_v29  ;;  %v9004_v4 = vld [vmem:[#allocation11 + $0x74] ss:$8 sps:$4 sm:$0xff]  }
 0x5f8   :  { %7398 = vmatprep.subr.bf16.mxu1 %v8986_v22  ;;  %v9002_v22 = vld [vmem:[#allocation11 + $0x70] ss:$8 sps:$4 sm:$0xff]  }
 0x5fd   :  { %6536 = vmatmul.mubr.bf16.gmra.mrb[0].mxu1 %v9713_v3  ;;  %v8984_v3 = vld [vmem:[#allocation11 + $0x10] ss:$8 sps:$4 sm:$0xff]  }
 0x5fe   :  { %6545 = vmatprep.mubr.bf16.mxu1 %v9761_v49  ;;  %7399 = vmatpush1.bf16.msra.mxu1 %v8984_v3  ;;  %v8989_v49 = vld [vmem:[#allocation11 + $0x24] ss:$8 sps:$4 sm:$0xff]  }
 0x5ff   :  { %7400 = vmatprep.subr.bf16.mxu1 %v8989_v49 }
 0x605   :  { %6546 = vmatmul.mubr.bf16.gmra.mrb[4].mxu1 %v9755_v26  ;;  %v8987_v26 = vld [vmem:[#allocation11 + $0x20] ss:$8 sps:$4 sm:$0xff]  }
 0x606   :  { %6555 = vmatprep.mubr.bf16.mxu1 %v9810_v31  ;;  %7401 = vmatpush1.bf16.msra.mxu1 %v8987_v26  ;;  %v8990_v31 = vld [vmem:[#allocation11 + $0x30] ss:$8 sps:$4 sm:$0xff]  }
 0x60d   :  { %6556 = vmatmul.mubr.bf16.gmra.mrb[8].mxu1 %v11248_v6  ;;  %v8998_v6 = vld [vmem:[#allocation11 + $0x54] ss:$8 sps:$4 sm:$0xff]  }
 0x60e   :  { %6565 = vmatprep.mubr.bf16.mxu1 %v9864_v18  ;;  %v8992_v18 = vld [vmem:[#allocation11 + $0x34] ss:$8 sps:$4 sm:$0xff]  }
 0x60f   :  { %7402 = vmatprep.subr.bf16.mxu1 %v8992_v18 }
 0x610   :  { %7403 = vmatpush1.bf16.msra.mxu1 %v8990_v31 }
 0x615   :  { %6566 = vmatmul.mubr.bf16.gmra.mrb[12].mxu1 %v11255_v62 }
 0x616   :  { %6575 = vmatprep.mubr.bf16.mxu1 %v9900_v61  ;;  %v8995_v61 = vld [vmem:[#allocation11 + $0x44] ss:$8 sps:$4 sm:$0xff]  }
 0x617   :  { %7404 = vmatprep.subr.bf16.mxu1 %v8995_v61 }
 0x61d   :  { %6576 = vmatmul.mubr.bf16.gmra.mrb[16].mxu1 %v9896_v58  ;;  %v8993_v58 = vld [vmem:[#allocation11 + $0x40] ss:$8 sps:$4 sm:$0xff]  }
 0x61e   :  { %6585 = vmatprep.mubr.bf16.mxu1 %v9925_v16  ;;  %7405 = vmatpush1.bf16.msra.mxu1 %v8993_v58 }
 0x61f   :  { %7406 = vmatprep.subr.bf16.mxu1 %v8998_v6 }
 0x625   :  { %6586 = vmatmul.mubr.bf16.gmra.mrb[20].mxu1 %v11260_v40 }
 0x626   :  { %6595 = vmatprep.mubr.bf16.mxu1 %v9947_v41 }
 0x62d   :  { %6596 = vmatmul.mubr.bf16.gmra.mrb[24].mxu1 %v9957_v1  ;;  %v8996_v1 = vld [vmem:[#allocation11 + $0x50] ss:$8 sps:$4 sm:$0xff]  }
 0x62e   :  { %7428 = vmatprep.mubr.bf16.mxu1 %v11316_v42  ;;  %7407 = vmatpush1.bf16.msra.mxu1 %v8996_v1 }
 0x62f   :  { %7408 = vmatprep.subr.bf16.mxu1 %v9001_v54 }
 0x632   :  { %7409 = vmatpush1.bf16.msra.mxu1 %v8999_v13 }
 0x633   :  { %7410 = vmatprep.subr.bf16.mxu1 %v9004_v4 }
 0x636   :  { %7411 = vmatpush1.bf16.msra.mxu1 %v9002_v22 }
 0x648   :  { %v10537_v16 = vpop.f32.mrb[188].mxu1 }
 0x649   :  { %5019 = vrot.lane.b32.xlu0 %v10537_v16, %s9162_s23  ;;  %v4838_v41 = vpop.f32.mrb[189].mxu1  ;;  %v4928_v40 = vrot.slane %v10537_v16, 7 }
 0x64a   :  { %v4840_v62 = vpop.f32.mrb[190].mxu1  ;;  %v4988_v60 = vrot.slane %v4838_v41, 2  ;;  %v5079_v5 = vrot.slane %v4838_v41, 1 }
 0x64b   :  { %v4929_v34 = vrot.slane %v4840_v62, 7  ;;  %v4842_v19 = vpop.f32.mrb[191].mxu1 }
 0x64c   :  { %v4989_v24 = vrot.slane %v4842_v19, 2  ;;  %v5080_v43 = vrot.slane %v4842_v19, 1 }
 0x64d   :  { %5021 = vrot.lane.b32.xlu0 %v4840_v62, %s9162_s23  ;;  %v10546_v55 = vsel %vm2657_vm4, %v4928_v40, %v4929_v34 }
 0x64e   :  { %v4990_v37 = vsel %vm4232_vm8, %v4988_v60, %v4989_v24  ;;  %v10550_v56 = vsel %vm2584_vm0, %v5079_v5, %v5080_v43 }
 0x64f   :  { %5139 = vrot.lane.b32.xlu1 %v4990_v37, %s9162_s23 }
 0x650   :  { %v4846_v52 = vpop.f32.mrb[192].mxu1 }
 0x651   :  { %v4931_v28 = vrot.slane %v4846_v52, 7  ;;  %5023 = vrot.lane.b32.xlu0 %v4846_v52, %s9162_s23  ;;  %v4848_v8 = vpop.f32.mrb[193].mxu1 }
 0x652   :  { %v4991_v20 = vrot.slane %v4848_v8, 2  ;;  %v5082_v7 = vrot.slane %v4848_v8, 1  ;;  %v4850_v27 = vpop.f32.mrb[194].mxu1 }
 0x653   :  { %v4933_v53 = vrot.slane %v4850_v27, 7  ;;  %v4852_v11 = vpop.f32.mrb[195].mxu1  ;;  %v10555_v21 = vsel %vm2657_vm4, %v4929_v34, %v4931_v28 }
 0x654   :  { %v4993_v0 = vrot.slane %v4852_v11, 2  ;;  %v5084_v10 = vrot.slane %v4852_v11, 1  ;;  %v4992_v9 = vsel %vm4232_vm8, %v4989_v24, %v4991_v20  ;;  %v10559_v30 = vsel %vm2584_vm0, %v5080_v43, %v5082_v7 }
 0x655   :  { %5025 = vrot.lane.b32.xlu0 %v4850_v27, %s9162_s23  ;;  %v10563_v50 = vsel %vm2657_vm4, %v4931_v28, %v4933_v53 }
 0x656   :  { %v4994_v48 = vsel %vm4232_vm8, %v4991_v20, %v4993_v0  ;;  %v10567_v25 = vsel %vm2584_vm0, %v5082_v7, %v5084_v10 }
 0x657   :  { %5143 = vrot.lane.b32.xlu1 %v4994_v48, %s9162_s23 }
 0x658   :  { %v4856_v59 = vpop.f32.mrb[196].mxu1 }
 0x659   :  { %v4935_v39 = vrot.slane %v4856_v59, 7  ;;  %5141 = vrot.lane.b32.xlu0 %v4992_v9, %s9162_s23  ;;  %v4858_v63 = vpop.f32.mrb[197].mxu1 }
 0x65a   :  { %v4995_v2 = vrot.slane %v4858_v63, 2  ;;  %v5086_v35 = vrot.slane %v4858_v63, 1  ;;  %v4860_v32 = vpop.f32.mrb[198].mxu1 }
 0x65b   :  { %v4937_v45 = vrot.slane %v4860_v32, 7  ;;  %v4862_v46 = vpop.f32.mrb[199].mxu1  ;;  %v10572_v15 = vsel %vm2657_vm4, %v4933_v53, %v4935_v39 }
 0x65c   :  { %v4997_v36 = vrot.slane %v4862_v46, 2  ;;  %v5088_v14 = vrot.slane %v4862_v46, 1  ;;  %v4996_v12 = vsel %vm4232_vm8, %v4993_v0, %v4995_v2  ;;  %v10576_v29 = vsel %vm2584_vm0, %v5084_v10, %v5086_v35 }
 0x65d   :  { %5027 = vrot.lane.b32.xlu0 %v4856_v59, %s9162_s23  ;;  %5145 = vrot.lane.b32.xlu1 %v4996_v12, %s9162_s23  ;;  %v10581_v3 = vsel %vm2657_vm4, %v4935_v39, %v4937_v45 }
 0x65e   :  { %v4998_v26 = vsel %vm4232_vm8, %v4995_v2, %v4997_v36  ;;  %v10585_v49 = vsel %vm2584_vm0, %v5086_v35, %v5088_v14 }
 0x660   :  { %v4866_v31 = vpop.f32.mrb[200].mxu1 }
 0x661   :  { %v4939_v18 = vrot.slane %v4866_v31, 7  ;;  %5029 = vrot.lane.b32.xlu0 %v4860_v32, %s9162_s23  ;;  %5147 = vrot.lane.b32.xlu1 %v4998_v26, %s9162_s23  ;;  %v4868_v58 = vpop.f32.mrb[201].mxu1 }
 0x662   :  { %v4999_v61 = vrot.slane %v4868_v58, 2  ;;  %v5090_v41 = vrot.slane %v4868_v58, 1  ;;  %v4870_v1 = vpop.f32.mrb[202].mxu1 }
 0x663   :  { %v4941_v6 = vrot.slane %v4870_v1, 7  ;;  %v4872_v62 = vpop.f32.mrb[203].mxu1  ;;  %v10590_v34 = vsel %vm2657_vm4, %v4937_v45, %v4939_v18 }
 0x664   :  { %v5001_v19 = vrot.slane %v4872_v62, 2  ;;  %v5092_v60 = vrot.slane %v4872_v62, 1  ;;  %v5000_v5 = vsel %vm4232_vm8, %v4997_v36, %v4999_v61  ;;  %v10594_v24 = vsel %vm2584_vm0, %v5088_v14, %v5090_v41 }
 0x665   :  { %5031 = vrot.lane.b32.xlu0 %v4866_v31, %s9162_s23  ;;  %5149 = vrot.lane.b32.xlu1 %v5000_v5, %s9162_s23  ;;  %v10599_v43 = vsel %vm2657_vm4, %v4939_v18, %v4941_v6 }
 0x666   :  { %v5002_v37 = vsel %vm4232_vm8, %v4999_v61, %v5001_v19  ;;  %v10603_v52 = vsel %vm2584_vm0, %v5090_v41, %v5092_v60 }
 0x668   :  { %v4876_v28 = vpop.f32.mrb[204].mxu1 }
 0x669   :  { %v4943_v8 = vrot.slane %v4876_v28, 7  ;;  %5033 = vrot.lane.b32.xlu0 %v4870_v1, %s9162_s23  ;;  %5151 = vrot.lane.b32.xlu1 %v5002_v37, %s9162_s23  ;;  %v4878_v20 = vpop.f32.mrb[205].mxu1 }
 0x66a   :  { %v5003_v7 = vrot.slane %v4878_v20, 2  ;;  %v5094_v27 = vrot.slane %v4878_v20, 1  ;;  %v4880_v53 = vpop.f32.mrb[206].mxu1 }
 0x66b   :  { %v4945_v11 = vrot.slane %v4880_v53, 7  ;;  %v4882_v0 = vpop.f32.mrb[207].mxu1  ;;  %v10608_v10 = vsel %vm2657_vm4, %v4941_v6, %v4943_v8 }
 0x66c   :  { %v5005_v9 = vrot.slane %v4882_v0, 2  ;;  %v5096_v48 = vrot.slane %v4882_v0, 1  ;;  %v5004_v59 = vsel %vm4232_vm8, %v5001_v19, %v5003_v7  ;;  %v10612_v13 = vsel %vm2584_vm0, %v5092_v60, %v5094_v27 }
 0x66d   :  { %5035 = vrot.lane.b32.xlu0 %v4876_v28, %s9162_s23  ;;  %5153 = vrot.lane.b32.xlu1 %v5004_v59, %s9162_s23  ;;  %v10617_v54 = vsel %vm2657_vm4, %v4943_v8, %v4945_v11 }
 0x66e   :  { %v5006_v39 = vsel %vm4232_vm8, %v5003_v7, %v5005_v9  ;;  %v10621_v63 = vsel %vm2584_vm0, %v5094_v27, %v5096_v48 }
 0x670   :  { %v4886_v2 = vpop.f32.mrb[208].mxu1 }
 0x671   :  { %v4947_v35 = vrot.slane %v4886_v2, 7  ;;  %5037 = vrot.lane.b32.xlu0 %v4880_v53, %s9162_s23  ;;  %5155 = vrot.lane.b32.xlu1 %v5006_v39, %s9162_s23  ;;  %v4888_v32 = vpop.f32.mrb[209].mxu1 }
 0x672   :  { %v5007_v45 = vrot.slane %v4888_v32, 2  ;;  %v5098_v46 = vrot.slane %v4888_v32, 1  ;;  %v4890_v36 = vpop.f32.mrb[210].mxu1 }
 0x673   :  { %v4949_v14 = vrot.slane %v4890_v36, 7  ;;  %v4892_v12 = vpop.f32.mrb[211].mxu1  ;;  %v10626_v4 = vsel %vm2657_vm4, %v4945_v11, %v4947_v35 }
 0x674   :  { %v5009_v22 = vrot.slane %v4892_v12, 2  ;;  %v5100_v26 = vrot.slane %v4892_v12, 1  ;;  %v5008_v31 = vsel %vm4232_vm8, %v5005_v9, %v5007_v45  ;;  %v10630_v18 = vsel %vm2584_vm0, %v5096_v48, %v5098_v46 }
 0x675   :  { %5039 = vrot.lane.b32.xlu0 %v4886_v2, %s9162_s23  ;;  %5157 = vrot.lane.b32.xlu1 %v5008_v31, %s9162_s23  ;;  %v10635_v58 = vsel %vm2657_vm4, %v4947_v35, %v4949_v14 }
 0x676   :  { %v5010_v61 = vsel %vm4232_vm8, %v5007_v45, %v5009_v22  ;;  %v10639_v41 = vsel %vm2584_vm0, %v5098_v46, %v5100_v26 }
 0x678   :  { %v4896_v1 = vpop.f32.mrb[212].mxu1 }
 0x679   :  { %v4951_v6 = vrot.slane %v4896_v1, 7  ;;  %5041 = vrot.lane.b32.xlu0 %v4890_v36, %s9162_s23  ;;  %5159 = vrot.lane.b32.xlu1 %v5010_v61, %s9162_s23  ;;  %v4898_v62 = vpop.f32.mrb[213].mxu1 }
 0x67a   :  { %v5011_v19 = vrot.slane %v4898_v62, 2  ;;  %v5102_v60 = vrot.slane %v4898_v62, 1  ;;  %v4900_v5 = vpop.f32.mrb[214].mxu1 }
 0x67b   :  { %v4953_v37 = vrot.slane %v4900_v5, 7  ;;  %v4902_v28 = vpop.f32.mrb[215].mxu1  ;;  %v10644_v8 = vsel %vm2657_vm4, %v4949_v14, %v4951_v6 }
 0x67c   :  { %v5013_v20 = vrot.slane %v4902_v28, 2  ;;  %v5104_v7 = vrot.slane %v4902_v28, 1  ;;  %v5012_v27 = vsel %vm4232_vm8, %v5009_v22, %v5011_v19  ;;  %v10648_v53 = vsel %vm2584_vm0, %v5100_v26, %v5102_v60  ;;  %v10681_v26 = vld [vmem:[%s11183_s6] ss:$0 sm:$0xff] }
 0x67d   :  { %5043 = vrot.lane.b32.xlu0 %v4896_v1, %s9162_s23  ;;  %5161 = vrot.lane.b32.xlu1 %v5012_v27, %s9162_s23  ;;  %v10653_v11 = vsel %vm2657_vm4, %v4951_v6, %v4953_v37 }
 0x67e   :  { %v5014_v0 = vsel %vm4232_vm8, %v5011_v19, %v5013_v20  ;;  %v10657_v9 = vsel %vm2584_vm0, %v5102_v60, %v5104_v7 }
 0x680   :  { %v4906_v48 = vpop.f32.mrb[216].mxu1 }
 0x681   :  { %v4955_v59 = vrot.slane %v4906_v48, 7  ;;  %5045 = vrot.lane.b32.xlu0 %v4900_v5, %s9162_s23  ;;  %5163 = vrot.lane.b32.xlu1 %v5014_v0, %s9162_s23  ;;  %v10661_v39 = vpop.f32.mrb[217].mxu1 }
 0x682   :  { %11317 = vst [vmem:[#allocation69_spill] sm:$0xff] %v10661_v39  ;;  %v11219_v2 = vrot.slane %v10661_v39, 2  ;;  %v11220_v35 = vrot.slane %v10661_v39, 1  ;;  %v4910_v32 = vpop.f32.mrb[218].mxu1 }
 0x683   :  { %v4911_v45 = vpop.f32.mrb[219].mxu1  ;;  %v10666_v46 = vsel %vm2657_vm4, %v4953_v37, %v4955_v59 }
 0x684   :  { %v5016_v36 = vsel %vm4232_vm8, %v5013_v20, %v11219_v2  ;;  %v10674_v14 = vsel %vm2584_vm0, %v5104_v7, %v11220_v35  ;;  %v11327_v2 = vld [vmem:[#allocation19_spill] sm:$0xff] }
 0x685   :  { %5047 = vrot.lane.b32.xlu0 %v4906_v48, %s9162_s23 }
 0x688   :  { %v6303_v12 = vpop.f32.mrb[220].mxu1 }
 0x689   :  { %5165 = vrot.lane.b32.xlu0 %v5016_v36, %s9162_s23  ;;  %v6305_v22 = vpop.f32.mrb[221].mxu1  ;;  %v6726_v62 = vadd.f32 %v10681_v26, %v6303_v12 }
 0x68a   :  { %v6307_v31 = vpop.f32.mrb[222].mxu1  ;;  %v6756_v1 = vrot.slane %v6305_v22, 1 }
 0x68b   :  { %v6309_v61 = vpop.f32.mrb[223].mxu1  ;;  %v6727_v27 = vadd.f32 %v10681_v26, %v6307_v31 }
 0x68c   :  { %v6757_v6 = vrot.slane %v6309_v61, 1 }
 0x68e   :  { %v6758_v19 = vsel %vm2584_vm0, %v6756_v1, %v6757_v6 }
 0x68f   :  { %v6800_v60 = vadd.f32 %v6758_v19, %v6726_v62 }
 0x690   :  { %v6313_v5 = vpop.f32.mrb[224].mxu1 }
 0x691   :  { %v6877_v37 = vadd.f32 %v10111_v38, %v6800_v60  ;;  %v6315_v28 = vpop.f32.mrb[225].mxu1  ;;  %v6728_v45 = vadd.f32 %v10681_v26, %v6313_v5 }
 0x692   :  { %v6759_v20 = vrot.slane %v6315_v28, 1  ;;  %v6317_v7 = vpop.f32.mrb[226].mxu1 }
 0x693   :  { %v6319_v0 = vpop.f32.mrb[227].mxu1  ;;  %v10688_v48 = vadd.f32 %v10114_v33, %v6877_v37 }
 0x694   :  { %v6760_v59 = vsel %vm2584_vm0, %v6757_v6, %v6759_v20  ;;  %v6761_v32 = vrot.slane %v6319_v0, 1  ;;  %v6729_v6 = vadd.f32 %v10681_v26, %v6317_v7  ;;  %v11318_v7 = vld [vmem:[#allocation20_spill] sm:$0xff] }
 0x695   :  { %v6801_v36 = vadd.f32 %v6760_v59, %v6727_v27 }
 0x696   :  { %v6762_v12 = vsel %vm2584_vm0, %v6759_v20, %v6761_v32 }
 0x697   :  { %v6878_v22 = vadd.f32 %v10118_v17, %v6801_v36  ;;  %v6802_v38 = vadd.f32 %v6762_v12, %v6728_v45 }
 0x698   :  { %v6323_v61 = vpop.f32.mrb[228].mxu1 }
 0x699   :  { %v6879_v1 = vadd.f32 %v10126_v44, %v6802_v38  ;;  %v6325_v62 = vpop.f32.mrb[229].mxu1  ;;  %v10696_v31 = vadd.f32 %v10123_v47, %v6878_v22  ;;  %v6730_v17 = vadd.f32 %v10681_v26, %v6323_v61  ;;  %v11319_v38 = vld [vmem:[#allocation21_spill] sm:$0xff] }
 0x69a   :  { %v6763_v33 = vrot.slane %v6325_v62, 1  ;;  %v6327_v19 = vpop.f32.mrb[230].mxu1 }
 0x69b   :  { %v6329_v60 = vpop.f32.mrb[231].mxu1  ;;  %v10700_v5 = vadd.f32 %v10131_v51, %v6879_v1 }
 0x69c   :  { %v6764_v37 = vsel %vm2584_vm0, %v6761_v32, %v6763_v33  ;;  %v6765_v28 = vrot.slane %v6329_v60, 1  ;;  %v6731_v32 = vadd.f32 %v10681_v26, %v6327_v19  ;;  %v11322_v19 = vld [vmem:[#allocation22_spill] sm:$0xff] }
 0x69d   :  { %v6803_v20 = vadd.f32 %v6764_v37, %v6729_v6  ;;  %v11320_v6 = vld [vmem:[#allocation18_spill] sm:$0xff] }
 0x69e   :  { %v6766_v44 = vsel %vm2584_vm0, %v6763_v33, %v6765_v28 }
 0x69f   :  { %v6880_v27 = vadd.f32 %v10138_v23, %v6803_v20  ;;  %v6804_v47 = vadd.f32 %v6766_v44, %v6730_v17  ;;  %v11321_v20 = vld [vmem:[#allocation23_spill] sm:$0xff] }
 0x6a0   :  { %v6333_v0 = vpop.f32.mrb[232].mxu1 }
 0x6a1   :  { %v6881_v59 = vadd.f32 %v10148_v57, %v6804_v47  ;;  %v6335_v45 = vpop.f32.mrb[233].mxu1  ;;  %v10708_v36 = vadd.f32 %v11318_v7, %v6880_v27  ;;  %v6732_v23 = vadd.f32 %v10681_v26, %v6333_v0 }
 0x6a2   :  { %v6767_v51 = vrot.slane %v6335_v45, 1  ;;  %v6337_v12 = vpop.f32.mrb[234].mxu1 }
 0x6a3   :  { %v6339_v22 = vpop.f32.mrb[235].mxu1  ;;  %v10712_v61 = vadd.f32 %v11319_v38, %v6881_v59 }
 0x6a4   :  { %v6768_v1 = vsel %vm2584_vm0, %v6765_v28, %v6767_v51  ;;  %v6769_v62 = vrot.slane %v6339_v22, 1  ;;  %v6733_v28 = vadd.f32 %v10681_v26, %v6337_v12  ;;  %v11323_v22 = vld [vmem:[#allocation26_spill] sm:$0xff]  ;;  %v11326_v12 = vld [vmem:[#allocation25_spill] sm:$0xff] }
 0x6a5   :  { %v6805_v33 = vadd.f32 %v6768_v1, %v6731_v32 }
 0x6a6   :  { %v6770_v57 = vsel %vm2584_vm0, %v6767_v51, %v6769_v62 }
 0x6a7   :  { %v6882_v60 = vadd.f32 %v11320_v6, %v6805_v33  ;;  %v6806_v37 = vadd.f32 %v6770_v57, %v6732_v23  ;;  %v11324_v33 = vld [vmem:[#allocation24_spill] sm:$0xff] }
 0x6a8   :  { %v6343_v17 = vpop.f32.mrb[236].mxu1 }
 0x6a9   :  { %v6883_v44 = vadd.f32 %v11321_v20, %v6806_v37  ;;  %v6345_v27 = vpop.f32.mrb[237].mxu1  ;;  %v10720_v47 = vadd.f32 %v11322_v19, %v6882_v60  ;;  %v6734_v38 = vadd.f32 %v10681_v26, %v6343_v17  ;;  %v11325_v37 = vld [vmem:[#allocation17_spill] sm:$0xff] }
 0x6aa   :  { %v6771_v59 = vrot.slane %v6345_v27, 1  ;;  %v6347_v45 = vpop.f32.mrb[238].mxu1 }
 0x6ab   :  { %v6349_v7 = vpop.f32.mrb[239].mxu1  ;;  %v10724_v0 = vadd.f32 %v11323_v22, %v6883_v44 }
 0x6ac   :  { %v6772_v51 = vsel %vm2584_vm0, %v6769_v62, %v6771_v59  ;;  %v6773_v32 = vrot.slane %v6349_v7, 1  ;;  %v6735_v62 = vadd.f32 %v10681_v26, %v6347_v45  ;;  %v11330_v45 = vld [vmem:[#allocation28_spill] sm:$0xff] }
 0x6ad   :  { %v6807_v1 = vadd.f32 %v6772_v51, %v6733_v28 }
 0x6ae   :  { %v6774_v23 = vsel %vm2584_vm0, %v6771_v59, %v6773_v32 }
 0x6af   :  { %v6884_v57 = vadd.f32 %v11324_v33, %v6807_v1  ;;  %v6808_v6 = vadd.f32 %v6774_v23, %v6734_v38  ;;  %v11328_v23 = vld [vmem:[#allocation27_spill] sm:$0xff] }
 0x6b0   :  { %v6353_v60 = vpop.f32.mrb[240].mxu1 }
 0x6b1   :  { %v6885_v20 = vadd.f32 %v11325_v37, %v6808_v6  ;;  %v6355_v27 = vpop.f32.mrb[241].mxu1  ;;  %v10732_v19 = vadd.f32 %v11326_v12, %v6884_v57  ;;  %v6736_v51 = vadd.f32 %v10681_v26, %v6353_v60  ;;  %v11329_v37 = vld [vmem:[#allocation31_spill] sm:$0xff]  ;;  %v4972_v60 = vsel %vm2657_vm4, 0.0, %v4928_v40 }
 0x6b2   :  { %v6775_v44 = vrot.slane %v6355_v27, 1  ;;  %v6357_v22 = vpop.f32.mrb[242].mxu1 }
 0x6b3   :  { %v6359_v7 = vpop.f32.mrb[243].mxu1  ;;  %v10736_v17 = vadd.f32 %v11327_v2, %v6885_v20 }
 0x6b4   :  { %v6776_v59 = vsel %vm2584_vm0, %v6773_v32, %v6775_v44  ;;  %v6777_v28 = vrot.slane %v6359_v7, 1  ;;  %v6737_v32 = vadd.f32 %v10681_v26, %v6357_v22 }
 0x6b5   :  { %v6809_v38 = vadd.f32 %v6776_v59, %v6735_v62  ;;  %v11331_v62 = vld [vmem:[#allocation29_spill] sm:$0xff] }
 0x6b6   :  { %v6778_v1 = vsel %vm2584_vm0, %v6775_v44, %v6777_v28 }
 0x6b7   :  { %v6886_v33 = vadd.f32 %v11328_v23, %v6809_v38  ;;  %v6810_v57 = vadd.f32 %v6778_v1, %v6736_v51 }
 0x6b8   :  { %v6363_v6 = vpop.f32.mrb[244].mxu1 }
 0x6b9   :  { %v6887_v27 = vadd.f32 %v11329_v37, %v6810_v57  ;;  %v6365_v12 = vpop.f32.mrb[245].mxu1  ;;  %v10744_v35 = vadd.f32 %v11330_v45, %v6886_v33  ;;  %v6738_v23 = vadd.f32 %v10681_v26, %v6363_v6  ;;  %v11332_v37 = vld [vmem:[#allocation30_spill] sm:$0xff] }
 0x6ba   :  { %v6779_v2 = vrot.slane %v6365_v12, 1  ;;  %v6367_v20 = vpop.f32.mrb[246].mxu1 }
 0x6bb   :  { %v5020_v7 = vpop.permute.xlu0 %5019  ;;  %v6369_v44 = vpop.f32.mrb[247].mxu1  ;;  %v10751_v59 = vadd.f32 %v11331_v62, %v6887_v27  ;;  %v11333_v27 = vld [vmem:[#allocation33_spill] sm:$0xff] }
 0x6bc   :  { %v6780_v51 = vsel %vm2584_vm0, %v6777_v28, %v6779_v2  ;;  %v5064_v38 = vadd.f32 %v5020_v7, %v4972_v60  ;;  %v6781_v1 = vrot.slane %v6369_v44, 1  ;;  %v11334_v44 = vld [vmem:[#allocation32_spill] sm:$0xff] }
 0x6bd   :  { %v6811_v33 = vadd.f32 %v6780_v51, %v6737_v32 }
 0x6be   :  { %v6782_v57 = vsel %vm2584_vm0, %v6779_v2, %v6781_v1  ;;  %v5123_v22 = vadd.f32 %v10550_v56, %v5064_v38  ;;  %v6739_v38 = vadd.f32 %v10681_v26, %v6367_v20  ;;  %v11337_v20 = vld [vmem:[#allocation34_spill] sm:$0xff] }
 0x6bf   :  { %v6888_v12 = vadd.f32 %v11332_v37, %v6811_v33  ;;  %v6812_v16 = vadd.f32 %v6782_v57, %v6738_v23  ;;  %v5022_v45 = vpop.permute.xlu0 %5021 }
 0x6c0   :  { %v5065_v40 = vadd.f32 %v5022_v45, %v10546_v55  ;;  %v6373_v39 = vpop.f32.mrb[248].mxu1  ;;  %v11335_v55 = vld [vmem:[#allocation36_spill] sm:$0xff] }
 0x6c1   :  { %v6889_v62 = vadd.f32 %v11333_v27, %v6812_v16  ;;  %v6740_v28 = vadd.f32 %v10681_v26, %v6373_v39  ;;  %v5140_v7 = vpop.permute.xlu1 %5139  ;;  %v6375_v60 = vpop.f32.mrb[249].mxu1  ;;  %v10762_v6 = vadd.f32 %v11334_v44, %v6888_v12  ;;  %v11336_v12 = vld [vmem:[#allocation37_spill] sm:$0xff] }
 0x6c2   :  { %v5184_v32 = vadd.f32 %v5140_v7, %v5123_v22  ;;  %v6783_v2 = vrot.slane %v6375_v60, 1  ;;  %v6377_v51 = vpop.f32.mrb[250].mxu1  ;;  %v5124_v56 = vadd.f32 %v10559_v30, %v5065_v40  ;;  %v10774_v22 = vld [vmem:[%s11185_s8] ss:$0 sm:$0xff] }
 0x6c3   :  { %v5024_v23 = vpop.permute.xlu0 %5023  ;;  %v6378_v33 = vpop.f32.mrb[251].mxu1  ;;  %v10767_v57 = vadd.f32 %v11335_v55, %v6889_v62  ;;  %v11338_v62 = vld [vmem:[#allocation38_spill] sm:$0xff] }
 0x6c4   :  { %v6784_v37 = vsel %vm2584_vm0, %v6781_v1, %v6783_v2  ;;  %v6814_v39 = vadd.f32 %v6783_v2, %v6740_v28  ;;  %v5066_v16 = vadd.f32 %v5024_v23, %v10555_v21  ;;  %v5206_v21 = vadd.f32 %v10774_v22, %v5184_v32  ;;  %v11339_v2 = vld [vmem:[#allocation35_spill] sm:$0xff] }
 0x6c5   :  { %v6813_v45 = vadd.f32 %v6784_v37, %v6739_v38 }
 0x6c6   :  { %v6891_v30 = vadd.f32 %v11336_v12, %v6814_v39  ;;  %v5125_v26 = vadd.f32 %v10567_v25, %v5066_v16  ;;  %v5221_v32 = vmax.f32 %v5206_v21, 0.0 }
 0x6c7   :  { %v6890_v40 = vadd.f32 %v11337_v20, %v6813_v45  ;;  %v5026_v27 = vpop.permute.xlu0 %5025 }
 0x6c8   :  { %v10780_v7 = vadd.f32 %v11338_v62, %v6891_v30  ;;  %v5067_v1 = vadd.f32 %v5026_v27, %v10563_v50  ;;  %v6527_v28 = vpop.f32.mrb[252].mxu1 }
 0x6c9   :  { %v5144_v60 = vpop.permute.xlu1 %5143  ;;  %v6529_v44 = vpop.f32.mrb[253].mxu1  ;;  %v10785_v51 = vadd.f32 %v11339_v2, %v6890_v40  ;;  %v6985_v33 = vrot.slane %v6527_v28, 4 }
 0x6ca   :  { %v5186_v38 = vadd.f32 %v5144_v60, %v5125_v26  ;;  %v6531_v23 = vpop.f32.mrb[254].mxu1  ;;  %v5126_v25 = vadd.f32 %v10576_v29, %v5067_v1  ;;  %v7062_v45 = vrot.slane %v6529_v44, 5 }
 0x6cb   :  { %v6986_v55 = vrot.slane %v6531_v23, 4  ;;  %v5142_v37 = vpop.permute.xlu0 %5141  ;;  %v6533_v39 = vpop.f32.mrb[255].mxu1 }
 0x6cc   :  { %v5208_v16 = vadd.f32 %v10774_v22, %v5186_v38  ;;  %v5185_v50 = vadd.f32 %v5142_v37, %v5124_v56  ;;  %v7063_v12 = vrot.slane %v6533_v39, 5  ;;  %v5237_v56 = vsel %vm5236_vm13, %v5221_v32, 0.0 }
 0x6cd   :  { %v6987_v30 = vsel %vm4388_vm11, %v6985_v33, %v6986_v55  ;;  %v11340_v33 = vld [vmem:[#allocation39_spill] sm:$0xff] }
 0x6ce   :  { %v5223_v20 = vmax.f32 %v5208_v16, 0.0  ;;  %v7031_v40 = vadd.f32 %v6987_v30, %v10688_v48  ;;  %v5207_v26 = vadd.f32 %v10774_v22, %v5185_v50  ;;  %v7064_v29 = vsel %vm4466_vm12, %v7062_v45, %v7063_v12 }
 0x6cf   :  { %v5028_v27 = vpop.permute.xlu0 %5027  ;;  %v5146_v62 = vpop.permute.xlu1 %5145 }
 0x6d0   :  { %v5222_v1 = vmax.f32 %v5207_v26, 0.0  ;;  %v7108_v28 = vadd.f32 %v7064_v29, %v7031_v40  ;;  %v5068_v60 = vadd.f32 %v5028_v27, %v10572_v15  ;;  %v6537_v44 = vpop.f32.mrb[0].mxu1  ;;  %v5240_v21 = vsel %vm5236_vm13, %v5223_v20, 0.0  ;;  %v11341_v20 = vld [vmem:[#allocation40_spill] sm:$0xff] }
 0x6d1   :  { %v5187_v2 = vadd.f32 %v5146_v62, %v5126_v25  ;;  %v6988_v38 = vrot.slane %v6537_v44, 4  ;;  %v6539_v23 = vpop.f32.mrb[1].mxu1 }
 0x6d2   :  { %v5238_v48 = vsel %vm5236_vm13, %v5222_v1, 0.0  ;;  %v7185_v37 = vadd.f32 %v11340_v33, %v7108_v28  ;;  %v7065_v39 = vrot.slane %v6539_v23, 5  ;;  %v6541_v16 = vpop.f32.mrb[2].mxu1  ;;  %v5127_v45 = vadd.f32 %v10585_v49, %v5068_v60 }
 0x6d3   :  { %v5239_v50 = vadd.f32 %v5238_v48, %v5237_v56  ;;  %v5209_v30 = vadd.f32 %v10774_v22, %v5187_v2  ;;  %v6989_v15 = vsel %vm4388_vm11, %v6986_v55, %v6988_v38  ;;  %v6990_v40 = vrot.slane %v6541_v16, 4  ;;  %v5030_v32 = vpop.permute.xlu0 %5029  ;;  %v5148_v26 = vpop.permute.xlu1 %5147 }
 0x6d4   :  { %v7262_v25 = vadd.f32 %v11341_v20, %v7185_v37  ;;  %v7032_v29 = vadd.f32 %v6989_v15, %v10696_v31  ;;  %v7066_v27 = vsel %vm4466_vm12, %v7063_v12, %v7065_v39  ;;  %v5069_v62 = vadd.f32 %v5030_v32, %v10581_v3  ;;  %v6543_v1 = vpop.f32.mrb[3].mxu1  ;;  %v11342_v3 = vld [vmem:[#allocation41_spill] sm:$0xff]  ;;  %v11343_v20 = vld [vmem:[#allocation42_spill] sm:$0xff] }
 0x6d5   :  { %v5241_v28 = vadd.f32 %v5240_v21, %v5239_v50  ;;  %v5224_v44 = vmax.f32 %v5209_v30, 0.0  ;;  %v6991_v49 = vsel %vm4388_vm11, %v6988_v38, %v6990_v40  ;;  %v5188_v60 = vadd.f32 %v5148_v26, %v5127_v45 }
 0x6d6   :  { %v7109_v56 = vadd.f32 %v7066_v27, %v7032_v29  ;;  %v7033_v55 = vadd.f32 %v6991_v49, %v10700_v5  ;;  %v7067_v2 = vrot.slane %v6543_v1, 5  ;;  %v5128_v31 = vadd.f32 %v10594_v24, %v5069_v62 }
 0x6d7   :  { %v5242_v23 = vsel %vm5236_vm13, %v5224_v44, 0.0  ;;  %v5210_v48 = vadd.f32 %v10774_v22, %v5188_v60  ;;  %v5032_v33 = vpop.permute.xlu0 %5031  ;;  %v5150_v12 = vpop.permute.xlu1 %5149  ;;  %v7277_v26 = vmax.f32 %v7262_v25, 0.0 }
 0x6d8   :  { %v5243_v37 = vadd.f32 %v5242_v23, %v5241_v28  ;;  %v7186_v16 = vadd.f32 %v11342_v3, %v7109_v56  ;;  %v7068_v21 = vsel %vm4466_vm12, %v7065_v39, %v7067_v2  ;;  %v5070_v38 = vadd.f32 %v5032_v33, %v10590_v34  ;;  %v6547_v45 = vpop.f32.mrb[4].mxu1  ;;  %v11344_v28 = vld [vmem:[#allocation43_spill] sm:$0xff]  ;;  %v11345_v33 = vld [vmem:[#allocation44_spill] sm:$0xff] }
 0x6d9   :  { %v5225_v50 = vmax.f32 %v5210_v48, 0.0  ;;  %v7110_v30 = vadd.f32 %v7068_v21, %v7033_v55  ;;  %v5189_v5 = vadd.f32 %v5150_v12, %v5128_v31  ;;  %v6992_v15 = vrot.slane %v6547_v45, 4  ;;  %v6549_v32 = vpop.f32.mrb[5].mxu1 }
 0x6da   :  { %v7263_v29 = vadd.f32 %v11343_v20, %v7186_v16  ;;  %v7069_v27 = vrot.slane %v6549_v32, 5  ;;  %v6551_v1 = vpop.f32.mrb[6].mxu1  ;;  %v5129_v24 = vadd.f32 %v10603_v52, %v5070_v38  ;;  %v11346_v32 = vld [vmem:[#allocation45_spill] sm:$0xff] }
 0x6db   :  { %v5244_v62 = vsel %vm5236_vm13, %v5225_v50, 0.0  ;;  %v7187_v44 = vadd.f32 %v11344_v28, %v7110_v30  ;;  %v5211_v39 = vadd.f32 %v10774_v22, %v5189_v5  ;;  %v6993_v34 = vsel %vm4388_vm11, %v6990_v40, %v6992_v15  ;;  %v5034_v49 = vpop.permute.xlu0 %5033  ;;  %v5152_v60 = vpop.permute.xlu1 %5151 }
 0x6dc   :  { %v7278_v56 = vmax.f32 %v7263_v29, 0.0  ;;  %v5245_v55 = vadd.f32 %v5244_v62, %v5243_v37  ;;  %v7034_v25 = vadd.f32 %v6993_v34, %v10708_v36  ;;  %v7070_v23 = vsel %vm4466_vm12, %v7067_v2, %v7069_v27  ;;  %v6553_v48 = vpop.f32.mrb[7].mxu1 }
 0x6dd   :  { %v7264_v31 = vadd.f32 %v11345_v33, %v7187_v44  ;;  %v5226_v52 = vmax.f32 %v5211_v39, 0.0  ;;  %v6994_v12 = vrot.slane %v6551_v1, 4  ;;  %v5071_v3 = vadd.f32 %v5034_v49, %v10599_v43  ;;  %v11348_v33 = vld [vmem:[#allocation47_spill] sm:$0xff] }
 0x6de   :  { %v7292_v16 = vpack.c.bf16 %v7278_v56, %v7277_v26  ;;  %v7111_v21 = vadd.f32 %v7070_v23, %v7034_v25  ;;  %v5190_v38 = vadd.f32 %v5152_v60, %v5129_v24  ;;  %v7071_v45 = vrot.slane %v6553_v48, 5 }
 0x6df   :  { %v7279_v40 = vmax.f32 %v7264_v31, 0.0  ;;  %v5246_v50 = vsel %vm5236_vm13, %v5226_v52, 0.0  ;;  %v6995_v37 = vsel %vm4388_vm11, %v6992_v15, %v6994_v12  ;;  %v5036_v30 = vpop.permute.xlu0 %5035  ;;  %v5130_v36 = vadd.f32 %v10612_v13, %v5071_v3  ;;  %v5154_v2 = vpop.permute.xlu1 %5153  ;;  %v11347_v13 = vld [vmem:[#allocation46_spill] sm:$0xff] }
 0x6e0   :  { %v5247_v5 = vadd.f32 %v5246_v50, %v5245_v55  ;;  %v7188_v20 = vadd.f32 %v11346_v32, %v7111_v21  ;;  %v7035_v29 = vadd.f32 %v6995_v37, %v10712_v61  ;;  %v5212_v43 = vadd.f32 %v10774_v22, %v5190_v38  ;;  %v6557_v26 = vpop.f32.mrb[8].mxu1  ;;  %7429 = vmatmul.mubr.bf16.vlgmr.msra.gmra.mrb[28].mxu1 %v7292_v16  ;;  %v11349_v37 = vld [vmem:[#allocation48_spill] sm:$0xff] }
 0x6e1   :  { %v7072_v1 = vsel %vm4466_vm12, %v7069_v27, %v7071_v45  ;;  %v5072_v24 = vadd.f32 %v5036_v30, %v10608_v10  ;;  %v5191_v62 = vadd.f32 %v5154_v2, %v5130_v36  ;;  %v6996_v28 = vrot.slane %v6557_v26, 4  ;;  %v6559_v15 = vpop.f32.mrb[9].mxu1  ;;  %7438 = vmatprep.mubr.bf16.mxu1 %v11316_v42 }
 0x6e2   :  { %v7265_v44 = vadd.f32 %v11347_v13, %v7188_v20  ;;  %v5227_v39 = vmax.f32 %v5212_v43, 0.0  ;;  %v7112_v34 = vadd.f32 %v7072_v1, %v7035_v29  ;;  %v7073_v49 = vrot.slane %v6559_v15, 5  ;;  %v6561_v60 = vpop.f32.mrb[10].mxu1  ;;  %v11350_v1 = vld [vmem:[#allocation49_spill] sm:$0xff]  ;;  %v11351_v13 = vld [vmem:[#allocation50_spill] sm:$0xff] }
 0x6e3   :  { %v5213_v61 = vadd.f32 %v10774_v22, %v5191_v62  ;;  %v6997_v56 = vsel %vm4388_vm11, %v6994_v12, %v6996_v28  ;;  %v6998_v55 = vrot.slane %v6561_v60, 4  ;;  %v5038_v25 = vpop.permute.xlu0 %5037  ;;  %v5131_v27 = vadd.f32 %v10621_v63, %v5072_v24  ;;  %v5156_v10 = vpop.permute.xlu1 %5155 }
 0x6e4   :  { %v7280_v23 = vmax.f32 %v7265_v44, 0.0  ;;  %v5248_v48 = vsel %vm5236_vm13, %v5227_v39, 0.0  ;;  %v7189_v31 = vadd.f32 %v11348_v33, %v7112_v34  ;;  %v7036_v52 = vadd.f32 %v6997_v56, %v10720_v47  ;;  %v6563_v3 = vpop.f32.mrb[11].mxu1 }
 0x6e5   :  { %v5249_v16 = vadd.f32 %v5248_v48, %v5247_v5  ;;  %v5228_v21 = vmax.f32 %v5213_v61, 0.0  ;;  %v7074_v38 = vsel %vm4466_vm12, %v7071_v45, %v7073_v49  ;;  %v6999_v50 = vsel %vm4388_vm11, %v6996_v28, %v6998_v55 }
 0x6e6   :  { %v7293_v12 = vpack.c.bf16 %v7280_v23, %v7279_v40  ;;  %v7266_v30 = vadd.f32 %v11349_v37, %v7189_v31  ;;  %v7113_v36 = vadd.f32 %v7074_v38, %v7036_v52  ;;  %v7037_v63 = vadd.f32 %v6999_v50, %v10724_v0  ;;  %v11353_v50 = vld [vmem:[#allocation52_spill] sm:$0xff] }
 0x6e7   :  { %v5250_v2 = vsel %vm5236_vm13, %v5228_v21, 0.0  ;;  %v5073_v32 = vadd.f32 %v5038_v25, %v10617_v54  ;;  %v5192_v20 = vadd.f32 %v5156_v10, %v5131_v27  ;;  %v7075_v29 = vrot.slane %v6563_v3, 5  ;;  %v5040_v47 = vpop.permute.xlu0 %5039  ;;  %v5158_v43 = vpop.permute.xlu1 %5157 }
 0x6e8   :  { %v7281_v5 = vmax.f32 %v7266_v30, 0.0  ;;  %v5251_v26 = vadd.f32 %v5250_v2, %v5249_v16  ;;  %v7190_v45 = vadd.f32 %v11350_v1, %v7113_v36  ;;  %v5074_v24 = vadd.f32 %v5040_v47, %v10626_v4  ;;  %v6567_v40 = vpop.f32.mrb[12].mxu1  ;;  %7439 = vmatmul.mubr.bf16.gmra.mrb[32].mxu1 %v7293_v12 }
 0x6e9   :  { %v5214_v62 = vadd.f32 %v10774_v22, %v5192_v20  ;;  %v7076_v0 = vsel %vm4466_vm12, %v7073_v49, %v7075_v29  ;;  %v5132_v28 = vadd.f32 %v10630_v18, %v5073_v32  ;;  %v7000_v15 = vrot.slane %v6567_v40, 4  ;;  %v6569_v54 = vpop.f32.mrb[13].mxu1  ;;  %7448 = vmatprep.mubr.bf16.mxu1 %v11316_v42  ;;  %v11352_v18 = vld [vmem:[#allocation51_spill] sm:$0xff] }
 0x6ea   :  { %v7267_v44 = vadd.f32 %v11351_v13, %v7190_v45  ;;  %v7114_v39 = vadd.f32 %v7076_v0, %v7037_v63  ;;  %v7077_v34 = vrot.slane %v6569_v54, 5  ;;  %v6571_v60 = vpop.f32.mrb[14].mxu1  ;;  %v5133_v61 = vadd.f32 %v10639_v41, %v5074_v24 }
 0x6eb   :  { %v5229_v4 = vmax.f32 %v5214_v62, 0.0  ;;  %v5193_v56 = vadd.f32 %v5158_v43, %v5132_v28  ;;  %v7001_v25 = vsel %vm4388_vm11, %v6998_v55, %v7000_v15  ;;  %v7002_v27 = vrot.slane %v6571_v60, 4  ;;  %v5042_v10 = vpop.permute.xlu0 %5041  ;;  %v5160_v49 = vpop.permute.xlu1 %5159  ;;  %v11355_v62 = vld [vmem:[#allocation54_spill] sm:$0xff] }
 0x6ec   :  { %v7282_v23 = vmax.f32 %v7267_v44, 0.0  ;;  %v7191_v48 = vadd.f32 %v11352_v18, %v7114_v39  ;;  %v7038_v33 = vadd.f32 %v7001_v25, %v10732_v19  ;;  %v7078_v31 = vsel %vm4466_vm12, %v7075_v29, %v7077_v34  ;;  %v6573_v52 = vpop.f32.mrb[15].mxu1  ;;  %v11354_v29 = vld [vmem:[#allocation53_spill] sm:$0xff] }
 0x6ed   :  { %v5252_v3 = vsel %vm5236_vm13, %v5229_v4, 0.0  ;;  %v5215_v16 = vadd.f32 %v10774_v22, %v5193_v56  ;;  %v7003_v41 = vsel %vm4388_vm11, %v7000_v15, %v7002_v27  ;;  %v5075_v21 = vadd.f32 %v5042_v10, %v10635_v58 }
 0x6ee   :  { %v7294_v55 = vpack.c.bf16 %v7282_v23, %v7281_v5  ;;  %v5253_v38 = vadd.f32 %v5252_v3, %v5251_v26  ;;  %v7268_v12 = vadd.f32 %v11353_v50, %v7191_v48  ;;  %v7115_v37 = vadd.f32 %v7078_v31, %v7038_v33  ;;  %v11357_v33 = vld [vmem:[#allocation56_spill] sm:$0xff] }
 0x6ef   :  { %v5230_v30 = vmax.f32 %v5215_v16, 0.0  ;;  %v7039_v36 = vadd.f32 %v7003_v41, %v10736_v17  ;;  %v5194_v19 = vadd.f32 %v5160_v49, %v5133_v61  ;;  %v7079_v63 = vrot.slane %v6573_v52, 5  ;;  %v5044_v2 = vpop.permute.xlu0 %5043  ;;  %v5162_v32 = vpop.permute.xlu1 %5161  ;;  %v11356_v61 = vld [vmem:[#allocation55_spill] sm:$0xff] }
 0x6f0   :  { %v7283_v20 = vmax.f32 %v7268_v12, 0.0  ;;  %v7192_v47 = vadd.f32 %v11354_v29, %v7115_v37  ;;  %v5076_v43 = vadd.f32 %v5044_v2, %v10644_v8  ;;  %v5134_v1 = vadd.f32 %v10648_v53, %v5075_v21  ;;  %v6577_v58 = vpop.f32.mrb[16].mxu1  ;;  %7449 = vmatmul.mubr.bf16.gmra.mrb[36].mxu1 %v7294_v55  ;;  %v11359_v29 = vld [vmem:[#allocation69_spill] sm:$0xff] }
 0x6f1   :  { %v5254_v5 = vsel %vm5236_vm13, %v5230_v30, 0.0  ;;  %v5216_v26 = vadd.f32 %v10774_v22, %v5194_v19  ;;  %v7080_v45 = vsel %vm4466_vm12, %v7077_v34, %v7079_v63  ;;  %v7004_v17 = vrot.slane %v6577_v58, 4  ;;  %v6579_v24 = vpop.f32.mrb[17].mxu1  ;;  %7458 = vmatprep.mubr.bf16.mxu1 %v11316_v42  ;;  %v11358_v30 = vld [vmem:[#allocation57_spill] sm:$0xff] }
 0x6f2   :  { %v5255_v40 = vadd.f32 %v5254_v5, %v5253_v38  ;;  %v7269_v0 = vadd.f32 %v11355_v62, %v7192_v47  ;;  %v7116_v28 = vadd.f32 %v7080_v45, %v7039_v36  ;;  %v5195_v15 = vadd.f32 %v5162_v32, %v5134_v1  ;;  %v6581_v8 = vpop.f32.mrb[18].mxu1  ;;  %v11361_v1 = vld [vmem:[#allocation58_spill] sm:$0xff] }
 0x6f3   :  { %v5231_v54 = vmax.f32 %v5216_v26, 0.0  ;;  %v7005_v53 = vsel %vm4388_vm11, %v7002_v27, %v7004_v17  ;;  %v7081_v13 = vrot.slane %v6579_v24, 5  ;;  %v7006_v44 = vrot.slane %v6581_v8, 4  ;;  %v5046_v39 = vpop.permute.xlu0 %5045  ;;  %v6583_v25 = vpop.f32.mrb[19].mxu1 }
 0x6f4   :  { %v7284_v60 = vmax.f32 %v7269_v0, 0.0  ;;  %v7193_v4 = vadd.f32 %v11356_v61, %v7116_v28  ;;  %v5217_v34 = vadd.f32 %v10774_v22, %v5195_v15  ;;  %v7040_v56 = vadd.f32 %v7005_v53, %v10744_v35  ;;  %v5164_v3 = vpop.permute.xlu1 %5163  ;;  %v11363_v53 = vld [vmem:[#allocation60_spill] sm:$0xff] }
 0x6f5   :  { %v5256_v10 = vsel %vm5236_vm13, %v5231_v54, 0.0  ;;  %v7082_v49 = vsel %vm4466_vm12, %v7079_v63, %v7081_v13  ;;  %v7007_v23 = vsel %vm4388_vm11, %v7004_v17, %v7006_v44  ;;  %v5077_v18 = vadd.f32 %v5046_v39, %v10653_v11  ;;  %v11362_v17 = vld [vmem:[#allocation59_spill] sm:$0xff] }
 0x6f6   :  { %v7295_v27 = vpack.c.bf16 %v7284_v60, %v7283_v20  ;;  %v5257_v48 = vadd.f32 %v5256_v10, %v5255_v40  ;;  %v7270_v31 = vadd.f32 %v11357_v33, %v7193_v4  ;;  %v5232_v52 = vmax.f32 %v5217_v34, 0.0 }
 0x6f7   :  { %v7117_v16 = vadd.f32 %v7082_v49, %v7040_v56  ;;  %v7041_v41 = vadd.f32 %v7007_v23, %v10751_v59  ;;  %v5135_v35 = vadd.f32 %v10657_v9, %v5076_v43  ;;  %v7083_v21 = vrot.slane %v6583_v25, 5  ;;  %v5048_v55 = vpop.permute.xlu0 %5047  ;;  %v11364_v23 = vld [vmem:[#allocation61_spill] sm:$0xff] }
 0x6f8   :  { %v5258_v38 = vsel %vm5236_vm13, %v5232_v52, 0.0  ;;  %v5078_v50 = vadd.f32 %v5048_v55, %v10666_v46  ;;  %v6587_v12 = vpop.f32.mrb[20].mxu1  ;;  %7459 = vmatmul.mubr.bf16.gmra.mrb[40].mxu1 %v7295_v27  ;;  %v5136_v11 = vadd.f32 %v10674_v14, %v5077_v18  ;;  %v11360_v47 = vrot.slane %v11359_v29, 1 }
 0x6f9   :  { %v5259_v37 = vadd.f32 %v5258_v38, %v5257_v48  ;;  %v7194_v36 = vadd.f32 %v11358_v30, %v7117_v16  ;;  %v5196_v19 = vadd.f32 %v5164_v3, %v5135_v35  ;;  %v7084_v63 = vsel %vm4466_vm12, %v7081_v13, %v7083_v21  ;;  %v6589_v2 = vpop.f32.mrb[21].mxu1  ;;  %7468 = vmatprep.mubr.bf16.mxu1 %v11316_v42  ;;  %v11366_v16 = vld [vmem:[#allocation63_spill] sm:$0xff]  ;;  %v11367_v30 = vld [vmem:[#allocation64_spill] sm:$0xff] }
 0x6fa   :  { %v7118_v9 = vadd.f32 %v7084_v63, %v7041_v41  ;;  %v7008_v59 = vrot.slane %v6587_v12, 4  ;;  %v7085_v32 = vrot.slane %v6589_v2, 5  ;;  %v6591_v20 = vpop.f32.mrb[22].mxu1  ;;  %v10890_v46 = vadd.f32 %v11360_v47, %v5078_v50 }
 0x6fb   :  { %v7285_v43 = vmax.f32 %v7270_v31, 0.0  ;;  %v7271_v14 = vadd.f32 %v11361_v1, %v7194_v36  ;;  %v5218_v58 = vadd.f32 %v10774_v22, %v5196_v19  ;;  %v7010_v5 = vrot.slane %v6591_v20, 4  ;;  %v5166_v26 = vpop.permute.xlu0 %5165  ;;  %v6593_v45 = vpop.f32.mrb[23].mxu1  ;;  %v11365_v31 = vld [vmem:[#allocation62_spill] sm:$0xff]  ;;  %v11370_v1 = vld [vmem:[#allocation67_spill] sm:$0xff] }
 0x6fc   :  { %v7195_v24 = vadd.f32 %v11362_v17, %v7118_v9  ;;  %v7009_v40 = vsel %vm4388_vm11, %v7006_v44, %v7008_v59  ;;  %v7086_v62 = vsel %vm4466_vm12, %v7083_v21, %v7085_v32  ;;  %v5197_v0 = vadd.f32 %v5166_v26, %v5136_v11  ;;  %v11371_v26 = vld [vmem:[#allocation68_spill] sm:$0xff] }
 0x6fd   :  { %v7286_v28 = vmax.f32 %v7271_v14, 0.0  ;;  %v5233_v15 = vmax.f32 %v5218_v58, 0.0  ;;  %v7042_v8 = vadd.f32 %v7009_v40, %v10762_v6  ;;  %v7011_v54 = vsel %vm4388_vm11, %v7008_v59, %v7010_v5 }
 0x6fe   :  { %v7272_v13 = vadd.f32 %v11363_v53, %v7195_v24  ;;  %v7043_v39 = vadd.f32 %v7011_v54, %v10767_v57  ;;  %v5219_v60 = vadd.f32 %v10774_v22, %v5197_v0  ;;  %v7087_v61 = vrot.slane %v6593_v45, 5 }
 0x6ff   :  { %v7296_v4 = vpack.c.bf16 %v7286_v28, %v7285_v43  ;;  %v5260_v34 = vsel %vm5236_vm13, %v5233_v15, 0.0  ;;  %v7119_v44 = vadd.f32 %v7086_v62, %v7042_v8 }
 0x700   :  { %v5261_v56 = vadd.f32 %v5260_v34, %v5259_v37  ;;  %v5234_v25 = vmax.f32 %v5219_v60, 0.0  ;;  %v7088_v10 = vsel %vm4466_vm12, %v7085_v32, %v7087_v61  ;;  %v6597_v49 = vpop.f32.mrb[24].mxu1  ;;  %v7287_v11 = vmax.f32 %v7272_v13, 0.0  ;;  %v11368_v32 = vld [vmem:[#allocation65_spill] sm:$0xff] }
 0x701   :  { %v7196_v6 = vadd.f32 %v11364_v23, %v7119_v44  ;;  %v7120_v18 = vadd.f32 %v7088_v10, %v7043_v39  ;;  %v7012_v27 = vrot.slane %v6597_v49, 4  ;;  %7469 = vmatmul.mubr.bf16.gmra.mrb[44].mxu1 %v7296_v4  ;;  %v6599_v48 = vpop.f32.mrb[25].mxu1 }
 0x702   :  { %v5262_v57 = vsel %vm5236_vm13, %v5234_v25, 0.0  ;;  %v7089_v33 = vrot.slane %v6599_v48, 5  ;;  %v6601_v22 = vpop.f32.mrb[26].mxu1  ;;  %7478 = vmatprep.mubr.bf16.mxu1 %v11316_v42 }
 0x703   :  { %v7273_v52 = vadd.f32 %v11365_v31, %v7196_v6  ;;  %v10908_v3 = vadd.f32 %v5262_v57, %v5261_v56  ;;  %v7197_v41 = vadd.f32 %v11366_v16, %v7120_v18  ;;  %v7013_v35 = vsel %vm4388_vm11, %v7010_v5, %v7012_v27  ;;  %v6603_v21 = vpop.f32.mrb[27].mxu1 }
 0x704   :  { %v7044_v55 = vadd.f32 %v7013_v35, %v10785_v51  ;;  %v7090_v38 = vsel %vm4466_vm12, %v7087_v61, %v7089_v33  ;;  %v7014_v50 = vrot.slane %v6601_v22, 4  ;;  %v7091_v12 = vrot.slane %v6603_v21, 5  ;;  %v11369_v51 = vld [vmem:[#allocation66_spill] sm:$0xff] }
 0x705   :  { %v7288_v37 = vmax.f32 %v7273_v52, 0.0  ;;  %v7274_v36 = vadd.f32 %v11367_v30, %v7197_v41 }
 0x706   :  { %v7121_v19 = vadd.f32 %v7090_v38, %v7044_v55  ;;  %v7015_v63 = vsel %vm4388_vm11, %v7012_v27, %v7014_v50  ;;  %v7092_v2 = vsel %vm4466_vm12, %v7089_v33, %v7091_v12 }
 0x707   :  { %v7297_v9 = vpack.c.bf16 %v7288_v37, %v7287_v11  ;;  %v7045_v59 = vadd.f32 %v7015_v63, %v10780_v7  ;;  %v7289_v58 = vmax.f32 %v7274_v36, 0.0 }
 0x708   :  { %v7198_v20 = vadd.f32 %v11368_v32, %v7121_v19  ;;  %v9167_v32 = vmov 0.0  }
 0x709   :  { %v7122_v47 = vadd.f32 %v7092_v2, %v7045_v59  ;;  %7479 = vmatmul.mubr.bf16.gmra.mrb[48].mxu1 %v7297_v9  ;;  %v9005_v9 = vld [vmem:[%s11186_s9] sm:$0xff]   ;;  %8446 = vmatprep.subr.bf16.mxu0 %v9167_v32 }
 0x70a   :  { %v7275_v43 = vadd.f32 %v11369_v51, %v7198_v20  ;;  %7488 = vmatprep.mubr.bf16.mxu1 %v11316_v42  ;;  %8447 = vmatpush3.bf16.msra.mxu0 %v9005_v9 }
 0x70b   :  { %v7199_v14 = vadd.f32 %v11370_v1, %v7122_v47  ;;  %8448 = vmatprep.subr.bf16.mxu0 %v9167_v32  ;;  %8454 = vmatprep.mubr.msk.bf16.mxu0 %vm9168_vm14, %v9167_v32 }
 0x70c   :  { %v7290_v5 = vmax.f32 %v7275_v43, 0.0 }
 0x70d   :  { %v7276_v45 = vadd.f32 %v11371_v26, %v7199_v14 }
 0x70e   :  { %v7298_v17 = vpack.c.bf16 %v7290_v5, %v7289_v58 }
 0x70f   :  { %v7291_v24 = vmax.f32 %v7276_v45, 0.0 }
 0x711   :  { %7489 = vmatmul.mubr.bf16.gmra.mrb[52].mxu1 %v7298_v17  ;;  %v7299_v7 = vpack.c.bf16 %v7291_v24, %v7291_v24 }
 0x712   :  { %7498 = vmatprep.mubr.bf16.mxu1 %v11316_v42 }
 0x719   :  { %7499 = vmatmul.mubr.bf16.gmra.mrb[56].mxu1 %v7299_v7 }
 0x7b3   :  { %v10924_v40 = vpop.f32.mrb[28].mxu1 }
 0x7b4   :  { %7613 = vrot.lane.b32.xlu1 %v10924_v40, %s9162_s23  ;;  %v7432_v62 = vpop.f32.mrb[29].mxu1  ;;  %v7522_v28 = vrot.slane %v10924_v40, 7  ;;  %v11097_v40 = vld [vmem:[%s11185_s8] ss:$0 sm:$0xff] }
 0x7b5   :  { %v7434_v0 = vpop.f32.mrb[30].mxu1  ;;  %v7582_v54 = vrot.slane %v7432_v62, 2  ;;  %v7673_v53 = vrot.slane %v7432_v62, 1 }
 0x7b6   :  { %v7523_v15 = vrot.slane %v7434_v0, 7  ;;  %v7436_v8 = vpop.f32.mrb[31].mxu1 }
 0x7b7   :  { %v7583_v13 = vrot.slane %v7436_v8, 2  ;;  %v7674_v39 = vrot.slane %v7436_v8, 1 }
 0x7b8   :  { %7615 = vrot.lane.b32.xlu1 %v7434_v0, %s9162_s23  ;;  %v10933_v42 = vsel %vm2657_vm4, %v7522_v28, %v7523_v15 }
 0x7b9   :  { %v7584_v60 = vsel %vm4232_vm8, %v7582_v54, %v7583_v13  ;;  %v10937_v61 = vsel %vm2584_vm0, %v7673_v53, %v7674_v39 }
 0x7ba   :  { %7733 = vrot.lane.b32.xlu0 %v7584_v60, %s9162_s23 }
 0x7bb   :  { %v7440_v4 = vpop.f32.mrb[32].mxu1 }
 0x7bc   :  { %v7525_v34 = vrot.slane %v7440_v4, 7  ;;  %7617 = vrot.lane.b32.xlu1 %v7440_v4, %s9162_s23  ;;  %v7442_v44 = vpop.f32.mrb[33].mxu1 }
 0x7bd   :  { %v7585_v56 = vrot.slane %v7442_v44, 2  ;;  %v7676_v25 = vrot.slane %v7442_v44, 1  ;;  %v7444_v10 = vpop.f32.mrb[34].mxu1 }
 0x7be   :  { %v7527_v49 = vrot.slane %v7444_v10, 7  ;;  %v7446_v23 = vpop.f32.mrb[35].mxu1  ;;  %v10942_v6 = vsel %vm2657_vm4, %v7523_v15, %v7525_v34 }
 0x7bf   :  { %v7587_v18 = vrot.slane %v7446_v23, 2  ;;  %v7678_v27 = vrot.slane %v7446_v23, 1  ;;  %v7586_v48 = vsel %vm4232_vm8, %v7583_v13, %v7585_v56  ;;  %v10946_v57 = vsel %vm2584_vm0, %v7674_v39, %v7676_v25 }
 0x7c0   :  { %7619 = vrot.lane.b32.xlu1 %v7444_v10, %s9162_s23  ;;  %v10950_v33 = vsel %vm2657_vm4, %v7525_v34, %v7527_v49 }
 0x7c1   :  { %v7588_v22 = vsel %vm4232_vm8, %v7585_v56, %v7587_v18  ;;  %v10954_v31 = vsel %vm2584_vm0, %v7676_v25, %v7678_v27 }
 0x7c3   :  { %v7450_v52 = vpop.f32.mrb[36].mxu1 }
 0x7c4   :  { %v7529_v16 = vrot.slane %v7450_v52, 7  ;;  %7735 = vrot.lane.b32.xlu1 %v7586_v48, %s9162_s23  ;;  %7621 = vrot.lane.b32.xlu0 %v7450_v52, %s9162_s23  ;;  %v7452_v41 = vpop.f32.mrb[37].mxu1 }
 0x7c5   :  { %v7589_v35 = vrot.slane %v7452_v41, 2  ;;  %v7680_v21 = vrot.slane %v7452_v41, 1  ;;  %v7454_v55 = vpop.f32.mrb[38].mxu1 }
 0x7c6   :  { %v7531_v38 = vrot.slane %v7454_v55, 7  ;;  %v7456_v50 = vpop.f32.mrb[39].mxu1  ;;  %v10959_v12 = vsel %vm2657_vm4, %v7527_v49, %v7529_v16 }
 0x7c7   :  { %v7591_v11 = vrot.slane %v7456_v50, 2  ;;  %v7682_v37 = vrot.slane %v7456_v50, 1  ;;  %v7590_v30 = vsel %vm4232_vm8, %v7587_v18, %v7589_v35  ;;  %v10963_v36 = vsel %vm2584_vm0, %v7678_v27, %v7680_v21  ;;  %v9006_v27 = vld [vmem:[%s11186_s9 + $0x8] sm:$0xff]  }
 0x7c8   :  { %7737 = vrot.lane.b32.xlu1 %v7588_v22, %s9162_s23  ;;  %7623 = vrot.lane.b32.xlu0 %v7454_v55, %s9162_s23  ;;  %v10968_v19 = vsel %vm2657_vm4, %v7529_v16, %v7531_v38 }
 0x7c9   :  { %v7592_v63 = vsel %vm4232_vm8, %v7589_v35, %v7591_v11  ;;  %v10972_v2 = vsel %vm2584_vm0, %v7680_v21, %v7682_v37  ;;  %8449 = vmatpush3.bf16.msra.mxu0 %v9006_v27 }
 0x7ca   :  { %8450 = vmatprep.subr.bf16.mxu0 %v9167_v32 }
 0x7cb   :  { %v7460_v59 = vpop.f32.mrb[40].mxu1 }
 0x7cc   :  { %v7533_v20 = vrot.slane %v7460_v59, 7  ;;  %7739 = vrot.lane.b32.xlu1 %v7590_v30, %s9162_s23  ;;  %7625 = vrot.lane.b32.xlu0 %v7460_v59, %s9162_s23  ;;  %v7462_v47 = vpop.f32.mrb[41].mxu1 }
 0x7cd   :  { %v7593_v51 = vrot.slane %v7462_v47, 2  ;;  %v7684_v43 = vrot.slane %v7462_v47, 1  ;;  %v7464_v1 = vpop.f32.mrb[42].mxu1 }
 0x7ce   :  { %v7535_v14 = vrot.slane %v7464_v1, 7  ;;  %v7466_v58 = vpop.f32.mrb[43].mxu1  ;;  %v10981_v5 = vsel %vm2657_vm4, %v7531_v38, %v7533_v20 }
 0x7cf   :  { %v7595_v26 = vrot.slane %v7466_v58, 2  ;;  %v7686_v45 = vrot.slane %v7466_v58, 1  ;;  %v7594_v17 = vsel %vm4232_vm8, %v7591_v11, %v7593_v51  ;;  %v10986_v24 = vsel %vm2584_vm0, %v7682_v37, %v7684_v43 }
 0x7d0   :  { %7741 = vrot.lane.b32.xlu1 %v7592_v63, %s9162_s23  ;;  %7627 = vrot.lane.b32.xlu0 %v7464_v1, %s9162_s23  ;;  %v10991_v7 = vsel %vm2657_vm4, %v7533_v20, %v7535_v14 }
 0x7d1   :  { %v7596_v62 = vsel %vm4232_vm8, %v7593_v51, %v7595_v26  ;;  %v10995_v0 = vsel %vm2584_vm0, %v7684_v43, %v7686_v45 }
 0x7d4   :  { %v7470_v15 = vpop.f32.mrb[44].mxu1  ;;  %7743 = vrot.lane.b32.xlu1 %v7594_v17, %s9162_s23 }
 0x7d5   :  { %v7537_v8 = vrot.slane %v7470_v15, 7  ;;  %7629 = vrot.lane.b32.xlu0 %v7470_v15, %s9162_s23  ;;  %v7472_v54 = vpop.f32.mrb[45].mxu1 }
 0x7d6   :  { %v7597_v53 = vrot.slane %v7472_v54, 2  ;;  %v7688_v13 = vrot.slane %v7472_v54, 1  ;;  %v7474_v39 = vpop.f32.mrb[46].mxu1 }
 0x7d7   :  { %v7539_v60 = vrot.slane %v7474_v39, 7  ;;  %v7476_v4 = vpop.f32.mrb[47].mxu1  ;;  %v11000_v34 = vsel %vm2657_vm4, %v7535_v14, %v7537_v8 }
 0x7d8   :  { %v7599_v44 = vrot.slane %v7476_v4, 2  ;;  %v7690_v56 = vrot.slane %v7476_v4, 1  ;;  %7745 = vrot.lane.b32.xlu1 %v7596_v62, %s9162_s23  ;;  %v7598_v25 = vsel %vm4232_vm8, %v7595_v26, %v7597_v53  ;;  %v11005_v10 = vsel %vm2584_vm0, %v7686_v45, %v7688_v13 }
 0x7d9   :  { %7631 = vrot.lane.b32.xlu0 %v7474_v39, %s9162_s23  ;;  %v11009_v49 = vsel %vm2657_vm4, %v7537_v8, %v7539_v60 }
 0x7da   :  { %v7600_v23 = vsel %vm4232_vm8, %v7597_v53, %v7599_v44  ;;  %v11013_v18 = vsel %vm2584_vm0, %v7688_v13, %v7690_v56 }
 0x7dc   :  { %v7480_v48 = vpop.f32.mrb[48].mxu1  ;;  %7747 = vrot.lane.b32.xlu1 %v7598_v25, %s9162_s23 }
 0x7dd   :  { %v7541_v22 = vrot.slane %v7480_v48, 7  ;;  %7633 = vrot.lane.b32.xlu0 %v7480_v48, %s9162_s23  ;;  %v7482_v52 = vpop.f32.mrb[49].mxu1  ;;  %v11372_v48 = vrot.slane %v11359_v29, 2  ;;  %v9007_v29 = vld [vmem:[%s11186_s9 + $0x10] sm:$0xff]  }
 0x7de   :  { %v7601_v16 = vrot.slane %v7482_v52, 2  ;;  %v7692_v41 = vrot.slane %v7482_v52, 1  ;;  %v7484_v35 = vpop.f32.mrb[50].mxu1  ;;  %8451 = vmatpush3.bf16.msra.mxu0 %v9007_v29 }
 0x7df   :  { %v7543_v21 = vrot.slane %v7484_v35, 7  ;;  %v7486_v55 = vpop.f32.mrb[51].mxu1  ;;  %v11022_v38 = vsel %vm2657_vm4, %v7539_v60, %v7541_v22  ;;  %8452 = vmatprep.subr.bf16.mxu0 %v9167_v32 }
 0x7e0   :  { %v7603_v50 = vrot.slane %v7486_v55, 2  ;;  %v7694_v11 = vrot.slane %v7486_v55, 1  ;;  %7749 = vrot.lane.b32.xlu1 %v7600_v23, %s9162_s23  ;;  %v7602_v37 = vsel %vm4232_vm8, %v7599_v44, %v7601_v16  ;;  %v11027_v30 = vsel %vm2584_vm0, %v7690_v56, %v7692_v41 }
 0x7e1   :  { %7635 = vrot.lane.b32.xlu0 %v7484_v35, %s9162_s23  ;;  %v11031_v63 = vsel %vm2657_vm4, %v7541_v22, %v7543_v21  ;;  %v5018_v22 = vsel %vm4310_vm9, %v11372_v48, 0.0  ;;  %v9008_v35 = vld [vmem:[%s11186_s9 + $0x18] sm:$0xff]   ;;  %v7566_v55 = vsel %vm2657_vm4, 0.0, %v7522_v28 }
 0x7e2   :  { %v7604_v9 = vsel %vm4232_vm8, %v7601_v16, %v7603_v50  ;;  %v11035_v59 = vsel %vm2584_vm0, %v7692_v41, %v7694_v11  ;;  %8453 = vmatpush3.bf16.msra.mxu0 %v9008_v35 }
 0x7e4   :  { %v7490_v20 = vpop.f32.mrb[52].mxu1  ;;  %7751 = vrot.lane.b32.xlu1 %v7602_v37, %s9162_s23 }
 0x7e5   :  { %v7545_v47 = vrot.slane %v7490_v20, 7  ;;  %7637 = vrot.lane.b32.xlu0 %v7490_v20, %s9162_s23  ;;  %v7492_v51 = vpop.f32.mrb[53].mxu1 }
 0x7e6   :  { %v7605_v43 = vrot.slane %v7492_v51, 2  ;;  %v7696_v1 = vrot.slane %v7492_v51, 1  ;;  %v7494_v14 = vpop.f32.mrb[54].mxu1 }
 0x7e7   :  { %v7547_v58 = vrot.slane %v7494_v14, 7  ;;  %v7496_v26 = vpop.f32.mrb[55].mxu1  ;;  %v11040_v45 = vsel %vm2657_vm4, %v7543_v21, %v7545_v47 }
 0x7e8   :  { %v7607_v17 = vrot.slane %v7496_v26, 2  ;;  %v7698_v62 = vrot.slane %v7496_v26, 1  ;;  %7753 = vrot.lane.b32.xlu1 %v7604_v9, %s9162_s23  ;;  %v7606_v15 = vsel %vm4232_vm8, %v7603_v50, %v7605_v43  ;;  %v11045_v8 = vsel %vm2584_vm0, %v7694_v11, %v7696_v1 }
 0x7e9   :  { %7639 = vrot.lane.b32.xlu0 %v7494_v14, %s9162_s23  ;;  %v11049_v54 = vsel %vm2657_vm4, %v7545_v47, %v7547_v58 }
 0x7ea   :  { %v7608_v53 = vsel %vm4232_vm8, %v7605_v43, %v7607_v17  ;;  %v11053_v13 = vsel %vm2584_vm0, %v7696_v1, %v7698_v62 }
 0x7ec   :  { %v7500_v39 = vpop.f32.mrb[56].mxu1  ;;  %7755 = vrot.lane.b32.xlu1 %v7606_v15, %s9162_s23 }
 0x7ed   :  { %v7549_v60 = vrot.slane %v7500_v39, 7  ;;  %7641 = vrot.lane.b32.xlu0 %v7500_v39, %s9162_s23  ;;  %v11057_v4 = vpop.f32.mrb[57].mxu1 }
 0x7ee   :  { %v7609_v44 = vrot.slane %v11057_v4, 2  ;;  %v7700_v56 = vrot.slane %v11057_v4, 1  ;;  %v7504_v25 = vpop.f32.mrb[58].mxu1 }
 0x7ef   :  { %v7505_v23 = vpop.f32.mrb[59].mxu1  ;;  %v11062_v27 = vsel %vm2657_vm4, %v7547_v58, %v7549_v60 }
 0x7f0   :  { %7757 = vrot.lane.b32.xlu1 %v7608_v53, %s9162_s23  ;;  %v7610_v52 = vsel %vm4232_vm8, %v7607_v17, %v7609_v44  ;;  %v11072_v16 = vsel %vm2584_vm0, %v7698_v62, %v7700_v56  ;;  %v7612_v41 = vsel %vm4310_vm9, %v7609_v44, 0.0  ;;  %vm7956_vm0 = vcmask 24576  }
 0x7f1   :  { %5167 = vrot.lane.b32.xlu0 %v5018_v22, %s9162_s23 }
 0x7f4   :  { %7759 = vrot.lane.b32.xlu1 %v7610_v52, %s9162_s23 }
 0x7f8   :  { %7761 = vrot.lane.b32.xlu1 %v7612_v41, %s9162_s23 }
 0x826   :  { %v7614_v21 = vpop.permute.xlu1 %7613 }
 0x827   :  { %v7658_v50 = vadd.f32 %v7614_v21, %v7566_v55 }
 0x829   :  { %v7717_v11 = vadd.f32 %v10937_v61, %v7658_v50 }
 0x82a   :  { %v7616_v37 = vpop.permute.xlu1 %7615 }
 0x82b   :  { %v7659_v9 = vadd.f32 %v7616_v37, %v10933_v42 }
 0x82c   :  { %v7734_v47 = vpop.permute.xlu0 %7733 }
 0x82d   :  { %v7718_v20 = vadd.f32 %v10946_v57, %v7659_v9  ;;  %v7778_v1 = vadd.f32 %v7734_v47, %v7717_v11 }
 0x82e   :  { %v7618_v51 = vpop.permute.xlu1 %7617 }
 0x82f   :  { %v7660_v43 = vadd.f32 %v7618_v51, %v10942_v6  ;;  %v7800_v14 = vadd.f32 %v11097_v40, %v7778_v1 }
 0x831   :  { %v7719_v32 = vadd.f32 %v10954_v31, %v7660_v43  ;;  %v7815_v17 = vmax.f32 %v7800_v14, 0.0 }
 0x832   :  { %v7620_v28 = vpop.permute.xlu1 %7619 }
 0x833   :  { %v7661_v61 = vadd.f32 %v7620_v28, %v10950_v33  ;;  %v7830_v44 = vsel %vm5236_vm13, %v7815_v17, 0.0 }
 0x835   :  { %v7720_v42 = vadd.f32 %v10963_v36, %v7661_v61 }
 0x836   :  { %v7736_v57 = vpop.permute.xlu1 %7735  ;;  %v7622_v58 = vpop.permute.xlu0 %7621 }
 0x837   :  { %v7779_v26 = vadd.f32 %v7736_v57, %v7718_v20  ;;  %v7662_v6 = vadd.f32 %v7622_v58, %v10959_v12 }
 0x839   :  { %v7801_v31 = vadd.f32 %v11097_v40, %v7779_v26  ;;  %v7721_v62 = vadd.f32 %v10972_v2, %v7662_v6 }
 0x83a   :  { %v7738_v15 = vpop.permute.xlu1 %7737  ;;  %v7624_v53 = vpop.permute.xlu0 %7623 }
 0x83b   :  { %v7816_v39 = vmax.f32 %v7801_v31, 0.0  ;;  %v7780_v60 = vadd.f32 %v7738_v15, %v7719_v32  ;;  %v7663_v33 = vadd.f32 %v7624_v53, %v10968_v19 }
 0x83d   :  { %v7831_v36 = vsel %vm5236_vm13, %v7816_v39, 0.0  ;;  %v7802_v25 = vadd.f32 %v11097_v40, %v7780_v60  ;;  %v7722_v23 = vadd.f32 %v10986_v24, %v7663_v33 }
 0x83e   :  { %v7832_v12 = vadd.f32 %v7831_v36, %v7830_v44  ;;  %v7740_v48 = vpop.permute.xlu1 %7739  ;;  %v7626_v22 = vpop.permute.xlu0 %7625 }
 0x83f   :  { %v7817_v52 = vmax.f32 %v7802_v25, 0.0  ;;  %v7781_v41 = vadd.f32 %v7740_v48, %v7720_v42  ;;  %v7664_v2 = vadd.f32 %v7626_v22, %v10981_v5 }
 0x841   :  { %v7833_v29 = vsel %vm5236_vm13, %v7817_v52, 0.0  ;;  %v7803_v35 = vadd.f32 %v11097_v40, %v7781_v41  ;;  %v7723_v19 = vadd.f32 %v10995_v0, %v7664_v2 }
 0x842   :  { %v7834_v21 = vadd.f32 %v7833_v29, %v7832_v12  ;;  %v7742_v55 = vpop.permute.xlu1 %7741  ;;  %v7628_v50 = vpop.permute.xlu0 %7627 }
 0x843   :  { %v7818_v11 = vmax.f32 %v7803_v35, 0.0  ;;  %v7782_v37 = vadd.f32 %v7742_v55, %v7721_v62  ;;  %v7665_v24 = vadd.f32 %v7628_v50, %v10991_v7 }
 0x845   :  { %v7835_v9 = vsel %vm5236_vm13, %v7818_v11, 0.0  ;;  %v7804_v20 = vadd.f32 %v11097_v40, %v7782_v37  ;;  %v7724_v47 = vadd.f32 %v11005_v10, %v7665_v24 }
 0x846   :  { %v7836_v5 = vadd.f32 %v7835_v9, %v7834_v21  ;;  %v7744_v51 = vpop.permute.xlu1 %7743 }
 0x847   :  { %v7819_v43 = vmax.f32 %v7804_v20, 0.0  ;;  %v7783_v1 = vadd.f32 %v7744_v51, %v7722_v23  ;;  %v7630_v32 = vpop.permute.xlu0 %7629 }
 0x848   :  { %v7666_v0 = vadd.f32 %v7630_v32, %v11000_v34 }
 0x849   :  { %v7837_v28 = vsel %vm5236_vm13, %v7819_v43, 0.0  ;;  %v7805_v61 = vadd.f32 %v11097_v40, %v7783_v1 }
 0x84a   :  { %v7838_v14 = vadd.f32 %v7837_v28, %v7836_v5  ;;  %v7746_v42 = vpop.permute.xlu1 %7745  ;;  %v7725_v7 = vadd.f32 %v11013_v18, %v7666_v0 }
 0x84b   :  { %v7820_v57 = vmax.f32 %v7805_v61, 0.0  ;;  %v7784_v58 = vadd.f32 %v7746_v42, %v7723_v19  ;;  %v7632_v26 = vpop.permute.xlu0 %7631 }
 0x84c   :  { %v7667_v10 = vadd.f32 %v7632_v26, %v11009_v49 }
 0x84d   :  { %v7839_v6 = vsel %vm5236_vm13, %v7820_v57, 0.0  ;;  %v7806_v17 = vadd.f32 %v11097_v40, %v7784_v58 }
 0x84e   :  { %v7840_v31 = vadd.f32 %v7839_v6, %v7838_v14  ;;  %v7748_v62 = vpop.permute.xlu1 %7747  ;;  %v7726_v34 = vadd.f32 %v11027_v30, %v7667_v10 }
 0x84f   :  { %v7821_v15 = vmax.f32 %v7806_v17, 0.0  ;;  %v7785_v53 = vadd.f32 %v7748_v62, %v7724_v47  ;;  %v7634_v39 = vpop.permute.xlu0 %7633 }
 0x850   :  { %v7668_v60 = vadd.f32 %v7634_v39, %v11022_v38 }
 0x851   :  { %v7841_v18 = vsel %vm5236_vm13, %v7821_v15, 0.0  ;;  %v7807_v33 = vadd.f32 %v11097_v40, %v7785_v53 }
 0x852   :  { %v7842_v44 = vadd.f32 %v7841_v18, %v7840_v31  ;;  %v7750_v36 = vpop.permute.xlu1 %7749  ;;  %v7727_v49 = vadd.f32 %v11035_v59, %v7668_v60 }
 0x853   :  { %v7822_v25 = vmax.f32 %v7807_v33, 0.0  ;;  %v7786_v23 = vadd.f32 %v7750_v36, %v7725_v7  ;;  %v7636_v12 = vpop.permute.xlu0 %7635 }
 0x854   :  { %v7669_v48 = vadd.f32 %v7636_v12, %v11031_v63 }
 0x855   :  { %v7843_v30 = vsel %vm5236_vm13, %v7822_v25, 0.0  ;;  %v7808_v22 = vadd.f32 %v11097_v40, %v7786_v23 }
 0x856   :  { %v7844_v52 = vadd.f32 %v7843_v30, %v7842_v44  ;;  %v7752_v41 = vpop.permute.xlu1 %7751  ;;  %v7728_v38 = vadd.f32 %v11045_v8, %v7669_v48 }
 0x857   :  { %v7823_v2 = vmax.f32 %v7808_v22, 0.0  ;;  %v7787_v29 = vadd.f32 %v7752_v41, %v7726_v34  ;;  %v7638_v35 = vpop.permute.xlu0 %7637 }
 0x858   :  { %v7670_v19 = vadd.f32 %v7638_v35, %v11040_v45 }
 0x859   :  { %v7845_v59 = vsel %vm5236_vm13, %v7823_v2, 0.0  ;;  %v7809_v21 = vadd.f32 %v11097_v40, %v7787_v29 }
 0x85a   :  { %v7846_v55 = vadd.f32 %v7845_v59, %v7844_v52  ;;  %v7754_v50 = vpop.permute.xlu1 %7753  ;;  %v7729_v63 = vadd.f32 %v11053_v13, %v7670_v19 }
 0x85b   :  { %v7824_v11 = vmax.f32 %v7809_v21, 0.0  ;;  %v7788_v37 = vadd.f32 %v7754_v50, %v7727_v49  ;;  %v7640_v24 = vpop.permute.xlu0 %7639 }
 0x85c   :  { %v7671_v9 = vadd.f32 %v7640_v24, %v11049_v54 }
 0x85d   :  { %v7847_v8 = vsel %vm5236_vm13, %v7824_v11, 0.0  ;;  %v7810_v20 = vadd.f32 %v11097_v40, %v7788_v37 }
 0x85e   :  { %v7848_v47 = vadd.f32 %v7847_v8, %v7846_v55  ;;  %v7756_v5 = vpop.permute.xlu1 %7755  ;;  %v7730_v45 = vadd.f32 %v11072_v16, %v7671_v9  ;;  %v8435_v55 = vld [vmem:[%s11187_s10] ss:$0 sm:$0xff]  ;;  %s9124_s10 = scalar_lea.vmem %s7967_s2, 32 }
 0x85f   :  { %v7825_v51 = vmax.f32 %v7810_v20, 0.0  ;;  %v7789_v43 = vadd.f32 %v7756_v5, %v7728_v38  ;;  %v7642_v1 = vpop.permute.xlu0 %7641  ;;  %p9125_p12 = scmp.ne.s32.totalorder %s7967_s2, %s9124_s10  ;;  %p9130_p0 = scmp.lt.s32.totalorder %s9124_s10, %s9124_s10 }
 0x860   :  { %v7672_v32 = vadd.f32 %v7642_v1, %v11062_v27  ;;  %v9013_v27 = vld [vmem:[%s11185_s8] ss:$0 sm:$0xff] }
 0x861   :  { %v7849_v13 = vsel %vm5236_vm13, %v7825_v51, 0.0  ;;  %v7811_v0 = vadd.f32 %v11097_v40, %v7789_v43  ;;  %p9131_p1 = por %p9130_p0, %p9129_p13 }
 0x862   :  { %v7850_v28 = vadd.f32 %v7849_v13, %v7848_v47  ;;  %v7758_v61 = vpop.permute.xlu1 %7757  ;;  %v7731_v54 = vadd.f32 %v7700_v56, %v7672_v32 }
 0x863   :  { %v7826_v14 = vmax.f32 %v7811_v0, 0.0  ;;  %v7790_v42 = vadd.f32 %v7758_v61, %v7729_v63  ;;  %v5168_v7 = vpop.permute.xlu0 %5167  ;;  %p9132_p2 = pnand %p9131_p1, %p9125_p12 }
 0x864   :  { %v5198_v57 = vadd.f32 %v5168_v7, %v10890_v46 }
 0x865   :  { %v7851_v16 = vsel %vm5236_vm13, %v7826_v14, 0.0  ;;  %v7812_v58 = vadd.f32 %v11097_v40, %v7790_v42 }
 0x866   :  { %v7852_v26 = vadd.f32 %v7851_v16, %v7850_v28  ;;  %v5220_v10 = vadd.f32 %v9013_v27, %v5198_v57  ;;  %v7760_v6 = vpop.permute.xlu1 %7759 }
 0x867   :  { %v7827_v17 = vmax.f32 %v7812_v58, 0.0  ;;  %v7791_v4 = vadd.f32 %v7760_v6, %v7730_v45 }
 0x868   :  { %v5235_v56 = vmax.f32 %v5220_v10, 0.0 }
 0x869   :  { %v7853_v31 = vsel %vm5236_vm13, %v7827_v17, 0.0  ;;  %v7813_v62 = vadd.f32 %v11097_v40, %v7791_v4 }
 0x86a   :  { %v7854_v46 = vadd.f32 %v7853_v31, %v7852_v26  ;;  %v5265_v34 = vsel %vm5264_vm15, %v5235_v56, 0.0  ;;  %v7762_v15 = vpop.permute.xlu1 %7761 }
 0x86b   :  { %v5266_v53 = vadd.f32 %v5265_v34, %v10908_v3  ;;  %v7828_v39 = vmax.f32 %v7813_v62, 0.0  ;;  %v7792_v60 = vadd.f32 %v7762_v15, %v7731_v54 }
 0x86d   :  { %v5267_v18 = vrot.slane %v5266_v53, 4  ;;  %v7855_v33 = vsel %vm5236_vm13, %v7828_v39, 0.0  ;;  %v7814_v44 = vadd.f32 %v11097_v40, %v7792_v60 }
 0x86e   :  { %v7856_v36 = vadd.f32 %v7855_v33, %v7854_v46 }
 0x86f   :  { %v5268_v49 = vadd.f32 %v5267_v18, %v5266_v53  ;;  %v7829_v25 = vmax.f32 %v7814_v44, 0.0 }
 0x871   :  { %v5269_v23 = vrot.slane %v5268_v49, 2  ;;  %v7857_v12 = vsel %vm5264_vm15, %v7829_v25, 0.0 }
 0x872   :  { %v7858_v48 = vadd.f32 %v7857_v12, %v7856_v36 }
 0x873   :  { %v5270_v30 = vadd.f32 %v5269_v23, %v5268_v49 }
 0x874   :  { %v7859_v22 = vrot.slane %v7858_v48, 4 }
 0x875   :  { %v5271_v41 = vrot.slane %v5270_v30, 1 }
 0x876   :  { %v7860_v52 = vadd.f32 %v7859_v22, %v7858_v48 }
 0x877   :  { %v5272_v2 = vadd.f32 %v5271_v41, %v5270_v30 }
 0x878   :  { %v7861_v38 = vrot.slane %v7860_v52, 2 }
 0x879   :  { %v5274_v19 = vmul.f32 0.008474576, %v5272_v2 }
 0x87a   :  { %v7862_v3 = vadd.f32 %v7861_v38, %v7860_v52 }
 0x87c   :  { %v7863_v29 = vrot.slane %v7862_v3, 1 }
 0x87e   :  { %v7864_v35 = vadd.f32 %v7863_v29, %v7862_v3 }
 0x880   :  { %v7865_v59 = vmul.f32 0.008474576, %v7864_v35 }
 0x882   :  { %v7866_v40 = vsel %vm2657_vm4, %v5274_v19, %v7865_v59 }
 0x883   :  { %v7867_v21 = vpack.c.bf16 %v7866_v40, %v7866_v40 }
 0x885   :  { %8455 = vmatmul.mubr.msk.bf16.vlgmr.msra.gmra.mrb[124].mxu0 %vm5236_vm13, %v7867_v21 }
 0x958   :  { %v7944_v50 = vpop.f32.mrb[124].mxu0 }
 0x959   :  { %v7945_v63 = vadd.f32 %v8435_v55, %v7944_v50  ;;  %v8456_v11 = vpop.f32.mrb[125].mxu0 }
 0x95a   :  { %v7947_v37 = vpop.f32.mrb[126].mxu0 }
 0x95b   :  { %v7950_v24 = vsub.f32 0.0, %v7945_v63  ;;  %v8457_v9 = vpop.f32.mrb[127].mxu0 }
 0x95d   :  { %v7951_v8 = vmul.f32 1.442695, %v7950_v24 }
 0x95f   :  { %9009 = vpow2.f32 %v7951_v8 }
 0x969   :  { %v9010_v20 = vpop.eup %9009 }
 0x96a   :  { %v7953_v47 = vadd.f32 1.0, %v9010_v20 }
 0x96c   :  { %9011 = vrcp.f32 %v7953_v47 }
 0x976   :  { %v9012_v5 = vpop.eup %9011 }
 0x977   :  { %7957 = vst.msk [vmem:[#allocation12] sm:$0x1] %vm7956_vm0, %v9012_v5 }
 0x978   :  { %7960 = vst.msk [vmem:[#allocation12] sm:$0x2] %vm7959_vm1, %v9012_v5 }
 0x979   :  { %9135 = shalt.err (!%p9132_p2)
}
 0x97a   :  { %s9136_s27 = scalar_lea.hbm %s11190_s13, 32 }
 0x97b   :  { %p9137_p3 = scmp.ne.s32.totalorder %s11190_s13, %s9136_s27  ;;  %p9140_p4 = scmp.lt.u32.totalorder %s9136_s27, %s11190_s13 }
 0x97d   :  { %p9142_p5 = pnand %p9140_p4, %p9137_p3 }
 0x97f   :  { %9145 = shalt.err (!%p9142_p5)
}
 0x980   :  { %s9170_s4 = smov 16   ;;  %s9171_s30 = smov 1  }
 0x981   :  { %7972 = dma.vmem_to_hbm [thread:$0]  %s7967_s2, 32, %s11190_s13, [#allocation5], %s9170_s4, %s9170_s4, %s9171_s30  }
 0x982   :  { %9152 = dma.done.wait [#allocation5], 32  }
 0x983   :  { %9153 = vsyncadd [#allocation5], 4294967264 }
 0x984   :  { %7976 = vsyncpa [#allocation4], 1 }
 0x985   :  { %7977 = vsyncpa [#allocation7], 1 }
 0x986   :  { %7978 = vsyncpa [#allocation10], 1 }
 0x987   :  { %7979 = vsyncpa [#allocation5], 1 }

</bundles_post_ra>
